<compile_context>
chip_gen: v7x
topology: tpu7x:2x2x1
jax: 0.10.0
libtpu: 0.0.40
codegen_flags: <defaults>
</compile_context>

<pallas_src>
import functools

import jax
import jax.numpy as jnp
from jax.experimental import pallas as pl
from jax.experimental.pallas import tpu as pltpu


_NEG_BIG = -1e30  # additive mask for non-edges (representable in bf16)


def _gat_layer_kernel(x_ref, xt_ref, xblk_ref, adjb_ref, w_ref, srcpt_ref,
                      dstp_ref, b_ref, o_ref, *, heads, out_ch, output_slope):
    """One GATConv layer for a row block of target nodes.

    x_ref:    [N, F]        all source-node features
    xt_ref:   [F, N]        same features, pre-transposed (no in-kernel transpose)
    xblk_ref: [T, F]        this block's target-node features
    adjb_ref: [T, N] bf16   additive mask (0 on edges j->i, -1e30 elsewhere)
    w_ref:    [F, H*C]      projection weight
    srcpt_ref:[8, F]        (W @ a_src) per head, transposed, zero-padded to 8 rows
    dstp_ref: [F, 8]        (W @ a_dst) per head, zero-padded to 8 cols
    b_ref:    [1, H*C]      bias
    o_ref:    [T, H*C]      output row block
    """
    f32 = jnp.float32
    bf16 = jnp.bfloat16

    hc = heads * out_ch
    x_src = x_ref[...]                                            # [N, F]
    n_src = x_src.shape[0]
    t = xblk_ref.shape[0]

    # Projection of every source node on the MXU (bf16 operands, f32 accumulate).
    h = jnp.dot(x_src.astype(bf16), w_ref[...].astype(bf16),
                preferred_element_type=f32)                       # [N, H*C]
    h_bf = h.astype(bf16)

    # Attention-logit halves for all heads in two matmuls (kept f32 for logits).
    # alpha_src_t[hd, j] = a_src[hd] . h_j     alpha_dst[i, hd] = a_dst[hd] . h_i
    alpha_src_t = jnp.dot(srcpt_ref[...], xt_ref[...],
                          preferred_element_type=f32)             # [8, N]
    alpha_dst = jnp.dot(xblk_ref[...], dstp_ref[...],
                        preferred_element_type=f32)               # [T, 8]

    adjb = adjb_ref[...].astype(f32)                              # [T, N]
    ones_src = jnp.ones((n_src, 8), bf16)                         # MXU row-sum helper
    col = jax.lax.broadcasted_iota(jnp.int32, (1, hc), 1)

    acc = jnp.zeros((t, hc), f32)   # unnormalized aggregation, all heads (lane-dense)
    inv = jnp.zeros((t, hc), f32)   # per-column 1/denominator
    for hd in range(heads):         # static unroll (heads = 4 or 1)
        e = alpha_dst[:, hd:hd + 1] + alpha_src_t[hd:hd + 1, :]   # [T, N]
        e = jnp.where(e > 0, e, 0.2 * e)        # LeakyReLU(0.2), GAT attention slope
        e = e + adjb                            # mask non-edges (additive -1e30)
        e = e - jnp.max(e, axis=1, keepdims=True)
        p = jnp.exp(e)                          # f32; masked entries are exactly 0
        p_bf = p.astype(bf16)

        # Softmax denominator straight off the MXU (no XLU row reduce).
        den = jnp.dot(p_bf, ones_src, preferred_element_type=f32)[:, 0:1]   # [T, 1]
        r = pl.reciprocal(den, approx=True)

        # Head-placement mask keeps the accumulator a single lane-dense slab.
        sel = (col >= hd * out_ch) & (col < (hd + 1) * out_ch)              # [1, HC]
        acc = acc + jnp.dot(p_bf, h_bf * sel.astype(bf16),
                            preferred_element_type=f32)
        inv = inv + r * sel.astype(f32)

    # Normalize after aggregation, add bias, optional fused output activation,
    # one full-width store.
    out = acc * inv + b_ref[...]
    if output_slope is not None:
        out = jnp.where(out > 0, out, output_slope * out)
    o_ref[...] = out.astype(o_ref.dtype)


def gat_layer(x, adj_bias, w, a_src, a_dst, bias, *, output_slope=None,
              tile_n=128):
    """One GATConv layer. x:[N, F] -> [N, heads*out_ch] (heads concatenated).
    If output_slope is not None, leaky_relu(., output_slope) is fused into the
    kernel epilogue."""
    n, f = x.shape
    heads, c = a_src.shape          # static (from array shapes)
    hc = heads * c
    hp = max(8, heads)              # pad head dim to 8 for friendly matmul shapes

    # Fold the per-head attention vectors into the projection so the attention
    # logits come out of MXU matmuls (no per-head XLU reductions/transposes).
    w3 = w.reshape(f, heads, c)
    srcp = jnp.einsum("fhc,hc->fh", w3, a_src)                    # [F, heads]
    dstp = jnp.einsum("fhc,hc->fh", w3, a_dst)                    # [F, heads]
    srcp_t = jnp.zeros((hp, f), jnp.float32).at[:heads, :].set(srcp.T)
    dstp_p = jnp.zeros((f, hp), jnp.float32).at[:, :heads].set(dstp)

    xt = x.T                        # transposed copy built by XLA (trace time)

    tn = n if n <= tile_n else tile_n
    assert tn == n or tn % 8 == 0
    grid = (pl.cdiv(n, tn),)

    kernel = functools.partial(_gat_layer_kernel, heads=heads, out_ch=c,
                               output_slope=output_slope)
    return pl.pallas_call(
        kernel,
        out_shape=jax.ShapeDtypeStruct((n, hc), jnp.float32),
        grid=grid,
        in_specs=[
            pl.BlockSpec((n, f), lambda i: (0, 0)),      # x (all source nodes)
            pl.BlockSpec((f, n), lambda i: (0, 0)),      # x^T
            pl.BlockSpec((tn, f), lambda i: (i, 0)),     # x row block (targets)
            pl.BlockSpec((tn, n), lambda i: (i, 0)),     # adj-bias row block (bf16)
            pl.BlockSpec((f, hc), lambda i: (0, 0)),     # W
            pl.BlockSpec((hp, f), lambda i: (0, 0)),     # folded a_src (transposed)
            pl.BlockSpec((f, hp), lambda i: (0, 0)),     # folded a_dst
            pl.BlockSpec((1, hc), lambda i: (0, 0)),     # bias
        ],
        out_specs=pl.BlockSpec((tn, hc), lambda i: (i, 0)),
        compiler_params=pltpu.CompilerParams(
            # Row blocks are independent -> megacore-shard them (2x on v7x).
            dimension_semantics=("parallel",),
            # Comfortable on v5e/v6e (128 MiB phys) and v7x (64 MiB per TC).
            vmem_limit_bytes=48 * 1024 * 1024,
        ),
    )(x, xt, x, adj_bias, w, srcp_t, dstp_p, bias)


def gae_encoder_forward(x, adj, params):
    """x: [N, in_dim] f32; adj: [N, N] dense mask with adj[i, j] = 1 iff edge
    j -> i (self loops included). Returns [N, out_dim]."""
    # Additive attention mask in bf16: halves the N^2 HBM traffic vs f32 adj and
    # turns two in-kernel selects per head into one add per block.
    adj_bias = jnp.where(adj > 0, 0.0, _NEG_BIG).astype(jnp.bfloat16)

    # conv1: GATConv(in_dim -> hidden_dim, heads, concat); the inter-layer
    # F.leaky_relu(., 0.01) is fused into conv1's epilogue.
    h = gat_layer(x, adj_bias,
                  params["w1"], params["asrc1"], params["adst1"], params["b1"],
                  output_slope=0.01)
    # conv2: GATConv(heads*hidden_dim -> out_dim, 1 head); raw output returned.
    out = gat_layer(h, adj_bias,
                    params["w2"], params["asrc2"], params["adst2"], params["b2"],
                    output_slope=None)
    return out


def _glorot(key, shape):
    fan_in, fan_out = shape[-2], shape[-1]
    a = jnp.sqrt(6.0 / (fan_in + fan_out))
    return jax.random.uniform(key, shape, jnp.float32, minval=-a, maxval=a)


def make_params(key, in_dim, hidden_dim, out_dim, heads):
    # NOTE: only arrays here (hyperparameters are recovered from static shapes),
    # so the dict can be passed straight through jax.jit.
    ks = jax.random.split(key, 8)
    return {
        # conv1: in_dim -> hidden_dim, `heads` heads, concat
        "w1": _glorot(ks[0], (in_dim, heads * hidden_dim)),
        "asrc1": _glorot(ks[1], (heads, hidden_dim)),
        "adst1": _glorot(ks[2], (heads, hidden_dim)),
        "b1": 0.01 * jax.random.normal(ks[3], (1, heads * hidden_dim), jnp.float32),
        # conv2: heads*hidden_dim -> out_dim, 1 head
        "w2": _glorot(ks[4], (heads * hidden_dim, out_dim)),
        "asrc2": _glorot(ks[5], (1, out_dim)),
        "adst2": _glorot(ks[6], (1, out_dim)),
        "b2": 0.01 * jax.random.normal(ks[7], (1, out_dim), jnp.float32),
    }


def edge_index_to_dense_adj(edge_index, num_nodes):
    """edge_index: [2, E] int32 (row 0 = source j, row 1 = target i).
    Returns adj[i, j] = 1.0 with self loops added (GATConv default)."""
    src, dst = edge_index[0], edge_index[1]
    adj = jnp.zeros((num_nodes, num_nodes), jnp.float32)
    adj = adj.at[dst, src].set(1.0)
    adj = jnp.maximum(adj, jnp.eye(num_nodes, dtype=jnp.float32))  # self loops
    return adj


if __name__ == "__main__":
    N = 256         # nodes (exercises a 2-block row grid with tile_n=128)
    IN_DIM = 16
    HIDDEN = 32
    OUT_DIM = 16
    HEADS = 4

    key = jax.random.PRNGKey(0)
    k_x, k_p = jax.random.split(key)

    # Deterministic node features.
    x = jax.random.normal(k_x, (N, IN_DIM), jnp.float32)

    # Deterministic sparse graph: ring + skip-3 edges.  edge_index: [2, E]
    src = jnp.concatenate([jnp.arange(N), jnp.arange(N)]).astype(jnp.int32)
    dst = jnp.concatenate([(jnp.arange(N) + 1) % N,
                           (jnp.arange(N) + 3) % N]).astype(jnp.int32)
    edge_index = jnp.stack([src, dst], axis=0)
    adj = edge_index_to_dense_adj(edge_index, N)

    params = make_params(k_p, IN_DIM, HIDDEN, OUT_DIM, HEADS)

    out = jax.jit(gae_encoder_forward)(x, adj, params)
    out = jax.block_until_ready(out)
    assert out.shape == (N, OUT_DIM) and out.dtype == jnp.float32
    assert bool(jnp.all(jnp.isfinite(out)))
    print("KERNEL_OK")
</pallas_src>

<mosaic_0001>
module attributes {stable_mosaic.version = 11 : i64} {
  func.func @_gat_layer_kernel(%arg0: i32, %arg1: memref<256x16xf32, #tpu.memory_space<vmem>>, %arg2: memref<16x256xf32, #tpu.memory_space<vmem>>, %arg3: memref<128x16xf32, #tpu.memory_space<vmem>>, %arg4: memref<128x256xbf16, #tpu.memory_space<vmem>>, %arg5: memref<16x128xf32, #tpu.memory_space<vmem>>, %arg6: memref<8x16xf32, #tpu.memory_space<vmem>>, %arg7: memref<16x8xf32, #tpu.memory_space<vmem>>, %arg8: memref<1x128xf32, #tpu.memory_space<vmem>>, %arg9: memref<128x128xf32, #tpu.memory_space<vmem>>) attributes {dimension_semantics = [#tpu.dimension_semantics<parallel>], iteration_bounds = array<i64: 2>, scalar_prefetch = 0 : i64, scratch_operands = 0 : i64, tpu.core_type = #tpu.core_type<tc>, window_params = [{pipeline_mode = #tpu.pipeline_mode<synchronous>, transform_indices = @transform_0, window_bounds = array<i64: 256, 16>}, {pipeline_mode = #tpu.pipeline_mode<synchronous>, transform_indices = @transform_1, window_bounds = array<i64: 16, 256>}, {transform_indices = @transform_2, window_bounds = array<i64: 128, 16>}, {transform_indices = @transform_3, window_bounds = array<i64: 128, 256>}, {pipeline_mode = #tpu.pipeline_mode<synchronous>, transform_indices = @transform_4, window_bounds = array<i64: 16, 128>}, {pipeline_mode = #tpu.pipeline_mode<synchronous>, transform_indices = @transform_5, window_bounds = array<i64: 8, 16>}, {pipeline_mode = #tpu.pipeline_mode<synchronous>, transform_indices = @transform_6, window_bounds = array<i64: 16, 8>}, {pipeline_mode = #tpu.pipeline_mode<synchronous>, transform_indices = @transform_7, window_bounds = array<i64: 1, 128>}, {transform_indices = @transform_8, window_bounds = array<i64: 128, 128>}]} {
    %c0 = arith.constant 0 : index
    %c0_0 = arith.constant 0 : index
    %0 = vector.load %arg1[%c0, %c0_0] : memref<256x16xf32, #tpu.memory_space<vmem>>, vector<256x16xf32>
    %1 = arith.truncf %0 : vector<256x16xf32> to vector<256x16xbf16>
    %c0_1 = arith.constant 0 : index
    %c0_2 = arith.constant 0 : index
    %2 = vector.load %arg5[%c0_1, %c0_2] : memref<16x128xf32, #tpu.memory_space<vmem>>, vector<16x128xf32>
    %3 = arith.truncf %2 : vector<16x128xf32> to vector<16x128xbf16>
    %cst = arith.constant dense<0.000000e+00> : vector<256x128xf32>
    %4 = tpu.matmul %1, %3, %cst {dimension_numbers = #tpu.dot_dimension_numbers<[1], [0], [0], [1], [0, 0, 1, 1], [], []>} : vector<256x16xbf16>, vector<16x128xbf16>, vector<256x128xf32> -> vector<256x128xf32>
    %5 = arith.truncf %4 : vector<256x128xf32> to vector<256x128xbf16>
    %c0_3 = arith.constant 0 : index
    %c0_4 = arith.constant 0 : index
    %6 = vector.load %arg6[%c0_3, %c0_4] : memref<8x16xf32, #tpu.memory_space<vmem>>, vector<8x16xf32>
    %c0_5 = arith.constant 0 : index
    %c0_6 = arith.constant 0 : index
    %7 = vector.load %arg2[%c0_5, %c0_6] : memref<16x256xf32, #tpu.memory_space<vmem>>, vector<16x256xf32>
    %cst_7 = arith.constant dense<0.000000e+00> : vector<8x256xf32>
    %8 = tpu.matmul %6, %7, %cst_7 {dimension_numbers = #tpu.dot_dimension_numbers<[1], [0], [0], [1], [0, 0, 1, 1], [], []>} : vector<8x16xf32>, vector<16x256xf32>, vector<8x256xf32> -> vector<8x256xf32>
    %c0_8 = arith.constant 0 : index
    %c0_9 = arith.constant 0 : index
    %9 = vector.load %arg3[%c0_8, %c0_9] : memref<128x16xf32, #tpu.memory_space<vmem>>, vector<128x16xf32>
    %c0_10 = arith.constant 0 : index
    %c0_11 = arith.constant 0 : index
    %10 = vector.load %arg7[%c0_10, %c0_11] : memref<16x8xf32, #tpu.memory_space<vmem>>, vector<16x8xf32>
    %cst_12 = arith.constant dense<0.000000e+00> : vector<128x8xf32>
    %11 = tpu.matmul %9, %10, %cst_12 {dimension_numbers = #tpu.dot_dimension_numbers<[1], [0], [0], [1], [0, 0, 1, 1], [], []>} : vector<128x16xf32>, vector<16x8xf32>, vector<128x8xf32> -> vector<128x8xf32>
    %c0_13 = arith.constant 0 : index
    %c0_14 = arith.constant 0 : index
    %12 = vector.load %arg4[%c0_13, %c0_14] : memref<128x256xbf16, #tpu.memory_space<vmem>>, vector<128x256xbf16>
    %13 = arith.extf %12 : vector<128x256xbf16> to vector<128x256xf32>
    %cst_15 = arith.constant 1.000000e+00 : bf16
    %14 = vector.broadcast %cst_15 : bf16 to vector<256x8xbf16>
    %15 = tpu.iota {dimensions = array<i32: 1>} : vector<1x128xi32>
    %cst_16 = arith.constant 0.000000e+00 : f32
    %16 = vector.broadcast %cst_16 : f32 to vector<128x128xf32>
    %cst_17 = arith.constant 0.000000e+00 : f32
    %17 = vector.broadcast %cst_17 : f32 to vector<128x128xf32>
    %18 = vector.extract_strided_slice %11 {offsets = [0, 0], sizes = [128, 1], strides = [1, 1]} : vector<128x8xf32> to vector<128x1xf32>
    %19 = vector.extract_strided_slice %8 {offsets = [0, 0], sizes = [1, 256], strides = [1, 1]} : vector<8x256xf32> to vector<1x256xf32>
    %20 = vector.broadcast %18 : vector<128x1xf32> to vector<128x256xf32>
    %21 = vector.broadcast %19 : vector<1x256xf32> to vector<128x256xf32>
    %22 = arith.addf %20, %21 : vector<128x256xf32>
    %cst_18 = arith.constant 0.000000e+00 : f32
    %23 = vector.broadcast %cst_18 : f32 to vector<128x256xf32>
    %24 = arith.cmpf ogt, %22, %23 : vector<128x256xf32>
    %cst_19 = arith.constant 2.000000e-01 : f32
    %25 = vector.broadcast %cst_19 : f32 to vector<128x256xf32>
    %26 = arith.mulf %25, %22 : vector<128x256xf32>
    %27 = arith.select %24, %22, %26 : vector<128x256xi1>, vector<128x256xf32>
    %28 = arith.addf %27, %13 : vector<128x256xf32>
    %cst_20 = arith.constant dense<0xFF800000> : vector<128xf32>
    %29 = vector.multi_reduction <maximumf>, %28, %cst_20 [1] : vector<128x256xf32> to vector<128xf32>
    %30 = vector.shape_cast %29 : vector<128xf32> to vector<128x1xf32>
    %31 = vector.broadcast %30 : vector<128x1xf32> to vector<128x256xf32>
    %32 = arith.subf %28, %31 : vector<128x256xf32>
    %33 = math.exp %32 : vector<128x256xf32>
    %34 = arith.truncf %33 : vector<128x256xf32> to vector<128x256xbf16>
    %cst_21 = arith.constant dense<0.000000e+00> : vector<128x8xf32>
    %35 = tpu.matmul %34, %14, %cst_21 {dimension_numbers = #tpu.dot_dimension_numbers<[1], [0], [0], [1], [0, 0, 1, 1], [], []>} : vector<128x256xbf16>, vector<256x8xbf16>, vector<128x8xf32> -> vector<128x8xf32>
    %36 = vector.extract_strided_slice %35 {offsets = [0, 0], sizes = [128, 1], strides = [1, 1]} : vector<128x8xf32> to vector<128x1xf32>
    %37 = tpu.reciprocal %36 {approx = true} : vector<128x1xf32> -> vector<128x1xf32>
    %c0_i32 = arith.constant 0 : i32
    %38 = vector.broadcast %c0_i32 : i32 to vector<1x128xi32>
    %39 = arith.cmpi sge, %15, %38 : vector<1x128xi32>
    %c32_i32 = arith.constant 32 : i32
    %40 = vector.broadcast %c32_i32 : i32 to vector<1x128xi32>
    %41 = arith.cmpi slt, %15, %40 : vector<1x128xi32>
    %42 = arith.andi %39, %41 : vector<1x128xi1>
    %43 = arith.extui %42 : vector<1x128xi1> to vector<1x128xi32>
    %44 = arith.sitofp %43 : vector<1x128xi32> to vector<1x128xf32>
    %45 = arith.truncf %44 : vector<1x128xf32> to vector<1x128xbf16>
    %46 = vector.broadcast %45 : vector<1x128xbf16> to vector<256x128xbf16>
    %47 = arith.mulf %5, %46 : vector<256x128xbf16>
    %cst_22 = arith.constant dense<0.000000e+00> : vector<128x128xf32>
    %48 = tpu.matmul %34, %47, %cst_22 {dimension_numbers = #tpu.dot_dimension_numbers<[1], [0], [0], [1], [0, 0, 1, 1], [], []>} : vector<128x256xbf16>, vector<256x128xbf16>, vector<128x128xf32> -> vector<128x128xf32>
    %49 = arith.addf %16, %48 : vector<128x128xf32>
    %50 = arith.extui %42 : vector<1x128xi1> to vector<1x128xi32>
    %51 = arith.sitofp %50 : vector<1x128xi32> to vector<1x128xf32>
    %52 = vector.broadcast %37 : vector<128x1xf32> to vector<128x128xf32>
    %53 = vector.broadcast %51 : vector<1x128xf32> to vector<128x128xf32>
    %54 = arith.mulf %52, %53 : vector<128x128xf32>
    %55 = arith.addf %17, %54 : vector<128x128xf32>
    %56 = vector.extract_strided_slice %11 {offsets = [0, 1], sizes = [128, 1], strides = [1, 1]} : vector<128x8xf32> to vector<128x1xf32>
    %57 = vector.extract_strided_slice %8 {offsets = [1, 0], sizes = [1, 256], strides = [1, 1]} : vector<8x256xf32> to vector<1x256xf32>
    %58 = vector.broadcast %56 : vector<128x1xf32> to vector<128x256xf32>
    %59 = vector.broadcast %57 : vector<1x256xf32> to vector<128x256xf32>
    %60 = arith.addf %58, %59 : vector<128x256xf32>
    %cst_23 = arith.constant 0.000000e+00 : f32
    %61 = vector.broadcast %cst_23 : f32 to vector<128x256xf32>
    %62 = arith.cmpf ogt, %60, %61 : vector<128x256xf32>
    %cst_24 = arith.constant 2.000000e-01 : f32
    %63 = vector.broadcast %cst_24 : f32 to vector<128x256xf32>
    %64 = arith.mulf %63, %60 : vector<128x256xf32>
    %65 = arith.select %62, %60, %64 : vector<128x256xi1>, vector<128x256xf32>
    %66 = arith.addf %65, %13 : vector<128x256xf32>
    %cst_25 = arith.constant dense<0xFF800000> : vector<128xf32>
    %67 = vector.multi_reduction <maximumf>, %66, %cst_25 [1] : vector<128x256xf32> to vector<128xf32>
    %68 = vector.shape_cast %67 : vector<128xf32> to vector<128x1xf32>
    %69 = vector.broadcast %68 : vector<128x1xf32> to vector<128x256xf32>
    %70 = arith.subf %66, %69 : vector<128x256xf32>
    %71 = math.exp %70 : vector<128x256xf32>
    %72 = arith.truncf %71 : vector<128x256xf32> to vector<128x256xbf16>
    %cst_26 = arith.constant dense<0.000000e+00> : vector<128x8xf32>
    %73 = tpu.matmul %72, %14, %cst_26 {dimension_numbers = #tpu.dot_dimension_numbers<[1], [0], [0], [1], [0, 0, 1, 1], [], []>} : vector<128x256xbf16>, vector<256x8xbf16>, vector<128x8xf32> -> vector<128x8xf32>
    %74 = vector.extract_strided_slice %73 {offsets = [0, 0], sizes = [128, 1], strides = [1, 1]} : vector<128x8xf32> to vector<128x1xf32>
    %75 = tpu.reciprocal %74 {approx = true} : vector<128x1xf32> -> vector<128x1xf32>
    %c32_i32_27 = arith.constant 32 : i32
    %76 = vector.broadcast %c32_i32_27 : i32 to vector<1x128xi32>
    %77 = arith.cmpi sge, %15, %76 : vector<1x128xi32>
    %c64_i32 = arith.constant 64 : i32
    %78 = vector.broadcast %c64_i32 : i32 to vector<1x128xi32>
    %79 = arith.cmpi slt, %15, %78 : vector<1x128xi32>
    %80 = arith.andi %77, %79 : vector<1x128xi1>
    %81 = arith.extui %80 : vector<1x128xi1> to vector<1x128xi32>
    %82 = arith.sitofp %81 : vector<1x128xi32> to vector<1x128xf32>
    %83 = arith.truncf %82 : vector<1x128xf32> to vector<1x128xbf16>
    %84 = vector.broadcast %83 : vector<1x128xbf16> to vector<256x128xbf16>
    %85 = arith.mulf %5, %84 : vector<256x128xbf16>
    %cst_28 = arith.constant dense<0.000000e+00> : vector<128x128xf32>
    %86 = tpu.matmul %72, %85, %cst_28 {dimension_numbers = #tpu.dot_dimension_numbers<[1], [0], [0], [1], [0, 0, 1, 1], [], []>} : vector<128x256xbf16>, vector<256x128xbf16>, vector<128x128xf32> -> vector<128x128xf32>
    %87 = arith.addf %49, %86 : vector<128x128xf32>
    %88 = arith.extui %80 : vector<1x128xi1> to vector<1x128xi32>
    %89 = arith.sitofp %88 : vector<1x128xi32> to vector<1x128xf32>
    %90 = vector.broadcast %75 : vector<128x1xf32> to vector<128x128xf32>
    %91 = vector.broadcast %89 : vector<1x128xf32> to vector<128x128xf32>
    %92 = arith.mulf %90, %91 : vector<128x128xf32>
    %93 = arith.addf %55, %92 : vector<128x128xf32>
    %94 = vector.extract_strided_slice %11 {offsets = [0, 2], sizes = [128, 1], strides = [1, 1]} : vector<128x8xf32> to vector<128x1xf32>
    %95 = vector.extract_strided_slice %8 {offsets = [2, 0], sizes = [1, 256], strides = [1, 1]} : vector<8x256xf32> to vector<1x256xf32>
    %96 = vector.broadcast %94 : vector<128x1xf32> to vector<128x256xf32>
    %97 = vector.broadcast %95 : vector<1x256xf32> to vector<128x256xf32>
    %98 = arith.addf %96, %97 : vector<128x256xf32>
    %cst_29 = arith.constant 0.000000e+00 : f32
    %99 = vector.broadcast %cst_29 : f32 to vector<128x256xf32>
    %100 = arith.cmpf ogt, %98, %99 : vector<128x256xf32>
    %cst_30 = arith.constant 2.000000e-01 : f32
    %101 = vector.broadcast %cst_30 : f32 to vector<128x256xf32>
    %102 = arith.mulf %101, %98 : vector<128x256xf32>
    %103 = arith.select %100, %98, %102 : vector<128x256xi1>, vector<128x256xf32>
    %104 = arith.addf %103, %13 : vector<128x256xf32>
    %cst_31 = arith.constant dense<0xFF800000> : vector<128xf32>
    %105 = vector.multi_reduction <maximumf>, %104, %cst_31 [1] : vector<128x256xf32> to vector<128xf32>
    %106 = vector.shape_cast %105 : vector<128xf32> to vector<128x1xf32>
    %107 = vector.broadcast %106 : vector<128x1xf32> to vector<128x256xf32>
    %108 = arith.subf %104, %107 : vector<128x256xf32>
    %109 = math.exp %108 : vector<128x256xf32>
    %110 = arith.truncf %109 : vector<128x256xf32> to vector<128x256xbf16>
    %cst_32 = arith.constant dense<0.000000e+00> : vector<128x8xf32>
    %111 = tpu.matmul %110, %14, %cst_32 {dimension_numbers = #tpu.dot_dimension_numbers<[1], [0], [0], [1], [0, 0, 1, 1], [], []>} : vector<128x256xbf16>, vector<256x8xbf16>, vector<128x8xf32> -> vector<128x8xf32>
    %112 = vector.extract_strided_slice %111 {offsets = [0, 0], sizes = [128, 1], strides = [1, 1]} : vector<128x8xf32> to vector<128x1xf32>
    %113 = tpu.reciprocal %112 {approx = true} : vector<128x1xf32> -> vector<128x1xf32>
    %c64_i32_33 = arith.constant 64 : i32
    %114 = vector.broadcast %c64_i32_33 : i32 to vector<1x128xi32>
    %115 = arith.cmpi sge, %15, %114 : vector<1x128xi32>
    %c96_i32 = arith.constant 96 : i32
    %116 = vector.broadcast %c96_i32 : i32 to vector<1x128xi32>
    %117 = arith.cmpi slt, %15, %116 : vector<1x128xi32>
    %118 = arith.andi %115, %117 : vector<1x128xi1>
    %119 = arith.extui %118 : vector<1x128xi1> to vector<1x128xi32>
    %120 = arith.sitofp %119 : vector<1x128xi32> to vector<1x128xf32>
    %121 = arith.truncf %120 : vector<1x128xf32> to vector<1x128xbf16>
    %122 = vector.broadcast %121 : vector<1x128xbf16> to vector<256x128xbf16>
    %123 = arith.mulf %5, %122 : vector<256x128xbf16>
    %cst_34 = arith.constant dense<0.000000e+00> : vector<128x128xf32>
    %124 = tpu.matmul %110, %123, %cst_34 {dimension_numbers = #tpu.dot_dimension_numbers<[1], [0], [0], [1], [0, 0, 1, 1], [], []>} : vector<128x256xbf16>, vector<256x128xbf16>, vector<128x128xf32> -> vector<128x128xf32>
    %125 = arith.addf %87, %124 : vector<128x128xf32>
    %126 = arith.extui %118 : vector<1x128xi1> to vector<1x128xi32>
    %127 = arith.sitofp %126 : vector<1x128xi32> to vector<1x128xf32>
    %128 = vector.broadcast %113 : vector<128x1xf32> to vector<128x128xf32>
    %129 = vector.broadcast %127 : vector<1x128xf32> to vector<128x128xf32>
    %130 = arith.mulf %128, %129 : vector<128x128xf32>
    %131 = arith.addf %93, %130 : vector<128x128xf32>
    %132 = vector.extract_strided_slice %11 {offsets = [0, 3], sizes = [128, 1], strides = [1, 1]} : vector<128x8xf32> to vector<128x1xf32>
    %133 = vector.extract_strided_slice %8 {offsets = [3, 0], sizes = [1, 256], strides = [1, 1]} : vector<8x256xf32> to vector<1x256xf32>
    %134 = vector.broadcast %132 : vector<128x1xf32> to vector<128x256xf32>
    %135 = vector.broadcast %133 : vector<1x256xf32> to vector<128x256xf32>
    %136 = arith.addf %134, %135 : vector<128x256xf32>
    %cst_35 = arith.constant 0.000000e+00 : f32
    %137 = vector.broadcast %cst_35 : f32 to vector<128x256xf32>
    %138 = arith.cmpf ogt, %136, %137 : vector<128x256xf32>
    %cst_36 = arith.constant 2.000000e-01 : f32
    %139 = vector.broadcast %cst_36 : f32 to vector<128x256xf32>
    %140 = arith.mulf %139, %136 : vector<128x256xf32>
    %141 = arith.select %138, %136, %140 : vector<128x256xi1>, vector<128x256xf32>
    %142 = arith.addf %141, %13 : vector<128x256xf32>
    %cst_37 = arith.constant dense<0xFF800000> : vector<128xf32>
    %143 = vector.multi_reduction <maximumf>, %142, %cst_37 [1] : vector<128x256xf32> to vector<128xf32>
    %144 = vector.shape_cast %143 : vector<128xf32> to vector<128x1xf32>
    %145 = vector.broadcast %144 : vector<128x1xf32> to vector<128x256xf32>
    %146 = arith.subf %142, %145 : vector<128x256xf32>
    %147 = math.exp %146 : vector<128x256xf32>
    %148 = arith.truncf %147 : vector<128x256xf32> to vector<128x256xbf16>
    %cst_38 = arith.constant dense<0.000000e+00> : vector<128x8xf32>
    %149 = tpu.matmul %148, %14, %cst_38 {dimension_numbers = #tpu.dot_dimension_numbers<[1], [0], [0], [1], [0, 0, 1, 1], [], []>} : vector<128x256xbf16>, vector<256x8xbf16>, vector<128x8xf32> -> vector<128x8xf32>
    %150 = vector.extract_strided_slice %149 {offsets = [0, 0], sizes = [128, 1], strides = [1, 1]} : vector<128x8xf32> to vector<128x1xf32>
    %151 = tpu.reciprocal %150 {approx = true} : vector<128x1xf32> -> vector<128x1xf32>
    %c96_i32_39 = arith.constant 96 : i32
    %152 = vector.broadcast %c96_i32_39 : i32 to vector<1x128xi32>
    %153 = arith.cmpi sge, %15, %152 : vector<1x128xi32>
    %c128_i32 = arith.constant 128 : i32
    %154 = vector.broadcast %c128_i32 : i32 to vector<1x128xi32>
    %155 = arith.cmpi slt, %15, %154 : vector<1x128xi32>
    %156 = arith.andi %153, %155 : vector<1x128xi1>
    %157 = arith.extui %156 : vector<1x128xi1> to vector<1x128xi32>
    %158 = arith.sitofp %157 : vector<1x128xi32> to vector<1x128xf32>
    %159 = arith.truncf %158 : vector<1x128xf32> to vector<1x128xbf16>
    %160 = vector.broadcast %159 : vector<1x128xbf16> to vector<256x128xbf16>
    %161 = arith.mulf %5, %160 : vector<256x128xbf16>
    %cst_40 = arith.constant dense<0.000000e+00> : vector<128x128xf32>
    %162 = tpu.matmul %148, %161, %cst_40 {dimension_numbers = #tpu.dot_dimension_numbers<[1], [0], [0], [1], [0, 0, 1, 1], [], []>} : vector<128x256xbf16>, vector<256x128xbf16>, vector<128x128xf32> -> vector<128x128xf32>
    %163 = arith.addf %125, %162 : vector<128x128xf32>
    %164 = arith.extui %156 : vector<1x128xi1> to vector<1x128xi32>
    %165 = arith.sitofp %164 : vector<1x128xi32> to vector<1x128xf32>
    %166 = vector.broadcast %151 : vector<128x1xf32> to vector<128x128xf32>
    %167 = vector.broadcast %165 : vector<1x128xf32> to vector<128x128xf32>
    %168 = arith.mulf %166, %167 : vector<128x128xf32>
    %169 = arith.addf %131, %168 : vector<128x128xf32>
    %170 = arith.mulf %163, %169 : vector<128x128xf32>
    %c0_41 = arith.constant 0 : index
    %c0_42 = arith.constant 0 : index
    %171 = vector.load %arg8[%c0_41, %c0_42] : memref<1x128xf32, #tpu.memory_space<vmem>>, vector<1x128xf32>
    %172 = vector.broadcast %171 : vector<1x128xf32> to vector<128x128xf32>
    %173 = arith.addf %170, %172 : vector<128x128xf32>
    %cst_43 = arith.constant 0.000000e+00 : f32
    %174 = vector.broadcast %cst_43 : f32 to vector<128x128xf32>
    %175 = arith.cmpf ogt, %173, %174 : vector<128x128xf32>
    %cst_44 = arith.constant 0.00999999977 : f32
    %176 = vector.broadcast %cst_44 : f32 to vector<128x128xf32>
    %177 = arith.mulf %176, %173 : vector<128x128xf32>
    %178 = arith.select %175, %173, %177 : vector<128x128xi1>, vector<128x128xf32>
    %c0_45 = arith.constant 0 : index
    %c0_46 = arith.constant 0 : index
    %179 = vector.load %arg9[%c0_45, %c0_46] : memref<128x128xf32, #tpu.memory_space<vmem>>, vector<128x128xf32>
    tpu.vector_store %arg9[%c0_45, %c0_46], %178 {strides = array<i32>} : memref<128x128xf32, #tpu.memory_space<vmem>>, vector<128x128xf32>,
    return
  }
  func.func @transform_0(%arg0: i32) -> (i32, i32) {
    %c0_i32 = arith.constant 0 : i32
    %c0_i32_0 = arith.constant 0 : i32
    %c0_i32_1 = arith.constant 0 : i32
    return %c0_i32, %c0_i32_0 : i32, i32
  }
  func.func @transform_1(%arg0: i32) -> (i32, i32) {
    %c0_i32 = arith.constant 0 : i32
    %c0_i32_0 = arith.constant 0 : i32
    %c0_i32_1 = arith.constant 0 : i32
    return %c0_i32, %c0_i32_0 : i32, i32
  }
  func.func @transform_2(%arg0: i32) -> (i32, i32) {
    %c0_i32 = arith.constant 0 : i32
    %c0_i32_0 = arith.constant 0 : i32
    return %arg0, %c0_i32 : i32, i32
  }
  func.func @transform_3(%arg0: i32) -> (i32, i32) {
    %c0_i32 = arith.constant 0 : i32
    %c0_i32_0 = arith.constant 0 : i32
    return %arg0, %c0_i32 : i32, i32
  }
  func.func @transform_4(%arg0: i32) -> (i32, i32) {
    %c0_i32 = arith.constant 0 : i32
    %c0_i32_0 = arith.constant 0 : i32
    %c0_i32_1 = arith.constant 0 : i32
    return %c0_i32, %c0_i32_0 : i32, i32
  }
  func.func @transform_5(%arg0: i32) -> (i32, i32) {
    %c0_i32 = arith.constant 0 : i32
    %c0_i32_0 = arith.constant 0 : i32
    %c0_i32_1 = arith.constant 0 : i32
    return %c0_i32, %c0_i32_0 : i32, i32
  }
  func.func @transform_6(%arg0: i32) -> (i32, i32) {
    %c0_i32 = arith.constant 0 : i32
    %c0_i32_0 = arith.constant 0 : i32
    %c0_i32_1 = arith.constant 0 : i32
    return %c0_i32, %c0_i32_0 : i32, i32
  }
  func.func @transform_7(%arg0: i32) -> (i32, i32) {
    %c0_i32 = arith.constant 0 : i32
    %c0_i32_0 = arith.constant 0 : i32
    %c0_i32_1 = arith.constant 0 : i32
    return %c0_i32, %c0_i32_0 : i32, i32
  }
  func.func @transform_8(%arg0: i32) -> (i32, i32) {
    %c0_i32 = arith.constant 0 : i32
    %c0_i32_0 = arith.constant 0 : i32
    return %arg0, %c0_i32 : i32, i32
  }
}

module attributes {stable_mosaic.version = 11 : i64} {
  func.func @_gat_layer_kernel(%arg0: i32, %arg1: memref<256x128xf32, #tpu.memory_space<vmem>>, %arg2: memref<128x256xf32, #tpu.memory_space<vmem>>, %arg3: memref<128x128xf32, #tpu.memory_space<vmem>>, %arg4: memref<128x256xbf16, #tpu.memory_space<vmem>>, %arg5: memref<128x16xf32, #tpu.memory_space<vmem>>, %arg6: memref<8x128xf32, #tpu.memory_space<vmem>>, %arg7: memref<128x8xf32, #tpu.memory_space<vmem>>, %arg8: memref<1x16xf32, #tpu.memory_space<vmem>>, %arg9: memref<128x16xf32, #tpu.memory_space<vmem>>) attributes {dimension_semantics = [#tpu.dimension_semantics<parallel>], iteration_bounds = array<i64: 2>, scalar_prefetch = 0 : i64, scratch_operands = 0 : i64, tpu.core_type = #tpu.core_type<tc>, window_params = [{pipeline_mode = #tpu.pipeline_mode<synchronous>, transform_indices = @transform_0, window_bounds = array<i64: 256, 128>}, {pipeline_mode = #tpu.pipeline_mode<synchronous>, transform_indices = @transform_1, window_bounds = array<i64: 128, 256>}, {transform_indices = @transform_2, window_bounds = array<i64: 128, 128>}, {transform_indices = @transform_3, window_bounds = array<i64: 128, 256>}, {pipeline_mode = #tpu.pipeline_mode<synchronous>, transform_indices = @transform_4, window_bounds = array<i64: 128, 16>}, {pipeline_mode = #tpu.pipeline_mode<synchronous>, transform_indices = @transform_5, window_bounds = array<i64: 8, 128>}, {pipeline_mode = #tpu.pipeline_mode<synchronous>, transform_indices = @transform_6, window_bounds = array<i64: 128, 8>}, {pipeline_mode = #tpu.pipeline_mode<synchronous>, transform_indices = @transform_7, window_bounds = array<i64: 1, 16>}, {transform_indices = @transform_8, window_bounds = array<i64: 128, 16>}]} {
    %c0 = arith.constant 0 : index
    %c0_0 = arith.constant 0 : index
    %0 = vector.load %arg1[%c0, %c0_0] : memref<256x128xf32, #tpu.memory_space<vmem>>, vector<256x128xf32>
    %1 = arith.truncf %0 : vector<256x128xf32> to vector<256x128xbf16>
    %c0_1 = arith.constant 0 : index
    %c0_2 = arith.constant 0 : index
    %2 = vector.load %arg5[%c0_1, %c0_2] : memref<128x16xf32, #tpu.memory_space<vmem>>, vector<128x16xf32>
    %3 = arith.truncf %2 : vector<128x16xf32> to vector<128x16xbf16>
    %cst = arith.constant dense<0.000000e+00> : vector<256x16xf32>
    %4 = tpu.matmul %1, %3, %cst {dimension_numbers = #tpu.dot_dimension_numbers<[1], [0], [0], [1], [0, 0, 1, 1], [], []>} : vector<256x128xbf16>, vector<128x16xbf16>, vector<256x16xf32> -> vector<256x16xf32>
    %5 = arith.truncf %4 : vector<256x16xf32> to vector<256x16xbf16>
    %c0_3 = arith.constant 0 : index
    %c0_4 = arith.constant 0 : index
    %6 = vector.load %arg6[%c0_3, %c0_4] : memref<8x128xf32, #tpu.memory_space<vmem>>, vector<8x128xf32>
    %c0_5 = arith.constant 0 : index
    %c0_6 = arith.constant 0 : index
    %7 = vector.load %arg2[%c0_5, %c0_6] : memref<128x256xf32, #tpu.memory_space<vmem>>, vector<128x256xf32>
    %cst_7 = arith.constant dense<0.000000e+00> : vector<8x256xf32>
    %8 = tpu.matmul %6, %7, %cst_7 {dimension_numbers = #tpu.dot_dimension_numbers<[1], [0], [0], [1], [0, 0, 1, 1], [], []>} : vector<8x128xf32>, vector<128x256xf32>, vector<8x256xf32> -> vector<8x256xf32>
    %c0_8 = arith.constant 0 : index
    %c0_9 = arith.constant 0 : index
    %9 = vector.load %arg3[%c0_8, %c0_9] : memref<128x128xf32, #tpu.memory_space<vmem>>, vector<128x128xf32>
    %c0_10 = arith.constant 0 : index
    %c0_11 = arith.constant 0 : index
    %10 = vector.load %arg7[%c0_10, %c0_11] : memref<128x8xf32, #tpu.memory_space<vmem>>, vector<128x8xf32>
    %cst_12 = arith.constant dense<0.000000e+00> : vector<128x8xf32>
    %11 = tpu.matmul %9, %10, %cst_12 {dimension_numbers = #tpu.dot_dimension_numbers<[1], [0], [0], [1], [0, 0, 1, 1], [], []>} : vector<128x128xf32>, vector<128x8xf32>, vector<128x8xf32> -> vector<128x8xf32>
    %c0_13 = arith.constant 0 : index
    %c0_14 = arith.constant 0 : index
    %12 = vector.load %arg4[%c0_13, %c0_14] : memref<128x256xbf16, #tpu.memory_space<vmem>>, vector<128x256xbf16>
    %13 = arith.extf %12 : vector<128x256xbf16> to vector<128x256xf32>
    %cst_15 = arith.constant 1.000000e+00 : bf16
    %14 = vector.broadcast %cst_15 : bf16 to vector<256x8xbf16>
    %15 = tpu.iota {dimensions = array<i32: 1>} : vector<1x16xi32>
    %cst_16 = arith.constant 0.000000e+00 : f32
    %16 = vector.broadcast %cst_16 : f32 to vector<128x16xf32>
    %cst_17 = arith.constant 0.000000e+00 : f32
    %17 = vector.broadcast %cst_17 : f32 to vector<128x16xf32>
    %18 = vector.extract_strided_slice %11 {offsets = [0, 0], sizes = [128, 1], strides = [1, 1]} : vector<128x8xf32> to vector<128x1xf32>
    %19 = vector.extract_strided_slice %8 {offsets = [0, 0], sizes = [1, 256], strides = [1, 1]} : vector<8x256xf32> to vector<1x256xf32>
    %20 = vector.broadcast %18 : vector<128x1xf32> to vector<128x256xf32>
    %21 = vector.broadcast %19 : vector<1x256xf32> to vector<128x256xf32>
    %22 = arith.addf %20, %21 : vector<128x256xf32>
    %cst_18 = arith.constant 0.000000e+00 : f32
    %23 = vector.broadcast %cst_18 : f32 to vector<128x256xf32>
    %24 = arith.cmpf ogt, %22, %23 : vector<128x256xf32>
    %cst_19 = arith.constant 2.000000e-01 : f32
    %25 = vector.broadcast %cst_19 : f32 to vector<128x256xf32>
    %26 = arith.mulf %25, %22 : vector<128x256xf32>
    %27 = arith.select %24, %22, %26 : vector<128x256xi1>, vector<128x256xf32>
    %28 = arith.addf %27, %13 : vector<128x256xf32>
    %cst_20 = arith.constant dense<0xFF800000> : vector<128xf32>
    %29 = vector.multi_reduction <maximumf>, %28, %cst_20 [1] : vector<128x256xf32> to vector<128xf32>
    %30 = vector.shape_cast %29 : vector<128xf32> to vector<128x1xf32>
    %31 = vector.broadcast %30 : vector<128x1xf32> to vector<128x256xf32>
    %32 = arith.subf %28, %31 : vector<128x256xf32>
    %33 = math.exp %32 : vector<128x256xf32>
    %34 = arith.truncf %33 : vector<128x256xf32> to vector<128x256xbf16>
    %cst_21 = arith.constant dense<0.000000e+00> : vector<128x8xf32>
    %35 = tpu.matmul %34, %14, %cst_21 {dimension_numbers = #tpu.dot_dimension_numbers<[1], [0], [0], [1], [0, 0, 1, 1], [], []>} : vector<128x256xbf16>, vector<256x8xbf16>, vector<128x8xf32> -> vector<128x8xf32>
    %36 = vector.extract_strided_slice %35 {offsets = [0, 0], sizes = [128, 1], strides = [1, 1]} : vector<128x8xf32> to vector<128x1xf32>
    %37 = tpu.reciprocal %36 {approx = true} : vector<128x1xf32> -> vector<128x1xf32>
    %c0_i32 = arith.constant 0 : i32
    %38 = vector.broadcast %c0_i32 : i32 to vector<1x16xi32>
    %39 = arith.cmpi sge, %15, %38 : vector<1x16xi32>
    %c16_i32 = arith.constant 16 : i32
    %40 = vector.broadcast %c16_i32 : i32 to vector<1x16xi32>
    %41 = arith.cmpi slt, %15, %40 : vector<1x16xi32>
    %42 = arith.andi %39, %41 : vector<1x16xi1>
    %43 = arith.extui %42 : vector<1x16xi1> to vector<1x16xi32>
    %44 = arith.sitofp %43 : vector<1x16xi32> to vector<1x16xf32>
    %45 = arith.truncf %44 : vector<1x16xf32> to vector<1x16xbf16>
    %46 = vector.broadcast %45 : vector<1x16xbf16> to vector<256x16xbf16>
    %47 = arith.mulf %5, %46 : vector<256x16xbf16>
    %cst_22 = arith.constant dense<0.000000e+00> : vector<128x16xf32>
    %48 = tpu.matmul %34, %47, %cst_22 {dimension_numbers = #tpu.dot_dimension_numbers<[1], [0], [0], [1], [0, 0, 1, 1], [], []>} : vector<128x256xbf16>, vector<256x16xbf16>, vector<128x16xf32> -> vector<128x16xf32>
    %49 = arith.addf %16, %48 : vector<128x16xf32>
    %50 = arith.extui %42 : vector<1x16xi1> to vector<1x16xi32>
    %51 = arith.sitofp %50 : vector<1x16xi32> to vector<1x16xf32>
    %52 = vector.broadcast %37 : vector<128x1xf32> to vector<128x16xf32>
    %53 = vector.broadcast %51 : vector<1x16xf32> to vector<128x16xf32>
    %54 = arith.mulf %52, %53 : vector<128x16xf32>
    %55 = arith.addf %17, %54 : vector<128x16xf32>
    %56 = arith.mulf %49, %55 : vector<128x16xf32>
    %c0_23 = arith.constant 0 : index
    %c0_24 = arith.constant 0 : index
    %57 = vector.load %arg8[%c0_23, %c0_24] : memref<1x16xf32, #tpu.memory_space<vmem>>, vector<1x16xf32>
    %58 = vector.broadcast %57 : vector<1x16xf32> to vector<128x16xf32>
    %59 = arith.addf %56, %58 : vector<128x16xf32>
    %c0_25 = arith.constant 0 : index
    %c0_26 = arith.constant 0 : index
    %60 = vector.load %arg9[%c0_25, %c0_26] : memref<128x16xf32, #tpu.memory_space<vmem>>, vector<128x16xf32>
    tpu.vector_store %arg9[%c0_25, %c0_26], %59 {strides = array<i32>} : memref<128x16xf32, #tpu.memory_space<vmem>>, vector<128x16xf32>,
    return
  }
  func.func @transform_0(%arg0: i32) -> (i32, i32) {
    %c0_i32 = arith.constant 0 : i32
    %c0_i32_0 = arith.constant 0 : i32
    %c0_i32_1 = arith.constant 0 : i32
    return %c0_i32, %c0_i32_0 : i32, i32
  }
  func.func @transform_1(%arg0: i32) -> (i32, i32) {
    %c0_i32 = arith.constant 0 : i32
    %c0_i32_0 = arith.constant 0 : i32
    %c0_i32_1 = arith.constant 0 : i32
    return %c0_i32, %c0_i32_0 : i32, i32
  }
  func.func @transform_2(%arg0: i32) -> (i32, i32) {
    %c0_i32 = arith.constant 0 : i32
    %c0_i32_0 = arith.constant 0 : i32
    return %arg0, %c0_i32 : i32, i32
  }
  func.func @transform_3(%arg0: i32) -> (i32, i32) {
    %c0_i32 = arith.constant 0 : i32
    %c0_i32_0 = arith.constant 0 : i32
    return %arg0, %c0_i32 : i32, i32
  }
  func.func @transform_4(%arg0: i32) -> (i32, i32) {
    %c0_i32 = arith.constant 0 : i32
    %c0_i32_0 = arith.constant 0 : i32
    %c0_i32_1 = arith.constant 0 : i32
    return %c0_i32, %c0_i32_0 : i32, i32
  }
  func.func @transform_5(%arg0: i32) -> (i32, i32) {
    %c0_i32 = arith.constant 0 : i32
    %c0_i32_0 = arith.constant 0 : i32
    %c0_i32_1 = arith.constant 0 : i32
    return %c0_i32, %c0_i32_0 : i32, i32
  }
  func.func @transform_6(%arg0: i32) -> (i32, i32) {
    %c0_i32 = arith.constant 0 : i32
    %c0_i32_0 = arith.constant 0 : i32
    %c0_i32_1 = arith.constant 0 : i32
    return %c0_i32, %c0_i32_0 : i32, i32
  }
  func.func @transform_7(%arg0: i32) -> (i32, i32) {
    %c0_i32 = arith.constant 0 : i32
    %c0_i32_0 = arith.constant 0 : i32
    %c0_i32_1 = arith.constant 0 : i32
    return %c0_i32, %c0_i32_0 : i32, i32
  }
  func.func @transform_8(%arg0: i32) -> (i32, i32) {
    %c0_i32 = arith.constant 0 : i32
    %c0_i32_0 = arith.constant 0 : i32
    return %arg0, %c0_i32 : i32, i32
  }
}

</mosaic_0001>

<bundles_post_ra>
// kernel: gae_encoder_forward.3
= control target key start
LH: loop header
LB: loop body
LE: loop exit
PB: predicated region body
PF: predicated region fallthrough
CT: control target
= control target key end

     0   :  { %s2326_s27 = smov 0   ;;  %s3338_s0 = inlined_call_operand.vmem [shape: f32[256,128], index: 0, kind: input, shape index: {}, may-alias: {0,2}]   ;;  %s3339_s1 = inlined_call_operand.vmem [shape: f32[128,256], index: 1, kind: input, shape index: {}]   ;;  %s3340_s2 = inlined_call_operand.vmem [shape: f32[256,128], index: 2, kind: input, shape index: {}, may-alias: {0,2}]   ;;  %s3341_s3 = inlined_call_operand.vmem [shape: bf16[256,256], index: 3, kind: input, shape index: {}]   ;;  %s3342_s4 = inlined_call_operand.vmem [shape: f32[128,16], index: 4, kind: input, shape index: {}]   ;;  %s3343_s5 = inlined_call_operand.vmem [shape: f32[8,128], index: 5, kind: input, shape index: {}]   ;;  %s3344_s6 = inlined_call_operand.vmem [shape: f32[128,8], index: 6, kind: input, shape index: {}]   ;;  %s3345_s7 = inlined_call_operand.vmem [shape: f32[1,16], index: 7, kind: input, shape index: {}]   ;;  %s3346_s8 = inlined_call_operand.vmem [shape: f32[256,16], index: 8, kind: output, shape index: {}]  }
   0x1 LB: > { %s1792_s28 = sadd.s32 4294967295, %s2276_s27   ;;  %p1796_p0 = scmp.ge.s32.totalorder %s2276_s27, 1  ;;  %s2276_s27 = sphi %s2326_s27, %s18_s27  }
   0x2   : > { %p275_p1 = scmp.lt.s32.totalorder %s2276_s27, 3 }
   0x4   : > { %p276_p2 = pnand %p1796_p0, %p275_p1 }
   0x6   : > { %279 = sbr.rel (%p276_p2) target bundleno = 1020 (0x3fc), region = 52 }
   0xd   : > { %v587_v0 = vld [vmem:[%s3339_s1 + $0x8] sm:$0xff]  ;;  %v589_v1 = vld [vmem:[%s3339_s1 + $0x18] sm:$0xff]  ;;  %v586_v2 = vld [vmem:[%s3339_s1] sm:$0xff]  ;;  %v2278_v7 = vmov 0.0   ;;  %s1797_s11 = sshll.u32 %s1792_s28, 4 }
   0xe   : > { %v2097_v3 = vpack.c.bf16 %v589_v1, %v587_v0  ;;  %v588_v4 = vld [vmem:[%s3339_s1 + $0x10] sm:$0xff]  ;;  %v591_v5 = vld [vmem:[%s3339_s1 + $0x28] sm:$0xff]  ;;  %v593_v6 = vld [vmem:[%s3339_s1 + $0x38] sm:$0xff]  ;;  %682 = vmatprep.mubr.f32.mxu1 %v2278_v7  ;;  %p316_p3 = scmp.lt.s32.totalorder %s1797_s11, 31 }
   0xf   : > { %v2099_v8 = vpack.c.bf16 %v588_v4, %v586_v2  ;;  %v2101_v9 = vpack.c.bf16 %v593_v6, %v591_v5  ;;  %v590_v10 = vld [vmem:[%s3339_s1 + $0x20] sm:$0xff]  ;;  %v592_v11 = vld [vmem:[%s3339_s1 + $0x30] sm:$0xff]  ;;  %v595_v12 = vld [vmem:[%s3339_s1 + $0x48] sm:$0xff] }
  0x10   : > { %2098 = vmatprep.subr.bf16.mxu1 %v2097_v3  ;;  %v597_v13 = vld [vmem:[%s3339_s1 + $0x58] sm:$0xff]  ;;  %v2103_v14 = vpack.c.bf16 %v592_v11, %v590_v10  ;;  %v594_v16 = vld [vmem:[%s3339_s1 + $0x40] sm:$0xff]  ;;  %v596_v17 = vld [vmem:[%s3339_s1 + $0x50] sm:$0xff]  ;;  %s3457_s11 = smov (!%p316_p3, %s1797_s11), 31 }
  0x11   : > { %2100 = vmatpush1.bf16.msra.mxu1 %v2099_v8  ;;  %v2105_v15 = vpack.c.bf16 %v597_v13, %v595_v12  ;;  %v599_v18 = vld [vmem:[%s3339_s1 + $0x68] sm:$0xff]  ;;  %v601_v19 = vld [vmem:[%s3339_s1 + $0x78] sm:$0xff]  ;;  %v2107_v20 = vpack.c.bf16 %v596_v17, %v594_v16  ;;  %v598_v22 = vld [vmem:[%s3339_s1 + $0x60] sm:$0xff]  ;;  %s2439_s16 = sshll.u32 %s3457_s11, 3 }
  0x12   : > { %2102 = vmatprep.subr.bf16.mxu1 %v2101_v9  ;;  %v2109_v21 = vpack.c.bf16 %v601_v19, %v599_v18  ;;  %v600_v23 = vld [vmem:[%s3339_s1 + $0x70] sm:$0xff]  ;;  %v603_v24 = vld [vmem:[%s3339_s1 + $0x88] sm:$0xff]  ;;  %v605_v25 = vld [vmem:[%s3339_s1 + $0x98] sm:$0xff]  ;;  %s2451_s22 = scalar_lea.vmem %s3340_s2, %s2439_s16  ;;  %s2686_s29 = scalar_lea.vmem %s3341_s3, %s2439_s16 }
  0x13   : > { %v2111_v26 = vpack.c.bf16 %v600_v23, %v598_v22  ;;  %v2113_v27 = vpack.c.bf16 %v605_v25, %v603_v24  ;;  %v602_v28 = vld [vmem:[%s3339_s1 + $0x80] sm:$0xff]  ;;  %v604_v29 = vld [vmem:[%s3339_s1 + $0x90] sm:$0xff]  ;;  %v607_v30 = vld [vmem:[%s3339_s1 + $0xa8] sm:$0xff]  ;;  %s3256_s13 = scalar_lea.vmem %s3346_s8, %s2439_s16 }
  0x14   : > { %v609_v31 = vld [vmem:[%s3339_s1 + $0xb8] sm:$0xff]  ;;  %v2115_v32 = vpack.c.bf16 %v604_v29, %v602_v28  ;;  %v606_v34 = vld [vmem:[%s3339_s1 + $0xa0] sm:$0xff]  ;;  %v608_v35 = vld [vmem:[%s3339_s1 + $0xb0] sm:$0xff] }
  0x15   : > { %2104 = vmatpush1.bf16.msra.mxu1 %v2103_v14  ;;  %v2117_v33 = vpack.c.bf16 %v609_v31, %v607_v30  ;;  %v611_v36 = vld [vmem:[%s3339_s1 + $0xc8] sm:$0xff]  ;;  %v613_v37 = vld [vmem:[%s3339_s1 + $0xd8] sm:$0xff]  ;;  %v2119_v38 = vpack.c.bf16 %v608_v35, %v606_v34  ;;  %v610_v40 = vld [vmem:[%s3339_s1 + $0xc0] sm:$0xff] }
  0x16   : > { %2106 = vmatprep.subr.bf16.mxu1 %v2105_v15  ;;  %v2121_v39 = vpack.c.bf16 %v613_v37, %v611_v36  ;;  %v612_v41 = vld [vmem:[%s3339_s1 + $0xd0] sm:$0xff]  ;;  %v615_v42 = vld [vmem:[%s3339_s1 + $0xe8] sm:$0xff]  ;;  %v617_v43 = vld [vmem:[%s3339_s1 + $0xf8] sm:$0xff] }
  0x17   : > { %v2123_v44 = vpack.c.bf16 %v612_v41, %v610_v40  ;;  %v2125_v45 = vpack.c.bf16 %v617_v43, %v615_v42  ;;  %v614_v46 = vld [vmem:[%s3339_s1 + $0xe0] sm:$0xff]  ;;  %v616_v47 = vld [vmem:[%s3339_s1 + $0xf0] sm:$0xff]  ;;  %v706_v49 = vld [vmem:[%s3344_s6 + $0x8] sm:$0xff] }
  0x18   : > { %v705_v48 = vld [vmem:[%s3344_s6] sm:$0xff]  ;;  %v2127_v50 = vpack.c.bf16 %v616_v47, %v614_v46  ;;  %v707_v52 = vld [vmem:[%s3344_s6 + $0x10] sm:$0xff]  ;;  %v708_v53 = vld [vmem:[%s3344_s6 + $0x18] sm:$0xff] }
  0x19   : > { %2108 = vmatpush1.bf16.msra.mxu1 %v2107_v20  ;;  %v2129_v51 = vpack.c.bf16 %v706_v49, %v705_v48  ;;  %v585_v54 = vld [vmem:[%s3343_s5] sm:$0xff]  ;;  %v2133_v55 = vpack.c.bf16 %v708_v53, %v707_v52  ;;  %v710_v58 = vld [vmem:[%s3344_s6 + $0x28] sm:$0xff]  ;;  %v711_v60 = vld [vmem:[%s3344_s6 + $0x30] sm:$0xff] }
  0x1a   : > { %2110 = vmatprep.subr.bf16.mxu1 %v2109_v21  ;;  %v689_v56 = vld [vmem:[%s2451_s22] sm:$0xff]  ;;  %v712_v61 = vld [vmem:[%s3344_s6 + $0x38] sm:$0xff]  ;;  %v714_v0 = vld [vmem:[%s3344_s6 + $0x48] sm:$0xff] }
  0x1b   : > { %v709_v57 = vld [vmem:[%s3344_s6 + $0x20] sm:$0xff]  ;;  %v2141_v62 = vpack.c.bf16 %v712_v61, %v711_v60  ;;  %v715_v2 = vld [vmem:[%s3344_s6 + $0x50] sm:$0xff]  ;;  %v716_v3 = vld [vmem:[%s3344_s6 + $0x58] sm:$0xff] }
  0x1c   : > { %v2137_v59 = vpack.c.bf16 %v710_v58, %v709_v57  ;;  %v713_v63 = vld [vmem:[%s3344_s6 + $0x40] sm:$0xff]  ;;  %v2149_v4 = vpack.c.bf16 %v716_v3, %v715_v2  ;;  %v718_v6 = vld [vmem:[%s3344_s6 + $0x68] sm:$0xff]  ;;  %v719_v9 = vld [vmem:[%s3344_s6 + $0x70] sm:$0xff] }
  0x1d   : > { %2112 = vmatpush1.bf16.msra.mxu1 %v2111_v26  ;;  %v2145_v1 = vpack.c.bf16 %v714_v0, %v713_v63  ;;  %v717_v5 = vld [vmem:[%s3344_s6 + $0x60] sm:$0xff]  ;;  %v720_v10 = vld [vmem:[%s3344_s6 + $0x78] sm:$0xff]  ;;  %v690_v12 = vld [vmem:[%s2451_s22 + $0x8] sm:$0xff] }
  0x1e   : > { %2114 = vmatprep.subr.bf16.mxu1 %v2113_v27  ;;  %v2153_v8 = vpack.c.bf16 %v718_v6, %v717_v5  ;;  %v2157_v11 = vpack.c.bf16 %v720_v10, %v719_v9  ;;  %v691_v13 = vld [vmem:[%s2451_s22 + $0x10] sm:$0xff]  ;;  %v692_v14 = vld [vmem:[%s2451_s22 + $0x18] sm:$0xff]  ;;  %v693_v15 = vld [vmem:[%s2451_s22 + $0x20] sm:$0xff] }
  0x1f   : > { %v694_v16 = vld [vmem:[%s2451_s22 + $0x28] sm:$0xff]  ;;  %v695_v17 = vld [vmem:[%s2451_s22 + $0x30] sm:$0xff]  ;;  %v696_v18 = vld [vmem:[%s2451_s22 + $0x38] sm:$0xff] }
  0x20   : > { %v697_v19 = vld [vmem:[%s2451_s22 + $0x40] sm:$0xff]  ;;  %v698_v20 = vld [vmem:[%s2451_s22 + $0x48] sm:$0xff]  ;;  %v699_v21 = vld [vmem:[%s2451_s22 + $0x50] sm:$0xff] }
  0x21   : > { %2116 = vmatpush1.bf16.msra.mxu1 %v2115_v32  ;;  %v700_v22 = vld [vmem:[%s2451_s22 + $0x58] sm:$0xff]  ;;  %v701_v23 = vld [vmem:[%s2451_s22 + $0x60] sm:$0xff]  ;;  %v702_v24 = vld [vmem:[%s2451_s22 + $0x68] sm:$0xff] }
  0x22   : > { %2118 = vmatprep.subr.bf16.mxu1 %v2117_v33  ;;  %v703_v25 = vld [vmem:[%s2451_s22 + $0x70] sm:$0xff]  ;;  %v704_v26 = vld [vmem:[%s2451_s22 + $0x78] sm:$0xff]  ;;  %v384_v27 = vld [vmem:[%s3342_s4] sm:$0xff] }
  0x23   : > { %v385_v28 = vld [vmem:[%s3342_s4 + $0x8] sm:$0xff]  ;;  %v386_v29 = vld [vmem:[%s3342_s4 + $0x10] sm:$0xff]  ;;  %v387_v31 = vld [vmem:[%s3342_s4 + $0x18] sm:$0xff] }
  0x24   : > { %v400_v30 = vpack.c.bf16 %v385_v28, %v384_v27  ;;  %v401_v32 = vpack.c.bf16 %v387_v31, %v386_v29  ;;  %v388_v33 = vld [vmem:[%s3342_s4 + $0x20] sm:$0xff]  ;;  %v389_v34 = vld [vmem:[%s3342_s4 + $0x28] sm:$0xff]  ;;  %v390_v36 = vld [vmem:[%s3342_s4 + $0x30] sm:$0xff] }
  0x25   : > { %2120 = vmatpush1.bf16.msra.mxu1 %v2119_v38  ;;  %v402_v35 = vpack.c.bf16 %v389_v34, %v388_v33  ;;  %v391_v37 = vld [vmem:[%s3342_s4 + $0x38] sm:$0xff]  ;;  %v392_v40 = vld [vmem:[%s3342_s4 + $0x40] sm:$0xff]  ;;  %v393_v41 = vld [vmem:[%s3342_s4 + $0x48] sm:$0xff] }
  0x26   : > { %2122 = vmatprep.subr.bf16.mxu1 %v2121_v39  ;;  %1993 = vmatprep.subr.bf16.mxu0 %v400_v30  ;;  %v403_v38 = vpack.c.bf16 %v391_v37, %v390_v36  ;;  %v2279_v39 = vmov 0   ;;  %v404_v42 = vpack.c.bf16 %v393_v41, %v392_v40  ;;  %v394_v43 = vld [vmem:[%s3342_s4 + $0x50] sm:$0xff]  ;;  %v396_v46 = vld [vmem:[%s3342_s4 + $0x60] sm:$0xff]  ;;  %v397_v47 = vld [vmem:[%s3342_s4 + $0x68] sm:$0xff] }
  0x27   : > { %1994 = vmatpush3.bf16.msra.mxu0 %v400_v30  ;;  %2172 = vset.pattern.permute.xlu0 %v2279_v39  ;;  %v406_v48 = vpack.c.bf16 %v397_v47, %v396_v46  ;;  %v398_v49 = vld [vmem:[%s3342_s4 + $0x70] sm:$0xff]  ;;  %v336_v52 = vld [vmem:[%s3338_s0] sm:$0xff]  ;;  %v337_v53 = vld [vmem:[%s3338_s0 + $0x8] sm:$0xff] }
  0x28   : > { %1995 = vmatprep.subr.bf16.mxu0 %v401_v32  ;;  %2173 = vset.pattern.permute.xlu1 %v2279_v39  ;;  %v340_v58 = vld [vmem:[%s3338_s0 + $0x20] sm:$0xff]  ;;  %v342_v61 = vld [vmem:[%s3338_s0 + $0x30] sm:$0xff]  ;;  %v363_v29 = vld [vmem:[%s3338_s0 + $0xd8] sm:$0xff] }
  0x29   : > { %2124 = vmatpush1.bf16.msra.mxu1 %v2123_v44  ;;  %v395_v44 = vld [vmem:[%s3342_s4 + $0x58] sm:$0xff]  ;;  %v344_v0 = vld [vmem:[%s3338_s0 + $0x40] sm:$0xff]  ;;  %v346_v3 = vld [vmem:[%s3338_s0 + $0x50] sm:$0xff] }
  0x2a   : > { %2126 = vmatprep.subr.bf16.mxu1 %v2125_v45  ;;  %v405_v45 = vpack.c.bf16 %v395_v44, %v394_v43  ;;  %v348_v6 = vld [vmem:[%s3338_s0 + $0x60] sm:$0xff]  ;;  %v350_v10 = vld [vmem:[%s3338_s0 + $0x70] sm:$0xff]  ;;  %v365_v31 = vld [vmem:[%s3338_s0 + $0xe8] sm:$0xff] }
  0x2b   : > { %1996 = vmatpush3.bf16.msra.mxu0 %v401_v32  ;;  %v362_v28 = vld [vmem:[%s3338_s0 + $0xd0] sm:$0xff]  ;;  %v364_v30 = vld [vmem:[%s3338_s0 + $0xe0] sm:$0xff] }
  0x2c   : > { %1997 = vmatprep.subr.bf16.mxu0 %v402_v35  ;;  %v381_v32 = vpack.c.bf16 %v363_v29, %v362_v28  ;;  %v382_v33 = vpack.c.bf16 %v365_v31, %v364_v30  ;;  %v366_v34 = vld [vmem:[%s3338_s0 + $0xf0] sm:$0xff]  ;;  %v2736_v28 = vld [vmem:[%s2686_s29 + $0x40] sm:$0xff] }
  0x2d   : > { %2128 = vmatpush1.bf16.msra.mxu1 %v2127_v50  ;;  %v399_v50 = vld [vmem:[%s3342_s4 + $0x78] sm:$0xff] }
  0x2e   : > { %2130 = vmatprep.subr.bf16.mxu1 %v2129_v51 }
  0x2f   : > { %1998 = vmatpush3.bf16.msra.mxu0 %v402_v35  ;;  %v367_v35 = vld [vmem:[%s3338_s0 + $0xf8] sm:$0xff] }
  0x30   : > { %683 = vmatmul.mubr.f32.vlgmr.msra.gmra.mrb[0].mxu1 %v585_v54  ;;  %1999 = vmatprep.subr.bf16.mxu0 %v403_v38  ;;  %v368_v54 = vpack.c.bf16 %v337_v53, %v336_v52  ;;  %v383_v36 = vpack.c.bf16 %v367_v35, %v366_v34 }
  0x31   : > { %2132 = vmatpush3.bf16.msra.mxu1 %v2129_v51  ;;  %2073 = vmatprep.mubr.f32.mxu1 %v689_v56  ;;  %v407_v51 = vpack.c.bf16 %v399_v50, %v398_v49  ;;  %v339_v56 = vld [vmem:[%s3338_s0 + $0x18] sm:$0xff] }
  0x32   : > { %2134 = vmatprep.subr.bf16.mxu1 %v2133_v55  ;;  %2009 = vmatprep.mubr.bf16.mxu0 %v368_v54 }
  0x33   : > { %2000 = vmatpush3.bf16.msra.mxu0 %v403_v38 }
  0x34   : > { %2001 = vmatprep.subr.bf16.mxu0 %v404_v42 }
  0x35   : > { %2136 = vmatpush3.bf16.msra.mxu1 %v2133_v55  ;;  %v338_v55 = vld [vmem:[%s3338_s0 + $0x10] sm:$0xff] }
  0x36   : > { %2138 = vmatprep.subr.bf16.mxu1 %v2137_v59  ;;  %v369_v57 = vpack.c.bf16 %v339_v56, %v338_v55  ;;  %v2280_v55 = vmov 1065369472  }
  0x37   : > { %2002 = vmatpush3.bf16.msra.mxu0 %v404_v42 }
  0x38   : > { %2003 = vmatprep.subr.bf16.mxu0 %v405_v45 }
  0x39   : > { %2140 = vmatpush3.bf16.msra.mxu1 %v2137_v59  ;;  %v341_v59 = vld [vmem:[%s3338_s0 + $0x28] sm:$0xff] }
  0x3a   : > { %2142 = vmatprep.subr.bf16.mxu1 %v2141_v62  ;;  %v370_v60 = vpack.c.bf16 %v341_v59, %v340_v58 }
  0x3b   : > { %2004 = vmatpush3.bf16.msra.mxu0 %v405_v45 }
  0x3c   : > { %2005 = vmatprep.subr.bf16.mxu0 %v406_v48 }
  0x3d   : > { %2144 = vmatpush3.bf16.msra.mxu1 %v2141_v62  ;;  %v343_v62 = vld [vmem:[%s3338_s0 + $0x38] sm:$0xff] }
  0x3e   : > { %2146 = vmatprep.subr.bf16.mxu1 %v2145_v1  ;;  %v371_v63 = vpack.c.bf16 %v343_v62, %v342_v61 }
  0x3f   : > { %2006 = vmatpush3.bf16.msra.mxu0 %v406_v48 }
  0x40   : > { %2007 = vmatprep.subr.bf16.mxu0 %v407_v51 }
  0x41   : > { %2148 = vmatpush3.bf16.msra.mxu1 %v2145_v1  ;;  %v345_v1 = vld [vmem:[%s3338_s0 + $0x48] sm:$0xff] }
  0x42   : > { %2150 = vmatprep.subr.bf16.mxu1 %v2149_v4  ;;  %v372_v2 = vpack.c.bf16 %v345_v1, %v344_v0  ;;  %v914_v0 = vlaneseq }
  0x43   : > { %2008 = vmatpush3.bf16.msra.mxu0 %v407_v51 }
  0x44   : > { %1865 = vmatprep.subr.bf16.mxu0 %v2280_v55 }
  0x45   : > { %2152 = vmatpush3.bf16.msra.mxu1 %v2149_v4  ;;  %v347_v4 = vld [vmem:[%s3338_s0 + $0x58] sm:$0xff] }
  0x46   : > { %2154 = vmatprep.subr.bf16.mxu1 %v2153_v8  ;;  %2010 = vmatmul.mubr.bf16.vlgmr.msra.gmra.mrb[0].mxu0 %v369_v57  ;;  %v373_v5 = vpack.c.bf16 %v347_v4, %v346_v3  ;;  %v915_v4 = vand.u32 127, %v914_v0 }
  0x47   : > { %2013 = vmatprep.mubr.bf16.mxu0 %v370_v60  ;;  %1866 = vmatpush3.bf16.msra.mxu0 %v2280_v55 }
  0x48   : > { %1867 = vmatprep.subr.bf16.mxu0 %v2280_v55  ;;  %vm1438_vm0 = vcmp.lt.s32.totalorder %v915_v4, 16  ;;  %v2779_v4 = vld [vmem:[%s2686_s29 + $0x58] sm:$0xff] }
  0x49   : > { %2156 = vmatpush3.bf16.msra.mxu1 %v2153_v8  ;;  %v349_v8 = vld [vmem:[%s3338_s0 + $0x68] sm:$0xff] }
  0x4a   : > { %2158 = vmatprep.subr.bf16.mxu1 %v2157_v11  ;;  %v374_v9 = vpack.c.bf16 %v349_v8, %v348_v6  ;;  %v997_v6 = vshrl.u32 %v914_v0, 7 }
  0x4b   : > { %1868 = vmatpush3.bf16.msra.mxu0 %v2280_v55 }
  0x4c   : > { %1869 = vmatprep.subr.bf16.mxu0 %v2280_v55 }
  0x4d   : > { %2160 = vmatpush3.bf16.msra.mxu1 %v2157_v11  ;;  %v351_v11 = vld [vmem:[%s3338_s0 + $0x78] sm:$0xff] }
  0x4e   : > { %2014 = vmatmul.mubr.bf16.gmra.mrb[4].mxu0 %v371_v63 }
  0x4f   : > { %2017 = vmatprep.mubr.bf16.mxu0 %v372_v2  ;;  %1870 = vmatpush3.bf16.msra.mxu0 %v2280_v55 }
  0x50   : > { %2074 = vmatmul.mubr.f32.vlgmr.msra.gmra.mrb[2].mxu1 %v690_v12  ;;  %v352_v12 = vld [vmem:[%s3338_s0 + $0x80] sm:$0xff]  ;;  %1871 = vmatprep.subr.bf16.mxu0 %v2280_v55 }
  0x51   : > { %2076 = vmatprep.mubr.f32.mxu1 %v691_v13  ;;  %v353_v13 = vld [vmem:[%s3338_s0 + $0x88] sm:$0xff] }
  0x53   : > { %1872 = vmatpush3.bf16.msra.mxu0 %v2280_v55 }
  0x54   : > { %2077 = vmatmul.mubr.f32.gmra.mrb[4].mxu1 %v692_v14  ;;  %v375_v14 = vpack.c.bf16 %v351_v11, %v350_v10  ;;  %1873 = vmatprep.subr.bf16.mxu0 %v2280_v55  ;;  %v998_v10 = vsub.s32 0, %v997_v6 }
  0x55   : > { %2079 = vmatprep.mubr.f32.mxu1 %v693_v15  ;;  %v376_v15 = vpack.c.bf16 %v353_v13, %v352_v12  ;;  %v2693_v12 = vsel %vm1438_vm0, 1.0, %v2278_v7 }
  0x56   : > { %2018 = vmatmul.mubr.bf16.gmra.mrb[8].mxu0 %v373_v5  ;;  %3375 = vst [vmem:[#allocation5_spill] sm:$0xff] %v2693_v12  ;;  %v2715_v7 = vpack.c.bf16 %v2693_v12, %v2693_v12 }
  0x57   : > { %2021 = vmatprep.mubr.bf16.mxu0 %v374_v9  ;;  %1874 = vmatpush3.bf16.msra.mxu0 %v2280_v55 }
  0x58   : > { %2080 = vmatmul.mubr.f32.gmra.mrb[6].mxu1 %v694_v16  ;;  %v354_v16 = vld [vmem:[%s3338_s0 + $0x90] sm:$0xff]  ;;  %1875 = vmatprep.subr.bf16.mxu0 %v2280_v55 }
  0x59   : > { %2082 = vmatprep.mubr.f32.mxu1 %v695_v17  ;;  %v355_v17 = vld [vmem:[%s3338_s0 + $0x98] sm:$0xff] }
  0x5b   : > { %1876 = vmatpush3.bf16.msra.mxu0 %v2280_v55 }
  0x5c   : > { %2083 = vmatmul.mubr.f32.gmra.mrb[8].mxu1 %v696_v18  ;;  %v356_v18 = vld [vmem:[%s3338_s0 + $0xa0] sm:$0xff]  ;;  %1877 = vmatprep.subr.bf16.mxu0 %v2280_v55 }
  0x5d   : > { %2085 = vmatprep.mubr.f32.mxu1 %v697_v19  ;;  %v357_v19 = vld [vmem:[%s3338_s0 + $0xa8] sm:$0xff] }
  0x5e   : > { %2022 = vmatmul.mubr.bf16.gmra.mrb[12].mxu0 %v375_v14 }
  0x5f   : > { %2025 = vmatprep.mubr.bf16.mxu0 %v376_v15  ;;  %1878 = vmatpush3.bf16.msra.mxu0 %v2280_v55  ;;  %v2700_v15 = vld [vmem:[%s2686_s29] sm:$0xff] }
  0x60   : > { %2086 = vmatmul.mubr.f32.gmra.mrb[10].mxu1 %v698_v20  ;;  %v377_v20 = vpack.c.bf16 %v355_v17, %v354_v16  ;;  %1879 = vmatprep.subr.bf16.mxu0 %v2280_v55  ;;  %v2703_v16 = vld [vmem:[%s2686_s29 + $0x8] sm:$0xff] }
  0x61   : > { %2088 = vmatprep.mubr.f32.mxu1 %v699_v21  ;;  %v378_v21 = vpack.c.bf16 %v357_v19, %v356_v18  ;;  %v2708_v18 = vld [vmem:[%s2686_s29 + $0x10] sm:$0xff]  ;;  %v2711_v19 = vld [vmem:[%s2686_s29 + $0x20] sm:$0xff]  ;;  %v885_v29 = vunpack.c.h.bf16 %v2703_v16  ;;  %v2786_v17 = vld [vmem:[%s2686_s29 + $0x68] sm:$0xff] }
  0x63   : > { %1880 = vmatpush3.bf16.msra.mxu0 %v2280_v55 }
  0x64   : > { %2089 = vmatmul.mubr.f32.gmra.mrb[12].mxu1 %v700_v22  ;;  %v358_v22 = vld [vmem:[%s3338_s0 + $0xb0] sm:$0xff] }
  0x65   : > { %2091 = vmatprep.mubr.f32.mxu1 %v701_v23  ;;  %v359_v23 = vld [vmem:[%s3338_s0 + $0xb8] sm:$0xff] }
  0x66   : > { %2026 = vmatmul.mubr.bf16.gmra.mrb[16].mxu0 %v377_v20 }
  0x67   : > { %2029 = vmatprep.mubr.bf16.mxu0 %v378_v21  ;;  %v2721_v21 = vld [vmem:[%s2686_s29 + $0x18] sm:$0xff] }
  0x68   : > { %2092 = vmatmul.mubr.f32.gmra.mrb[14].mxu1 %v702_v24  ;;  %v360_v24 = vld [vmem:[%s3338_s0 + $0xc0] sm:$0xff] }
  0x69   : > { %2094 = vmatprep.mubr.f32.mxu1 %v703_v25  ;;  %v361_v25 = vld [vmem:[%s3338_s0 + $0xc8] sm:$0xff] }
  0x6a   : > { %v380_v27 = vpack.c.bf16 %v361_v25, %v360_v24  ;;  %v882_v24 = vunpack.c.l.bf16 %v2700_v15  ;;  %v883_v25 = vunpack.c.h.bf16 %v2700_v15 }
  0x6c   : > { %2095 = vmatmul.mubr.f32.gmra.mrb[16].mxu1 %v704_v26  ;;  %v379_v26 = vpack.c.bf16 %v359_v23, %v358_v22  ;;  %v2724_v22 = vld [vmem:[%s2686_s29 + $0x30] sm:$0xff] }
  0x6e   : > { %2030 = vmatmul.mubr.bf16.gmra.mrb[20].mxu0 %v379_v26  ;;  %v884_v26 = vunpack.c.l.bf16 %v2703_v16 }
  0x6f   : > { %2033 = vmatprep.mubr.bf16.mxu0 %v380_v27  ;;  %v2733_v27 = vld [vmem:[%s2686_s29 + $0x28] sm:$0xff] }
  0x76   : > { %2034 = vmatmul.mubr.bf16.gmra.mrb[24].mxu0 %v381_v32 }
  0x77   : > { %2037 = vmatprep.mubr.bf16.mxu0 %v382_v33 }
  0x7e   : > { %2038 = vmatmul.mubr.bf16.gmra.mrb[28].mxu0 %v383_v36 }
 0x103   : > { %v2652_v37 = vpop.f32.mrb[0].mxu1 }
 0x104   : > { %v2654_v38 = vpop.f32.mrb[1].mxu1  ;;  %v2718_v20 = vrot.slane %v2652_v37, %v998_v10 }
 0x105   : > { %v2727_v23 = vrot.slane %v2654_v38, %v998_v10  ;;  %v2749_v38 = vld [vmem:[%s2686_s29 + $0x38] sm:$0xff] }
 0x119   : > { %v2656_v56 = vpop.f32.mrb[0].mxu0 }
 0x11a   : > { %v2658_v57 = vpop.f32.mrb[1].mxu0 }
 0x11b   : > { %v2660_v58 = vpop.f32.mrb[2].mxu0 }
 0x11c   : > { %v2664_v60 = vpop.f32.mrb[3].mxu0 }
 0x121   : > { %v2668_v62 = vpop.f32.mrb[4].mxu0 }
 0x122   : > { %v2670_v63 = vpop.f32.mrb[5].mxu0 }
 0x123   : > { %v2075_v39 = vpop.f32.mrb[2].mxu1  ;;  %v2672_v1 = vpop.f32.mrb[6].mxu0 }
 0x124   : > { %v787_v40 = vpop.f32.mrb[3].mxu1  ;;  %v2676_v3 = vpop.f32.mrb[7].mxu0 }
 0x125   : > { %918 = vperm.xlu0 %2172, %v787_v40  }
 0x127   : > { %v2078_v41 = vpop.f32.mrb[4].mxu1 }
 0x128   : > { %v797_v42 = vpop.f32.mrb[5].mxu1 }
 0x129   : > { %923 = vperm.xlu0 %2172, %v2075_v39   ;;  %928 = vperm.xlu1 %2173, %v797_v42   ;;  %v2680_v8 = vpop.f32.mrb[8].mxu0  ;;  %v2752_v39 = vld [vmem:[%s2686_s29 + $0x50] sm:$0xff] }
 0x12a   : > { %3372 = vst [vmem:[#allocation2_spill] sm:$0xff] %v2680_v8  ;;  %v2688_v9 = vpop.f32.mrb[9].mxu0 }
 0x12b   : > { %v2081_v43 = vpop.f32.mrb[6].mxu1  ;;  %3373 = vst [vmem:[#allocation3_spill] sm:$0xff] %v2688_v9  ;;  %v2690_v11 = vpop.f32.mrb[10].mxu0 }
 0x12c   : > { %v807_v44 = vpop.f32.mrb[7].mxu1  ;;  %3374 = vst [vmem:[#allocation4_spill] sm:$0xff] %v2690_v11  ;;  %v2697_v14 = vpop.f32.mrb[11].mxu0 }
 0x12d   : > { %933 = vperm.xlu1 %2173, %v2078_v41   ;;  %938 = vperm.xlu0 %2172, %v807_v44   ;;  %3376 = vst [vmem:[#allocation6_spill] sm:$0xff] %v2697_v14  ;;  %v2802_v44 = vld [vmem:[%s2686_s29 + $0x78] sm:$0xff] }
 0x12f   : > { %v2084_v45 = vpop.f32.mrb[8].mxu1 }
 0x130   : > { %v817_v46 = vpop.f32.mrb[9].mxu1 }
 0x131   : > { %943 = vperm.xlu1 %2173, %v2081_v43   ;;  %948 = vperm.xlu0 %2172, %v817_v46   ;;  %v2742_v33 = vpop.f32.mrb[12].mxu0  ;;  %v2761_v46 = vld [vmem:[%s2686_s29 + $0x48] sm:$0xff] }
 0x132   : > { %3377 = vst [vmem:[#allocation7_spill] sm:$0xff] %v2742_v33  ;;  %v2754_v40 = vpop.f32.mrb[13].mxu0  ;;  %v3387_v33 = vunpack.c.h.bf16 %v2708_v18 }
 0x133   : > { %v2087_v47 = vpop.f32.mrb[10].mxu1  ;;  %3378 = vst [vmem:[#allocation8_spill] sm:$0xff] %v2754_v40 }
 0x134   : > { %v827_v48 = vpop.f32.mrb[11].mxu1 }
 0x135   : > { %953 = vperm.xlu1 %2173, %v2084_v45   ;;  %958 = vperm.xlu0 %2172, %v827_v48  }
 0x137   : > { %v2090_v49 = vpop.f32.mrb[12].mxu1 }
 0x138   : > { %v837_v50 = vpop.f32.mrb[13].mxu1 }
 0x139   : > { %963 = vperm.xlu1 %2173, %v2087_v47   ;;  %968 = vperm.xlu0 %2172, %v837_v50   ;;  %v2763_v47 = vpop.f32.mrb[14].mxu0 }
 0x13a   : > { %3379 = vst [vmem:[#allocation9_spill] sm:$0xff] %v2763_v47 }
 0x13b   : > { %v2093_v51 = vpop.f32.mrb[14].mxu1 }
 0x13c   : > { %v847_v52 = vpop.f32.mrb[15].mxu1 }
 0x13d   : > { %973 = vperm.xlu1 %2173, %v2090_v49   ;;  %978 = vperm.xlu0 %2172, %v847_v52   ;;  %v2795_v52 = vld [vmem:[%s2686_s29 + $0x70] sm:$0xff] }
 0x13f   : > { %v2096_v53 = vpop.f32.mrb[16].mxu1 }
 0x140   : > { %v857_v54 = vpop.f32.mrb[17].mxu1 }
 0x141   : > { %983 = vperm.xlu1 %2173, %v2093_v51   ;;  %988 = vperm.xlu0 %2172, %v857_v54   ;;  %v2769_v51 = vld [vmem:[%s2686_s29 + $0x60] sm:$0xff] }
 0x145   : > { %993 = vperm.xlu1 %2173, %v2096_v53   ;;  %v2773_v53 = vpop.f32.mrb[15].mxu0 }
 0x146   : > { %3380 = vst [vmem:[#allocation10_spill] sm:$0xff] %v2773_v53  ;;  %v2804_v61 = vpop.f32.mrb[16].mxu0 }
 0x1a4   : > { %v919_v41 = vpop.permute.xlu0 %918 }
 0x1a5   : > { %v1004_v48 = vadd.f32 %v2718_v20, %v919_v41  ;;  %v1005_v49 = vadd.f32 %v2727_v23, %v919_v41 }
 0x1a7   : > { %v1068_v10 = vmul.f32 0.2, %v1004_v48  ;;  %v1069_v41 = vmul.f32 0.2, %v1005_v49  ;;  %vm1036_vm1 = vcmp.gt.f32.partialorder %v1004_v48, 0.0  ;;  %vm1037_vm2 = vcmp.gt.f32.partialorder %v1005_v49, 0.0 }
 0x1a8   : > { %v924_v2 = vpop.permute.xlu0 %923  ;;  %v929_v5 = vpop.permute.xlu1 %928 }
 0x1a9   : > { %v1006_v6 = vadd.f32 %v2718_v20, %v924_v2  ;;  %v1007_v0 = vadd.f32 %v2727_v23, %v924_v2  ;;  %v1008_v54 = vadd.f32 %v2718_v20, %v929_v5  ;;  %v1100_v55 = vsel %vm1036_vm1, %v1004_v48, %v1068_v10  ;;  %v2818_v10 = vpop.f32.mrb[17].mxu0 }
 0x1aa   : > { %v1101_v13 = vsel %vm1037_vm2, %v1005_v49, %v1069_v41  ;;  %v1009_v42 = vadd.f32 %v2727_v23, %v929_v5  ;;  %v2822_v5 = vadd.f32 %v1100_v55, %v882_v24  ;;  %v2828_v45 = vpop.f32.mrb[18].mxu0 }
 0x1ab   : > { %v1070_v43 = vmul.f32 0.2, %v1006_v6  ;;  %v1071_v2 = vmul.f32 0.2, %v1007_v0  ;;  %vm1038_vm3 = vcmp.gt.f32.partialorder %v1006_v6, 0.0  ;;  %vm1039_vm4 = vcmp.gt.f32.partialorder %v1007_v0, 0.0 }
 0x1ac   : > { %v934_v37 = vpop.permute.xlu1 %933  ;;  %v939_v50 = vpop.permute.xlu0 %938  ;;  %vm1040_vm5 = vcmp.gt.f32.partialorder %v1008_v54, 0.0  ;;  %v1072_v49 = vmul.f32 0.2, %v1008_v54  ;;  %3381 = vst [vmem:[#allocation11_spill] sm:$0xff] %v2822_v5  ;;  %v2826_v41 = vadd.f32 %v1101_v13, %v883_v25  ;;  %vm1041_vm6 = vcmp.gt.f32.partialorder %v1009_v42, 0.0 }
 0x1ad   : > { %v2811_v59 = vadd.f32 %v2718_v20, %v934_v37  ;;  %v2814_v36 = vadd.f32 %v2727_v23, %v934_v37  ;;  %v1012_v37 = vadd.f32 %v2718_v20, %v939_v50  ;;  %v1013_v35 = vadd.f32 %v2727_v23, %v939_v50 }
 0x1ae   : > { %3382 = vst [vmem:[#allocation12_spill] sm:$0xff] %v2826_v41  ;;  %v1102_v48 = vsel %vm1038_vm3, %v1006_v6, %v1070_v43  ;;  %v1103_v34 = vsel %vm1039_vm4, %v1007_v0, %v1071_v2  ;;  %v1073_v32 = vmul.f32 0.2, %v1009_v42  ;;  %v1164_v25 = vmax.f32 %v2822_v5, %v2826_v41  ;;  %v2843_v43 = vpop.f32.mrb[19].mxu0 }
 0x1af   : > { %vm1042_vm7 = vcmp.gt.f32.partialorder %v2811_v59, 0.0  ;;  %vm1043_vm8 = vcmp.gt.f32.partialorder %v2814_v36, 0.0  ;;  %v1074_v13 = vmul.f32 0.2, %v2811_v59  ;;  %v2850_v6 = vadd.f32 %v1102_v48, %v884_v26  ;;  %v2857_v31 = vpop.f32.mrb[20].mxu0 }
 0x1b0   : > { %v944_v24 = vpop.permute.xlu1 %943  ;;  %v949_v55 = vpop.permute.xlu0 %948  ;;  %v2854_v2 = vadd.f32 %v1103_v34, %v885_v29  ;;  %v1104_v15 = vsel %vm1040_vm5, %v1008_v54, %v1072_v49  ;;  %v1075_v30 = vmul.f32 0.2, %v2814_v36  ;;  %v1076_v12 = vmul.f32 0.2, %v1012_v37  ;;  %1165 = vmax.xlane.f32.xlu0 %v1164_v25 }
 0x1b1   : > { %v2841_v50 = vadd.f32 %v2718_v20, %v944_v24  ;;  %v2846_v0 = vadd.f32 %v2727_v23, %v944_v24  ;;  %3383 = vst [vmem:[#allocation13_spill] sm:$0xff] %v2850_v6  ;;  %v1077_v41 = vmul.f32 0.2, %v1013_v35  ;;  %v1016_v24 = vadd.f32 %v2718_v20, %v949_v55  ;;  %v2873_v5 = vpop.f32.mrb[21].mxu0 }
 0x1b2   : > { %3384 = vst [vmem:[#allocation14_spill] sm:$0xff] %v2854_v2  ;;  %vm1044_vm9 = vcmp.gt.f32.partialorder %v1012_v37, 0.0  ;;  %vm1045_vm10 = vcmp.gt.f32.partialorder %v1013_v35, 0.0  ;;  %v1017_v26 = vadd.f32 %v2727_v23, %v949_v55  ;;  %v1167_v34 = vmax.f32 %v2850_v6, %v2854_v2 }
 0x1b3   : > { %vm1046_vm11 = vcmp.gt.f32.partialorder %v2841_v50, 0.0  ;;  %v1105_v54 = vsel %vm1041_vm6, %v1009_v42, %v1073_v32  ;;  %v3385_v48 = vunpack.c.l.bf16 %v2708_v18  ;;  %vm1047_vm12 = vcmp.gt.f32.partialorder %v2846_v0, 0.0  ;;  %v2884_v32 = vpop.f32.mrb[22].mxu0 }
 0x1b4   : > { %v954_v16 = vpop.permute.xlu1 %953  ;;  %v959_v29 = vpop.permute.xlu0 %958  ;;  %v1078_v55 = vmul.f32 0.2, %v2841_v50  ;;  %v2879_v47 = vadd.f32 %v1105_v54, %v3387_v33  ;;  %v1079_v42 = vmul.f32 0.2, %v2846_v0  ;;  %vm1048_vm13 = vcmp.gt.f32.partialorder %v1016_v24, 0.0  ;;  %1168 = vmax.xlane.f32.xlu1 %v1167_v34 }
 0x1b5   : > { %v2868_v49 = vadd.f32 %v1104_v15, %v3385_v48  ;;  %v2871_v25 = vadd.f32 %v2718_v20, %v954_v16  ;;  %v2882_v2 = vadd.f32 %v2727_v23, %v954_v16  ;;  %v1108_v15 = vsel %vm1044_vm9, %v1012_v37, %v1076_v12  ;;  %v2889_v6 = vpop.f32.mrb[23].mxu0 }
 0x1b6   : > { %3388 = vst [vmem:[#allocation16_spill] sm:$0xff] %v2879_v47  ;;  %v1109_v48 = vsel %vm1045_vm10, %v1013_v35, %v1077_v41  ;;  %vm1049_vm14 = vcmp.gt.f32.partialorder %v1017_v26, 0.0  ;;  %v1080_v40 = vmul.f32 0.2, %v1016_v24  ;;  %v1020_v33 = vadd.f32 %v2718_v20, %v959_v29 }
 0x1b7   : > { %3386 = vst [vmem:[#allocation15_spill] sm:$0xff] %v2868_v49  ;;  %v1170_v18 = vmax.f32 %v2868_v49, %v2879_v47  ;;  %v1081_v53 = vmul.f32 0.2, %v1017_v26  ;;  %v2895_v8 = vmul.f32 0.2, %v2871_v25  ;;  %v1021_v34 = vadd.f32 %v2727_v23, %v959_v29 }
 0x1b8   : > { %v964_v16 = vpop.permute.xlu1 %963  ;;  %v969_v54 = vpop.permute.xlu0 %968  ;;  %v3389_v12 = vunpack.c.l.bf16 %v2711_v19  ;;  %vm1050_vm15 = vcmp.gt.f32.partialorder %v2871_v25, 0.0  ;;  %vm1051_vm0 = vcmp.gt.f32.partialorder %v2882_v2, 0.0  ;;  %v3391_v41 = vunpack.c.h.bf16 %v2711_v19 }
 0x1b9   : > { %1171 = vmax.xlane.f32.xlu0 %v1170_v18  ;;  %v1106_v49 = vsel %vm1042_vm7, %v2811_v59, %v1074_v13  ;;  %v1107_v29 = vsel %vm1043_vm8, %v2814_v36, %v1075_v30  ;;  %v2917_v18 = vpop.f32.mrb[24].mxu0  ;;  %v3395_v19 = vunpack.c.h.bf16 %v2721_v21  ;;  %v2931_v59 = vadd.f32 %v2718_v20, %v969_v54 }
 0x1ba   : > { %v2900_v35 = vadd.f32 %v1108_v15, %v3389_v12  ;;  %v2906_v37 = vadd.f32 %v1109_v48, %v3391_v41  ;;  %v2915_v15 = vadd.f32 %v2718_v20, %v964_v16  ;;  %v3393_v12 = vunpack.c.l.bf16 %v2721_v21  ;;  %v2933_v30 = vpop.f32.mrb[25].mxu0 }
 0x1bb   : > { %v2925_v48 = vadd.f32 %v1107_v29, %v3395_v19  ;;  %v2928_v41 = vadd.f32 %v2727_v23, %v964_v16  ;;  %v1083_v36 = vmul.f32 0.2, %v2882_v2  ;;  %vm1052_vm1 = vcmp.gt.f32.partialorder %v1020_v33, 0.0 }
 0x1bc   : > { %3390 = vst [vmem:[#allocation17_spill] sm:$0xff] %v2900_v35  ;;  %3392 = vst [vmem:[#allocation18_spill] sm:$0xff] %v2906_v37  ;;  %v2921_v47 = vadd.f32 %v1106_v49, %v3393_v12  ;;  %v1176_v13 = vmax.f32 %v2900_v35, %v2906_v37  ;;  %v2939_v49 = vadd.f32 %v2727_v23, %v969_v54  ;;  %v974_v21 = vpop.permute.xlu1 %973  ;;  %vm1053_vm2 = vcmp.gt.f32.partialorder %v1021_v34, 0.0  ;;  %v979_v19 = vpop.permute.xlu0 %978 }
 0x1bd   : > { %3396 = vst [vmem:[#allocation20_spill] sm:$0xff] %v2925_v48  ;;  %v1084_v29 = vmul.f32 0.2, %v1020_v33  ;;  %v1085_v12 = vmul.f32 0.2, %v1021_v34  ;;  %vm1056_vm3 = vcmp.gt.f32.partialorder %v2931_v59, 0.0  ;;  %v1112_v54 = vsel %vm1048_vm13, %v1016_v24, %v1080_v40 }
 0x1be   : > { %3394 = vst [vmem:[#allocation19_spill] sm:$0xff] %v2921_v47  ;;  %v1173_v16 = vmax.f32 %v2921_v47, %v2925_v48  ;;  %1177 = vmax.xlane.f32.xlu1 %v1176_v13  ;;  %v2944_v11 = vmul.f32 0.2, %v2915_v15  ;;  %v2947_v9 = vmul.f32 0.2, %v2928_v41  ;;  %vm1054_vm4 = vcmp.gt.f32.partialorder %v2915_v15, 0.0 }
 0x1bf   : > { %vm1055_vm5 = vcmp.gt.f32.partialorder %v2928_v41, 0.0  ;;  %vm1057_vm6 = vcmp.gt.f32.partialorder %v2939_v49, 0.0  ;;  %v1113_v35 = vsel %vm1049_vm14, %v1017_v26, %v1081_v53  ;;  %v3397_v13 = vunpack.c.l.bf16 %v2724_v22 }
 0x1c0   : > { %1174 = vmax.xlane.f32.xlu0 %v1173_v16  ;;  %v1110_v48 = vsel %vm1046_vm11, %v2841_v50, %v1078_v55  ;;  %v1111_v40 = vsel %vm1047_vm12, %v2846_v0, %v1079_v42  ;;  %v3399_v24 = vunpack.c.h.bf16 %v2724_v22  ;;  %v3401_v47 = vunpack.c.l.bf16 %v2733_v27 }
 0x1c1   : > { %v2957_v37 = vadd.f32 %v1112_v54, %v3397_v13  ;;  %v3402_v53 = vunpack.c.h.bf16 %v2733_v27  ;;  %v1026_v54 = vadd.f32 %v2718_v20, %v974_v21  ;;  %v2979_v50 = vadd.f32 %v2727_v23, %v974_v21 }
 0x1c2   : > { %v2967_v16 = vadd.f32 %v1113_v35, %v3399_v24  ;;  %v2971_v14 = vadd.f32 %v1110_v48, %v3401_v47  ;;  %v1028_v55 = vadd.f32 %v2718_v20, %v979_v19  ;;  %v1029_v0 = vadd.f32 %v2727_v23, %v979_v19  ;;  %v984_v48 = vpop.permute.xlu1 %983 }
 0x1c3   : > { %3398 = vst [vmem:[#allocation21_spill] sm:$0xff] %v2957_v37  ;;  %v2975_v26 = vadd.f32 %v1111_v40, %v3402_v53  ;;  %v1116_v22 = vsel %vm1052_vm1, %v1020_v33, %v1084_v29  ;;  %v1088_v42 = vmul.f32 0.2, %v2931_v59  ;;  %v1089_v47 = vmul.f32 0.2, %v2939_v49  ;;  %v989_v40 = vpop.permute.xlu0 %988 }
 0x1c4   : > { %3400 = vst [vmem:[#allocation22_spill] sm:$0xff] %v2967_v16  ;;  %v1182_v27 = vmax.f32 %v2957_v37, %v2967_v16  ;;  %vm1058_vm7 = vcmp.gt.f32.partialorder %v1026_v54, 0.0  ;;  %v1090_v21 = vmul.f32 0.2, %v1026_v54  ;;  %v1091_v13 = vmul.f32 0.2, %v2979_v50 }
 0x1c5   : > { %v1179_v35 = vmax.f32 %v2971_v14, %v2975_v26  ;;  %vm1060_vm8 = vcmp.gt.f32.partialorder %v1028_v55, 0.0  ;;  %vm1059_vm9 = vcmp.gt.f32.partialorder %v2979_v50, 0.0  ;;  %vm1061_vm10 = vcmp.gt.f32.partialorder %v1029_v0, 0.0 }
 0x1c6   : > { %1183 = vmax.xlane.f32.xlu1 %v1182_v27  ;;  %v1092_v33 = vmul.f32 0.2, %v1028_v55  ;;  %v1117_v29 = vsel %vm1053_vm2, %v1021_v34, %v1085_v12  ;;  %v3403_v19 = vunpack.c.l.bf16 %v2736_v28  ;;  %v3405_v53 = vunpack.c.h.bf16 %v2736_v28 }
 0x1c7   : > { %1180 = vmax.xlane.f32.xlu0 %v1179_v35  ;;  %v1114_v27 = vsel %vm1050_vm15, %v2871_v25, %v2895_v8  ;;  %v1115_v35 = vsel %vm1051_vm0, %v2882_v2, %v1083_v36  ;;  %v1030_v16 = vadd.f32 %v2718_v20, %v984_v48  ;;  %v3407_v34 = vunpack.c.l.bf16 %v2749_v38 }
 0x1c8   : > { %v2995_v24 = vadd.f32 %v1116_v22, %v3403_v19  ;;  %v2999_v37 = vadd.f32 %v1117_v29, %v3405_v53  ;;  %v3409_v22 = vunpack.c.h.bf16 %v2749_v38  ;;  %v1031_v29 = vadd.f32 %v2727_v23, %v984_v48  ;;  %v3019_v53 = vpop.f32.mrb[26].mxu0  ;;  %v994_v48 = vpop.permute.xlu1 %993 }
 0x1c9   : > { %v3011_v12 = vadd.f32 %v1114_v27, %v3407_v34  ;;  %v1032_v19 = vadd.f32 %v2718_v20, %v989_v40  ;;  %v1093_v8 = vmul.f32 0.2, %v1029_v0  ;;  %vm1062_vm11 = vcmp.gt.f32.partialorder %v1030_v16, 0.0  ;;  %v3024_v36 = vpop.f32.mrb[27].mxu0 }
 0x1ca   : > { %3404 = vst [vmem:[#allocation23_spill] sm:$0xff] %v2995_v24  ;;  %3406 = vst [vmem:[#allocation24_spill] sm:$0xff] %v2999_v37  ;;  %v3015_v28 = vadd.f32 %v1115_v35, %v3409_v22  ;;  %v1188_v2 = vmax.f32 %v2995_v24, %v2999_v37  ;;  %v1033_v25 = vadd.f32 %v2727_v23, %v989_v40  ;;  %vm1063_vm12 = vcmp.gt.f32.partialorder %v1031_v29, 0.0 }
 0x1cb   : > { %3408 = vst [vmem:[#allocation25_spill] sm:$0xff] %v3011_v12  ;;  %v1094_v27 = vmul.f32 0.2, %v1030_v16  ;;  %v1095_v35 = vmul.f32 0.2, %v1031_v29  ;;  %vm1064_vm13 = vcmp.gt.f32.partialorder %v1032_v19, 0.0  ;;  %v1120_v22 = vsel %vm1056_vm3, %v2931_v59, %v1088_v42 }
 0x1cc   : > { %v1185_v38 = vmax.f32 %v3011_v12, %v3015_v28  ;;  %1189 = vmax.xlane.f32.xlu1 %v1188_v2  ;;  %vm1065_vm14 = vcmp.gt.f32.partialorder %v1033_v25, 0.0  ;;  %v1096_v34 = vmul.f32 0.2, %v1032_v19  ;;  %v1121_v40 = vsel %vm1057_vm6, %v2939_v49, %v1089_v47 }
 0x1cd   : > { %v3410_v24 = vunpack.c.l.bf16 %v2752_v39  ;;  %v1118_v2 = vsel %vm1054_vm4, %v2915_v15, %v2944_v11  ;;  %v1119_v12 = vsel %vm1055_vm5, %v2928_v41, %v2947_v9  ;;  %v3411_v59 = vunpack.c.h.bf16 %v2752_v39 }
 0x1ce   : > { %1186 = vmax.xlane.f32.xlu0 %v1185_v38  ;;  %v3412_v49 = vunpack.c.l.bf16 %v2761_v46  ;;  %v1035_v11 = vadd.f32 %v2727_v23, %v994_v48  ;;  %v1124_v15 = vsel %vm1060_vm8, %v1028_v55, %v1092_v33  ;;  %v1125_v9 = vsel %vm1061_vm10, %v1029_v0, %v1093_v8 }
 0x1cf   : > { %v3036_v37 = vadd.f32 %v1120_v22, %v3410_v24  ;;  %v3048_v42 = vadd.f32 %v1121_v40, %v3411_v59  ;;  %v3413_v24 = vunpack.c.h.bf16 %v2761_v46  ;;  %v1034_v22 = vadd.f32 %v2718_v20, %v994_v48 }
 0x1d0   : > { %v3052_v47 = vadd.f32 %v1118_v2, %v3412_v49  ;;  %v1122_v39 = vsel %vm1058_vm7, %v1026_v54, %v1090_v21  ;;  %v1097_v41 = vmul.f32 0.2, %v1033_v25  ;;  %v1099_v20 = vmul.f32 0.2, %v1035_v11 }
 0x1d1   : > { %v3056_v38 = vadd.f32 %v1119_v12, %v3413_v24  ;;  %v1194_v40 = vmax.f32 %v3036_v37, %v3048_v42  ;;  %v1098_v46 = vmul.f32 0.2, %v1034_v22  ;;  %v3067_v12 = vpop.f32.mrb[28].mxu0  ;;  %vm1066_vm15 = vcmp.gt.f32.partialorder %v1034_v22, 0.0 }
 0x1d2   : > { %v3414_v23 = vunpack.c.l.bf16 %v2769_v51  ;;  %v3415_v55 = vunpack.c.h.bf16 %v2769_v51  ;;  %v554_v54 = vpop.f32.mrb[29].mxu0  ;;  %vm1067_vm0 = vcmp.gt.f32.partialorder %v1035_v11, 0.0  ;;  %v1123_v21 = vsel %vm1059_vm9, %v2979_v50, %v1091_v13 }
 0x1d3   : > { %v1191_v2 = vmax.f32 %v3052_v47, %v3056_v38  ;;  %1195 = vmax.xlane.f32.xlu1 %v1194_v40  ;;  %v3416_v33 = vunpack.c.l.bf16 %v2779_v4  ;;  %v1126_v59 = vsel %vm1062_vm11, %v1030_v16, %v1094_v27  ;;  %v3417_v51 = vunpack.c.h.bf16 %v2779_v4 }
 0x1d4   : > { %v3071_v48 = vadd.f32 %v1124_v15, %v3414_v23  ;;  %v3075_v0 = vadd.f32 %v1125_v9, %v3415_v55  ;;  %v1127_v15 = vsel %vm1063_vm12, %v1031_v29, %v1095_v35  ;;  %v3418_v9 = vunpack.c.l.bf16 %v2786_v17  ;;  %v2040_v55 = vpop.f32.mrb[30].mxu0 }
 0x1d5   : > { %1192 = vmax.xlane.f32.xlu0 %v1191_v2  ;;  %v3082_v8 = vadd.f32 %v1122_v39, %v3416_v33  ;;  %v3089_v24 = vadd.f32 %v1123_v21, %v3417_v51  ;;  %v3419_v50 = vunpack.c.h.bf16 %v2786_v17  ;;  %v1128_v39 = vsel %vm1064_vm13, %v1032_v19, %v1096_v34  ;;  %v3431_v51 = vld [vmem:[#allocation4_spill] sm:$0xff] }
 0x1d6   : > { %v1200_v49 = vmax.f32 %v3071_v48, %v3075_v0  ;;  %v3094_v40 = vadd.f32 %v1126_v59, %v3418_v9  ;;  %v1129_v16 = vsel %vm1065_vm14, %v1033_v25, %v1097_v41  ;;  %v1130_v27 = vsel %vm1066_vm15, %v1034_v22, %v1098_v46 }
 0x1d7   : > { %v3098_v13 = vadd.f32 %v1127_v15, %v3419_v50  ;;  %v1197_v4 = vmax.f32 %v3082_v8, %v3089_v24  ;;  %v3420_v2 = vunpack.c.l.bf16 %v2795_v52  ;;  %v3421_v35 = vunpack.c.h.bf16 %v2795_v52  ;;  %v557_v52 = vpop.f32.mrb[31].mxu0  ;;  %v3432_v15 = vld [vmem:[#allocation2_spill] sm:$0xff] }
 0x1d8   : > { %v1131_v17 = vsel %vm1067_vm0, %v1035_v11, %v1099_v20  ;;  %1201 = vmax.xlane.f32.xlu1 %v1200_v49  ;;  %v3422_v25 = vunpack.c.l.bf16 %v2802_v44  ;;  %v3423_v22 = vunpack.c.h.bf16 %v2802_v44  ;;  %v578_v46 = vpack.c.bf16 %v2828_v45, %v2804_v61  ;;  %v3434_v50 = vld [vmem:[#allocation10_spill] sm:$0xff] }
 0x1d9   : > { %v3107_v29 = vadd.f32 %v1128_v39, %v3420_v2  ;;  %v3111_v23 = vadd.f32 %v1129_v16, %v3421_v35  ;;  %v1203_v19 = vmax.f32 %v3094_v40, %v3098_v13  ;;  %1198 = vmax.xlane.f32.xlu0 %v1197_v4  ;;  %v577_v20 = vpack.c.bf16 %v2843_v43, %v2818_v10  ;;  %v3435_v39 = vld [vmem:[#allocation8_spill] sm:$0xff]  ;;  %v3437_v2 = vld [vmem:[#allocation9_spill] sm:$0xff]  ;;  %v3438_v35 = vld [vmem:[#allocation7_spill] sm:$0xff] }
 0x1da   : > { %v3117_v34 = vadd.f32 %v1130_v27, %v3422_v25  ;;  %v3121_v41 = vadd.f32 %v1131_v17, %v3423_v22  ;;  %v580_v21 = vpack.c.bf16 %v2884_v32, %v2857_v31  ;;  %v579_v33 = vpack.c.bf16 %v2889_v6, %v2873_v5  ;;  %v3440_v25 = vld [vmem:[#allocation11_spill] sm:$0xff] }
 0x1db   : > { %v1206_v11 = vmax.f32 %v3107_v29, %v3111_v23  ;;  %v3424_v44 = vpack.c.bf16 %v2664_v60, %v2658_v57  ;;  %v582_v61 = vpack.c.bf16 %v3019_v53, %v2917_v18  ;;  %v581_v45 = vpack.c.bf16 %v3024_v36, %v2933_v30  ;;  %v3428_v36 = vld [vmem:[#allocation6_spill] sm:$0xff] }
 0x1dc   : > { %v1452_v49 = vmul.bf16 %v2715_v7, %v578_v46  ;;  %v1451_v10 = vmul.bf16 %v2715_v7, %v577_v20  ;;  %v584_v31 = vpack.c.bf16 %v2040_v55, %v3067_v12  ;;  %v583_v43 = vpack.c.bf16 %v557_v52, %v554_v54  ;;  %v3429_v12 = vld [vmem:[#allocation3_spill] sm:$0xff]  ;;  %v3441_v46 = vld [vmem:[#allocation12_spill] sm:$0xff] }
 0x1dd   : > { %v1443_v59 = vmul.bf16 %v2715_v7, %v3424_v44  ;;  %1207 = vmax.xlane.f32.xlu1 %v1206_v11  ;;  %1204 = vmax.xlane.f32.xlu0 %v1203_v19  ;;  %v1209_v57 = vmax.f32 %v3117_v34, %v3121_v41  ;;  %v3425_v60 = vpack.c.bf16 %v2660_v58, %v2656_v56  ;;  %vm1707_vm1 = vcmask 130048  }
 0x1de   : > { %1929 = vmatprep.subr.bf16.mxu1 %v1451_v10  ;;  %v1453_v6 = vmul.bf16 %v2715_v7, %v579_v33  ;;  %v3426_v32 = vpack.c.bf16 %v2676_v3, %v2670_v63  ;;  %v1454_v30 = vmul.bf16 %v2715_v7, %v580_v21  ;;  %v3427_v53 = vpack.c.bf16 %v2672_v1, %v2668_v62  ;;  %v3442_v33 = vld [vmem:[#allocation13_spill] sm:$0xff] }
 0x1df   : > { %v1444_v5 = vmul.bf16 %v2715_v7, %v3425_v60  ;;  %1930 = vmatpush3.bf16.msra.mxu1 %v1443_v59  ;;  %v1455_v58 = vmul.bf16 %v2715_v7, %v581_v45  ;;  %v3430_v54 = vpack.c.bf16 %v3428_v36, %v3429_v12  ;;  %v1456_v3 = vmul.bf16 %v2715_v7, %v582_v61  ;;  %v3443_v59 = vld [vmem:[#allocation14_spill] sm:$0xff] }
 0x1e0   : > { %1931 = vmatprep.subr.bf16.mxu1 %v1452_v49  ;;  %v1445_v18 = vmul.bf16 %v2715_v7, %v3426_v32  ;;  %v1446_v56 = vmul.bf16 %v2715_v7, %v3427_v53  ;;  %v3433_v9 = vpack.c.bf16 %v3431_v51, %v3432_v15  ;;  %v1457_v1 = vmul.bf16 %v2715_v7, %v583_v43  ;;  %v3445_v43 = vld [vmem:[#allocation15_spill] sm:$0xff]  ;;  %v3448_v12 = vld [vmem:[#allocation18_spill] sm:$0xff] }
 0x1e1   : > { %1210 = vmax.xlane.f32.xlu0 %v1209_v57  ;;  %v1447_v63 = vmul.bf16 %v2715_v7, %v3430_v54  ;;  %v3436_v16 = vpack.c.bf16 %v3434_v50, %v3435_v39  ;;  %v1458_v4 = vmul.bf16 %v2715_v7, %v584_v31  ;;  %v3439_v17 = vpack.c.bf16 %v3437_v2, %v3438_v35  ;;  %v3446_v32 = vld [vmem:[#allocation19_spill] sm:$0xff]  ;;  %v3449_v39 = vld [vmem:[#allocation17_spill] sm:$0xff]  ;;  %v3450_v2 = vld [vmem:[#allocation22_spill] sm:$0xff] }
 0x1e2   : > { %v1448_v62 = vmul.bf16 %v2715_v7, %v3433_v9 }
 0x1e3   : > { %1932 = vmatpush3.bf16.msra.mxu1 %v1444_v5  ;;  %v1449_v27 = vmul.bf16 %v2715_v7, %v3436_v16  ;;  %v1450_v55 = vmul.bf16 %v2715_v7, %v3439_v17  ;;  %v3444_v7 = vld [vmem:[#allocation16_spill] sm:$0xff] }
 0x1e4   : > { %1933 = vmatprep.subr.bf16.mxu1 %v1453_v6 }
 0x1e7   : > { %1934 = vmatpush3.bf16.msra.mxu1 %v1445_v18 }
 0x1e8   : > { %1935 = vmatprep.subr.bf16.mxu1 %v1454_v30  ;;  %v3447_v30 = vld [vmem:[#allocation20_spill] sm:$0xff] }
 0x1eb   : > { %1936 = vmatpush3.bf16.msra.mxu1 %v1446_v56 }
 0x1ec   : > { %1937 = vmatprep.subr.bf16.mxu1 %v1455_v58 }
 0x1ef   : > { %1938 = vmatpush3.bf16.msra.mxu1 %v1447_v63 }
 0x1f0   : > { %1939 = vmatprep.subr.bf16.mxu1 %v1456_v3 }
 0x1f3   : > { %1940 = vmatpush3.bf16.msra.mxu1 %v1448_v62 }
 0x1f4   : > { %1941 = vmatprep.subr.bf16.mxu1 %v1457_v1 }
 0x1f7   : > { %1942 = vmatpush3.bf16.msra.mxu1 %v1449_v27 }
 0x1f8   : > { %1943 = vmatprep.subr.bf16.mxu1 %v1458_v4 }
 0x1fb   : > { %1944 = vmatpush3.bf16.msra.mxu1 %v1450_v55 }
 0x23d   : > { %v1166_v19 = vpop.xlane.xlu0 %1165 }
 0x23e   : > { %v1212_v22 = vsub.f32 %v3440_v25, %v1166_v19  ;;  %v1213_v52 = vsub.f32 %v3441_v46, %v1166_v19 }
 0x240   : > { %v1244_v11 = vmul.f32 1.442695, %v1212_v22  ;;  %v1246_v20 = vmul.f32 1.442695, %v1213_v52  ;;  %v3451_v52 = vld [vmem:[#allocation25_spill] sm:$0xff] }
 0x241   : > { %v1169_v21 = vpop.xlane.xlu1 %1168 }
 0x242   : > { %v1214_v44 = vsub.f32 %v3442_v33, %v1169_v21  ;;  %v1215_v61 = vsub.f32 %v3443_v59, %v1169_v21  ;;  %2174 = vpow2.f32 %v1244_v11  ;;  %v3452_v33 = vld [vmem:[#allocation21_spill] sm:$0xff] }
 0x243   : > { %2176 = vpow2.f32 %v1246_v20 }
 0x244   : > { %v1248_v45 = vmul.f32 1.442695, %v1214_v44  ;;  %v1250_v49 = vmul.f32 1.442695, %v1215_v61 }
 0x246   : > { %v1172_v10 = vpop.xlane.xlu0 %1171  ;;  %2178 = vpow2.f32 %v1248_v45 }
 0x247   : > { %v1217_v31 = vsub.f32 %v3444_v7, %v1172_v10  ;;  %2180 = vpow2.f32 %v1250_v49  ;;  %v1216_v57 = vsub.f32 %v3445_v43, %v1172_v10  ;;  %v3453_v49 = vld [vmem:[#allocation24_spill] sm:$0xff] }
 0x249   : > { %v1254_v6 = vmul.f32 1.442695, %v1217_v31  ;;  %v1252_v36 = vmul.f32 1.442695, %v1216_v57 }
 0x24b   : > { %v1178_v60 = vpop.xlane.xlu1 %1177  ;;  %2182 = vpow2.f32 %v1254_v6 }
 0x24c   : > { %v1221_v54 = vsub.f32 %v3448_v12, %v1178_v60  ;;  %v2175_v63 = vpop.eup %2174  ;;  %v1220_v16 = vsub.f32 %v3449_v39, %v1178_v60 }
 0x24d   : > { %v1175_v5 = vpop.xlane.xlu0 %1174  ;;  %v2177_v51 = vpop.eup %2176 }
 0x24e   : > { %v1218_v18 = vsub.f32 %v3446_v32, %v1175_v5  ;;  %v1219_v53 = vsub.f32 %v3447_v30, %v1175_v5  ;;  %v1262_v27 = vmul.f32 1.442695, %v1221_v54  ;;  %v1260_v22 = vmul.f32 1.442695, %v1220_v16 }
 0x250   : > { %v1256_v56 = vmul.f32 1.442695, %v1218_v18  ;;  %v1258_v58 = vmul.f32 1.442695, %v1219_v53  ;;  %v2179_v62 = vpop.eup %2178 }
 0x251   : > { %v2181_v50 = vpop.eup %2180  ;;  %v1308_v4 = vpack.c.bf16 %v2179_v62, %v2175_v63 }
 0x252   : > { %2184 = vpow2.f32 %v1256_v56  ;;  %v1309_v55 = vpack.c.bf16 %v2181_v50, %v2177_v51 }
 0x253   : > { %v1184_v15 = vpop.xlane.xlu1 %1183  ;;  %2186 = vpow2.f32 %v1258_v58 }
 0x254   : > { %v1181_v3 = vpop.xlane.xlu0 %1180  ;;  %2188 = vpow2.f32 %v1252_v36  ;;  %v1225_v35 = vsub.f32 %v3450_v2, %v1184_v15  ;;  %1356 = vmatprep.mubr.bf16.mxu0 %v1309_v55  ;;  %1491 = vmatprep.mubr.bf16.mxu1 %v1309_v55  ;;  %v1224_v44 = vsub.f32 %v3452_v33, %v1184_v15  ;;  %v3454_v36 = vld [vmem:[#allocation23_spill] sm:$0xff] }
 0x255   : > { %v1222_v9 = vsub.f32 %v2971_v14, %v1181_v3  ;;  %v1223_v1 = vsub.f32 %v2975_v26, %v1181_v3  ;;  %2190 = vpow2.f32 %v1262_v27  ;;  %1357 = vmatmul.mubr.bf16.vlgmr.msra.gmra.mrb[32].mxu0 %v1308_v4  ;;  %1492 = vmatmul.mubr.bf16.vlgmr.msra.gmra.mrb[20].mxu1 %v1308_v4  ;;  %v2183_v21 = vpop.eup %2182 }
 0x256   : > { %v1270_v26 = vmul.f32 1.442695, %v1225_v35  ;;  %v1268_v57 = vmul.f32 1.442695, %v1224_v44 }
 0x257   : > { %v1266_v17 = vmul.f32 1.442695, %v1223_v1  ;;  %v1264_v19 = vmul.f32 1.442695, %v1222_v9 }
 0x259   : > { %2192 = vpow2.f32 %v1266_v17  ;;  %v1190_v46 = vpop.xlane.xlu1 %1189 }
 0x25a   : > { %2194 = vpow2.f32 %v1264_v19  ;;  %v1229_v10 = vsub.f32 %v3453_v49, %v1190_v46  ;;  %v1228_v12 = vsub.f32 %v3454_v36, %v1190_v46 }
 0x25b   : > { %v1187_v25 = vpop.xlane.xlu0 %1186  ;;  %2196 = vpow2.f32 %v1260_v22 }
 0x25c   : > { %v1227_v14 = vsub.f32 %v3015_v28, %v1187_v25  ;;  %v1226_v11 = vsub.f32 %v3451_v52, %v1187_v25  ;;  %v2185_v59 = vpop.eup %2184  ;;  %2198 = vpow2.f32 %v1270_v26  ;;  %v1278_v6 = vmul.f32 1.442695, %v1229_v10 }
 0x25d   : > { %v2187_v45 = vpop.eup %2186  ;;  %v1276_v1 = vmul.f32 1.442695, %v1228_v12 }
 0x25e   : > { %v1274_v20 = vmul.f32 1.442695, %v1227_v14  ;;  %v2189_v28 = vpop.eup %2188  ;;  %v1272_v7 = vmul.f32 1.442695, %v1226_v11  ;;  %v1311_v43 = vpack.c.bf16 %v2187_v45, %v2183_v21 }
 0x25f   : > { %v1310_v60 = vpack.c.bf16 %v2185_v59, %v2189_v28  ;;  %v2191_v18 = vpop.eup %2190 }
 0x260   : > { %2200 = vpow2.f32 %v1274_v20  ;;  %1364 = vmatprep.mubr.bf16.mxu0 %v1311_v43  ;;  %1499 = vmatprep.mubr.bf16.mxu1 %v1311_v43  ;;  %v1196_v30 = vpop.xlane.xlu1 %1195 }
 0x261   : > { %1365 = vmatmul.mubr.bf16.gmra.mrb[36].mxu0 %v1310_v60  ;;  %1500 = vmatmul.mubr.bf16.gmra.mrb[24].mxu1 %v1310_v60  ;;  %2202 = vpow2.f32 %v1272_v7  ;;  %v1233_v63 = vsub.f32 %v3048_v42, %v1196_v30  ;;  %v1232_v2 = vsub.f32 %v3036_v37, %v1196_v30 }
 0x262   : > { %v1193_v61 = vpop.xlane.xlu0 %1192  ;;  %2204 = vpow2.f32 %v1268_v57 }
 0x263   : > { %v1231_v31 = vsub.f32 %v3056_v38, %v1193_v61  ;;  %v1230_v53 = vsub.f32 %v3052_v47, %v1193_v61  ;;  %v2193_v56 = vpop.eup %2192  ;;  %v1286_v39 = vmul.f32 1.442695, %v1233_v63  ;;  %v1284_v26 = vmul.f32 1.442695, %v1232_v2 }
 0x264   : > { %v2195_v38 = vpop.eup %2194  ;;  %v1313_v54 = vpack.c.bf16 %v2193_v56, %v2191_v18 }
 0x265   : > { %v1282_v5 = vmul.f32 1.442695, %v1231_v31  ;;  %v2197_v3 = vpop.eup %2196  ;;  %v1280_v51 = vmul.f32 1.442695, %v1230_v53  ;;  %v1202_v16 = vpop.xlane.xlu1 %1201 }
 0x266   : > { %v1199_v32 = vpop.xlane.xlu0 %1198  ;;  %1372 = vmatprep.mubr.bf16.mxu0 %v1313_v54  ;;  %1507 = vmatprep.mubr.bf16.mxu1 %v1313_v54  ;;  %v2199_v15 = vpop.eup %2198  ;;  %v1312_v62 = vpack.c.bf16 %v2195_v38, %v2197_v3  ;;  %v1237_v17 = vsub.f32 %v3075_v0, %v1202_v16  ;;  %v1236_v20 = vsub.f32 %v3071_v48, %v1202_v16 }
 0x267   : > { %v1235_v58 = vsub.f32 %v3089_v24, %v1199_v32  ;;  %2206 = vpow2.f32 %v1282_v5  ;;  %v1234_v27 = vsub.f32 %v3082_v8, %v1199_v32 }
 0x268   : > { %2208 = vpow2.f32 %v1278_v6  ;;  %v1294_v52 = vmul.f32 1.442695, %v1237_v17  ;;  %v1292_v10 = vmul.f32 1.442695, %v1236_v20 }
 0x269   : > { %v1290_v9 = vmul.f32 1.442695, %v1235_v58  ;;  %1373 = vmatmul.mubr.bf16.gmra.mrb[40].mxu0 %v1312_v62  ;;  %1508 = vmatmul.mubr.bf16.gmra.mrb[28].mxu1 %v1312_v62  ;;  %2210 = vpow2.f32 %v1280_v51  ;;  %v1288_v19 = vmul.f32 1.442695, %v1234_v27 }
 0x26a   : > { %v2201_v47 = vpop.eup %2200  ;;  %v1205_v50 = vpop.xlane.xlu0 %1204 }
 0x26b   : > { %v1315_v24 = vpack.c.bf16 %v2201_v47, %v2199_v15  ;;  %2212 = vpow2.f32 %v1290_v9  ;;  %v1239_v42 = vsub.f32 %v3098_v13, %v1205_v50  ;;  %v2203_v4 = vpop.eup %2202  ;;  %v1208_v13 = vpop.xlane.xlu1 %1207  ;;  %v1238_v11 = vsub.f32 %v3094_v40, %v1205_v50 }
 0x26c   : > { %2214 = vpow2.f32 %v1276_v1  ;;  %v2205_v35 = vpop.eup %2204  ;;  %v1241_v33 = vsub.f32 %v3111_v23, %v1208_v13  ;;  %v1240_v23 = vsub.f32 %v3107_v29, %v1208_v13 }
 0x26d   : > { %1380 = vmatprep.mubr.bf16.mxu0 %v1315_v24  ;;  %1515 = vmatprep.mubr.bf16.mxu1 %v1315_v24  ;;  %2216 = vpow2.f32 %v1286_v39  ;;  %v1298_v22 = vmul.f32 1.442695, %v1239_v42  ;;  %v1314_v14 = vpack.c.bf16 %v2203_v4, %v2205_v35  ;;  %v1296_v59 = vmul.f32 1.442695, %v1238_v11 }
 0x26e   : > { %v1211_v8 = vpop.xlane.xlu0 %1210  ;;  %2218 = vpow2.f32 %v1288_v19  ;;  %v1302_v28 = vmul.f32 1.442695, %v1241_v33  ;;  %v1300_v5 = vmul.f32 1.442695, %v1240_v23 }
 0x26f   : > { %2220 = vpow2.f32 %v1298_v22  ;;  %v1243_v37 = vsub.f32 %v3121_v41, %v1211_v8  ;;  %v1242_v41 = vsub.f32 %v3117_v34, %v1211_v8 }
 0x270   : > { %2222 = vpow2.f32 %v1284_v26 }
 0x271   : > { %v2207_v55 = vpop.eup %2206  ;;  %1381 = vmatmul.mubr.bf16.gmra.mrb[44].mxu0 %v1314_v14  ;;  %1516 = vmatmul.mubr.bf16.gmra.mrb[32].mxu1 %v1314_v14  ;;  %2224 = vpow2.f32 %v1294_v52  ;;  %v1306_v45 = vmul.f32 1.442695, %v1243_v37  ;;  %v1304_v43 = vmul.f32 1.442695, %v1242_v41 }
 0x272   : > { %v2209_v25 = vpop.eup %2208  ;;  %2226 = vpow2.f32 %v1296_v59 }
 0x273   : > { %v1317_v46 = vpack.c.bf16 %v2207_v55, %v2209_v25  ;;  %v2211_v0 = vpop.eup %2210  ;;  %2228 = vpow2.f32 %v1306_v45 }
 0x274   : > { %2230 = vpow2.f32 %v1292_v10 }
 0x275   : > { %1388 = vmatprep.mubr.bf16.mxu0 %v1317_v46  ;;  %1523 = vmatprep.mubr.bf16.mxu1 %v1317_v46  ;;  %v2213_v21 = vpop.eup %2212  ;;  %2232 = vpow2.f32 %v1302_v28 }
 0x276   : > { %v2215_v44 = vpop.eup %2214  ;;  %2234 = vpow2.f32 %v1304_v43 }
 0x277   : > { %v2217_v61 = vpop.eup %2216  ;;  %v1316_v49 = vpack.c.bf16 %v2211_v0, %v2215_v44  ;;  %2236 = vpow2.f32 %v1300_v5 }
 0x278   : > { %v1319_v40 = vpack.c.bf16 %v2213_v21, %v2217_v61  ;;  %v2219_v48 = vpop.eup %2218 }
 0x279   : > { %1389 = vmatmul.mubr.bf16.gmra.mrb[48].mxu0 %v1316_v49  ;;  %1524 = vmatmul.mubr.bf16.gmra.mrb[36].mxu1 %v1316_v49  ;;  %v2221_v7 = vpop.eup %2220 }
 0x27a   : > { %1396 = vmatprep.mubr.bf16.mxu0 %v1319_v40  ;;  %1531 = vmatprep.mubr.bf16.mxu1 %v1319_v40  ;;  %v2223_v31 = vpop.eup %2222 }
 0x27b   : > { %v2225_v57 = vpop.eup %2224  ;;  %v1318_v60 = vpack.c.bf16 %v2219_v48, %v2223_v31 }
 0x27c   : > { %v1321_v6 = vpack.c.bf16 %v2221_v7, %v2225_v57  ;;  %v2227_v34 = vpop.eup %2226 }
 0x27d   : > { %v2229_v32 = vpop.eup %2228 }
 0x27e   : > { %v2231_v18 = vpop.eup %2230 }
 0x27f   : > { %v2233_v30 = vpop.eup %2232  ;;  %v1320_v53 = vpack.c.bf16 %v2227_v34, %v2231_v18 }
 0x280   : > { %v1323_v29 = vpack.c.bf16 %v2229_v32, %v2233_v30  ;;  %v2235_v56 = vpop.eup %2234 }
 0x281   : > { %1397 = vmatmul.mubr.bf16.gmra.mrb[52].mxu0 %v1318_v60  ;;  %1532 = vmatmul.mubr.bf16.gmra.mrb[40].mxu1 %v1318_v60  ;;  %v2237_v58 = vpop.eup %2236 }
 0x282   : > { %1404 = vmatprep.mubr.bf16.mxu0 %v1321_v6  ;;  %1539 = vmatprep.mubr.bf16.mxu1 %v1321_v6  ;;  %v1322_v38 = vpack.c.bf16 %v2235_v56, %v2237_v58 }
 0x289   : > { %1405 = vmatmul.mubr.bf16.gmra.mrb[56].mxu0 %v1320_v53  ;;  %1540 = vmatmul.mubr.bf16.gmra.mrb[44].mxu1 %v1320_v53 }
 0x28a   : > { %1412 = vmatprep.mubr.bf16.mxu0 %v1323_v29  ;;  %1547 = vmatprep.mubr.bf16.mxu1 %v1323_v29 }
 0x291   : > { %1413 = vmatmul.mubr.bf16.gmra.mrb[60].mxu0 %v1322_v38  ;;  %1548 = vmatmul.mubr.bf16.gmra.mrb[48].mxu1 %v1322_v38 }
 0x328   : > { %v1881_v36 = vpop.f32.mrb[32].mxu0  ;;  %v1945_v12 = vpop.f32.mrb[20].mxu1 }
 0x329   : > { %v1882_v54 = vpop.f32.mrb[33].mxu0  ;;  %v1946_v63 = vpop.f32.mrb[21].mxu1 }
 0x32a   : > { %v1883_v3 = vadd.f32 %v1882_v54, %v1881_v36  ;;  %v3212_v51 = vadd.f32 %v1946_v63, %v1945_v12  ;;  %v1884_v15 = vpop.f32.mrb[34].mxu0  ;;  %v1948_v9 = vpop.f32.mrb[22].mxu1 }
 0x32b   : > { %v1885_v62 = vpop.f32.mrb[35].mxu0  ;;  %v1949_v47 = vpop.f32.mrb[23].mxu1 }
 0x32c   : > { %2238 = vrcp.f32 %v1883_v3  ;;  %v1886_v1 = vadd.f32 %v1885_v62, %v1884_v15  ;;  %v3214_v50 = vadd.f32 %v1949_v47, %v1948_v9 }
 0x32e   : > { %2240 = vrcp.f32 %v1886_v1 }
 0x334   : > { %v1887_v39 = vpop.f32.mrb[36].mxu0  ;;  %v1951_v24 = vpop.f32.mrb[24].mxu1 }
 0x335   : > { %v1888_v16 = vpop.f32.mrb[37].mxu0  ;;  %v1952_v27 = vpop.f32.mrb[25].mxu1 }
 0x336   : > { %v1889_v42 = vadd.f32 %v1888_v16, %v1887_v39  ;;  %v3216_v4 = vadd.f32 %v1952_v27, %v1951_v24  ;;  %v1890_v2 = vpop.f32.mrb[38].mxu0  ;;  %v1954_v35 = vpop.f32.mrb[26].mxu1 }
 0x337   : > { %v1891_v17 = vpop.f32.mrb[39].mxu0  ;;  %v1955_v55 = vpop.f32.mrb[27].mxu1 }
 0x338   : > { %2242 = vrcp.f32 %v1889_v42  ;;  %v1892_v19 = vadd.f32 %v1891_v17, %v1890_v2  ;;  %v3218_v25 = vadd.f32 %v1955_v55, %v1954_v35  ;;  %v2239_v22 = vpop.eup %2238 }
 0x339   : > { %1558 = vperm.xlu1 %2173, %v2239_v22   ;;  %v2241_v14 = vpop.eup %2240 }
 0x33a   : > { %2244 = vrcp.f32 %v1892_v19  ;;  %1563 = vperm.xlu0 %2172, %v2241_v14  }
 0x33c   : > { %v1893_v26 = vpop.f32.mrb[40].mxu0  ;;  %v1957_v8 = vpop.f32.mrb[28].mxu1 }
 0x33d   : > { %v1894_v46 = vpop.f32.mrb[41].mxu0  ;;  %v1958_v52 = vpop.f32.mrb[29].mxu1 }
 0x33e   : > { %v1895_v13 = vadd.f32 %v1894_v46, %v1893_v26  ;;  %v3220_v11 = vadd.f32 %v1958_v52, %v1957_v8  ;;  %v1896_v37 = vpop.f32.mrb[42].mxu0  ;;  %v1960_v0 = vpop.f32.mrb[30].mxu1 }
 0x33f   : > { %v1897_v20 = vpop.f32.mrb[43].mxu0  ;;  %v1961_v21 = vpop.f32.mrb[31].mxu1 }
 0x340   : > { %2246 = vrcp.f32 %v1895_v13  ;;  %v1898_v33 = vadd.f32 %v1897_v20, %v1896_v37  ;;  %v3222_v44 = vadd.f32 %v1961_v21, %v1960_v0 }
 0x342   : > { %v2243_v59 = vpop.eup %2242  ;;  %2248 = vrcp.f32 %v1898_v33 }
 0x343   : > { %1568 = vperm.xlu1 %2173, %v2243_v59  }
 0x344   : > { %v1899_v61 = vpop.f32.mrb[44].mxu0  ;;  %v1963_v45 = vpop.f32.mrb[32].mxu1 }
 0x345   : > { %v1900_v49 = vpop.f32.mrb[45].mxu0  ;;  %v1964_v10 = vpop.f32.mrb[33].mxu1 }
 0x346   : > { %v2245_v40 = vpop.eup %2244  ;;  %v1901_v28 = vadd.f32 %v1900_v49, %v1899_v61  ;;  %v3224_v41 = vadd.f32 %v1964_v10, %v1963_v45  ;;  %v1902_v48 = vpop.f32.mrb[46].mxu0 }
 0x347   : > { %v1966_v23 = vpop.f32.mrb[34].mxu1  ;;  %1573 = vperm.xlu1 %2173, %v2245_v40   ;;  %v1903_v7 = vpop.f32.mrb[47].mxu0 }
 0x348   : > { %v1967_v31 = vpop.f32.mrb[35].mxu1  ;;  %2250 = vrcp.f32 %v1901_v28  ;;  %v1904_v43 = vadd.f32 %v1903_v7, %v1902_v48 }
 0x349   : > { %v3226_v57 = vadd.f32 %v1967_v31, %v1966_v23 }
 0x34a   : > { %v2247_v60 = vpop.eup %2246  ;;  %2252 = vrcp.f32 %v1904_v43 }
 0x34b   : > { %1578 = vperm.xlu0 %2172, %v2247_v60  }
 0x34c   : > { %v2249_v5 = vpop.eup %2248  ;;  %v1905_v6 = vpop.f32.mrb[48].mxu0 }
 0x34d   : > { %v1969_v34 = vpop.f32.mrb[36].mxu1  ;;  %1583 = vperm.xlu1 %2173, %v2249_v5   ;;  %v1906_v32 = vpop.f32.mrb[49].mxu0 }
 0x34e   : > { %v1970_v18 = vpop.f32.mrb[37].mxu1  ;;  %v1907_v30 = vadd.f32 %v1906_v32, %v1905_v6  ;;  %v1908_v29 = vpop.f32.mrb[50].mxu0 }
 0x34f   : > { %v3228_v53 = vadd.f32 %v1970_v18, %v1969_v34  ;;  %v1972_v56 = vpop.f32.mrb[38].mxu1  ;;  %v1909_v58 = vpop.f32.mrb[51].mxu0  ;;  %v3455_v18 = vld [vmem:[#allocation5_spill] sm:$0xff] }
 0x350   : > { %v1973_v38 = vpop.f32.mrb[39].mxu1  ;;  %2254 = vrcp.f32 %v1907_v30  ;;  %v1910_v36 = vadd.f32 %v1909_v58, %v1908_v29  ;;  %v3248_v29 = vld [vmem:[%s3345_s7] ss:$0 sm:$0xff] }
 0x351   : > { %v3230_v12 = vadd.f32 %v1973_v38, %v1972_v56 }
 0x352   : > { %v2251_v54 = vpop.eup %2250  ;;  %2256 = vrcp.f32 %v1910_v36 }
 0x353   : > { %1588 = vperm.xlu0 %2172, %v2251_v54  }
 0x354   : > { %v2253_v63 = vpop.eup %2252  ;;  %v1911_v3 = vpop.f32.mrb[52].mxu0 }
 0x355   : > { %v1975_v15 = vpop.f32.mrb[40].mxu1  ;;  %1593 = vperm.xlu1 %2173, %v2253_v63   ;;  %v1912_v9 = vpop.f32.mrb[53].mxu0 }
 0x356   : > { %v1976_v62 = vpop.f32.mrb[41].mxu1  ;;  %v1913_v47 = vadd.f32 %v1912_v9, %v1911_v3  ;;  %v1914_v39 = vpop.f32.mrb[54].mxu0 }
 0x357   : > { %v3232_v1 = vadd.f32 %v1976_v62, %v1975_v15  ;;  %v1978_v24 = vpop.f32.mrb[42].mxu1  ;;  %v1915_v16 = vpop.f32.mrb[55].mxu0 }
 0x358   : > { %v1979_v27 = vpop.f32.mrb[43].mxu1  ;;  %2258 = vrcp.f32 %v1913_v47  ;;  %v1916_v42 = vadd.f32 %v1915_v16, %v1914_v39 }
 0x359   : > { %v3234_v2 = vadd.f32 %v1979_v27, %v1978_v24 }
 0x35a   : > { %v2255_v35 = vpop.eup %2254  ;;  %2260 = vrcp.f32 %v1916_v42 }
 0x35b   : > { %1598 = vperm.xlu0 %2172, %v2255_v35  }
 0x35c   : > { %v2257_v17 = vpop.eup %2256  ;;  %v1917_v55 = vpop.f32.mrb[56].mxu0 }
 0x35d   : > { %v1981_v19 = vpop.f32.mrb[44].mxu1  ;;  %1603 = vperm.xlu1 %2173, %v2257_v17   ;;  %v1918_v22 = vpop.f32.mrb[57].mxu0 }
 0x35e   : > { %v1982_v14 = vpop.f32.mrb[45].mxu1  ;;  %v1919_v26 = vadd.f32 %v1918_v22, %v1917_v55  ;;  %v1920_v46 = vpop.f32.mrb[58].mxu0 }
 0x35f   : > { %v3236_v8 = vadd.f32 %v1982_v14, %v1981_v19  ;;  %v1984_v52 = vpop.f32.mrb[46].mxu1  ;;  %v1921_v13 = vpop.f32.mrb[59].mxu0 }
 0x360   : > { %v1985_v37 = vpop.f32.mrb[47].mxu1  ;;  %2262 = vrcp.f32 %v1919_v26  ;;  %v1922_v0 = vadd.f32 %v1921_v13, %v1920_v46 }
 0x361   : > { %v3238_v20 = vadd.f32 %v1985_v37, %v1984_v52 }
 0x362   : > { %v2259_v21 = vpop.eup %2258  ;;  %2264 = vrcp.f32 %v1922_v0 }
 0x363   : > { %1608 = vperm.xlu0 %2172, %v2259_v21  }
 0x364   : > { %v2261_v33 = vpop.eup %2260  ;;  %v1923_v59 = vpop.f32.mrb[60].mxu0 }
 0x365   : > { %v1987_v61 = vpop.f32.mrb[48].mxu1  ;;  %1613 = vperm.xlu1 %2173, %v2261_v33   ;;  %v1924_v45 = vpop.f32.mrb[61].mxu0 }
 0x366   : > { %v1988_v49 = vpop.f32.mrb[49].mxu1  ;;  %v1925_v10 = vadd.f32 %v1924_v45, %v1923_v59  ;;  %v1926_v28 = vpop.f32.mrb[62].mxu0 }
 0x367   : > { %v3240_v40 = vadd.f32 %v1988_v49, %v1987_v61  ;;  %v1990_v48 = vpop.f32.mrb[50].mxu1  ;;  %v1927_v23 = vpop.f32.mrb[63].mxu0 }
 0x368   : > { %v1991_v7 = vpop.f32.mrb[51].mxu1  ;;  %2266 = vrcp.f32 %v1925_v10  ;;  %v1928_v31 = vadd.f32 %v1927_v23, %v1926_v28 }
 0x369   : > { %v3242_v43 = vadd.f32 %v1991_v7, %v1990_v48 }
 0x36a   : > { %v2263_v60 = vpop.eup %2262  ;;  %2268 = vrcp.f32 %v1928_v31 }
 0x36b   : > { %1618 = vperm.xlu0 %2172, %v2263_v60  }
 0x36c   : > { %v2265_v5 = vpop.eup %2264 }
 0x36d   : > { %1623 = vperm.xlu1 %2173, %v2265_v5  }
 0x372   : > { %v2267_v6 = vpop.eup %2266 }
 0x373   : > { %1628 = vperm.xlu0 %2172, %v2267_v6  }
 0x374   : > { %v2269_v34 = vpop.eup %2268 }
 0x375   : > { %1633 = vperm.xlu1 %2173, %v2269_v34  }
 0x3b8   : > { %v1559_v32 = vpop.permute.xlu1 %1558 }
 0x3b9   : > { %v1636_v30 = vmul.f32 %v3455_v18, %v1559_v32  ;;  %v1564_v56 = vpop.permute.xlu0 %1563 }
 0x3ba   : > { %v1637_v38 = vmul.f32 %v3455_v18, %v1564_v56 }
 0x3bb   : > { %v1668_v58 = vmul.f32 %v3212_v51, %v1636_v30 }
 0x3bc   : > { %v1669_v54 = vmul.f32 %v3214_v50, %v1637_v38 }
 0x3bd   : > { %v1691_v36 = vadd.f32 %v3248_v29, %v1668_v58 }
 0x3be   : > { %v1692_v51 = vadd.f32 %v3248_v29, %v1669_v54 }
 0x3bf   : > { %1708 = vst.msk [vmem:[%s3256_s13] sm:$0xff] %vm1707_vm1, %v1691_v36 }
 0x3c0   : > { %1709 = vst.msk [vmem:[%s3256_s13 + $0x8] sm:$0xff] %vm1707_vm1, %v1692_v51 }
 0x3c2   : > { %v1569_v63 = vpop.permute.xlu1 %1568 }
 0x3c3   : > { %v1638_v3 = vmul.f32 %v3455_v18, %v1569_v63 }
 0x3c5   : > { %v1670_v15 = vmul.f32 %v3216_v4, %v1638_v3 }
 0x3c6   : > { %v1574_v9 = vpop.permute.xlu1 %1573 }
 0x3c7   : > { %v1693_v62 = vadd.f32 %v3248_v29, %v1670_v15  ;;  %v1639_v47 = vmul.f32 %v3455_v18, %v1574_v9 }
 0x3c9   : > { %1710 = vst.msk [vmem:[%s3256_s13 + $0x10] sm:$0xff] %vm1707_vm1, %v1693_v62  ;;  %v1671_v50 = vmul.f32 %v3218_v25, %v1639_v47 }
 0x3ca   : > { %v1579_v39 = vpop.permute.xlu0 %1578 }
 0x3cb   : > { %v1694_v24 = vadd.f32 %v3248_v29, %v1671_v50  ;;  %v1640_v16 = vmul.f32 %v3455_v18, %v1579_v39 }
 0x3cc   : > { %v1584_v27 = vpop.permute.xlu1 %1583 }
 0x3cd   : > { %1711 = vst.msk [vmem:[%s3256_s13 + $0x18] sm:$0xff] %vm1707_vm1, %v1694_v24  ;;  %v1672_v4 = vmul.f32 %v3220_v11, %v1640_v16  ;;  %v1641_v42 = vmul.f32 %v3455_v18, %v1584_v27 }
 0x3cf   : > { %v1695_v35 = vadd.f32 %v3248_v29, %v1672_v4  ;;  %v1673_v17 = vmul.f32 %v3222_v44, %v1641_v42 }
 0x3d1   : > { %1712 = vst.msk [vmem:[%s3256_s13 + $0x20] sm:$0xff] %vm1707_vm1, %v1695_v35  ;;  %v1696_v25 = vadd.f32 %v3248_v29, %v1673_v17 }
 0x3d2   : > { %v1589_v55 = vpop.permute.xlu0 %1588 }
 0x3d3   : > { %1713 = vst.msk [vmem:[%s3256_s13 + $0x28] sm:$0xff] %vm1707_vm1, %v1696_v25  ;;  %v1642_v19 = vmul.f32 %v3455_v18, %v1589_v55 }
 0x3d4   : > { %v1594_v22 = vpop.permute.xlu1 %1593 }
 0x3d5   : > { %v1674_v11 = vmul.f32 %v3224_v41, %v1642_v19  ;;  %v1643_v14 = vmul.f32 %v3455_v18, %v1594_v22 }
 0x3d7   : > { %v1697_v26 = vadd.f32 %v3248_v29, %v1674_v11  ;;  %v1675_v44 = vmul.f32 %v3226_v57, %v1643_v14 }
 0x3d9   : > { %1714 = vst.msk [vmem:[%s3256_s13 + $0x30] sm:$0xff] %vm1707_vm1, %v1697_v26  ;;  %v1698_v46 = vadd.f32 %v3248_v29, %v1675_v44 }
 0x3da   : > { %v1599_v52 = vpop.permute.xlu0 %1598 }
 0x3db   : > { %1715 = vst.msk [vmem:[%s3256_s13 + $0x38] sm:$0xff] %vm1707_vm1, %v1698_v46  ;;  %v1644_v13 = vmul.f32 %v3455_v18, %v1599_v52 }
 0x3dc   : > { %v1604_v37 = vpop.permute.xlu1 %1603 }
 0x3dd   : > { %v1676_v41 = vmul.f32 %v3228_v53, %v1644_v13  ;;  %v1645_v0 = vmul.f32 %v3455_v18, %v1604_v37 }
 0x3df   : > { %v1699_v21 = vadd.f32 %v3248_v29, %v1676_v41  ;;  %v1677_v57 = vmul.f32 %v3230_v12, %v1645_v0 }
 0x3e1   : > { %1716 = vst.msk [vmem:[%s3256_s13 + $0x40] sm:$0xff] %vm1707_vm1, %v1699_v21  ;;  %v1700_v33 = vadd.f32 %v3248_v29, %v1677_v57 }
 0x3e2   : > { %v1609_v59 = vpop.permute.xlu0 %1608 }
 0x3e3   : > { %1717 = vst.msk [vmem:[%s3256_s13 + $0x48] sm:$0xff] %vm1707_vm1, %v1700_v33  ;;  %v1646_v61 = vmul.f32 %v3455_v18, %v1609_v59 }
 0x3e4   : > { %v1614_v45 = vpop.permute.xlu1 %1613 }
 0x3e5   : > { %v1678_v53 = vmul.f32 %v3232_v1, %v1646_v61  ;;  %v1647_v49 = vmul.f32 %v3455_v18, %v1614_v45 }
 0x3e7   : > { %v1701_v10 = vadd.f32 %v3248_v29, %v1678_v53  ;;  %v1679_v12 = vmul.f32 %v3234_v2, %v1647_v49 }
 0x3e9   : > { %1718 = vst.msk [vmem:[%s3256_s13 + $0x50] sm:$0xff] %vm1707_vm1, %v1701_v10  ;;  %v1702_v28 = vadd.f32 %v3248_v29, %v1679_v12 }
 0x3ea   : > { %v1619_v48 = vpop.permute.xlu0 %1618 }
 0x3eb   : > { %1719 = vst.msk [vmem:[%s3256_s13 + $0x58] sm:$0xff] %vm1707_vm1, %v1702_v28  ;;  %v1648_v23 = vmul.f32 %v3455_v18, %v1619_v48 }
 0x3ec   : > { %v1624_v7 = vpop.permute.xlu1 %1623 }
 0x3ed   : > { %v1680_v1 = vmul.f32 %v3236_v8, %v1648_v23  ;;  %v1649_v31 = vmul.f32 %v3455_v18, %v1624_v7 }
 0x3ef   : > { %v1703_v60 = vadd.f32 %v3248_v29, %v1680_v1  ;;  %v1681_v2 = vmul.f32 %v3238_v20, %v1649_v31 }
 0x3f1   : > { %1720 = vst.msk [vmem:[%s3256_s13 + $0x60] sm:$0xff] %vm1707_vm1, %v1703_v60  ;;  %v1704_v5 = vadd.f32 %v3248_v29, %v1681_v2 }
 0x3f2   : > { %v1629_v6 = vpop.permute.xlu0 %1628 }
 0x3f3   : > { %1721 = vst.msk [vmem:[%s3256_s13 + $0x68] sm:$0xff] %vm1707_vm1, %v1704_v5  ;;  %v1650_v34 = vmul.f32 %v3455_v18, %v1629_v6 }
 0x3f4   : > { %v1634_v32 = vpop.permute.xlu1 %1633 }
 0x3f5   : > { %v1682_v30 = vmul.f32 %v3240_v40, %v1650_v34  ;;  %v1651_v8 = vmul.f32 %v3455_v18, %v1634_v32 }
 0x3f7   : > { %v1705_v56 = vadd.f32 %v3248_v29, %v1682_v30  ;;  %v1683_v58 = vmul.f32 %v3242_v43, %v1651_v8 }
 0x3f9   : > { %1722 = vst.msk [vmem:[%s3256_s13 + $0x70] sm:$0xff] %vm1707_vm1, %v1705_v56  ;;  %v1706_v20 = vadd.f32 %v3248_v29, %v1683_v58 }
 0x3fb   : > { %1723 = vst.msk [vmem:[%s3256_s13 + $0x78] sm:$0xff] %vm1707_vm1, %v1706_v20 }
 0x3fc PF: > { %s18_s27 = sadd.s32 1, %s2276_s27  }
 0x3fd   : > { %p15_p4 = scmp.ge.s32.totalorder %s18_s27, 4  }
 0x3ff   :  { %17 = sbr.rel (!%p15_p4) target bundleno = 1 (0x1), region = 85 }

// kernel: gae_encoder_forward.2
= control target key start
LH: loop header
LB: loop body
LE: loop exit
PB: predicated region body
PF: predicated region fallthrough
CT: control target
= control target key end

     0   :  { %s5291_s27 = smov 0   ;;  %s7836_s0 = inlined_call_operand.vmem [shape: f32[256,16], index: 0, kind: input, shape index: {}, may-alias: {0,2}]   ;;  %s7837_s1 = inlined_call_operand.vmem [shape: f32[16,256], index: 1, kind: input, shape index: {}]   ;;  %s7838_s2 = inlined_call_operand.vmem [shape: f32[256,16], index: 2, kind: input, shape index: {}, may-alias: {0,2}]   ;;  %s7839_s3 = inlined_call_operand.vmem [shape: bf16[256,256], index: 3, kind: input, shape index: {}]   ;;  %s7840_s4 = inlined_call_operand.vmem [shape: f32[16,128], index: 4, kind: input, shape index: {}]   ;;  %s7841_s5 = inlined_call_operand.vmem [shape: f32[8,16], index: 5, kind: input, shape index: {}]   ;;  %s7842_s6 = inlined_call_operand.vmem [shape: f32[16,8], index: 6, kind: input, shape index: {}]   ;;  %s7843_s7 = inlined_call_operand.vmem [shape: f32[1,128], index: 7, kind: input, shape index: {}]   ;;  %s7844_s8 = inlined_call_operand.vmem [shape: f32[256,128], index: 8, kind: output, shape index: {}]  }
   0x1 LB: > { %s4116_s28 = sadd.s32 4294967295, %s5238_s27   ;;  %p4120_p0 = scmp.ge.s32.totalorder %s5238_s27, 1  ;;  %s5238_s27 = sphi %s5291_s27, %s18_s27  }
   0x2   : > { %p275_p1 = scmp.lt.s32.totalorder %s5238_s27, 3 }
   0x4   : > { %p276_p2 = pnand %p4120_p0, %p275_p1 }
   0x6   : > { %279 = sbr.rel (%p276_p2) target bundleno = 1385 (0x569), region = 52 }
   0xd   : > { %v384_v0 = vld [vmem:[%s7840_s4] sm:$0xff]  ;;  %v385_v1 = vld [vmem:[%s7840_s4 + $0x8] sm:$0xff]  ;;  %v951_v3 = vlaneseq  ;;  %s4121_s13 = sshll.u32 %s4116_s28, 4  ;;  %vm387_vm0 = vcmask 130048   ;;  %v366_v6 = vld [vmem:[%s7836_s0 + $0xf0] sm:$0xff]  ;;  %v5240_v19 = vmov 0.0  }
   0xe   : > { %v364_v2 = vld [vmem:[%s7836_s0 + $0xe0] sm:$0xff]  ;;  %v386_v4 = vpack.c.bf16 %v385_v1, %v384_v0  ;;  %v365_v5 = vld [vmem:[%s7836_s0 + $0xe8] sm:$0xff]  ;;  %v367_v7 = vld [vmem:[%s7836_s0 + $0xf8] sm:$0xff]  ;;  %p316_p3 = scmp.lt.s32.totalorder %s4121_s13, 31  ;;  %v5241_v42 = vmov 1   ;;  %v7845_v43 = vmov 0  }
   0xf   : > { %v382_v8 = vpack.c.bf16 %v365_v5, %v364_v2  ;;  %v615_v9 = vld [vmem:[%s7837_s1 + $0x8] sm:$0xff]  ;;  %v617_v10 = vld [vmem:[%s7837_s1 + $0x18] sm:$0xff]  ;;  %v614_v11 = vld [vmem:[%s7837_s1] sm:$0xff]  ;;  %v952_v12 = vand.u32 127, %v951_v3  ;;  %v383_v13 = vpack.c.bf16 %v367_v7, %v366_v6  ;;  %4803 = vset.pattern.permute.xlu1 %v5241_v42  ;;  %4802 = vset.pattern.permute.xlu0 %v7845_v43 }
  0x10   : > { %4786 = vmatprep.subr.bf16.mxu1 %v386_v4  ;;  %v4778_v14 = vpack.c.bf16 %v617_v10, %v615_v9  ;;  %v616_v15 = vld [vmem:[%s7837_s1 + $0x10] sm:$0xff]  ;;  %s8484_s13 = smov (!%p316_p3, %s4121_s13), 31  ;;  %4716 = vmatprep.subr.bf16.mxu0 %v386_v4  ;;  %v708_v17 = vld [vmem:[%s7842_s6] sm:$0xff]  ;;  %v709_v18 = vld [vmem:[%s7842_s6 + $0x8] sm:$0xff] }
  0x11   : > { %4787 = vmatpush3.bf16.msra.mxu1 %v386_v4  ;;  %4746 = vmatprep.mubr.msk.bf16.mxu1 %vm387_vm0, %v382_v8  ;;  %v4780_v16 = vpack.c.bf16 %v616_v15, %v614_v11  ;;  %vm1475_vm1 = vcmp.lt.s32.totalorder %v952_v12, 32  ;;  %vm2113_vm2 = vcmp.ge.s32.totalorder %v952_v12, 32  ;;  %vm2114_vm3 = vcmp.lt.s32.totalorder %v952_v12, 64  ;;  %s5342_s11 = sshll.u32 %s8484_s13, 3  ;;  %v613_v25 = vld [vmem:[%s7841_s5] sm:$0xff]  ;;  %v337_v45 = vld [vmem:[%s7836_s0 + $0x8] sm:$0xff] }
  0x12   : > { %4779 = vmatprep.subr.bf16.mxu1 %v4778_v14  ;;  %v5337_v20 = vsel %vm1475_vm1, 1.0, %v5240_v19  ;;  %4717 = vmatpush3.bf16.msra.mxu0 %v386_v4  ;;  %vm2115_vm4 = vmand %vm2113_vm2, %vm2114_vm3  ;;  %vm2946_vm5 = vcmp.ge.s32.totalorder %v952_v12, 64  ;;  %vm2947_vm6 = vcmp.lt.s32.totalorder %v952_v12, 96  ;;  %vm3698_vm8 = vcmp.ge.s32.totalorder %v952_v12, 96  ;;  %s5352_s15 = scalar_lea.vmem %s7838_s2, %s5342_s11  ;;  %v336_v44 = vld [vmem:[%s7836_s0] sm:$0xff]  ;;  %v338_v46 = vld [vmem:[%s7836_s0 + $0x10] sm:$0xff]  ;;  %s5637_s16 = scalar_lea.vmem %s7839_s3, %s5342_s11 }
  0x13   : > { %8069 = vst [vmem:[#allocation2_spill] sm:$0xff] %v5337_v20  ;;  %v5340_v21 = vsel %vm2115_vm4, 1.0, %v5240_v19  ;;  %vm2948_vm7 = vmand %vm2946_vm5, %vm2947_vm6  ;;  %v4782_v22 = vpack.c.bf16 %v709_v18, %v708_v17  ;;  %v5346_v24 = vsel %vm3698_vm8, 1.0, %v5240_v19  ;;  %v692_v26 = vld [vmem:[%s5352_s15] sm:$0xff]  ;;  %v693_v27 = vld [vmem:[%s5352_s15 + $0x8] sm:$0xff]  ;;  %v368_v47 = vpack.c.bf16 %v337_v45, %v336_v44  ;;  %s7736_s20 = scalar_lea.vmem %s7844_s8, %s5342_s11 }
  0x14   : > { %4747 = vmatmul.mubr.msk.bf16.vlgmr.msra.gmra.mrb[0].mxu1 %vm387_vm0, %v383_v13  ;;  %8070 = vst [vmem:[#allocation3_spill] sm:$0xff] %v5340_v21  ;;  %v5344_v23 = vsel %vm2948_vm7, 1.0, %v5240_v19  ;;  %8072 = vst [vmem:[#allocation5_spill] sm:$0xff] %v5346_v24  ;;  %v694_v28 = vld [vmem:[%s5352_s15 + $0x10] sm:$0xff]  ;;  %v695_v29 = vld [vmem:[%s5352_s15 + $0x18] sm:$0xff] }
  0x15   : > { %4781 = vmatpush1.bf16.msra.mxu1 %v4780_v16  ;;  %685 = vmatprep.mubr.f32.mxu1 %v5240_v19  ;;  %8071 = vst [vmem:[#allocation4_spill] sm:$0xff] %v5344_v23  ;;  %v696_v30 = vld [vmem:[%s5352_s15 + $0x20] sm:$0xff]  ;;  %v697_v31 = vld [vmem:[%s5352_s15 + $0x28] sm:$0xff]  ;;  %v698_v32 = vld [vmem:[%s5352_s15 + $0x30] sm:$0xff] }
  0x16   : > { %4783 = vmatprep.subr.bf16.mxu1 %v4782_v22  ;;  %v699_v33 = vld [vmem:[%s5352_s15 + $0x38] sm:$0xff]  ;;  %v700_v34 = vld [vmem:[%s5352_s15 + $0x40] sm:$0xff]  ;;  %v701_v35 = vld [vmem:[%s5352_s15 + $0x48] sm:$0xff]  ;;  %4718 = vmatprep.mubr.msk.bf16.mxu0 %vm387_vm0, %v368_v47 }
  0x17   : > { %v702_v36 = vld [vmem:[%s5352_s15 + $0x50] sm:$0xff]  ;;  %v703_v37 = vld [vmem:[%s5352_s15 + $0x58] sm:$0xff]  ;;  %v704_v38 = vld [vmem:[%s5352_s15 + $0x60] sm:$0xff] }
  0x18   : > { %v705_v39 = vld [vmem:[%s5352_s15 + $0x68] sm:$0xff]  ;;  %v706_v40 = vld [vmem:[%s5352_s15 + $0x70] sm:$0xff]  ;;  %v707_v41 = vld [vmem:[%s5352_s15 + $0x78] sm:$0xff] }
  0x19   : > { %v339_v48 = vld [vmem:[%s7836_s0 + $0x18] sm:$0xff]  ;;  %v340_v50 = vld [vmem:[%s7836_s0 + $0x20] sm:$0xff]  ;;  %v341_v51 = vld [vmem:[%s7836_s0 + $0x28] sm:$0xff] }
  0x1a   : > { %v369_v49 = vpack.c.bf16 %v339_v48, %v338_v46  ;;  %v370_v52 = vpack.c.bf16 %v341_v51, %v340_v50  ;;  %v342_v53 = vld [vmem:[%s7836_s0 + $0x30] sm:$0xff]  ;;  %v343_v54 = vld [vmem:[%s7836_s0 + $0x38] sm:$0xff]  ;;  %v344_v56 = vld [vmem:[%s7836_s0 + $0x40] sm:$0xff]  ;;  %v5243_v46 = vmov 2  }
  0x1b   : > { %v371_v55 = vpack.c.bf16 %v343_v54, %v342_v53  ;;  %v345_v57 = vld [vmem:[%s7836_s0 + $0x48] sm:$0xff]  ;;  %v346_v59 = vld [vmem:[%s7836_s0 + $0x50] sm:$0xff]  ;;  %v347_v60 = vld [vmem:[%s7836_s0 + $0x58] sm:$0xff] }
  0x1c   : > { %4144 = vmatmul.mubr.msk.f32.vlgmr.msra.gmra.mrb[4].mxu1 %vm387_vm0, %v613_v25  ;;  %4719 = vmatmul.mubr.msk.bf16.vlgmr.msra.gmra.mrb[0].mxu0 %vm387_vm0, %v369_v49  ;;  %v372_v58 = vpack.c.bf16 %v345_v57, %v344_v56  ;;  %v373_v61 = vpack.c.bf16 %v347_v60, %v346_v59  ;;  %v348_v62 = vld [vmem:[%s7836_s0 + $0x60] sm:$0xff]  ;;  %v349_v63 = vld [vmem:[%s7836_s0 + $0x68] sm:$0xff]  ;;  %v350_v1 = vld [vmem:[%s7836_s0 + $0x70] sm:$0xff] }
  0x1d   : > { %4785 = vmatpush3.bf16.msra.mxu1 %v4782_v22  ;;  %4754 = vmatprep.mubr.msk.f32.mxu1 %vm387_vm0, %v692_v26  ;;  %v374_v0 = vpack.c.bf16 %v349_v63, %v348_v62  ;;  %v351_v2 = vld [vmem:[%s7836_s0 + $0x78] sm:$0xff]  ;;  %v352_v5 = vld [vmem:[%s7836_s0 + $0x80] sm:$0xff]  ;;  %v353_v6 = vld [vmem:[%s7836_s0 + $0x88] sm:$0xff] }
  0x1e   : > { %4722 = vmatprep.mubr.msk.bf16.mxu0 %vm387_vm0, %v370_v52  ;;  %v375_v4 = vpack.c.bf16 %v351_v2, %v350_v1  ;;  %v376_v7 = vpack.c.bf16 %v353_v6, %v352_v5  ;;  %v354_v8 = vld [vmem:[%s7836_s0 + $0x90] sm:$0xff]  ;;  %v355_v9 = vld [vmem:[%s7836_s0 + $0x98] sm:$0xff]  ;;  %v356_v11 = vld [vmem:[%s7836_s0 + $0xa0] sm:$0xff] }
  0x1f   : > { %v377_v10 = vpack.c.bf16 %v355_v9, %v354_v8  ;;  %v357_v12 = vld [vmem:[%s7836_s0 + $0xa8] sm:$0xff]  ;;  %v358_v13 = vld [vmem:[%s7836_s0 + $0xb0] sm:$0xff]  ;;  %v359_v15 = vld [vmem:[%s7836_s0 + $0xb8] sm:$0xff] }
  0x20   : > { %4755 = vmatmul.mubr.msk.f32.vlgmr.msra.gmra.mrb[6].mxu1 %vm387_vm0, %v693_v27  ;;  %v378_v14 = vpack.c.bf16 %v357_v12, %v356_v11  ;;  %v379_v16 = vpack.c.bf16 %v359_v15, %v358_v13  ;;  %v360_v17 = vld [vmem:[%s7836_s0 + $0xc0] sm:$0xff]  ;;  %v361_v18 = vld [vmem:[%s7836_s0 + $0xc8] sm:$0xff]  ;;  %v362_v22 = vld [vmem:[%s7836_s0 + $0xd0] sm:$0xff] }
  0x21   : > { %4757 = vmatprep.mubr.msk.f32.mxu1 %vm387_vm0, %v694_v28  ;;  %v380_v19 = vpack.c.bf16 %v361_v18, %v360_v17  ;;  %v363_v25 = vld [vmem:[%s7836_s0 + $0xd8] sm:$0xff]  ;;  %v5491_v28 = vshrl.u32 %v951_v3, 7  ;;  %v904_v11 = vld [vmem:[%s5637_s16 + $0x8] sm:$0xff]  ;;  %v903_v12 = vld [vmem:[%s5637_s16] sm:$0xff] }
  0x22   : > { %v381_v26 = vpack.c.bf16 %v363_v25, %v362_v22  ;;  %v906_v13 = vld [vmem:[%s5637_s16 + $0x18] sm:$0xff]  ;;  %v5658_v17 = vunpack.c.l.bf16 %v904_v11 }
  0x23   : > { %v1035_v60 = vsub.s32 0, %v5491_v28 }
  0x24   : > { %4758 = vmatmul.mubr.msk.f32.gmra.mrb[8].mxu1 %vm387_vm0, %v695_v29  ;;  %4723 = vmatmul.mubr.msk.bf16.gmra.mrb[4].mxu0 %vm387_vm0, %v371_v55  ;;  %8095 = vst [vmem:[#allocation28_spill] sm:$0xff] %v5658_v17 }
  0x25   : > { %4760 = vmatprep.mubr.msk.f32.mxu1 %vm387_vm0, %v696_v30  ;;  %4726 = vmatprep.mubr.msk.bf16.mxu0 %vm387_vm0, %v372_v58 }
  0x28   : > { %4761 = vmatmul.mubr.msk.f32.gmra.mrb[10].mxu1 %vm387_vm0, %v697_v31 }
  0x29   : > { %4763 = vmatprep.mubr.msk.f32.mxu1 %vm387_vm0, %v698_v32 }
  0x2c   : > { %4764 = vmatmul.mubr.msk.f32.gmra.mrb[12].mxu1 %vm387_vm0, %v699_v33  ;;  %4727 = vmatmul.mubr.msk.bf16.gmra.mrb[8].mxu0 %vm387_vm0, %v373_v61  ;;  %v1674_v61 = vsub.s32 1, %v5491_v28 }
  0x2d   : > { %4766 = vmatprep.mubr.msk.f32.mxu1 %vm387_vm0, %v700_v34  ;;  %4730 = vmatprep.mubr.msk.bf16.mxu0 %vm387_vm0, %v374_v0  ;;  %v2507_v34 = vsub.s32 2, %v5491_v28 }
  0x30   : > { %4767 = vmatmul.mubr.msk.f32.gmra.mrb[14].mxu1 %vm387_vm0, %v701_v35  ;;  %v3259_v35 = vsub.s32 3, %v5491_v28 }
  0x31   : > { %4769 = vmatprep.mubr.msk.f32.mxu1 %vm387_vm0, %v702_v36 }
  0x34   : > { %4770 = vmatmul.mubr.msk.f32.gmra.mrb[16].mxu1 %vm387_vm0, %v703_v37  ;;  %4731 = vmatmul.mubr.msk.bf16.gmra.mrb[12].mxu0 %vm387_vm0, %v375_v4 }
  0x35   : > { %4772 = vmatprep.mubr.msk.f32.mxu1 %vm387_vm0, %v704_v38  ;;  %4734 = vmatprep.mubr.msk.bf16.mxu0 %vm387_vm0, %v376_v7 }
  0x38   : > { %4773 = vmatmul.mubr.msk.f32.gmra.mrb[18].mxu1 %vm387_vm0, %v705_v39 }
  0x39   : > { %4775 = vmatprep.mubr.msk.f32.mxu1 %vm387_vm0, %v706_v40 }
  0x3c   : > { %4776 = vmatmul.mubr.msk.f32.gmra.mrb[20].mxu1 %vm387_vm0, %v707_v41  ;;  %4735 = vmatmul.mubr.msk.bf16.gmra.mrb[16].mxu0 %vm387_vm0, %v377_v10 }
  0x3d   : > { %4738 = vmatprep.mubr.msk.bf16.mxu0 %vm387_vm0, %v378_v14 }
  0x44   : > { %4739 = vmatmul.mubr.msk.bf16.gmra.mrb[20].mxu0 %vm387_vm0, %v379_v16 }
  0x45   : > { %4742 = vmatprep.mubr.msk.bf16.mxu0 %vm387_vm0, %v380_v19 }
  0x4c   : > { %4743 = vmatmul.mubr.msk.bf16.gmra.mrb[24].mxu0 %vm387_vm0, %v381_v26 }
  0xe7   : > { %v4748_v27 = vpop.f32.mrb[0].mxu1 }
  0xe8   : > { %v582_v29 = vpop.f32.mrb[1].mxu1 }
  0xe9   : > { %v4749_v30 = vpop.f32.mrb[2].mxu1 }
  0xea   : > { %v5493_v31 = vpack.c.bf16 %v4749_v30, %v4748_v27  ;;  %v585_v32 = vpop.f32.mrb[3].mxu1  ;;  %v5666_v30 = vunpack.c.h.bf16 %v903_v12 }
  0xeb   : > { %v5495_v33 = vpack.c.bf16 %v585_v32, %v582_v29  ;;  %v5664_v29 = vunpack.c.l.bf16 %v903_v12  ;;  %v5668_v32 = vunpack.c.h.bf16 %v904_v11 }
  0xec   : > { %8073 = vst [vmem:[#allocation6_spill] sm:$0xff] %v5493_v31  ;;  %8097 = vst [vmem:[#allocation30_spill] sm:$0xff] %v5666_v30  ;;  %v8125_v31 = vmov 1065369472  }
  0xed   : > { %8074 = vst [vmem:[#allocation7_spill] sm:$0xff] %v5495_v33  ;;  %8096 = vst [vmem:[#allocation29_spill] sm:$0xff] %v5664_v29 }
  0xee   : > { %8098 = vst [vmem:[#allocation31_spill] sm:$0xff] %v5668_v32 }
  0xef   : > { %v5499_v36 = vpop.f32.mrb[4].mxu1 }
  0xf0   : > { %v5502_v37 = vrot.slane %v5499_v36, %v2507_v34  ;;  %v5505_v38 = vrot.slane %v5499_v36, %v3259_v35  ;;  %v5507_v3 = vpop.f32.mrb[5].mxu1  ;;  %v5630_v62 = vrot.slane %v5499_v36, %v1035_v60 }
  0xf1   : > { %v5510_v39 = vrot.slane %v5507_v3, %v2507_v34  ;;  %v5513_v40 = vrot.slane %v5507_v3, %v3259_v35  ;;  %v5643_v2 = vrot.slane %v5507_v3, %v1035_v60  ;;  %v5646_v4 = vrot.slane %v5507_v3, %v1674_v61 }
  0xf2   : > { %8075 = vst [vmem:[#allocation8_spill] sm:$0xff] %v5505_v38  ;;  %v5670_v34 = vunpack.c.l.bf16 %v906_v13 }
  0xf3   : > { %8076 = vst [vmem:[#allocation9_spill] sm:$0xff] %v5510_v39  ;;  %8077 = vst [vmem:[#allocation10_spill] sm:$0xff] %v5513_v40  ;;  %v5515_v41 = vpop.f32.mrb[6].mxu1 }
  0xf4   : > { %8078 = vst [vmem:[#allocation11_spill] sm:$0xff] %v5515_v41  ;;  %1613 = vperm.xlu1 %4803, %v5515_v41   ;;  %960 = vperm.xlu0 %4802, %v5515_v41   ;;  %v5519_v44 = vpop.f32.mrb[7].mxu1  ;;  %8099 = vst [vmem:[#allocation32_spill] sm:$0xff] %v5670_v34 }
  0xf5   : > { %8079 = vst [vmem:[#allocation12_spill] sm:$0xff] %v5519_v44 }
  0xf7   : > { %v5521_v45 = vpop.f32.mrb[8].mxu1 }
  0xf8   : > { %8080 = vst [vmem:[#allocation13_spill] sm:$0xff] %v5521_v45  ;;  %4807 = vset.pattern.permute.xlu1 %v5243_v46  ;;  %4804 = vset.pattern.permute.xlu0 %v5243_v46  ;;  %v5525_v47 = vpop.f32.mrb[9].mxu1 }
  0xf9   : > { %8081 = vst [vmem:[#allocation14_spill] sm:$0xff] %v5525_v47  ;;  %2446 = vperm.xlu0 %4804, %v5515_v41   ;;  %2442 = vperm.xlu1 %4807, %v5519_v44  }
  0xfb   : > { %v5529_v48 = vpop.f32.mrb[10].mxu1 }
  0xfc   : > { %8082 = vst [vmem:[#allocation15_spill] sm:$0xff] %v5529_v48  ;;  %v5531_v49 = vpop.f32.mrb[11].mxu1 }
  0xfd   : > { %8083 = vst [vmem:[#allocation16_spill] sm:$0xff] %v5531_v49  ;;  %4805 = vset.pattern.permute.xlu0 %v7845_v43  ;;  %4808 = vset.pattern.permute.xlu1 %v7845_v43 }
  0xfe   : > { %955 = vperm.xlu0 %4805, %v5519_v44   ;;  %970 = vperm.xlu1 %4808, %v5521_v45  }
  0xff   : > { %v5537_v50 = vpop.f32.mrb[12].mxu1 }
 0x100   : > { %8084 = vst [vmem:[#allocation17_spill] sm:$0xff] %v5537_v50  ;;  %v5539_v51 = vpop.f32.mrb[13].mxu1 }
 0x101   : > { %8085 = vst [vmem:[#allocation18_spill] sm:$0xff] %v5539_v51 }
 0x102   : > { %4806 = vset.pattern.permute.xlu0 %v5241_v42  ;;  %4809 = vset.pattern.permute.xlu1 %v5241_v42 }
 0x103   : > { %1609 = vperm.xlu0 %4806, %v5519_v44   ;;  %1621 = vperm.xlu1 %4809, %v5521_v45   ;;  %v5545_v52 = vpop.f32.mrb[14].mxu1 }
 0x104   : > { %8086 = vst [vmem:[#allocation19_spill] sm:$0xff] %v5545_v52  ;;  %v5547_v53 = vpop.f32.mrb[15].mxu1 }
 0x105   : > { %8087 = vst [vmem:[#allocation20_spill] sm:$0xff] %v5547_v53 }
 0x107   : > { %4817 = vset.pattern.permute.xlu0 %v7845_v43  ;;  %4810 = vset.pattern.permute.xlu1 %v5243_v46  ;;  %v5551_v54 = vpop.f32.mrb[16].mxu1 }
 0x108   : > { %8088 = vst [vmem:[#allocation21_spill] sm:$0xff] %v5551_v54  ;;  %2454 = vperm.xlu1 %4810, %v5521_v45   ;;  %975 = vperm.xlu0 %4817, %v5531_v49   ;;  %v5555_v55 = vpop.f32.mrb[17].mxu1 }
 0x109   : > { %8089 = vst [vmem:[#allocation22_spill] sm:$0xff] %v5555_v55 }
 0x10b   : > { %v5557_v56 = vpop.f32.mrb[18].mxu1 }
 0x10c   : > { %8090 = vst [vmem:[#allocation23_spill] sm:$0xff] %v5557_v56  ;;  %4811 = vset.pattern.permute.xlu1 %v7845_v43  ;;  %4819 = vset.pattern.permute.xlu0 %v5243_v46  ;;  %v5561_v57 = vpop.f32.mrb[19].mxu1 }
 0x10d   : > { %8091 = vst [vmem:[#allocation24_spill] sm:$0xff] %v5561_v57  ;;  %965 = vperm.xlu1 %4811, %v5525_v47   ;;  %2458 = vperm.xlu0 %4819, %v5531_v49  }
 0x10f   : > { %v5565_v58 = vpop.f32.mrb[20].mxu1 }
 0x110   : > { %8092 = vst [vmem:[#allocation25_spill] sm:$0xff] %v5565_v58  ;;  %v5567_v59 = vpop.f32.mrb[21].mxu1 }
 0x111   : > { %8093 = vst [vmem:[#allocation26_spill] sm:$0xff] %v5567_v59  ;;  %4812 = vset.pattern.permute.xlu1 %v5241_v42  ;;  %4823 = vset.pattern.permute.xlu0 %v7845_v43 }
 0x112   : > { %1617 = vperm.xlu1 %4812, %v5525_v47   ;;  %985 = vperm.xlu0 %4823, %v5539_v51  }
 0x116   : > { %4813 = vset.pattern.permute.xlu1 %v5243_v46  ;;  %4825 = vset.pattern.permute.xlu0 %v5243_v46 }
 0x117   : > { %2450 = vperm.xlu1 %4813, %v5525_v47   ;;  %2466 = vperm.xlu0 %4825, %v5539_v51  }
 0x11b   : > { %4814 = vset.pattern.permute.xlu1 %v7845_v43  ;;  %4827 = vset.pattern.permute.xlu0 %v5241_v42 }
 0x11c   : > { %980 = vperm.xlu1 %4814, %v5529_v48   ;;  %1645 = vperm.xlu0 %4827, %v5545_v52  }
 0x120   : > { %4815 = vset.pattern.permute.xlu1 %v5241_v42  ;;  %4828 = vset.pattern.permute.xlu0 %v7845_v43 }
 0x121   : > { %1629 = vperm.xlu1 %4815, %v5529_v48   ;;  %995 = vperm.xlu0 %4828, %v5547_v53  }
 0x125   : > { %4816 = vset.pattern.permute.xlu1 %v5243_v46  ;;  %4831 = vset.pattern.permute.xlu0 %v5241_v42 }
 0x126   : > { %2462 = vperm.xlu1 %4816, %v5529_v48   ;;  %1653 = vperm.xlu0 %4831, %v5551_v54  }
 0x12a   : > { %4818 = vset.pattern.permute.xlu1 %v5241_v42  ;;  %4832 = vset.pattern.permute.xlu0 %v7845_v43 }
 0x12b   : > { %1625 = vperm.xlu1 %4818, %v5531_v49   ;;  %1005 = vperm.xlu0 %4832, %v5555_v55  }
 0x12f   : > { %4820 = vset.pattern.permute.xlu1 %v7845_v43  ;;  %4835 = vset.pattern.permute.xlu0 %v5241_v42 }
 0x130   : > { %990 = vperm.xlu1 %4820, %v5537_v50   ;;  %1661 = vperm.xlu0 %4835, %v5557_v56  }
 0x134   : > { %4821 = vset.pattern.permute.xlu1 %v5241_v42  ;;  %4836 = vset.pattern.permute.xlu0 %v7845_v43 }
 0x135   : > { %1637 = vperm.xlu1 %4821, %v5537_v50   ;;  %1015 = vperm.xlu0 %4836, %v5561_v57  }
 0x139   : > { %4822 = vset.pattern.permute.xlu1 %v5243_v46  ;;  %4839 = vset.pattern.permute.xlu0 %v5241_v42 }
 0x13a   : > { %2470 = vperm.xlu1 %4822, %v5537_v50   ;;  %1669 = vperm.xlu0 %4839, %v5565_v58  }
 0x13e   : > { %4824 = vset.pattern.permute.xlu1 %v5241_v42  ;;  %4840 = vset.pattern.permute.xlu0 %v7845_v43 }
 0x13f   : > { %1633 = vperm.xlu1 %4824, %v5539_v51   ;;  %1025 = vperm.xlu0 %4840, %v5567_v59  }
 0x143   : > { %4826 = vset.pattern.permute.xlu1 %v7845_v43  ;;  %4842 = vset.pattern.permute.xlu0 %v5243_v46 }
 0x144   : > { %1000 = vperm.xlu1 %4826, %v5545_v52  }
 0x148   : > { %4829 = vset.pattern.permute.xlu1 %v5241_v42 }
 0x149   : > { %1641 = vperm.xlu1 %4829, %v5547_v53  }
 0x14d   : > { %4830 = vset.pattern.permute.xlu1 %v7845_v43 }
 0x14e   : > { %1010 = vperm.xlu1 %4830, %v5551_v54  }
 0x152   : > { %4833 = vset.pattern.permute.xlu1 %v5241_v42 }
 0x153   : > { %1649 = vperm.xlu1 %4833, %v5555_v55  }
 0x157   : > { %4834 = vset.pattern.permute.xlu1 %v7845_v43 }
 0x158   : > { %1020 = vperm.xlu1 %4834, %v5557_v56  }
 0x15c   : > { %4837 = vset.pattern.permute.xlu1 %v5241_v42 }
 0x15d   : > { %1657 = vperm.xlu1 %4837, %v5561_v57  }
 0x161   : > { %4838 = vset.pattern.permute.xlu1 %v7845_v43 }
 0x162   : > { %1030 = vperm.xlu1 %4838, %v5565_v58  }
 0x166   : > { %4841 = vset.pattern.permute.xlu1 %v5241_v42  ;;  %v5640_v42 = vrot.slane %v5499_v36, %v1674_v61 }
 0x167   : > { %1665 = vperm.xlu1 %4841, %v5567_v59  }
 0x16b   : > { %4843 = vset.pattern.permute.xlu1 %v5243_v46 }
 0x173   : > { %v1614_v63 = vpop.permute.xlu1 %1613  ;;  %v961_v0 = vpop.permute.xlu0 %960 }
 0x174   : > { %v1043_v1 = vadd.f32 %v5630_v62, %v961_v0  ;;  %v1682_v5 = vadd.f32 %v5640_v42, %v1614_v63  ;;  %v1683_v6 = vadd.f32 %v5646_v4, %v1614_v63  ;;  %v1044_v7 = vadd.f32 %v5643_v2, %v961_v0 }
 0x176   : > { %v1107_v10 = vmul.f32 0.2, %v1043_v1  ;;  %vm1075_vm9 = vcmp.gt.f32.partialorder %v1043_v1, 0.0  ;;  %v1746_v14 = vmul.f32 0.2, %v1682_v5  ;;  %vm1076_vm10 = vcmp.gt.f32.partialorder %v1044_v7, 0.0 }
 0x177   : > { %v1747_v15 = vmul.f32 0.2, %v1683_v6  ;;  %v1108_v16 = vmul.f32 0.2, %v1044_v7  ;;  %vm1714_vm11 = vcmp.gt.f32.partialorder %v1682_v5, 0.0  ;;  %vm1715_vm12 = vcmp.gt.f32.partialorder %v1683_v6, 0.0 }
 0x178   : > { %v5651_v8 = vpop.permute.xlu0 %2446  ;;  %v5653_v9 = vpop.permute.xlu1 %2442  ;;  %v1139_v22 = vsel %vm1075_vm9, %v1043_v1, %v1107_v10  ;;  %v1778_v46 = vsel %vm1714_vm11, %v1682_v5, %v1746_v14 }
 0x179   : > { %8094 = vst [vmem:[#allocation27_spill] sm:$0xff] %v5651_v8  ;;  %v1140_v3 = vsel %vm1076_vm10, %v1044_v7, %v1108_v16  ;;  %v5673_v60 = vadd.f32 %v1139_v22, %v5658_v17  ;;  %v1779_v61 = vsel %vm1715_vm12, %v1683_v6, %v1747_v15 }
 0x17a   : > { %v5701_v43 = vadd.f32 %v1779_v61, %v5668_v32 }
 0x17b   : > { %8100 = vst [vmem:[#allocation33_spill] sm:$0xff] %v5673_v60 }
 0x17c   : > { %8107 = vst [vmem:[#allocation40_spill] sm:$0xff] %v5701_v43 }
 0x17d   : > { %v956_v18 = vpop.permute.xlu0 %955  ;;  %v971_v19 = vpop.permute.xlu1 %970 }
 0x17e   : > { %v1041_v25 = vadd.f32 %v5630_v62, %v956_v18  ;;  %v1042_v26 = vadd.f32 %v5643_v2, %v956_v18  ;;  %v1047_v27 = vadd.f32 %v5630_v62, %v971_v19  ;;  %v1048_v28 = vadd.f32 %v5643_v2, %v971_v19 }
 0x180   : > { %v1105_v35 = vmul.f32 0.2, %v1041_v25  ;;  %v1106_v36 = vmul.f32 0.2, %v1042_v26  ;;  %vm1073_vm13 = vcmp.gt.f32.partialorder %v1041_v25, 0.0  ;;  %vm1074_vm14 = vcmp.gt.f32.partialorder %v1042_v26, 0.0 }
 0x181   : > { %v1111_v63 = vmul.f32 0.2, %v1047_v27  ;;  %v1112_v0 = vmul.f32 0.2, %v1048_v28  ;;  %vm1079_vm15 = vcmp.gt.f32.partialorder %v1047_v27, 0.0  ;;  %vm1080_vm0 = vcmp.gt.f32.partialorder %v1048_v28, 0.0 }
 0x182   : > { %v1610_v1 = vpop.permute.xlu0 %1609  ;;  %v1622_v10 = vpop.permute.xlu1 %1621  ;;  %v1137_v12 = vsel %vm1073_vm13, %v1041_v25, %v1105_v35  ;;  %v1138_v11 = vsel %vm1074_vm14, %v1042_v26, %v1106_v36  ;;  %v5687_v25 = vadd.f32 %v1140_v3, %v5668_v32  ;;  %v5698_v3 = vadd.f32 %v1778_v46, %v5658_v17  ;;  %v909_v17 = vld [vmem:[%s5637_s16 + $0x30] sm:$0xff] }
 0x183   : > { %v1680_v18 = vadd.f32 %v5640_v42, %v1610_v1  ;;  %v1681_v19 = vadd.f32 %v5646_v4, %v1610_v1  ;;  %v1686_v7 = vadd.f32 %v5640_v42, %v1622_v10  ;;  %v1687_v5 = vadd.f32 %v5646_v4, %v1622_v10 }
 0x184   : > { %v5681_v14 = vadd.f32 %v1137_v12, %v5664_v29  ;;  %v5684_v16 = vadd.f32 %v1138_v11, %v5666_v30  ;;  %8103 = vst [vmem:[#allocation36_spill] sm:$0xff] %v5687_v25  ;;  %v5695_v11 = vunpack.c.h.bf16 %v906_v13  ;;  %8106 = vst [vmem:[#allocation39_spill] sm:$0xff] %v5698_v3  ;;  %v1143_v24 = vsel %vm1079_vm15, %v1047_v27, %v1111_v63  ;;  %v905_v63 = vld [vmem:[%s5637_s16 + $0x10] sm:$0xff] }
 0x185   : > { %v1744_v6 = vmul.f32 0.2, %v1680_v18  ;;  %v1745_v15 = vmul.f32 0.2, %v1681_v19  ;;  %v1750_v22 = vmul.f32 0.2, %v1686_v7  ;;  %v1144_v40 = vsel %vm1080_vm0, %v1048_v28, %v1112_v0 }
 0x186   : > { %8101 = vst [vmem:[#allocation34_spill] sm:$0xff] %v5681_v14  ;;  %8102 = vst [vmem:[#allocation35_spill] sm:$0xff] %v5684_v16  ;;  %v1751_v26 = vmul.f32 0.2, %v1687_v5  ;;  %v1201_v35 = vmax.f32 %v5681_v14, %v5684_v16  ;;  %vm1712_vm1 = vcmp.gt.f32.partialorder %v1680_v18, 0.0  ;;  %vm1713_vm2 = vcmp.gt.f32.partialorder %v1681_v19, 0.0 }
 0x187   : > { %v5691_v36 = vpop.permute.xlu1 %2454  ;;  %v5693_v1 = vpop.permute.xlu0 %975  ;;  %v1776_v10 = vsel %vm1712_vm1, %v1680_v18, %v1744_v6  ;;  %v1777_v12 = vsel %vm1713_vm2, %v1681_v19, %v1745_v15  ;;  %8105 = vst [vmem:[#allocation38_spill] sm:$0xff] %v5695_v11  ;;  %vm1718_vm3 = vcmp.gt.f32.partialorder %v1686_v7, 0.0  ;;  %v1204_v38 = vmax.f32 %v5673_v60, %v5687_v25 }
 0x188   : > { %8104 = vst [vmem:[#allocation37_spill] sm:$0xff] %v5691_v36  ;;  %1202 = vmax.xlane.f32.xlu0 %v1201_v35  ;;  %v5708_v18 = vadd.f32 %v1776_v10, %v5664_v29  ;;  %v5711_v13 = vadd.f32 %v1777_v12, %v5666_v30  ;;  %vm1719_vm4 = vcmp.gt.f32.partialorder %v1687_v5, 0.0  ;;  %v1782_v19 = vsel %vm1718_vm3, %v1686_v7, %v1750_v22 }
 0x189   : > { %v1783_v46 = vsel %vm1719_vm4, %v1687_v5, %v1751_v26  ;;  %v5716_v27 = vadd.f32 %v1143_v24, %v5670_v34  ;;  %v5719_v28 = vadd.f32 %v1144_v40, %v5695_v11  ;;  %v1843_v15 = vmax.f32 %v5698_v3, %v5701_v43  ;;  %v4720_v40 = vpop.f32.mrb[0].mxu0 }
 0x18a   : > { %8108 = vst [vmem:[#allocation41_spill] sm:$0xff] %v5708_v18  ;;  %8109 = vst [vmem:[#allocation42_spill] sm:$0xff] %v5711_v13  ;;  %v1840_v61 = vmax.f32 %v5708_v18, %v5711_v13  ;;  %v5729_v5 = vadd.f32 %v1782_v19, %v5670_v34  ;;  %v5732_v24 = vadd.f32 %v1783_v46, %v5695_v11  ;;  %v5734_v22 = vunpack.c.l.bf16 %v905_v63  ;;  %v470_v35 = vpop.f32.mrb[1].mxu0 }
 0x18b   : > { %1205 = vmax.xlane.f32.xlu1 %v1204_v38  ;;  %8110 = vst [vmem:[#allocation43_spill] sm:$0xff] %v5716_v27  ;;  %8111 = vst [vmem:[#allocation44_spill] sm:$0xff] %v5719_v28  ;;  %v7858_v26 = vmov 1065369472   ;;  %v5740_v19 = vunpack.c.h.bf16 %v905_v63  ;;  %v4721_v44 = vpop.f32.mrb[2].mxu0 }
 0x18c   : > { %v966_v0 = vpop.permute.xlu1 %965  ;;  %v5722_v6 = vpop.permute.xlu0 %2458  ;;  %1841 = vmax.xlane.f32.xlu0 %v1840_v61  ;;  %8113 = vst [vmem:[#allocation46_spill] sm:$0xff] %v5729_v5  ;;  %8114 = vst [vmem:[#allocation47_spill] sm:$0xff] %v5732_v24  ;;  %4204 = vmatprep.subr.bf16.mxu1 %v7858_v26  ;;  %v1210_v61 = vmax.f32 %v5716_v27, %v5719_v28 }
 0x18d   : > { %8112 = vst [vmem:[#allocation45_spill] sm:$0xff] %v5722_v6  ;;  %v1045_v7 = vadd.f32 %v5630_v62, %v966_v0  ;;  %v1046_v38 = vadd.f32 %v5643_v2, %v966_v0  ;;  %8115 = vst [vmem:[#allocation48_spill] sm:$0xff] %v5734_v22  ;;  %4268 = vmatprep.subr.bf16.mxu0 %v7858_v26  ;;  %4205 = vmatpush3.bf16.msra.mxu1 %v7858_v26 }
 0x18e   : > { %8116 = vst [vmem:[#allocation49_spill] sm:$0xff] %v5740_v19  ;;  %4206 = vmatprep.subr.bf16.mxu1 %v7858_v26  ;;  %4269 = vmatpush3.bf16.msra.mxu0 %v7858_v26 }
 0x18f   : > { %v1109_v10 = vmul.f32 0.2, %v1045_v7  ;;  %v1110_v12 = vmul.f32 0.2, %v1046_v38  ;;  %1844 = vmax.xlane.f32.xlu1 %v1843_v15  ;;  %vm1077_vm5 = vcmp.gt.f32.partialorder %v1045_v7, 0.0  ;;  %vm1078_vm6 = vcmp.gt.f32.partialorder %v1046_v38, 0.0  ;;  %4270 = vmatprep.subr.bf16.mxu0 %v7858_v26 }
 0x190   : > { %1211 = vmax.xlane.f32.xlu0 %v1210_v61  ;;  %v1849_v15 = vmax.f32 %v5729_v5, %v5732_v24  ;;  %v5832_v24 = vunpack.c.l.bf16 %v909_v17  ;;  %v911_v5 = vld [vmem:[%s5637_s16 + $0x40] sm:$0xff] }
 0x191   : > { %v1618_v46 = vpop.permute.xlu1 %1617  ;;  %v5745_v0 = vpop.permute.xlu0 %985  ;;  %v1141_v50 = vsel %vm1077_vm5, %v1045_v7, %v1109_v10  ;;  %v1142_v48 = vsel %vm1078_vm6, %v1046_v38, %v1110_v12  ;;  %4207 = vmatpush3.bf16.msra.mxu1 %v7858_v26  ;;  %v5761_v7 = vpack.c.bf16 %v4721_v44, %v4720_v40 }
 0x192   : > { %v1684_v63 = vadd.f32 %v5640_v42, %v1618_v46  ;;  %v1685_v45 = vadd.f32 %v5646_v4, %v1618_v46  ;;  %v5753_v23 = vadd.f32 %v1141_v50, %v5734_v22  ;;  %v5756_v61 = vadd.f32 %v1142_v48, %v5740_v19  ;;  %4208 = vmatprep.subr.bf16.mxu1 %v7858_v26 }
 0x193   : > { %1850 = vmax.xlane.f32.xlu1 %v1849_v15  ;;  %4271 = vmatpush3.bf16.msra.mxu0 %v7858_v26  ;;  %8119 = vst [vmem:[#allocation52_spill] sm:$0xff] %v5761_v7  ;;  %v908_v15 = vld [vmem:[%s5637_s16 + $0x28] sm:$0xff]  ;;  %8132 = vst [vmem:[#allocation64_spill] sm:$0xff] %v5832_v24 }
 0x194   : > { %8117 = vst [vmem:[#allocation50_spill] sm:$0xff] %v5753_v23  ;;  %8118 = vst [vmem:[#allocation51_spill] sm:$0xff] %v5756_v61  ;;  %v1748_v6 = vmul.f32 0.2, %v1684_v63  ;;  %v1749_v51 = vmul.f32 0.2, %v1685_v45  ;;  %v1207_v38 = vmax.f32 %v5753_v23, %v5756_v61  ;;  %4272 = vmatprep.subr.bf16.mxu0 %v7858_v26  ;;  %v5797_v47 = vunpack.c.l.bf16 %v908_v15 }
 0x195   : > { %vm1716_vm7 = vcmp.gt.f32.partialorder %v1684_v63, 0.0  ;;  %vm1717_vm8 = vcmp.gt.f32.partialorder %v1685_v45, 0.0  ;;  %4209 = vmatpush3.bf16.msra.mxu1 %v7858_v26  ;;  %v5799_v41 = vunpack.c.h.bf16 %v908_v15 }
 0x196   : > { %v5766_v48 = vpop.permute.xlu1 %2450  ;;  %v5768_v50 = vpop.permute.xlu0 %2466  ;;  %v1780_v10 = vsel %vm1716_vm7, %v1684_v63, %v1748_v6  ;;  %v1781_v12 = vsel %vm1717_vm8, %v1685_v45, %v1749_v51  ;;  %1208 = vmax.xlane.f32.xlu0 %v1207_v38  ;;  %4210 = vmatprep.subr.bf16.mxu1 %v7858_v26  ;;  %v1049_v45 = vadd.f32 %v5630_v62, %v5693_v1 }
 0x197   : > { %8120 = vst [vmem:[#allocation53_spill] sm:$0xff] %v5766_v48  ;;  %8121 = vst [vmem:[#allocation54_spill] sm:$0xff] %v5768_v50  ;;  %v5771_v46 = vadd.f32 %v1780_v10, %v5734_v22  ;;  %v5774_v44 = vadd.f32 %v1781_v12, %v5740_v19  ;;  %4273 = vmatpush3.bf16.msra.mxu0 %v7858_v26  ;;  %v473_v10 = vpop.f32.mrb[3].mxu0  ;;  %v1050_v12 = vadd.f32 %v5643_v2, %v5693_v1 }
 0x198   : > { %4274 = vmatprep.subr.bf16.mxu0 %v7858_v26  ;;  %v5791_v50 = vpack.c.bf16 %v473_v10, %v470_v35  ;;  %v5793_v26 = vpop.f32.mrb[4].mxu0  ;;  %8126 = vst [vmem:[#allocation58_spill] sm:$0xff] %v5797_v47  ;;  %8127 = vst [vmem:[#allocation59_spill] sm:$0xff] %v5799_v41  ;;  %v5806_v1 = vpack.c.bf16 %v5337_v20, %v5337_v20  ;;  %v1113_v35 = vmul.f32 0.2, %v1049_v45  ;;  %vm1081_vm11 = vcmp.gt.f32.partialorder %v1049_v45, 0.0 }
 0x199   : > { %8122 = vst [vmem:[#allocation55_spill] sm:$0xff] %v5771_v46  ;;  %8123 = vst [vmem:[#allocation56_spill] sm:$0xff] %v5774_v44  ;;  %v1846_v40 = vmax.f32 %v5771_v46, %v5774_v44  ;;  %4211 = vmatpush3.bf16.msra.mxu1 %v8125_v31  ;;  %v5812_v10 = vpack.c.bf16 %v5340_v21, %v5340_v21  ;;  %v1114_v7 = vmul.f32 0.2, %v1050_v12  ;;  %vm1082_vm12 = vcmp.gt.f32.partialorder %v1050_v12, 0.0 }
 0x19a   : > { %8124 = vst [vmem:[#allocation57_spill] sm:$0xff] %v5791_v50  ;;  %4212 = vmatprep.subr.bf16.mxu1 %v8125_v31  ;;  %v1145_v23 = vsel %vm1081_vm11, %v1049_v45, %v1113_v35  ;;  %v912_v50 = vld [vmem:[%s5637_s16 + $0x48] sm:$0xff]  ;;  %v1054_v45 = vadd.f32 %v5643_v2, %v5745_v0 }
 0x19b   : > { %v981_v51 = vpop.permute.xlu1 %980  ;;  %v5784_v6 = vpop.permute.xlu0 %1645  ;;  %1847 = vmax.xlane.f32.xlu0 %v1846_v40  ;;  %4275 = vmatpush3.bf16.msra.mxu0 %v8125_v31  ;;  %v907_v40 = vld [vmem:[%s5637_s16 + $0x20] sm:$0xff]  ;;  %v1146_v27 = vsel %vm1082_vm12, %v1050_v12, %v1114_v7  ;;  %v5855_v3 = vunpack.c.h.bf16 %v912_v50 }
 0x19c   : > { %v1051_v63 = vadd.f32 %v5630_v62, %v981_v51  ;;  %v1052_v38 = vadd.f32 %v5643_v2, %v981_v51  ;;  %4276 = vmatprep.subr.bf16.mxu0 %v8125_v31  ;;  %v5808_v51 = vpop.f32.mrb[5].mxu0  ;;  %v5819_v46 = vunpack.c.l.bf16 %v907_v40  ;;  %vm1086_vm0 = vcmp.gt.f32.partialorder %v1054_v45, 0.0 }
 0x19d   : > { %v4725_v61 = vpop.f32.mrb[6].mxu0  ;;  %4213 = vmatpush3.bf16.msra.mxu1 %v8125_v31  ;;  %8136 = vst [vmem:[#allocation68_spill] sm:$0xff] %v5855_v3 }
 0x19e   : > { %v1115_v49 = vmul.f32 0.2, %v1051_v63  ;;  %v1116_v33 = vmul.f32 0.2, %v1052_v38  ;;  %vm1083_vm9 = vcmp.gt.f32.partialorder %v1051_v63, 0.0  ;;  %vm1084_vm10 = vcmp.gt.f32.partialorder %v1052_v38, 0.0  ;;  %4214 = vmatprep.subr.bf16.mxu1 %v8125_v31 }
 0x19f   : > { %8128 = vst [vmem:[#allocation60_spill] sm:$0xff] %v5819_v46  ;;  %4277 = vmatpush3.bf16.msra.mxu0 %v8125_v31  ;;  %v5896_v25 = vpack.c.bf16 %v4725_v61, %v5793_v26 }
 0x1a0   : > { %v1630_v15 = vpop.permute.xlu1 %1629  ;;  %v5814_v11 = vpop.permute.xlu0 %995  ;;  %v1147_v34 = vsel %vm1083_vm9, %v1051_v63, %v1115_v49  ;;  %v1148_v32 = vsel %vm1084_vm10, %v1052_v38, %v1116_v33  ;;  %v5828_v33 = vunpack.c.h.bf16 %v907_v40  ;;  %v914_v40 = vld [vmem:[%s5637_s16 + $0x58] sm:$0xff]  ;;  %4278 = vmatprep.subr.bf16.mxu0 %v8125_v31 }
 0x1a1   : > { %v1690_v20 = vadd.f32 %v5640_v42, %v1630_v15  ;;  %v1691_v44 = vadd.f32 %v5646_v4, %v1630_v15  ;;  %v5823_v21 = vadd.f32 %v1147_v34, %v5797_v47  ;;  %v5826_v49 = vadd.f32 %v1148_v32, %v5799_v41  ;;  %v489_v63 = vpop.f32.mrb[7].mxu0  ;;  %4215 = vmatpush3.bf16.msra.mxu1 %v8125_v31 }
 0x1a2   : > { %8131 = vst [vmem:[#allocation63_spill] sm:$0xff] %v5828_v33  ;;  %v1053_v32 = vadd.f32 %v5630_v62, %v5745_v0  ;;  %v4728_v19 = vpop.f32.mrb[8].mxu0  ;;  %v5857_v0 = vunpack.c.l.bf16 %v911_v5  ;;  %4216 = vmatprep.subr.bf16.mxu1 %v8125_v31  ;;  %8145 = vst [vmem:[#allocation77_spill] sm:$0xff] %v5896_v25  ;;  %v5899_v60 = vpack.c.bf16 %v489_v63, %v5808_v51 }
 0x1a3   : > { %8129 = vst [vmem:[#allocation61_spill] sm:$0xff] %v5823_v21  ;;  %8130 = vst [vmem:[#allocation62_spill] sm:$0xff] %v5826_v49  ;;  %v1754_v38 = vmul.f32 0.2, %v1690_v20  ;;  %v1755_v15 = vmul.f32 0.2, %v1691_v44  ;;  %v1216_v34 = vmax.f32 %v5823_v21, %v5826_v49  ;;  %v5851_v49 = vunpack.c.h.bf16 %v909_v17  ;;  %4279 = vmatpush3.bf16.msra.mxu0 %v8125_v31 }
 0x1a4   : > { %vm1722_vm13 = vcmp.gt.f32.partialorder %v1690_v20, 0.0  ;;  %vm1723_vm14 = vcmp.gt.f32.partialorder %v1691_v44, 0.0  ;;  %v5853_v21 = vunpack.c.l.bf16 %v912_v50  ;;  %8137 = vst [vmem:[#allocation69_spill] sm:$0xff] %v5857_v0  ;;  %v5859_v13 = vpop.f32.mrb[9].mxu0  ;;  %v5869_v17 = vunpack.c.l.bf16 %v914_v40  ;;  %4280 = vmatprep.subr.bf16.mxu0 %v8125_v31  ;;  %8146 = vst [vmem:[#allocation78_spill] sm:$0xff] %v5899_v60 }
 0x1a5   : > { %v5845_v35 = vpop.permute.xlu1 %2462  ;;  %v1786_v22 = vsel %vm1722_vm13, %v1690_v20, %v1754_v38  ;;  %v1787_v28 = vsel %vm1723_vm14, %v1691_v44, %v1755_v15  ;;  %v5849_v43 = vpop.permute.xlu0 %1653  ;;  %1217 = vmax.xlane.f32.xlu0 %v1216_v34  ;;  %8134 = vst [vmem:[#allocation66_spill] sm:$0xff] %v5851_v49  ;;  %v5867_v44 = vunpack.c.h.bf16 %v911_v5  ;;  %v1117_v50 = vmul.f32 0.2, %v1053_v32  ;;  %v5883_v5 = vld [vmem:[%s5637_s16 + $0x50] sm:$0xff]  ;;  %4217 = vmatpush3.bf16.msra.mxu1 %v8125_v31 }
 0x1a6   : > { %8133 = vst [vmem:[#allocation65_spill] sm:$0xff] %v5845_v35  ;;  %8135 = vst [vmem:[#allocation67_spill] sm:$0xff] %v5853_v21  ;;  %v5862_v20 = vadd.f32 %v1786_v22, %v5797_v47  ;;  %v5865_v7 = vadd.f32 %v1787_v28, %v5799_v41  ;;  %v4729_v12 = vpop.f32.mrb[10].mxu0  ;;  %v1698_v38 = vadd.f32 %v5640_v42, %v5784_v6  ;;  %v910_v28 = vld [vmem:[%s5637_s16 + $0x38] sm:$0xff]  ;;  %v1118_v34 = vmul.f32 0.2, %v1054_v45 }
 0x1a7   : > { %8140 = vst [vmem:[#allocation72_spill] sm:$0xff] %v5867_v44  ;;  %8141 = vst [vmem:[#allocation73_spill] sm:$0xff] %v5869_v17  ;;  %v5876_v15 = vadd.f32 %v1145_v23, %v5819_v46  ;;  %v5879_v22 = vadd.f32 %v1146_v27, %v5828_v33  ;;  %v1699_v41 = vadd.f32 %v5646_v4, %v5784_v6  ;;  %vm1085_vm15 = vcmp.gt.f32.partialorder %v1053_v32, 0.0  ;;  %v5890_v18 = vpop.f32.mrb[11].mxu0 }
 0x1a8   : > { %8138 = vst [vmem:[#allocation70_spill] sm:$0xff] %v5862_v20  ;;  %8139 = vst [vmem:[#allocation71_spill] sm:$0xff] %v5865_v7  ;;  %v1855_v47 = vmax.f32 %v5862_v20, %v5865_v7  ;;  %v5893_v27 = vunpack.c.h.bf16 %v914_v40  ;;  %4218 = vmatprep.subr.bf16.mxu1 %v8125_v31  ;;  %v5904_v20 = vunpack.c.l.bf16 %v910_v28  ;;  %v5907_v16 = vunpack.c.l.bf16 %v5883_v5  ;;  %v5909_v40 = vpop.f32.mrb[12].mxu0  ;;  %4281 = vmatpush3.bf16.msra.mxu0 %v8125_v31 }
 0x1a9   : > { %8142 = vst [vmem:[#allocation74_spill] sm:$0xff] %v5876_v15  ;;  %8143 = vst [vmem:[#allocation75_spill] sm:$0xff] %v5879_v22  ;;  %v1762_v14 = vmul.f32 0.2, %v1698_v38  ;;  %v1213_v61 = vmax.f32 %v5876_v15, %v5879_v22  ;;  %v1149_v51 = vsel %vm1085_vm15, %v1053_v32, %v1117_v50  ;;  %v5916_v63 = vpack.c.bf16 %v4729_v12, %v4728_v19  ;;  %v5918_v25 = vpop.f32.mrb[13].mxu0 }
 0x1aa   : > { %v1626_v23 = vpop.permute.xlu1 %1625  ;;  %8144 = vst [vmem:[#allocation76_spill] sm:$0xff] %v5893_v27  ;;  %1856 = vmax.xlane.f32.xlu1 %v1855_v47  ;;  %8147 = vst [vmem:[#allocation79_spill] sm:$0xff] %v5904_v20  ;;  %v5911_v26 = vpop.permute.xlu0 %1005  ;;  %v1763_v47 = vmul.f32 0.2, %v1699_v41  ;;  %v1150_v35 = vsel %vm1086_vm0, %v1054_v45, %v1118_v34  ;;  %4219 = vmatpush3.bf16.msra.mxu1 %v8125_v31  ;;  %v1057_v22 = vadd.f32 %v5630_v62, %v5814_v11 }
 0x1ab   : > { %v1688_v6 = vadd.f32 %v5640_v42, %v1626_v23  ;;  %v1689_v7 = vadd.f32 %v5646_v4, %v1626_v23  ;;  %8148 = vst [vmem:[#allocation80_spill] sm:$0xff] %v5907_v16  ;;  %8149 = vst [vmem:[#allocation81_spill] sm:$0xff] %v5916_v63  ;;  %4282 = vmatprep.subr.bf16.mxu0 %v8125_v31  ;;  %vm1730_vm3 = vcmp.gt.f32.partialorder %v1698_v38, 0.0  ;;  %v5926_v19 = vpop.f32.mrb[14].mxu0  ;;  %vm1731_vm4 = vcmp.gt.f32.partialorder %v1699_v41, 0.0 }
 0x1ac   : > { %v1058_v32 = vadd.f32 %v5643_v2, %v5814_v11  ;;  %v5932_v63 = vunpack.c.h.bf16 %v910_v28  ;;  %v5935_v30 = vadd.f32 %v1149_v51, %v5832_v24  ;;  %v5937_v29 = vpop.f32.mrb[15].mxu0  ;;  %4283 = vmatpush3.bf16.msra.mxu0 %v8125_v31  ;;  %v1795_v31 = vsel %vm1731_vm4, %v1699_v41, %v1763_v47 }
 0x1ad   : > { %v1752_v23 = vmul.f32 0.2, %v1688_v6  ;;  %v1753_v60 = vmul.f32 0.2, %v1689_v7  ;;  %vm1720_vm1 = vcmp.gt.f32.partialorder %v1688_v6, 0.0  ;;  %vm1721_vm2 = vcmp.gt.f32.partialorder %v1689_v7, 0.0 }
 0x1ae   : > { %1214 = vmax.xlane.f32.xlu1 %v1213_v61  ;;  %8150 = vst [vmem:[#allocation82_spill] sm:$0xff] %v5932_v63  ;;  %8151 = vst [vmem:[#allocation83_spill] sm:$0xff] %v5935_v30  ;;  %v5950_v28 = vpop.f32.mrb[16].mxu0  ;;  %v1121_v61 = vmul.f32 0.2, %v1057_v22  ;;  %vm1089_vm7 = vcmp.gt.f32.partialorder %v1057_v22, 0.0  ;;  %v5965_v47 = vadd.f32 %v1795_v31, %v5855_v3  ;;  %v1061_v59 = vadd.f32 %v5630_v62, %v5911_v26 }
 0x1af   : > { %v991_v12 = vpop.permute.xlu1 %990  ;;  %v1784_v50 = vsel %vm1720_vm1, %v1688_v6, %v1752_v23  ;;  %v1785_v15 = vsel %vm1721_vm2, %v1689_v7, %v1753_v60  ;;  %v5947_v60 = vadd.f32 %v1150_v35, %v5851_v49  ;;  %v1794_v7 = vsel %vm1730_vm3, %v1698_v38, %v1762_v14 }
 0x1b0   : > { %v1055_v45 = vadd.f32 %v5630_v62, %v991_v12  ;;  %v1056_v34 = vadd.f32 %v5643_v2, %v991_v12  ;;  %v5941_v11 = vadd.f32 %v1784_v50, %v5819_v46  ;;  %v5944_v6 = vadd.f32 %v1785_v15, %v5828_v33  ;;  %v5952_v12 = vpop.permute.xlu0 %1661  ;;  %v5957_v15 = vpop.f32.mrb[17].mxu0  ;;  %8157 = vst [vmem:[#allocation89_spill] sm:$0xff] %v5965_v47 }
 0x1b1   : > { %8154 = vst [vmem:[#allocation86_spill] sm:$0xff] %v5947_v60  ;;  %8155 = vst [vmem:[#allocation87_spill] sm:$0xff] %v5952_v12  ;;  %v1122_v48 = vmul.f32 0.2, %v1058_v32  ;;  %vm1090_vm8 = vcmp.gt.f32.partialorder %v1058_v32, 0.0  ;;  %v5962_v41 = vadd.f32 %v1794_v7, %v5853_v21  ;;  %v1153_v31 = vsel %vm1089_vm7, %v1057_v22, %v1121_v61 }
 0x1b2   : > { %8152 = vst [vmem:[#allocation84_spill] sm:$0xff] %v5941_v11  ;;  %8153 = vst [vmem:[#allocation85_spill] sm:$0xff] %v5944_v6  ;;  %v1119_v51 = vmul.f32 0.2, %v1055_v45  ;;  %v1120_v23 = vmul.f32 0.2, %v1056_v34  ;;  %v1852_v50 = vmax.f32 %v5941_v11, %v5944_v6  ;;  %v1702_v11 = vadd.f32 %v5640_v42, %v5849_v43 }
 0x1b3   : > { %vm1087_vm5 = vcmp.gt.f32.partialorder %v1055_v45, 0.0  ;;  %vm1088_vm6 = vcmp.gt.f32.partialorder %v1056_v34, 0.0  ;;  %8156 = vst [vmem:[#allocation88_spill] sm:$0xff] %v5962_v41  ;;  %v4737_v6 = vpop.f32.mrb[18].mxu0  ;;  %v1154_v36 = vsel %vm1090_vm8, %v1058_v32, %v1122_v48  ;;  %v5991_v39 = vunpack.c.h.bf16 %v5883_v5 }
 0x1b4   : > { %v1638_v35 = vpop.permute.xlu1 %1637  ;;  %v1151_v14 = vsel %vm1087_vm5, %v1055_v45, %v1119_v51  ;;  %v1152_v38 = vsel %vm1088_vm6, %v1056_v34, %v1120_v23  ;;  %1853 = vmax.xlane.f32.xlu0 %v1852_v50  ;;  %v5971_v45 = vadd.f32 %v5646_v4, %v5849_v43  ;;  %v915_v23 = vld [vmem:[%s5637_s16 + $0x60] sm:$0xff]  ;;  %v537_v7 = vpop.f32.mrb[19].mxu0  ;;  %v1062_v48 = vadd.f32 %v5643_v2, %v5911_v26 }
 0x1b5   : > { %v1694_v33 = vadd.f32 %v5640_v42, %v1638_v35  ;;  %v1695_v46 = vadd.f32 %v5646_v4, %v1638_v35  ;;  %v5974_v34 = vadd.f32 %v1151_v14, %v5904_v20  ;;  %v5977_v51 = vadd.f32 %v1152_v38, %v5932_v63  ;;  %v1016_v12 = vpop.permute.xlu0 %1015  ;;  %v5986_v14 = vpop.f32.mrb[20].mxu0  ;;  %8161 = vst [vmem:[#allocation93_spill] sm:$0xff] %v5991_v39 }
 0x1b6   : > { %v5993_v22 = vunpack.c.l.bf16 %v915_v23  ;;  %v5998_v32 = vadd.f32 %v1153_v31, %v5857_v0  ;;  %v6001_v61 = vadd.f32 %v1154_v36, %v5867_v44  ;;  %v1219_v26 = vmax.f32 %v5935_v30, %v5947_v60 }
 0x1b7   : > { %8158 = vst [vmem:[#allocation90_spill] sm:$0xff] %v5974_v34  ;;  %8159 = vst [vmem:[#allocation91_spill] sm:$0xff] %v5977_v51  ;;  %v1758_v50 = vmul.f32 0.2, %v1694_v33  ;;  %v1759_v35 = vmul.f32 0.2, %v1695_v46  ;;  %v1222_v43 = vmax.f32 %v5974_v34, %v5977_v51  ;;  %v6003_v51 = vunpack.c.h.bf16 %v915_v23 }
 0x1b8   : > { %vm1726_vm9 = vcmp.gt.f32.partialorder %v1694_v33, 0.0  ;;  %vm1727_vm10 = vcmp.gt.f32.partialorder %v1695_v46, 0.0  ;;  %8162 = vst [vmem:[#allocation94_spill] sm:$0xff] %v5993_v22  ;;  %v6005_v34 = vpop.f32.mrb[21].mxu0  ;;  %v1125_v36 = vmul.f32 0.2, %v1061_v59  ;;  %v1867_v23 = vmax.f32 %v5962_v41, %v5965_v47 }
 0x1b9   : > { %v5988_v38 = vpop.permute.xlu1 %2470  ;;  %v1790_v57 = vsel %vm1726_vm9, %v1694_v33, %v1758_v50  ;;  %v1791_v8 = vsel %vm1727_vm10, %v1695_v46, %v1759_v35  ;;  %1223 = vmax.xlane.f32.xlu0 %v1222_v43  ;;  %8163 = vst [vmem:[#allocation95_spill] sm:$0xff] %v6003_v51  ;;  %v1766_v46 = vmul.f32 0.2, %v1702_v11  ;;  %v6015_v50 = vpop.f32.mrb[22].mxu0  ;;  %v1767_v35 = vmul.f32 0.2, %v5971_v45 }
 0x1ba   : > { %8160 = vst [vmem:[#allocation92_spill] sm:$0xff] %v5988_v38  ;;  %v6008_v33 = vadd.f32 %v1790_v57, %v5904_v20  ;;  %v6011_v5 = vadd.f32 %v1791_v8, %v5932_v63  ;;  %vm1734_vm11 = vcmp.gt.f32.partialorder %v1702_v11, 0.0  ;;  %v1065_v31 = vadd.f32 %v5630_v62, %v1016_v12  ;;  %v6024_v8 = vpop.f32.mrb[23].mxu0  ;;  %v6026_v60 = vpop.permute.xlu0 %1669 }
 0x1bb   : > { %vm1093_vm12 = vcmp.gt.f32.partialorder %v1061_v59, 0.0  ;;  %vm1735_vm13 = vcmp.gt.f32.partialorder %v5971_v45, 0.0  ;;  %v1126_v43 = vmul.f32 0.2, %v1062_v48  ;;  %8166 = vst [vmem:[#allocation98_spill] sm:$0xff] %v6026_v60  ;;  %v6032_v47 = vpack.c.bf16 %v5890_v18, %v5859_v13  ;;  %v6041_v38 = vpop.f32.mrb[24].mxu0 }
 0x1bc   : > { %8164 = vst [vmem:[#allocation96_spill] sm:$0xff] %v6008_v33  ;;  %8165 = vst [vmem:[#allocation97_spill] sm:$0xff] %v6011_v5  ;;  %v1861_v57 = vmax.f32 %v6008_v33, %v6011_v5  ;;  %v6036_v41 = vpack.c.bf16 %v5926_v19, %v5909_v40  ;;  %v1066_v5 = vadd.f32 %v5643_v2, %v1016_v12  ;;  %vm1094_vm14 = vcmp.gt.f32.partialorder %v1062_v48, 0.0  ;;  %v6053_v40 = vpop.f32.mrb[25].mxu0 }
 0x1bd   : > { %8167 = vst [vmem:[#allocation99_spill] sm:$0xff] %v6032_v47  ;;  %v1157_v60 = vsel %vm1093_vm12, %v1061_v59, %v1125_v36  ;;  %v6044_v63 = vsel %vm1734_vm11, %v1702_v11, %v1766_v46  ;;  %v6048_v18 = vpack.c.bf16 %v5937_v29, %v5918_v25  ;;  %v6051_v13 = vpack.c.bf16 %v4737_v6, %v5950_v28  ;;  %v6058_v11 = vpop.f32.mrb[26].mxu0 }
 0x1be   : > { %v1634_v30 = vpop.permute.xlu1 %1633  ;;  %8168 = vst [vmem:[#allocation100_spill] sm:$0xff] %v6036_v41  ;;  %1862 = vmax.xlane.f32.xlu1 %v1861_v57  ;;  %v1129_v19 = vmul.f32 0.2, %v1065_v31  ;;  %v6056_v57 = vpack.c.bf16 %v537_v7, %v5957_v15  ;;  %v1158_v59 = vsel %vm1094_vm14, %v1062_v48, %v1126_v43  ;;  %vm1097_vm1 = vcmp.gt.f32.partialorder %v1065_v31, 0.0  ;;  %v6060_v28 = vpop.f32.mrb[27].mxu0 }
 0x1bf   : > { %v1692_v33 = vadd.f32 %v5640_v42, %v1634_v30  ;;  %v1693_v20 = vadd.f32 %v5646_v4, %v1634_v30  ;;  %8169 = vst [vmem:[#allocation101_spill] sm:$0xff] %v6048_v18  ;;  %v1130_v46 = vmul.f32 0.2, %v1066_v5  ;;  %vm1098_vm2 = vcmp.gt.f32.partialorder %v1066_v5, 0.0  ;;  %v1026_v36 = vpop.permute.xlu0 %1025 }
 0x1c0   : > { %8170 = vst [vmem:[#allocation102_spill] sm:$0xff] %v6056_v57  ;;  %v6071_v43 = vadd.f32 %v1157_v60, %v5907_v16 }
 0x1c1   : > { %v1756_v12 = vmul.f32 0.2, %v1692_v33  ;;  %v1757_v30 = vmul.f32 0.2, %v1693_v20  ;;  %vm1724_vm15 = vcmp.gt.f32.partialorder %v1692_v33, 0.0  ;;  %vm1725_vm0 = vcmp.gt.f32.partialorder %v1693_v20, 0.0 }
 0x1c2   : > { %1220 = vmax.xlane.f32.xlu1 %v1219_v26  ;;  %v1799_v26 = vsel %vm1735_vm13, %v5971_v45, %v1767_v35  ;;  %v1162_v60 = vsel %vm1098_vm2, %v1066_v5, %v1130_v46 }
 0x1c3   : > { %v1001_v29 = vpop.permute.xlu1 %1000  ;;  %v1788_v25 = vsel %vm1724_vm15, %v1692_v33, %v1756_v12  ;;  %v1789_v6 = vsel %vm1725_vm0, %v1693_v20, %v1757_v30  ;;  %v6074_v33 = vadd.f32 %v1158_v59, %v5991_v39  ;;  %v1161_v20 = vsel %vm1097_vm1, %v1065_v31, %v1129_v19 }
 0x1c4   : > { %v1059_v41 = vadd.f32 %v5630_v62, %v1001_v29  ;;  %v1060_v15 = vadd.f32 %v5643_v2, %v1001_v29  ;;  %v6065_v7 = vadd.f32 %v1788_v25, %v5832_v24  ;;  %v6068_v48 = vadd.f32 %v1789_v6, %v5851_v49 }
 0x1c5   : > { %8171 = vst [vmem:[#allocation103_spill] sm:$0xff] %v6074_v33  ;;  %v1069_v25 = vadd.f32 %v5630_v62, %v1026_v36  ;;  %v2127_v59 = vmul.bf16 %v5812_v10, %v6056_v57  ;;  %v1070_v31 = vadd.f32 %v5643_v2, %v1026_v36  ;;  %v6089_v6 = vpack.c.bf16 %v6015_v50, %v5986_v14 }
 0x1c6   : > { %v1123_v12 = vmul.f32 0.2, %v1059_v41  ;;  %v1124_v30 = vmul.f32 0.2, %v1060_v15  ;;  %v1858_v29 = vmax.f32 %v6065_v7, %v6068_v48  ;;  %vm1091_vm3 = vcmp.gt.f32.partialorder %v1059_v41, 0.0  ;;  %1868 = vmax.xlane.f32.xlu1 %v1867_v23 }
 0x1c7   : > { %vm1092_vm4 = vcmp.gt.f32.partialorder %v1060_v15, 0.0  ;;  %8172 = vst [vmem:[#allocation104_spill] sm:$0xff] %v6089_v6  ;;  %4332 = vmatprep.subr.bf16.mxu1 %v2127_v59  ;;  %v6102_v36 = vadd.f32 %v1161_v20, %v5993_v22  ;;  %v6105_v14 = vadd.f32 %v1162_v60, %v6003_v51  ;;  %v6109_v50 = vpack.c.bf16 %v6024_v8, %v6005_v34 }
 0x1c8   : > { %v1642_v19 = vpop.permute.xlu1 %1641  ;;  %1859 = vmax.xlane.f32.xlu0 %v1858_v29  ;;  %v1155_v45 = vsel %vm1091_vm3, %v1059_v41, %v1123_v12  ;;  %v1156_v35 = vsel %vm1092_vm4, %v1060_v15, %v1124_v30  ;;  %v1231_v41 = vmax.f32 %v6071_v43, %v6074_v33  ;;  %v8176_v30 = vmax.f32 %v5998_v32, %v6001_v61 }
 0x1c9   : > { %v1696_v49 = vadd.f32 %v5640_v42, %v1642_v19  ;;  %v1697_v23 = vadd.f32 %v5646_v4, %v1642_v19  ;;  %v6094_v5 = vadd.f32 %v1155_v45, %v5853_v21  ;;  %v6097_v46 = vadd.f32 %v1156_v35, %v5855_v3  ;;  %8173 = vst [vmem:[#allocation105_spill] sm:$0xff] %v6102_v36  ;;  %v917_v19 = vld [vmem:[%s5637_s16 + $0x70] sm:$0xff] }
 0x1ca   : > { %8174 = vst [vmem:[#allocation106_spill] sm:$0xff] %v6105_v14  ;;  %8175 = vst [vmem:[#allocation107_spill] sm:$0xff] %v6109_v50  ;;  %1226 = vmax.xlane.f32.xlu1 %v8176_v30  ;;  %v1133_v59 = vmul.f32 0.2, %v1069_v25  ;;  %v1134_v20 = vmul.f32 0.2, %v1070_v31  ;;  %v1488_v60 = vmul.bf16 %v5806_v1, %v6056_v57  ;;  %v6129_v24 = vadd.f32 %v6044_v63, %v5869_v17 }
 0x1cb   : > { %v1760_v15 = vmul.f32 0.2, %v1696_v49  ;;  %v1761_v12 = vmul.f32 0.2, %v1697_v23  ;;  %v1228_v29 = vmax.f32 %v6094_v5, %v6097_v46  ;;  %vm1728_vm5 = vcmp.gt.f32.partialorder %v1696_v49, 0.0 }
 0x1cc   : > { %vm1729_vm6 = vcmp.gt.f32.partialorder %v1697_v23, 0.0  ;;  %vm1101_vm7 = vcmp.gt.f32.partialorder %v1069_v25, 0.0  ;;  %vm1102_vm8 = vcmp.gt.f32.partialorder %v1070_v31, 0.0  ;;  %4396 = vmatprep.subr.bf16.mxu0 %v1488_v60  ;;  %8179 = vst [vmem:[#allocation110_spill] sm:$0xff] %v6129_v24 }
 0x1cd   : > { %v1011_v45 = vpop.permute.xlu1 %1010  ;;  %1229 = vmax.xlane.f32.xlu0 %v1228_v29  ;;  %v1792_v34 = vsel %vm1728_vm5, %v1696_v49, %v1760_v15  ;;  %v1793_v8 = vsel %vm1729_vm6, %v1697_v23, %v1761_v12  ;;  %v6132_v49 = vadd.f32 %v1799_v26, %v5893_v27  ;;  %v6134_v23 = vunpack.c.l.bf16 %v917_v19 }
 0x1ce   : > { %v1063_v35 = vadd.f32 %v5630_v62, %v1011_v45  ;;  %v1064_v30 = vadd.f32 %v5643_v2, %v1011_v45  ;;  %v6122_v3 = vadd.f32 %v1792_v34, %v5857_v0  ;;  %v6125_v21 = vadd.f32 %v1793_v8, %v5867_v44  ;;  %1232 = vmax.xlane.f32.xlu1 %v1231_v41 }
 0x1cf   : > { %8180 = vst [vmem:[#allocation111_spill] sm:$0xff] %v6132_v49  ;;  %8181 = vst [vmem:[#allocation112_spill] sm:$0xff] %v6134_v23  ;;  %v6136_v15 = vunpack.c.h.bf16 %v917_v19  ;;  %v1237_v41 = vmax.f32 %v6102_v36, %v6105_v14  ;;  %v1165_v63 = vsel %vm1101_vm7, %v1069_v25, %v1133_v59  ;;  %v1166_v60 = vsel %vm1102_vm8, %v1070_v31, %v1134_v20 }
 0x1d0   : > { %8177 = vst [vmem:[#allocation108_spill] sm:$0xff] %v6122_v3  ;;  %8178 = vst [vmem:[#allocation109_spill] sm:$0xff] %v6125_v21  ;;  %v1127_v12 = vmul.f32 0.2, %v1063_v35  ;;  %v1128_v29 = vmul.f32 0.2, %v1064_v30  ;;  %v1864_v45 = vmax.f32 %v6122_v3, %v6125_v21  ;;  %v6146_v19 = vpack.c.bf16 %v6058_v11, %v6041_v38 }
 0x1d1   : > { %8182 = vst [vmem:[#allocation113_spill] sm:$0xff] %v6136_v15  ;;  %vm1095_vm9 = vcmp.gt.f32.partialorder %v1063_v35, 0.0  ;;  %vm1096_vm10 = vcmp.gt.f32.partialorder %v1064_v30, 0.0  ;;  %v1873_v31 = vmax.f32 %v6129_v24, %v6132_v49  ;;  %v6159_v59 = vadd.f32 %v1165_v63, %v6134_v23 }
 0x1d2   : > { %v1650_v26 = vpop.permute.xlu1 %1649  ;;  %1865 = vmax.xlane.f32.xlu0 %v1864_v45  ;;  %v1159_v34 = vsel %vm1095_vm9, %v1063_v35, %v1127_v12  ;;  %v1160_v8 = vsel %vm1096_vm10, %v1064_v30, %v1128_v29  ;;  %8183 = vst [vmem:[#allocation114_spill] sm:$0xff] %v6146_v19  ;;  %1238 = vmax.xlane.f32.xlu1 %v1237_v41 }
 0x1d3   : > { %v1700_v44 = vadd.f32 %v5640_v42, %v1650_v26  ;;  %v1701_v0 = vadd.f32 %v5646_v4, %v1650_v26  ;;  %v6151_v14 = vadd.f32 %v1159_v34, %v5869_v17  ;;  %v6154_v25 = vadd.f32 %v1160_v8, %v5893_v27  ;;  %8186 = vst [vmem:[#allocation117_spill] sm:$0xff] %v6159_v59 }
 0x1d4   : > { %v6162_v38 = vadd.f32 %v1166_v60, %v6136_v15  ;;  %v6166_v11 = vpack.c.bf16 %v6060_v28, %v6053_v40  ;;  %v916_v28 = vld [vmem:[%s5637_s16 + $0x68] sm:$0xff] }
 0x1d5   : > { %8184 = vst [vmem:[#allocation115_spill] sm:$0xff] %v6151_v14  ;;  %8185 = vst [vmem:[#allocation116_spill] sm:$0xff] %v6154_v25  ;;  %v1764_v20 = vmul.f32 0.2, %v1700_v44  ;;  %v1765_v35 = vmul.f32 0.2, %v1701_v0  ;;  %v1234_v30 = vmax.f32 %v6151_v14, %v6154_v25 }
 0x1d6   : > { %8187 = vst [vmem:[#allocation118_spill] sm:$0xff] %v6162_v38  ;;  %8188 = vst [vmem:[#allocation119_spill] sm:$0xff] %v6166_v11  ;;  %vm1732_vm11 = vcmp.gt.f32.partialorder %v1700_v44, 0.0  ;;  %vm1733_vm12 = vcmp.gt.f32.partialorder %v1701_v0, 0.0  ;;  %1874 = vmax.xlane.f32.xlu1 %v1873_v31  ;;  %v1243_v26 = vmax.f32 %v6159_v59, %v6162_v38  ;;  %v6185_v31 = vunpack.c.h.bf16 %v916_v28 }
 0x1d7   : > { %v1021_v12 = vpop.permute.xlu1 %1020  ;;  %1235 = vmax.xlane.f32.xlu0 %v1234_v30  ;;  %v1796_v29 = vsel %vm1732_vm11, %v1700_v44, %v1764_v20  ;;  %v1797_v45 = vsel %vm1733_vm12, %v1701_v0, %v1765_v35  ;;  %v6183_v0 = vunpack.c.l.bf16 %v916_v28 }
 0x1d8   : > { %v1067_v41 = vadd.f32 %v5630_v62, %v1021_v12  ;;  %v1068_v63 = vadd.f32 %v5643_v2, %v1021_v12  ;;  %v6173_v60 = vadd.f32 %v1796_v29, %v5907_v16  ;;  %v6176_v40 = vadd.f32 %v1797_v45, %v5991_v39  ;;  %8192 = vst [vmem:[#allocation123_spill] sm:$0xff] %v6185_v31  ;;  %v918_v16 = vld [vmem:[%s5637_s16 + $0x78] sm:$0xff] }
 0x1d9   : > { %8191 = vst [vmem:[#allocation122_spill] sm:$0xff] %v6183_v0 }
 0x1da   : > { %8189 = vst [vmem:[#allocation120_spill] sm:$0xff] %v6173_v60  ;;  %8190 = vst [vmem:[#allocation121_spill] sm:$0xff] %v6176_v40  ;;  %v1131_v34 = vmul.f32 0.2, %v1067_v41  ;;  %v1132_v8 = vmul.f32 0.2, %v1068_v63  ;;  %v1870_v44 = vmax.f32 %v6173_v60, %v6176_v40  ;;  %1244 = vmax.xlane.f32.xlu1 %v1243_v26 }
 0x1db   : > { %vm1099_vm13 = vcmp.gt.f32.partialorder %v1067_v41, 0.0  ;;  %vm1100_vm14 = vcmp.gt.f32.partialorder %v1068_v63, 0.0  ;;  %v8206_v40 = vld [vmem:[#allocation30_spill] sm:$0xff] }
 0x1dc   : > { %v6187_v20 = vpop.permute.xlu1 %1657  ;;  %1871 = vmax.xlane.f32.xlu0 %v1870_v44  ;;  %v1163_v35 = vsel %vm1099_vm13, %v1067_v41, %v1131_v34  ;;  %v1164_v30 = vsel %vm1100_vm14, %v1068_v63, %v1132_v8  ;;  %v6200_v41 = vunpack.c.l.bf16 %v918_v16  ;;  %v6202_v63 = vunpack.c.h.bf16 %v918_v16  ;;  %v8197_v16 = vld [vmem:[#allocation9_spill] sm:$0xff] }
 0x1dd   : > { %v6190_v12 = vadd.f32 %v1163_v35, %v6183_v0  ;;  %v6193_v29 = vadd.f32 %v1164_v30, %v6185_v31 }
 0x1df   : > { %8193 = vst [vmem:[#allocation124_spill] sm:$0xff] %v6190_v12  ;;  %8194 = vst [vmem:[#allocation125_spill] sm:$0xff] %v6193_v29  ;;  %v1240_v45 = vmax.f32 %v6190_v12, %v6193_v29 }
 0x1e1   : > { %v1031_v26 = vpop.permute.xlu1 %1030  ;;  %1241 = vmax.xlane.f32.xlu0 %v1240_v45  ;;  %v8198_v45 = vld [vmem:[#allocation27_spill] sm:$0xff] }
 0x1e2   : > { %v1071_v28 = vadd.f32 %v5630_v62, %v1031_v26  ;;  %v1072_v39 = vadd.f32 %v5643_v2, %v1031_v26  ;;  %v5245_v2 = vmov 3   ;;  %v2515_v26 = vadd.f32 %v5502_v37, %v8198_v45 }
 0x1e4   : > { %v1135_v27 = vmul.f32 0.2, %v1071_v28  ;;  %v1136_v44 = vmul.f32 0.2, %v1072_v39  ;;  %vm1103_vm15 = vcmp.gt.f32.partialorder %v1071_v28, 0.0  ;;  %vm1104_vm0 = vcmp.gt.f32.partialorder %v1072_v39, 0.0 }
 0x1e5   : > { %vm2547_vm3 = vcmp.gt.f32.partialorder %v2515_v26, 0.0 }
 0x1e6   : > { %v1167_v34 = vsel %vm1103_vm15, %v1071_v28, %v1135_v27  ;;  %v1168_v8 = vsel %vm1104_vm0, %v1072_v39, %v1136_v44  ;;  %v2513_v39 = vadd.f32 %v5502_v37, %v5653_v9  ;;  %v2514_v27 = vadd.f32 %v8197_v16, %v5653_v9  ;;  %v8199_v44 = vld [vmem:[#allocation24_spill] sm:$0xff] }
 0x1e7   : > { %v6205_v35 = vadd.f32 %v1167_v34, %v6200_v41  ;;  %v6208_v30 = vadd.f32 %v1168_v8, %v6202_v63  ;;  %v8200_v8 = vld [vmem:[#allocation87_spill] sm:$0xff]  ;;  %v2579_v9 = vmul.f32 0.2, %v2515_v26 }
 0x1e8   : > { %v2577_v28 = vmul.f32 0.2, %v2513_v39  ;;  %v2578_v34 = vmul.f32 0.2, %v2514_v27  ;;  %vm2545_vm1 = vcmp.gt.f32.partialorder %v2513_v39, 0.0  ;;  %vm2546_vm2 = vcmp.gt.f32.partialorder %v2514_v27, 0.0 }
 0x1e9   : > { %8195 = vst [vmem:[#allocation126_spill] sm:$0xff] %v6205_v35  ;;  %8196 = vst [vmem:[#allocation127_spill] sm:$0xff] %v6208_v30  ;;  %v1246_v62 = vmax.f32 %v6205_v35, %v6208_v30  ;;  %v8203_v30 = vld [vmem:[#allocation53_spill] sm:$0xff] }
 0x1ea   : > { %v2517_v35 = vadd.f32 %v5502_v37, %v8203_v30  ;;  %v2610_v17 = vsel %vm2546_vm2, %v2514_v27, %v2578_v34  ;;  %v6256_v34 = vsel %vm2547_vm3, %v2515_v26, %v2579_v9 }
 0x1eb   : > { %1247 = vmax.xlane.f32.xlu0 %v1246_v62  ;;  %2478 = vperm.xlu1 %4843, %v5545_v52   ;;  %v1706_v62 = vadd.f32 %v5640_v42, %v8200_v8  ;;  %v2609_v52 = vsel %vm2545_vm1, %v2513_v39, %v2577_v28  ;;  %v8204_v28 = vld [vmem:[#allocation29_spill] sm:$0xff]  ;;  %v6250_v60 = vadd.f32 %v2610_v17, %v8206_v40 }
 0x1ec   : > { %v6247_v59 = vadd.f32 %v2609_v52, %v8204_v28  ;;  %v2581_v27 = vmul.f32 0.2, %v2517_v35  ;;  %vm2549_vm9 = vcmp.gt.f32.partialorder %v2517_v35, 0.0  ;;  %v8208_v17 = vld [vmem:[#allocation65_spill] sm:$0xff] }
 0x1ed   : > { %v1770_v38 = vmul.f32 0.2, %v1706_v62  ;;  %vm1738_vm4 = vcmp.gt.f32.partialorder %v1706_v62, 0.0  ;;  %8207 = vst [vmem:[#allocation27_spill] sm:$0xff] %v6250_v60  ;;  %v6280_v26 = vadd.f32 %v8197_v16, %v8208_v17 }
 0x1ee   : > { %8205 = vst [vmem:[#allocation9_spill] sm:$0xff] %v6247_v59  ;;  %v2613_v3 = vsel %vm2549_vm9, %v2517_v35, %v2581_v27 }
 0x1ef   : > { %2486 = vperm.xlu1 %4843, %v5551_v54   ;;  %v1666_v54 = vpop.permute.xlu1 %1665  ;;  %vm2556_vm2 = vcmp.gt.f32.partialorder %v6280_v26, 0.0 }
 0x1f0   : > { %v1709_v12 = vadd.f32 %v5646_v4, %v1666_v54 }
 0x1f2   : > { %v1773_v49 = vmul.f32 0.2, %v1709_v12  ;;  %vm1741_vm8 = vcmp.gt.f32.partialorder %v1709_v12, 0.0 }
 0x1f3   : > { %2494 = vperm.xlu1 %4843, %v5557_v56   ;;  %v2516_v56 = vadd.f32 %v8197_v16, %v8198_v45  ;;  %v1708_v45 = vadd.f32 %v5640_v42, %v1666_v54 }
 0x1f4   : > { %v1805_v21 = vsel %vm1741_vm8, %v1709_v12, %v1773_v49  ;;  %v8215_v12 = vld [vmem:[#allocation36_spill] sm:$0xff] }
 0x1f5   : > { %vm2548_vm6 = vcmp.gt.f32.partialorder %v2516_v56, 0.0  ;;  %v1772_v25 = vmul.f32 0.2, %v1708_v45  ;;  %vm1740_vm7 = vcmp.gt.f32.partialorder %v1708_v45, 0.0 }
 0x1f7   : > { %2502 = vperm.xlu1 %4843, %v5565_v58   ;;  %v1707_v58 = vadd.f32 %v5646_v4, %v8200_v8  ;;  %v2518_v8 = vadd.f32 %v8197_v16, %v8203_v30  ;;  %v1804_v36 = vsel %vm1740_vm7, %v1708_v45, %v1772_v25  ;;  %v8214_v25 = vld [vmem:[#allocation33_spill] sm:$0xff] }
 0x1f9   : > { %v1771_v29 = vmul.f32 0.2, %v1707_v58  ;;  %vm1739_vm5 = vcmp.gt.f32.partialorder %v1707_v58, 0.0  ;;  %v2582_v54 = vmul.f32 0.2, %v2518_v8  ;;  %vm2550_vm10 = vcmp.gt.f32.partialorder %v2518_v8, 0.0 }
 0x1fb   : > { %4844 = vset.pattern.permute.xlu1 %v5245_v2  ;;  %v1803_v14 = vsel %vm1739_vm5, %v1707_v58, %v1771_v29  ;;  %v8210_v29 = vld [vmem:[#allocation35_spill] sm:$0xff]  ;;  %v2614_v33 = vsel %vm2550_vm10, %v2518_v8, %v2582_v54  ;;  %v1705_v8 = vadd.f32 %v5646_v4, %v6187_v20  ;;  %v6296_v54 = vadd.f32 %v1804_v36, %v6134_v23 }
 0x1fc   : > { %v6276_v24 = vadd.f32 %v1803_v14, %v6185_v31  ;;  %v8220_v23 = vld [vmem:[#allocation39_spill] sm:$0xff] }
 0x1fd   : > { %8216 = vst [vmem:[#allocation53_spill] sm:$0xff] %v6296_v54  ;;  %vm1737_vm12 = vcmp.gt.f32.partialorder %v1705_v8, 0.0 }
 0x201   : > { %2474 = vperm.xlu0 %4842, %v5547_v53   ;;  %v8202_v53 = vld [vmem:[#allocation37_spill] sm:$0xff] }
 0x202   : > { %v6244_v39 = vadd.f32 %v8197_v16, %v8202_v53  ;;  %8212 = vst [vmem:[#allocation37_spill] sm:$0xff] %v6276_v24 }
 0x204   : > { %v6259_v52 = vmul.f32 0.2, %v6244_v39  ;;  %vm2552_vm0 = vcmp.gt.f32.partialorder %v6244_v39, 0.0 }
 0x205   : > { %2482 = vperm.xlu0 %4842, %v5555_v55   ;;  %v8201_v55 = vld [vmem:[#allocation26_spill] sm:$0xff] }
 0x209   : > { %2490 = vperm.xlu0 %4842, %v8199_v44   ;;  %v6234_v44 = vadd.f32 %v5502_v37, %v8202_v53  ;;  %v1802_v53 = vsel %vm1738_vm4, %v1706_v62, %v1770_v38  ;;  %v8209_v38 = vld [vmem:[#allocation34_spill] sm:$0xff] }
 0x20a   : > { %v6273_v28 = vadd.f32 %v1802_v53, %v6183_v0 }
 0x20b   : > { %v6253_v30 = vmul.f32 0.2, %v6234_v44  ;;  %vm2551_vm15 = vcmp.gt.f32.partialorder %v6234_v44, 0.0 }
 0x20c   : > { %8211 = vst [vmem:[#allocation87_spill] sm:$0xff] %v6273_v28  ;;  %v1879_v27 = vmax.f32 %v6273_v28, %v6276_v24 }
 0x20d   : > { %2498 = vperm.xlu0 %4842, %v8201_v55   ;;  %v2580_v55 = vmul.f32 0.2, %v2516_v56 }
 0x20f   : > { %v6268_v9 = vsel %vm2548_vm6, %v2516_v56, %v2580_v55  ;;  %v1704_v55 = vadd.f32 %v5640_v42, %v6187_v20  ;;  %v8219_v20 = vld [vmem:[#allocation42_spill] sm:$0xff] }
 0x211   : > { %4845 = vset.pattern.permute.xlu0 %v5245_v2  ;;  %v6263_v2 = vadd.f32 %v5502_v37, %v8208_v17  ;;  %v6299_v17 = vadd.f32 %v1805_v21, %v6136_v15  ;;  %v8221_v21 = vld [vmem:[#allocation40_spill] sm:$0xff]  ;;  %vm1736_vm11 = vcmp.gt.f32.partialorder %v1704_v55, 0.0 }
 0x213   : > { %v6285_v53 = vmul.f32 0.2, %v6263_v2  ;;  %8217 = vst [vmem:[#allocation65_spill] sm:$0xff] %v6299_v17  ;;  %vm2555_vm1 = vcmp.gt.f32.partialorder %v6263_v2, 0.0 }
 0x215   : > { %v1203_v40 = vpop.xlane.xlu0 %1202 }
 0x216   : > { %v1249_v58 = vsub.f32 %v8209_v38, %v1203_v40  ;;  %v1250_v62 = vsub.f32 %v8210_v29, %v1203_v40  ;;  %v8213_v29 = vld [vmem:[#allocation98_spill] sm:$0xff] }
 0x217   : > { %v1710_v14 = vadd.f32 %v5640_v42, %v8213_v29 }
 0x218   : > { %v1281_v56 = vmul.f32 1.442695, %v1249_v58  ;;  %v1283_v38 = vmul.f32 1.442695, %v1250_v62  ;;  %v1206_v40 = vpop.xlane.xlu1 %1205  ;;  %v8218_v62 = vld [vmem:[#allocation41_spill] sm:$0xff] }
 0x219   : > { %v1251_v49 = vsub.f32 %v8214_v25, %v1206_v40  ;;  %v1252_v35 = vsub.f32 %v8215_v12, %v1206_v40  ;;  %v1842_v45 = vpop.xlane.xlu0 %1841  ;;  %v1711_v40 = vadd.f32 %v5646_v4, %v8213_v29  ;;  %v1768_v12 = vmul.f32 0.2, %v1704_v55  ;;  %v8222_v29 = vld [vmem:[#allocation43_spill] sm:$0xff] }
 0x21a   : > { %4848 = vpow2.f32 %v1281_v56  ;;  %v1888_v25 = vsub.f32 %v8218_v62, %v1842_v45  ;;  %v1889_v31 = vsub.f32 %v8219_v20, %v1842_v45  ;;  %v1769_v56 = vmul.f32 0.2, %v1705_v8 }
 0x21b   : > { %v1285_v58 = vmul.f32 1.442695, %v1251_v49  ;;  %v1287_v42 = vmul.f32 1.442695, %v1252_v35  ;;  %4850 = vpow2.f32 %v1283_v38  ;;  %1880 = vmax.xlane.f32.xlu1 %v1879_v27  ;;  %v1882_v62 = vmax.f32 %v6296_v54, %v6299_v17  ;;  %v8223_v27 = vld [vmem:[#allocation44_spill] sm:$0xff] }
 0x21c   : > { %v1845_v0 = vpop.xlane.xlu1 %1844  ;;  %v1920_v36 = vmul.f32 1.442695, %v1888_v25  ;;  %v1922_v49 = vmul.f32 1.442695, %v1889_v31  ;;  %v1775_v31 = vmul.f32 0.2, %v1711_v40 }
 0x21d   : > { %4852 = vpow2.f32 %v1285_v58  ;;  %v1890_v24 = vsub.f32 %v8220_v23, %v1845_v0  ;;  %v1891_v15 = vsub.f32 %v8221_v21, %v1845_v0  ;;  %v1212_v35 = vpop.xlane.xlu0 %1211  ;;  %v6312_v23 = vmul.f32 0.2, %v6280_v26  ;;  %v8224_v25 = vld [vmem:[#allocation48_spill] sm:$0xff] }
 0x21e   : > { %4854 = vpow2.f32 %v1287_v42  ;;  %v1255_v45 = vsub.f32 %v8222_v29, %v1212_v35  ;;  %v1256_v58 = vsub.f32 %v8223_v27, %v1212_v35  ;;  %v1774_v0 = vmul.f32 0.2, %v1710_v14  ;;  %v8226_v35 = vld [vmem:[#allocation92_spill] sm:$0xff]  ;;  %v8227_v29 = vld [vmem:[#allocation46_spill] sm:$0xff]  ;;  %v8229_v27 = vld [vmem:[#allocation57_spill] sm:$0xff] }
 0x21f   : > { %4856 = vpow2.f32 %v1920_v36  ;;  %v1924_v4 = vmul.f32 1.442695, %v1890_v24  ;;  %v1926_v38 = vmul.f32 1.442695, %v1891_v15  ;;  %1883 = vmax.xlane.f32.xlu1 %v1882_v62  ;;  %v6315_v20 = vadd.f32 %v2613_v3, %v8224_v25  ;;  %v8225_v24 = vld [vmem:[#allocation49_spill] sm:$0xff]  ;;  %v8232_v25 = vld [vmem:[#allocation51_spill] sm:$0xff] }
 0x220   : > { %4858 = vpow2.f32 %v1922_v49  ;;  %v1851_v42 = vpop.xlane.xlu1 %1850  ;;  %v6318_v15 = vadd.f32 %v2614_v33, %v8225_v24  ;;  %vm1742_vm13 = vcmp.gt.f32.partialorder %v1710_v14, 0.0  ;;  %v1293_v36 = vmul.f32 1.442695, %v1255_v45 }
 0x221   : > { %4860 = vpow2.f32 %v1924_v4  ;;  %v1800_v21 = vsel %vm1736_vm11, %v1704_v55, %v1768_v12  ;;  %v1801_v49 = vsel %vm1737_vm12, %v1705_v8, %v1769_v56  ;;  %vm1743_vm14 = vcmp.gt.f32.partialorder %v1711_v40, 0.0  ;;  %v8230_v8 = vld [vmem:[#allocation47_spill] sm:$0xff]  ;;  %v8231_v56 = vld [vmem:[#allocation50_spill] sm:$0xff] }
 0x222   : > { %4862 = vpow2.f32 %v1926_v38  ;;  %v6323_v62 = vadd.f32 %v5502_v37, %v8226_v35  ;;  %v1295_v4 = vmul.f32 1.442695, %v1256_v58  ;;  %v1894_v38 = vsub.f32 %v8227_v29, %v1851_v42 }
 0x223   : > { %v8228_v3 = vmax.f32 %v6247_v59, %v6250_v60  ;;  %v1209_v33 = vpop.xlane.xlu0 %1208  ;;  %v2119_v45 = vmul.bf16 %v5812_v10, %v8229_v27  ;;  %v1895_v12 = vsub.f32 %v8230_v8, %v1851_v42  ;;  %v1806_v58 = vsel %vm1742_vm13, %v1710_v14, %v1774_v0 }
 0x224   : > { %v4849_v55 = vpop.eup %4848  ;;  %v1253_v24 = vsub.f32 %v8231_v56, %v1209_v33  ;;  %v1254_v54 = vsub.f32 %v8232_v25, %v1209_v33  ;;  %v2679_v59 = vmax.f32 %v6315_v20, %v6318_v15  ;;  %v6342_v60 = vadd.f32 %v1801_v49, %v6003_v51 }
 0x225   : > { %2674 = vmax.xlane.f32.xlu1 %v8228_v3  ;;  %v4851_v29 = vpop.eup %4850  ;;  %v6339_v3 = vadd.f32 %v1800_v21, %v5993_v22  ;;  %v1807_v17 = vsel %vm1743_vm14, %v1711_v40, %v1775_v31  ;;  %4864 = vpow2.f32 %v1293_v36  ;;  %v2128_v25 = vmul.bf16 %v5812_v10, %v6051_v13  ;;  %v8234_v36 = vld [vmem:[#allocation55_spill] sm:$0xff] }
 0x226   : > { %v1289_v42 = vmul.f32 1.442695, %v1253_v24  ;;  %v1291_v8 = vmul.f32 1.442695, %v1254_v54  ;;  %4866 = vpow2.f32 %v1295_v4  ;;  %v1932_v0 = vmul.f32 1.442695, %v1894_v38 }
 0x227   : > { %v4853_v28 = vpop.eup %4852  ;;  %v6350_v21 = vadd.f32 %v1806_v58, %v6200_v41  ;;  %v1934_v56 = vmul.f32 1.442695, %v1895_v12  ;;  %v6355_v54 = vadd.f32 %v1807_v17, %v6202_v63  ;;  %v8235_v38 = vld [vmem:[#allocation56_spill] sm:$0xff]  ;;  %v6363_v12 = vadd.f32 %v8197_v16, %v8226_v35 }
 0x228   : > { %v4855_v14 = vpop.eup %4854  ;;  %v6347_v33 = vpack.c.bf16 %v4853_v28, %v4849_v55  ;;  %4868 = vpow2.f32 %v1289_v42  ;;  %v1848_v40 = vpop.xlane.xlu0 %1847  ;;  %v1876_v28 = vmax.f32 %v6339_v3, %v6342_v60  ;;  %v8236_v58 = vld [vmem:[#allocation52_spill] sm:$0xff]  ;;  %vm2559_vm3 = vcmp.gt.f32.partialorder %v6323_v62, 0.0 }
 0x229   : > { %2680 = vmax.xlane.f32.xlu1 %v2679_v59  ;;  %v4857_v49 = vpop.eup %4856  ;;  %v6352_v31 = vpack.c.bf16 %v4855_v14, %v4851_v29  ;;  %4870 = vpow2.f32 %v1291_v8  ;;  %v1892_v4 = vsub.f32 %v8234_v36, %v1848_v40  ;;  %v1893_v59 = vsub.f32 %v8235_v38, %v1848_v40  ;;  %v8237_v29 = vld [vmem:[#allocation28_spill] sm:$0xff]  ;;  %v8238_v8 = vld [vmem:[#allocation31_spill] sm:$0xff] }
 0x22a   : > { %v4859_v24 = vpop.eup %4858  ;;  %v2120_v17 = vmul.bf16 %v5812_v10, %v8236_v58  ;;  %v6370_v42 = vadd.f32 %v6256_v34, %v8237_v29  ;;  %v6374_v14 = vadd.f32 %v6268_v9, %v8238_v8  ;;  %4872 = vpow2.f32 %v1932_v0  ;;  %v8246_v8 = vld [vmem:[#allocation59_spill] sm:$0xff] }
 0x22b   : > { %8233 = vst [vmem:[#allocation34_spill] sm:$0xff] %v6352_v31  ;;  %v4861_v55 = vpop.eup %4860  ;;  %1393 = vmatprep.mubr.bf16.mxu1 %v6352_v31  ;;  %v1928_v36 = vmul.f32 1.442695, %v1892_v4  ;;  %v1930_v38 = vmul.f32 1.442695, %v1893_v59  ;;  %4874 = vpow2.f32 %v1934_v56  ;;  %v1480_v34 = vmul.bf16 %v5806_v1, %v8229_v27  ;;  %v8240_v59 = vld [vmem:[#allocation32_spill] sm:$0xff] }
 0x22c   : > { %v4863_v40 = vpop.eup %4862  ;;  %1394 = vmatmul.mubr.bf16.vlgmr.msra.gmra.mrb[24].mxu1 %v6347_v33  ;;  %1877 = vmax.xlane.f32.xlu0 %v1876_v28  ;;  %v6377_v35 = vpack.c.bf16 %v4861_v55, %v4857_v49  ;;  %v2129_v9 = vmul.bf16 %v5812_v10, %v6109_v50  ;;  %v1885_v0 = vmax.f32 %v6350_v21, %v6355_v54  ;;  %vm2560_vm4 = vcmp.gt.f32.partialorder %v6363_v12, 0.0 }
 0x22d   : > { %4333 = vmatpush3.bf16.msra.mxu1 %v2119_v45  ;;  %v6379_v31 = vpack.c.bf16 %v4863_v40, %v4859_v24  ;;  %4876 = vpow2.f32 %v1928_v36  ;;  %v1489_v4 = vmul.bf16 %v5806_v1, %v6051_v13  ;;  %v2615_v45 = vsel %vm2551_vm15, %v6234_v44, %v6253_v30  ;;  %v8241_v40 = vld [vmem:[#allocation38_spill] sm:$0xff] }
 0x22e   : > { %4334 = vmatprep.subr.bf16.mxu1 %v2128_v25  ;;  %4878 = vpow2.f32 %v1930_v38  ;;  %v2616_v49 = vsel %vm2552_vm0, %v6244_v39, %v6259_v52  ;;  %v8239_v25 = vld [vmem:[#allocation78_spill] sm:$0xff]  ;;  %v1481_v44 = vmul.bf16 %v5806_v1, %v8236_v58  ;;  %v2676_v30 = vmax.f32 %v6370_v42, %v6374_v14 }
 0x22f   : > { %2032 = vmatprep.mubr.bf16.mxu0 %v6379_v31  ;;  %v2121_v56 = vmul.bf16 %v5812_v10, %v8239_v25  ;;  %v4865_v24 = vpop.eup %4864  ;;  %v2130_v39 = vmul.bf16 %v5812_v10, %v6089_v6  ;;  %v1490_v52 = vmul.bf16 %v5806_v1, %v6109_v50  ;;  %v6412_v28 = vadd.f32 %v2615_v45, %v8240_v59 }
 0x230   : > { %2033 = vmatmul.mubr.bf16.vlgmr.msra.gmra.mrb[28].mxu0 %v6377_v35  ;;  %1886 = vmax.xlane.f32.xlu0 %v1885_v0  ;;  %v4867_v55 = vpop.eup %4866  ;;  %v6415_v36 = vadd.f32 %v2616_v49, %v8241_v40  ;;  %v2620_v38 = vsel %vm2556_vm2, %v6280_v26, %v6312_v23  ;;  %v2591_v0 = vmul.f32 0.2, %v6323_v62  ;;  %v2592_v45 = vmul.f32 0.2, %v6363_v12 }
 0x231   : > { %4335 = vmatpush3.bf16.msra.mxu1 %v2120_v17  ;;  %4397 = vmatpush3.bf16.msra.mxu0 %v1480_v34  ;;  %v2619_v17 = vsel %vm2555_vm1, %v6263_v2, %v6285_v53  ;;  %v1482_v2 = vmul.bf16 %v5806_v1, %v8239_v25  ;;  %v8244_v53 = vld [vmem:[#allocation58_spill] sm:$0xff]  ;;  %v6441_v29 = vadd.f32 %v2620_v38, %v8246_v8 }
 0x232   : > { %4336 = vmatprep.subr.bf16.mxu1 %v2129_v9  ;;  %4398 = vmatprep.subr.bf16.mxu0 %v1489_v4  ;;  %v4869_v34 = vpop.eup %4868  ;;  %v8242_v9 = vld [vmem:[#allocation77_spill] sm:$0xff]  ;;  %v1218_v40 = vpop.xlane.xlu0 %1217  ;;  %v6438_v23 = vadd.f32 %v2619_v17, %v8244_v53  ;;  %v2623_v17 = vsel %vm2559_vm3, %v6323_v62, %v2591_v0  ;;  %v8249_v38 = vld [vmem:[#allocation62_spill] sm:$0xff]  ;;  %v8250_v0 = vld [vmem:[#allocation11_spill] sm:$0xff] }
 0x233   : > { %v2122_v4 = vmul.bf16 %v5812_v10, %v8242_v9  ;;  %v4871_v49 = vpop.eup %4870  ;;  %v6429_v59 = vpack.c.bf16 %v4865_v24, %v4869_v34  ;;  %8247 = vst [vmem:[#allocation33_spill] sm:$0xff] %v6441_v29  ;;  %v2682_v24 = vmax.f32 %v6412_v28, %v6415_v36  ;;  %v2131_v34 = vmul.bf16 %v5812_v10, %v6166_v11 }
 0x234   : > { %2677 = vmax.xlane.f32.xlu0 %v2676_v30  ;;  %v6435_v26 = vpack.c.bf16 %v4867_v55, %v4871_v49  ;;  %8245 = vst [vmem:[#allocation98_spill] sm:$0xff] %v6438_v23  ;;  %v4873_v30 = vpop.eup %4872  ;;  %v1491_v55 = vmul.bf16 %v5806_v1, %v6089_v6  ;;  %v1260_v49 = vsub.f32 %v8249_v38, %v1218_v40  ;;  %v8253_v38 = vld [vmem:[#allocation82_spill] sm:$0xff] }
 0x235   : > { %8243 = vst [vmem:[#allocation35_spill] sm:$0xff] %v6429_v59  ;;  %4337 = vmatpush3.bf16.msra.mxu1 %v2121_v56  ;;  %4399 = vmatpush3.bf16.msra.mxu0 %v1481_v44  ;;  %v4875_v25 = vpop.eup %4874  ;;  %v8248_v56 = vld [vmem:[#allocation61_spill] sm:$0xff]  ;;  %v1483_v62 = vmul.bf16 %v5806_v1, %v8242_v9 }
 0x236   : > { %4338 = vmatprep.subr.bf16.mxu1 %v2130_v39  ;;  %4400 = vmatprep.subr.bf16.mxu0 %v1490_v52  ;;  %v1259_v44 = vsub.f32 %v8248_v56, %v1218_v40  ;;  %v2624_v39 = vsel %vm2560_vm4, %v6363_v12, %v2592_v45  ;;  %v2123_v56 = vmul.bf16 %v5812_v10, %v6032_v47  ;;  %v8251_v45 = vld [vmem:[#allocation79_spill] sm:$0xff] }
 0x237   : > { %1401 = vmatprep.mubr.bf16.mxu1 %v6435_v26  ;;  %v4877_v52 = vpop.eup %4876  ;;  %v1857_v8 = vpop.xlane.xlu1 %1856  ;;  %v2688_v12 = vmax.f32 %v6438_v23, %v6441_v29 }
 0x238   : > { %1402 = vmatmul.mubr.bf16.gmra.mrb[28].mxu1 %v6429_v59  ;;  %2683 = vmax.xlane.f32.xlu0 %v2682_v24  ;;  %v4879_v53 = vpop.eup %4878  ;;  %v6461_v6 = vpack.c.bf16 %v4873_v30, %v4877_v52  ;;  %v6471_v24 = vadd.f32 %v2623_v17, %v8251_v45  ;;  %v6474_v59 = vadd.f32 %v2624_v39, %v8253_v38  ;;  %v1303_v52 = vmul.f32 1.442695, %v1260_v49  ;;  %v8256_v17 = vld [vmem:[#allocation70_spill] sm:$0xff]  ;;  %v8259_v45 = vld [vmem:[#allocation71_spill] sm:$0xff] }
 0x239   : > { %4339 = vmatpush3.bf16.msra.mxu1 %v2122_v4  ;;  %4401 = vmatpush3.bf16.msra.mxu0 %v1482_v2  ;;  %v6468_v40 = vpack.c.bf16 %v4875_v25, %v4879_v53  ;;  %v1301_v4 = vmul.f32 1.442695, %v1259_v44  ;;  %v2132_v2 = vmul.bf16 %v5812_v10, %v6146_v19  ;;  %v1492_v30 = vmul.bf16 %v5806_v1, %v6166_v11  ;;  %v8255_v53 = vld [vmem:[#allocation81_spill] sm:$0xff]  ;;  %v8257_v39 = vld [vmem:[#allocation74_spill] sm:$0xff]  ;;  %v8258_v44 = vld [vmem:[#allocation75_spill] sm:$0xff] }
 0x23a   : > { %3198 = vperm.xlu1 %4844, %v8250_v0   ;;  %4340 = vmatprep.subr.bf16.mxu1 %v2131_v34  ;;  %8252 = vst [vmem:[#allocation36_spill] sm:$0xff] %v6471_v24  ;;  %8254 = vst [vmem:[#allocation41_spill] sm:$0xff] %v6474_v59  ;;  %v2124_v34 = vmul.bf16 %v5812_v10, %v8255_v53  ;;  %v1898_v0 = vsub.f32 %v8256_v17, %v1857_v8  ;;  %v8260_v49 = vld [vmem:[#allocation14_spill] sm:$0xff] }
 0x23b   : > { %4402 = vmatprep.subr.bf16.mxu0 %v1491_v55  ;;  %2040 = vmatprep.mubr.bf16.mxu0 %v6468_v40  ;;  %v1215_v25 = vpop.xlane.xlu1 %1214  ;;  %v1899_v29 = vsub.f32 %v8259_v45, %v1857_v8  ;;  %v2694_v23 = vmax.f32 %v6471_v24, %v6474_v59  ;;  %4880 = vpow2.f32 %v1301_v4  ;;  %v2125_v45 = vmul.bf16 %v5812_v10, %v6048_v18  ;;  %v8274_v59 = vld [vmem:[#allocation83_spill] sm:$0xff] }
 0x23c   : > { %2689 = vmax.xlane.f32.xlu0 %v2688_v12  ;;  %v1257_v38 = vsub.f32 %v8257_v39, %v1215_v25  ;;  %v1258_v55 = vsub.f32 %v8258_v44, %v1215_v25  ;;  %2041 = vmatmul.mubr.bf16.gmra.mrb[32].mxu0 %v6461_v6  ;;  %v1484_v12 = vmul.bf16 %v5806_v1, %v6032_v47  ;;  %4882 = vpow2.f32 %v1303_v52  ;;  %v8264_v52 = vld [vmem:[#allocation85_spill] sm:$0xff] }
 0x23d   : > { %4341 = vmatpush3.bf16.msra.mxu1 %v2123_v56  ;;  %4403 = vmatpush3.bf16.msra.mxu0 %v1483_v62  ;;  %v1493_v25 = vmul.bf16 %v5806_v1, %v6146_v19  ;;  %v1940_v8 = vmul.f32 1.442695, %v1898_v0  ;;  %v8261_v56 = vld [vmem:[#allocation7_spill] sm:$0xff]  ;;  %v1942_v39 = vmul.f32 1.442695, %v1899_v29  ;;  %v8265_v0 = vld [vmem:[#allocation6_spill] sm:$0xff] }
 0x23e   : > { %3202 = vperm.xlu1 %4844, %v8260_v49   ;;  %v1297_v17 = vmul.f32 1.442695, %v1257_v38  ;;  %v1299_v11 = vmul.f32 1.442695, %v1258_v55  ;;  %4342 = vmatprep.subr.bf16.mxu1 %v2132_v2  ;;  %v2133_v62 = vmul.bf16 %v5812_v10, %v8261_v56  ;;  %v8262_v38 = vld [vmem:[#allocation16_spill] sm:$0xff]  ;;  %v1485_v2 = vmul.bf16 %v5806_v1, %v8255_v53 }
 0x23f   : > { %4404 = vmatprep.subr.bf16.mxu0 %v1492_v30  ;;  %v2134_v44 = vmul.bf16 %v5812_v10, %v8265_v0  ;;  %v1494_v29 = vmul.bf16 %v5806_v1, %v8261_v56  ;;  %v8266_v49 = vld [vmem:[#allocation100_spill] sm:$0xff] }
 0x240   : > { %2695 = vmax.xlane.f32.xlu0 %v2694_v23  ;;  %4884 = vpow2.f32 %v1297_v17  ;;  %v8263_v23 = vld [vmem:[#allocation84_spill] sm:$0xff]  ;;  %v8267_v17 = vld [vmem:[#allocation18_spill] sm:$0xff] }
 0x241   : > { %4343 = vmatpush3.bf16.msra.mxu1 %v2124_v34  ;;  %4886 = vpow2.f32 %v1299_v11  ;;  %4405 = vmatpush3.bf16.msra.mxu0 %v1484_v12  ;;  %v1854_v4 = vpop.xlane.xlu0 %1853  ;;  %v2126_v12 = vmul.bf16 %v5812_v10, %v8266_v49  ;;  %v8268_v10 = vmov 1065369472  }
 0x242   : > { %3210 = vperm.xlu1 %4844, %v8262_v38   ;;  %4344 = vmatprep.subr.bf16.mxu1 %v2133_v62  ;;  %v1896_v30 = vsub.f32 %v8263_v23, %v1854_v4  ;;  %v1897_v34 = vsub.f32 %v8264_v52, %v1854_v4  ;;  %4888 = vpow2.f32 %v1940_v8  ;;  %v1495_v8 = vmul.bf16 %v5806_v1, %v8265_v0  ;;  %v8269_v4 = vld [vmem:[#allocation90_spill] sm:$0xff] }
 0x243   : > { %4406 = vmatprep.subr.bf16.mxu0 %v1493_v25  ;;  %4890 = vpow2.f32 %v1942_v39  ;;  %v1486_v25 = vmul.bf16 %v5806_v1, %v6048_v18 }
 0x244   : > { %v1936_v11 = vmul.f32 1.442695, %v1896_v30  ;;  %v1938_v55 = vmul.f32 1.442695, %v1897_v34  ;;  %v8270_v30 = vld [vmem:[#allocation91_spill] sm:$0xff] }
 0x245   : > { %4345 = vmatpush3.bf16.msra.mxu1 %v2125_v45  ;;  %4407 = vmatpush3.bf16.msra.mxu0 %v1485_v2  ;;  %v4881_v38 = vpop.eup %4880 }
 0x246   : > { %3218 = vperm.xlu1 %4844, %v8267_v17   ;;  %4892 = vpow2.f32 %v1936_v11  ;;  %4346 = vmatprep.subr.bf16.mxu1 %v2134_v44  ;;  %v1224_v62 = vpop.xlane.xlu0 %1223  ;;  %v4883_v45 = vpop.eup %4882 }
 0x247   : > { %4408 = vmatprep.subr.bf16.mxu0 %v1494_v29  ;;  %4894 = vpow2.f32 %v1938_v55  ;;  %v1263_v2 = vsub.f32 %v8269_v4, %v1224_v62  ;;  %v1264_v52 = vsub.f32 %v8270_v30, %v1224_v62  ;;  %v8273_v4 = vld [vmem:[#allocation96_spill] sm:$0xff]  ;;  %v8275_v62 = vld [vmem:[#allocation86_spill] sm:$0xff] }
 0x249   : > { %4347 = vmatpush3.bf16.msra.mxu1 %v2126_v12  ;;  %4409 = vmatpush3.bf16.msra.mxu0 %v1486_v25  ;;  %v1309_v55 = vmul.f32 1.442695, %v1263_v2  ;;  %v1311_v17 = vmul.f32 1.442695, %v1264_v52 }
 0x24a   : > { %4460 = vmatprep.subr.bf16.mxu1 %v8268_v10  ;;  %v4885_v39 = vpop.eup %4884  ;;  %4410 = vmatprep.subr.bf16.mxu0 %v1495_v8 }
 0x24b   : > { %v4887_v23 = vpop.eup %4886  ;;  %v1863_v34 = vpop.xlane.xlu1 %1862  ;;  %v6518_v44 = vpack.c.bf16 %v4881_v38, %v4885_v39  ;;  %v8276_v39 = vld [vmem:[#allocation45_spill] sm:$0xff]  ;;  %4896 = vpow2.f32 %v1309_v55 }
 0x24c   : > { %v6520_v29 = vpack.c.bf16 %v4883_v45, %v4887_v23  ;;  %v4889_v11 = vpop.eup %4888  ;;  %v1902_v8 = vsub.f32 %v8273_v4, %v1863_v34  ;;  %v2521_v45 = vadd.f32 %v5502_v37, %v8276_v39  ;;  %v6531_v2 = vadd.f32 %v8197_v16, %v8276_v39  ;;  %v8277_v23 = vld [vmem:[#allocation97_spill] sm:$0xff] }
 0x24d   : > { %8271 = vst [vmem:[#allocation42_spill] sm:$0xff] %v6518_v44  ;;  %v4891_v12 = vpop.eup %4890  ;;  %v1903_v52 = vsub.f32 %v8277_v23, %v1863_v34  ;;  %4898 = vpow2.f32 %v1311_v17  ;;  %v8280_v23 = vld [vmem:[#allocation88_spill] sm:$0xff] }
 0x24e   : > { %8272 = vst [vmem:[#allocation39_spill] sm:$0xff] %v6520_v29  ;;  %1409 = vmatprep.mubr.bf16.mxu1 %v6520_v29  ;;  %v1948_v39 = vmul.f32 1.442695, %v1902_v8  ;;  %vm2553_vm5 = vcmp.gt.f32.partialorder %v2521_v45, 0.0  ;;  %vm2554_vm6 = vcmp.gt.f32.partialorder %v6531_v2, 0.0 }
 0x24f   : > { %1410 = vmatmul.mubr.bf16.gmra.mrb[32].mxu1 %v6518_v44  ;;  %v1221_v25 = vpop.xlane.xlu1 %1220  ;;  %v1950_v34 = vmul.f32 1.442695, %v1903_v52  ;;  %v2585_v55 = vmul.f32 0.2, %v2521_v45 }
 0x250   : > { %v4893_v24 = vpop.eup %4892  ;;  %v1261_v0 = vsub.f32 %v8274_v59, %v1221_v25  ;;  %v1262_v30 = vsub.f32 %v8275_v62, %v1221_v25  ;;  %v8278_v25 = vld [vmem:[#allocation54_spill] sm:$0xff] }
 0x251   : > { %v4895_v38 = vpop.eup %4894  ;;  %v6534_v18 = vpack.c.bf16 %v4889_v11, %v4893_v24  ;;  %v6540_v62 = vadd.f32 %v5502_v37, %v8278_v25  ;;  %v6544_v44 = vadd.f32 %v8197_v16, %v8278_v25  ;;  %v8281_v25 = vld [vmem:[#allocation89_spill] sm:$0xff] }
 0x252   : > { %v1305_v56 = vmul.f32 1.442695, %v1261_v0  ;;  %v1307_v53 = vmul.f32 1.442695, %v1262_v30  ;;  %v6536_v4 = vpack.c.bf16 %v4891_v12, %v4895_v38  ;;  %v8279_v12 = vld [vmem:[#allocation4_spill] sm:$0xff] }
 0x253   : > { %v1869_v59 = vpop.xlane.xlu1 %1868  ;;  %v6553_v17 = vpack.c.bf16 %v8279_v12, %v8279_v12  ;;  %vm2557_vm7 = vcmp.gt.f32.partialorder %v6540_v62, 0.0  ;;  %vm2558_vm8 = vcmp.gt.f32.partialorder %v6544_v44, 0.0 }
 0x254   : > { %4900 = vpow2.f32 %v1305_v56  ;;  %2048 = vmatprep.mubr.bf16.mxu0 %v6536_v4  ;;  %v2586_v56 = vmul.f32 0.2, %v6531_v2  ;;  %v1906_v52 = vsub.f32 %v8280_v23, %v1869_v59 }
 0x255   : > { %v1860_v24 = vpop.xlane.xlu0 %1859  ;;  %4902 = vpow2.f32 %v1307_v53  ;;  %2049 = vmatmul.mubr.bf16.gmra.mrb[36].mxu0 %v6534_v18  ;;  %v1487_v53 = vmul.bf16 %v5806_v1, %v8266_v49 }
 0x256   : > { %v1900_v0 = vsub.f32 %v6065_v7, %v1860_v24  ;;  %v1901_v11 = vsub.f32 %v6068_v48, %v1860_v24  ;;  %4904 = vpow2.f32 %v1948_v39  ;;  %v1907_v24 = vsub.f32 %v8281_v25, %v1869_v59  ;;  %v4897_v59 = vpop.eup %4896 }
 0x257   : > { %v1227_v38 = vpop.xlane.xlu1 %1226  ;;  %4906 = vpow2.f32 %v1950_v34  ;;  %4411 = vmatpush3.bf16.msra.mxu0 %v1487_v53  ;;  %v2617_v34 = vsel %vm2553_vm5, %v2521_v45, %v2585_v55  ;;  %v8282_v53 = vld [vmem:[#allocation103_spill] sm:$0xff]  ;;  %v2618_v45 = vsel %vm2554_vm6, %v6531_v2, %v2586_v56  ;;  %v8283_v55 = vld [vmem:[#allocation60_spill] sm:$0xff] }
 0x258   : > { %v1944_v8 = vmul.f32 1.442695, %v1900_v0  ;;  %v1946_v30 = vmul.f32 1.442695, %v1901_v11  ;;  %v1265_v7 = vsub.f32 %v5998_v32, %v1227_v38  ;;  %v1266_v48 = vsub.f32 %v6001_v61, %v1227_v38 }
 0x259   : > { %v2960_v11 = vmul.bf16 %v6553_v17, %v6056_v57  ;;  %v2589_v32 = vmul.f32 0.2, %v6540_v62  ;;  %v2590_v38 = vmul.f32 0.2, %v6544_v44  ;;  %v1958_v57 = vmul.f32 1.442695, %v1907_v24 }
 0x25a   : > { %v1230_v0 = vpop.xlane.xlu0 %1229  ;;  %4908 = vpow2.f32 %v1944_v8  ;;  %v1313_v12 = vmul.f32 1.442695, %v1265_v7  ;;  %v1315_v19 = vmul.f32 1.442695, %v1266_v48  ;;  %v4899_v7 = vpop.eup %4898  ;;  %v1956_v48 = vmul.f32 1.442695, %v1906_v52 }
 0x25b   : > { %v1267_v39 = vsub.f32 %v6094_v5, %v1230_v0  ;;  %4910 = vpow2.f32 %v1946_v30  ;;  %v1268_v1 = vsub.f32 %v6097_v46, %v1230_v0  ;;  %v1233_v61 = vpop.xlane.xlu1 %1232  ;;  %4524 = vmatprep.subr.bf16.mxu0 %v2960_v11  ;;  %v6577_v0 = vadd.f32 %v2617_v34, %v8283_v55  ;;  %v8285_v11 = vld [vmem:[#allocation108_spill] sm:$0xff]  ;;  %v8288_v24 = vld [vmem:[#allocation105_spill] sm:$0xff]  ;;  %v8291_v34 = vld [vmem:[#allocation63_spill] sm:$0xff] }
 0x25c   : > { %4912 = vpow2.f32 %v1313_v12  ;;  %v1269_v8 = vsub.f32 %v6071_v43, %v1233_v61  ;;  %v1270_v25 = vsub.f32 %v8282_v53, %v1233_v61  ;;  %v8289_v53 = vld [vmem:[#allocation106_spill] sm:$0xff]  ;;  %v6588_v29 = vadd.f32 %v2618_v45, %v8291_v34 }
 0x25d   : > { %v1317_v23 = vmul.f32 1.442695, %v1267_v39  ;;  %4914 = vpow2.f32 %v1315_v19  ;;  %v1319_v5 = vmul.f32 1.442695, %v1268_v1  ;;  %8284 = vst [vmem:[#allocation40_spill] sm:$0xff] %v6577_v0  ;;  %v8286_v19 = vld [vmem:[#allocation109_spill] sm:$0xff] }
 0x25e   : > { %v4901_v30 = vpop.eup %4900  ;;  %v1321_v61 = vmul.f32 1.442695, %v1269_v8  ;;  %v1323_v2 = vmul.f32 1.442695, %v1270_v25  ;;  %8292 = vst [vmem:[#allocation92_spill] sm:$0xff] %v6588_v29  ;;  %v8293_v45 = vld [vmem:[#allocation110_spill] sm:$0xff] }
 0x25f   : > { %4916 = vpow2.f32 %v1317_v23  ;;  %v1866_v46 = vpop.xlane.xlu0 %1865  ;;  %v4903_v12 = vpop.eup %4902  ;;  %v6581_v1 = vpack.c.bf16 %v4897_v59, %v4901_v30 }
 0x260   : > { %4918 = vpow2.f32 %v1319_v5  ;;  %v1239_v43 = vpop.xlane.xlu1 %1238  ;;  %v1904_v52 = vsub.f32 %v8285_v11, %v1866_v46  ;;  %v1905_v39 = vsub.f32 %v8286_v19, %v1866_v46  ;;  %v6585_v47 = vpack.c.bf16 %v4899_v7, %v4903_v12  ;;  %v4905_v5 = vpop.eup %4904 }
 0x261   : > { %8287 = vst [vmem:[#allocation43_spill] sm:$0xff] %v6581_v1  ;;  %v1273_v23 = vsub.f32 %v8288_v24, %v1239_v43  ;;  %v1274_v49 = vsub.f32 %v8289_v53, %v1239_v43  ;;  %4920 = vpow2.f32 %v1956_v48  ;;  %v4907_v59 = vpop.eup %4906  ;;  %v2621_v7 = vsel %vm2557_vm7, %v6540_v62, %v2589_v32  ;;  %v8294_v43 = vld [vmem:[#allocation115_spill] sm:$0xff] }
 0x262   : > { %8290 = vst [vmem:[#allocation44_spill] sm:$0xff] %v6585_v47  ;;  %v1952_v56 = vmul.f32 1.442695, %v1904_v52  ;;  %4922 = vpow2.f32 %v1958_v57  ;;  %v1954_v11 = vmul.f32 1.442695, %v1905_v39  ;;  %1417 = vmatprep.mubr.bf16.mxu1 %v6585_v47  ;;  %v2622_v48 = vsel %vm2558_vm8, %v6544_v44, %v2590_v38  ;;  %v8295_v39 = vld [vmem:[#allocation111_spill] sm:$0xff] }
 0x263   : > { %v1329_v30 = vmul.f32 1.442695, %v1273_v23  ;;  %1418 = vmatmul.mubr.bf16.gmra.mrb[36].mxu1 %v6581_v1  ;;  %v1331_v57 = vmul.f32 1.442695, %v1274_v49  ;;  %v8296_v23 = vld [vmem:[#allocation116_spill] sm:$0xff]  ;;  %v2685_v62 = vmax.f32 %v6577_v0, %v6588_v29 }
 0x264   : > { %4924 = vpow2.f32 %v1952_v56  ;;  %v1875_v8 = vpop.xlane.xlu1 %1874  ;;  %v1236_v46 = vpop.xlane.xlu0 %1235  ;;  %v8297_v38 = vld [vmem:[#allocation64_spill] sm:$0xff] }
 0x265   : > { %v4909_v25 = vpop.eup %4908  ;;  %4926 = vpow2.f32 %v1321_v61  ;;  %v1910_v12 = vsub.f32 %v8293_v45, %v1875_v8  ;;  %v1271_v52 = vsub.f32 %v8294_v43, %v1236_v46  ;;  %v1911_v24 = vsub.f32 %v8295_v39, %v1875_v8  ;;  %v8299_v8 = vld [vmem:[#allocation66_spill] sm:$0xff] }
 0x266   : > { %v4911_v19 = vpop.eup %4910  ;;  %4928 = vpow2.f32 %v1323_v2  ;;  %v1272_v53 = vsub.f32 %v8296_v23, %v1236_v46  ;;  %v6604_v44 = vpack.c.bf16 %v4905_v5, %v4909_v25  ;;  %v6607_v49 = vadd.f32 %v2621_v7, %v8297_v38  ;;  %v8301_v7 = vld [vmem:[#allocation120_spill] sm:$0xff] }
 0x267   : > { %v4913_v32 = vpop.eup %4912  ;;  %4930 = vpow2.f32 %v1954_v11  ;;  %v1325_v56 = vmul.f32 1.442695, %v1271_v52  ;;  %v6611_v2 = vpack.c.bf16 %v4907_v59, %v4911_v19  ;;  %v6614_v46 = vadd.f32 %v2622_v48, %v8299_v8 }
 0x268   : > { %8298 = vst [vmem:[#allocation46_spill] sm:$0xff] %v6607_v49  ;;  %v4915_v61 = vpop.eup %4914  ;;  %4932 = vpow2.f32 %v1329_v30  ;;  %v1327_v45 = vmul.f32 1.442695, %v1272_v53  ;;  %v6609_v43 = vpop.xlane.xlu1 %1244  ;;  %v1964_v23 = vmul.f32 1.442695, %v1910_v12  ;;  %v8302_v30 = vld [vmem:[#allocation121_spill] sm:$0xff] }
 0x269   : > { %8300 = vst [vmem:[#allocation57_spill] sm:$0xff] %v6614_v46  ;;  %v4917_v39 = vpop.eup %4916  ;;  %4934 = vpow2.f32 %v1331_v57  ;;  %v1872_v11 = vpop.xlane.xlu0 %1871  ;;  %v1966_v5 = vmul.f32 1.442695, %v1911_v24  ;;  %2056 = vmatprep.mubr.bf16.mxu0 %v6611_v2  ;;  %v2691_v24 = vmax.f32 %v6607_v49, %v6614_v46 }
 0x26a   : > { %v4919_v52 = vpop.eup %4918  ;;  %2686 = vmax.xlane.f32.xlu1 %v2685_v62  ;;  %v1908_v25 = vsub.f32 %v8301_v7, %v1872_v11  ;;  %v1909_v53 = vsub.f32 %v8302_v30, %v1872_v11  ;;  %v6619_v29 = vpack.c.bf16 %v4917_v39, %v4913_v32  ;;  %4936 = vpow2.f32 %v1325_v56  ;;  %2057 = vmatmul.mubr.bf16.gmra.mrb[40].mxu0 %v6604_v44 }
 0x26b   : > { %v6622_v59 = vpack.c.bf16 %v4919_v52, %v4915_v61  ;;  %v4921_v48 = vpop.eup %4920  ;;  %4938 = vpow2.f32 %v1327_v45  ;;  %v8305_v61 = vld [vmem:[#allocation117_spill] sm:$0xff] }
 0x26c   : > { %8303 = vst [vmem:[#allocation47_spill] sm:$0xff] %v6619_v29  ;;  %v1960_v57 = vmul.f32 1.442695, %v1908_v25  ;;  %v1962_v12 = vmul.f32 1.442695, %v1909_v53  ;;  %v2479_v19 = vpop.permute.xlu1 %2478  ;;  %v4923_v62 = vpop.eup %4922  ;;  %4940 = vpow2.f32 %v1964_v23  ;;  %v1277_v39 = vsub.f32 %v8305_v61, %v6609_v43  ;;  %v8306_v23 = vld [vmem:[#allocation124_spill] sm:$0xff] }
 0x26d   : > { %8304 = vst [vmem:[#allocation50_spill] sm:$0xff] %v6622_v59  ;;  %v2531_v7 = vadd.f32 %v5502_v37, %v2479_v19  ;;  %v2532_v32 = vadd.f32 %v8197_v16, %v2479_v19  ;;  %1425 = vmatprep.mubr.bf16.mxu1 %v6622_v59  ;;  %4942 = vpow2.f32 %v1966_v5  ;;  %v8307_v19 = vld [vmem:[#allocation125_spill] sm:$0xff] }
 0x26e   : > { %v4925_v56 = vpop.eup %4924  ;;  %2692 = vmax.xlane.f32.xlu1 %v2691_v24  ;;  %1426 = vmatmul.mubr.bf16.gmra.mrb[40].mxu1 %v6619_v29  ;;  %v1242_v45 = vpop.xlane.xlu0 %1241  ;;  %4944 = vpow2.f32 %v1960_v57  ;;  %v1337_v50 = vmul.f32 1.442695, %v1277_v39 }
 0x26f   : > { %v4927_v11 = vpop.eup %4926  ;;  %v2595_v52 = vmul.f32 0.2, %v2531_v7  ;;  %v2596_v25 = vmul.f32 0.2, %v2532_v32  ;;  %v1275_v30 = vsub.f32 %v8306_v23, %v1242_v45  ;;  %4946 = vpow2.f32 %v1962_v12 }
 0x270   : > { %v4929_v53 = vpop.eup %4928  ;;  %v1276_v46 = vsub.f32 %v8307_v19, %v1242_v45  ;;  %v2487_v49 = vpop.permute.xlu1 %2486  ;;  %v6634_v0 = vpack.c.bf16 %v4921_v48, %v4925_v56  ;;  %vm2563_vm9 = vcmp.gt.f32.partialorder %v2531_v7, 0.0  ;;  %vm2564_vm10 = vcmp.gt.f32.partialorder %v2532_v32, 0.0  ;;  %v8308_v48 = vld [vmem:[#allocation67_spill] sm:$0xff] }
 0x271   : > { %v4931_v5 = vpop.eup %4930  ;;  %v1333_v61 = vmul.f32 1.442695, %v1275_v30  ;;  %v2535_v24 = vadd.f32 %v5502_v37, %v2487_v49  ;;  %v2536_v29 = vadd.f32 %v8197_v16, %v2487_v49  ;;  %v2627_v23 = vsel %vm2563_vm9, %v2531_v7, %v2595_v52  ;;  %v8310_v30 = vld [vmem:[#allocation68_spill] sm:$0xff] }
 0x272   : > { %v4933_v57 = vpop.eup %4932  ;;  %v1335_v59 = vmul.f32 1.442695, %v1276_v46  ;;  %v6638_v1 = vpack.c.bf16 %v4923_v62, %v4931_v5  ;;  %v2628_v47 = vsel %vm2564_vm10, %v2532_v32, %v2596_v25  ;;  %v6641_v56 = vadd.f32 %v2627_v23, %v8308_v48  ;;  %v8312_v46 = vld [vmem:[#allocation118_spill] sm:$0xff] }
 0x273   : > { %v4935_v12 = vpop.eup %4934  ;;  %4948 = vpow2.f32 %v1333_v61  ;;  %v2599_v45 = vmul.f32 0.2, %v2535_v24  ;;  %v2600_v19 = vmul.f32 0.2, %v2536_v29  ;;  %v6645_v9 = vadd.f32 %v2628_v47, %v8310_v30  ;;  %v8315_v61 = vld [vmem:[#allocation76_spill] sm:$0xff] }
 0x274   : > { %8309 = vst [vmem:[#allocation51_spill] sm:$0xff] %v6641_v56  ;;  %4950 = vpow2.f32 %v1335_v59  ;;  %2064 = vmatprep.mubr.bf16.mxu0 %v6638_v1  ;;  %vm2567_vm11 = vcmp.gt.f32.partialorder %v2535_v24, 0.0  ;;  %vm2568_vm12 = vcmp.gt.f32.partialorder %v2536_v29, 0.0  ;;  %v4937_v49 = vpop.eup %4936  ;;  %v1278_v62 = vsub.f32 %v8312_v46, %v6609_v43  ;;  %v8313_v59 = vld [vmem:[#allocation73_spill] sm:$0xff]  ;;  %v8317_v46 = vld [vmem:[#allocation126_spill] sm:$0xff] }
 0x275   : > { %8311 = vst [vmem:[#allocation55_spill] sm:$0xff] %v6645_v9  ;;  %2065 = vmatmul.mubr.bf16.gmra.mrb[44].mxu0 %v6634_v0  ;;  %v2631_v7 = vsel %vm2567_vm11, %v2535_v24, %v2599_v45  ;;  %v2632_v32 = vsel %vm2568_vm12, %v2536_v29, %v2600_v19  ;;  %v4939_v52 = vpop.eup %4938  ;;  %v2700_v25 = vmax.f32 %v6641_v56, %v6645_v9  ;;  %4952 = vpow2.f32 %v1337_v50 }
 0x276   : > { %v6653_v5 = vadd.f32 %v2631_v7, %v8313_v59  ;;  %v6656_v47 = vadd.f32 %v2632_v32, %v8315_v61  ;;  %v4941_v23 = vpop.eup %4940  ;;  %v6658_v30 = vpack.c.bf16 %v4937_v49, %v4927_v11  ;;  %v6660_v43 = vpack.c.bf16 %v4939_v52, %v4929_v53  ;;  %v8318_v59 = vld [vmem:[#allocation127_spill] sm:$0xff] }
 0x277   : > { %v4943_v48 = vpop.eup %4942  ;;  %2701 = vmax.xlane.f32.xlu0 %v2700_v25  ;;  %v1339_v19 = vmul.f32 1.442695, %v1278_v62 }
 0x278   : > { %8314 = vst [vmem:[#allocation56_spill] sm:$0xff] %v6653_v5  ;;  %8316 = vst [vmem:[#allocation52_spill] sm:$0xff] %v6656_v47  ;;  %v1248_v24 = vpop.xlane.xlu0 %1247  ;;  %v2706_v29 = vmax.f32 %v6653_v5, %v6656_v47  ;;  %v4945_v45 = vpop.eup %4944  ;;  %1433 = vmatprep.mubr.bf16.mxu1 %v6660_v43 }
 0x279   : > { %v1279_v7 = vsub.f32 %v8317_v46, %v1248_v24  ;;  %v1280_v9 = vsub.f32 %v8318_v59, %v1248_v24  ;;  %v4947_v32 = vpop.eup %4946  ;;  %1434 = vmatmul.mubr.bf16.gmra.mrb[44].mxu1 %v6658_v30  ;;  %v6668_v11 = vpack.c.bf16 %v4941_v23, %v4945_v45  ;;  %4954 = vpow2.f32 %v1339_v19 }
 0x27a   : > { %v6670_v49 = vpack.c.bf16 %v4943_v48, %v4947_v32 }
 0x27b   : > { %v1341_v39 = vmul.f32 1.442695, %v1279_v7  ;;  %v1343_v53 = vmul.f32 1.442695, %v1280_v9  ;;  %2707 = vmax.xlane.f32.xlu0 %v2706_v29  ;;  %v8319_v7 = vld [vmem:[#allocation69_spill] sm:$0xff] }
 0x27c   : > { %2072 = vmatprep.mubr.bf16.mxu0 %v6670_v49 }
 0x27d   : > { %v4949_v52 = vpop.eup %4948  ;;  %4956 = vpow2.f32 %v1341_v39  ;;  %2073 = vmatmul.mubr.bf16.gmra.mrb[48].mxu0 %v6668_v11  ;;  %v8321_v39 = vld [vmem:[#allocation72_spill] sm:$0xff] }
 0x27e   : > { %v4951_v62 = vpop.eup %4950  ;;  %4958 = vpow2.f32 %v1343_v53  ;;  %v6676_v59 = vpack.c.bf16 %v4949_v52, %v4933_v57 }
 0x27f   : > { %v6674_v25 = vpack.c.bf16 %v4951_v62, %v4935_v12  ;;  %v4953_v46 = vpop.eup %4952 }
 0x280   : > { %v2475_v23 = vpop.permute.xlu0 %2474 }
 0x281   : > { %1441 = vmatprep.mubr.bf16.mxu1 %v6674_v25  ;;  %v2529_v50 = vadd.f32 %v5502_v37, %v2475_v23  ;;  %v2530_v9 = vadd.f32 %v8197_v16, %v2475_v23 }
 0x282   : > { %1442 = vmatmul.mubr.bf16.gmra.mrb[48].mxu1 %v6676_v59 }
 0x283   : > { %vm2561_vm13 = vcmp.gt.f32.partialorder %v2529_v50, 0.0  ;;  %vm2562_vm14 = vcmp.gt.f32.partialorder %v2530_v9, 0.0  ;;  %v2593_v48 = vmul.f32 0.2, %v2529_v50  ;;  %v2594_v24 = vmul.f32 0.2, %v2530_v9  ;;  %v4955_v52 = vpop.eup %4954 }
 0x284   : > { %v2483_v29 = vpop.permute.xlu0 %2482 }
 0x285   : > { %v2533_v45 = vadd.f32 %v5502_v37, %v2483_v29  ;;  %v2534_v12 = vadd.f32 %v8197_v16, %v2483_v29  ;;  %v2625_v57 = vsel %vm2561_vm13, %v2529_v50, %v2593_v48  ;;  %v2626_v19 = vsel %vm2562_vm14, %v2530_v9, %v2594_v24  ;;  %v8324_v24 = vld [vmem:[#allocation80_spill] sm:$0xff] }
 0x286   : > { %v6685_v32 = vadd.f32 %v2625_v57, %v8319_v7  ;;  %v6688_v53 = vadd.f32 %v2626_v19, %v8321_v39  ;;  %v8326_v19 = vld [vmem:[#allocation93_spill] sm:$0xff] }
 0x287   : > { %vm2565_vm15 = vcmp.gt.f32.partialorder %v2533_v45, 0.0  ;;  %vm2566_vm0 = vcmp.gt.f32.partialorder %v2534_v12, 0.0  ;;  %v2597_v62 = vmul.f32 0.2, %v2533_v45  ;;  %v2598_v23 = vmul.f32 0.2, %v2534_v12  ;;  %v4957_v61 = vpop.eup %4956 }
 0x288   : > { %8320 = vst [vmem:[#allocation61_spill] sm:$0xff] %v6685_v32  ;;  %8322 = vst [vmem:[#allocation62_spill] sm:$0xff] %v6688_v53  ;;  %v2697_v47 = vmax.f32 %v6685_v32, %v6688_v53  ;;  %v4959_v5 = vpop.eup %4958  ;;  %v6692_v29 = vpack.c.bf16 %v4957_v61, %v4953_v46 }
 0x289   : > { %v2629_v50 = vsel %vm2565_vm15, %v2533_v45, %v2597_v62  ;;  %v6694_v9 = vpack.c.bf16 %v4959_v5, %v4955_v52  ;;  %v2630_v48 = vsel %vm2566_vm0, %v2534_v12, %v2598_v23  ;;  %v8328_v5 = vld [vmem:[#allocation12_spill] sm:$0xff]  ;;  %v8330_v45 = vld [vmem:[#allocation15_spill] sm:$0xff]  ;;  %v8335_v52 = vld [vmem:[#allocation21_spill] sm:$0xff] }
 0x28a   : > { %8323 = vst [vmem:[#allocation11_spill] sm:$0xff] %v6692_v29  ;;  %2698 = vmax.xlane.f32.xlu1 %v2697_v47  ;;  %v6697_v57 = vadd.f32 %v2629_v50, %v8324_v24  ;;  %v6701_v39 = vadd.f32 %v2630_v48, %v8326_v19  ;;  %v8329_v47 = vld [vmem:[#allocation13_spill] sm:$0xff]  ;;  %v8333_v12 = vld [vmem:[#allocation19_spill] sm:$0xff] }
 0x28b   : > { %1449 = vmatprep.mubr.bf16.mxu1 %v6694_v9  ;;  %v8337_v23 = vld [vmem:[#allocation23_spill] sm:$0xff]  ;;  %v8339_v48 = vld [vmem:[#allocation25_spill] sm:$0xff] }
 0x28c   : > { %8325 = vst [vmem:[#allocation70_spill] sm:$0xff] %v6697_v57  ;;  %8327 = vst [vmem:[#allocation74_spill] sm:$0xff] %v6701_v39  ;;  %1450 = vmatmul.mubr.bf16.gmra.mrb[52].mxu1 %v6692_v29  ;;  %v2703_v61 = vmax.f32 %v6697_v57, %v6701_v39  ;;  %v8343_v39 = vld [vmem:[#allocation122_spill] sm:$0xff] }
 0x28d   : > { %2167 = vmatprep.mubr.bf16.mxu1 %v6379_v31  ;;  %v8331_v31 = vld [vmem:[#allocation17_spill] sm:$0xff] }
 0x28e   : > { %2704 = vmax.xlane.f32.xlu1 %v2703_v61 }
 0x291   : > { %3194 = vperm.xlu0 %4845, %v8328_v5   ;;  %v2491_v5 = vpop.permute.xlu0 %2490 }
 0x292   : > { %v2538_v24 = vadd.f32 %v8197_v16, %v2491_v5 }
 0x294   : > { %2168 = vmatmul.mubr.bf16.vlgmr.msra.gmra.mrb[56].mxu1 %v6377_v35  ;;  %v2495_v35 = vpop.permute.xlu1 %2494  ;;  %vm2570_vm6 = vcmp.gt.f32.partialorder %v2538_v24, 0.0 }
 0x295   : > { %3206 = vperm.xlu0 %4845, %v8329_v47   ;;  %2175 = vmatprep.mubr.bf16.mxu1 %v6468_v40  ;;  %v8332_v40 = vld [vmem:[#allocation20_spill] sm:$0xff]  ;;  %v2540_v61 = vadd.f32 %v8197_v16, %v2495_v35 }
 0x296   : > { %4461 = vmatpush3.bf16.msra.mxu1 %v8268_v10 }
 0x297   : > { %4462 = vmatprep.subr.bf16.mxu1 %v8268_v10  ;;  %vm2572_vm2 = vcmp.gt.f32.partialorder %v2540_v61, 0.0 }
 0x298   : > { %v2503_v46 = vpop.permute.xlu1 %2502 }
 0x299   : > { %3214 = vperm.xlu0 %4845, %v8330_v45  }
 0x29a   : > { %4463 = vmatpush3.bf16.msra.mxu1 %v8268_v10 }
 0x29b   : > { %4464 = vmatprep.subr.bf16.mxu1 %v8268_v10 }
 0x29c   : > { %2176 = vmatmul.mubr.bf16.gmra.mrb[60].mxu1 %v6461_v6  ;;  %v8334_v6 = vld [vmem:[#allocation22_spill] sm:$0xff] }
 0x29d   : > { %3222 = vperm.xlu0 %4845, %v8331_v31   ;;  %2183 = vmatprep.mubr.bf16.mxu1 %v6536_v4  ;;  %v8336_v4 = vld [vmem:[#allocation24_spill] sm:$0xff]  ;;  %v2543_v31 = vadd.f32 %v5502_v37, %v2503_v46 }
 0x29e   : > { %4465 = vmatpush3.bf16.msra.mxu1 %v8268_v10 }
 0x29f   : > { %4466 = vmatprep.subr.bf16.mxu1 %v8268_v10  ;;  %3226 = vperm.xlu1 %4844, %v8332_v40   ;;  %v2604_v40 = vmul.f32 0.2, %v2540_v61  ;;  %vm2575_vm3 = vcmp.gt.f32.partialorder %v2543_v31, 0.0 }
 0x2a1   : > { %3230 = vperm.xlu0 %4845, %v8333_v12   ;;  %v8341_v12 = vld [vmem:[#allocation87_spill] sm:$0xff]  ;;  %v2636_v19 = vsel %vm2572_vm2, %v2540_v61, %v2604_v40  ;;  %v8347_v61 = vld [vmem:[#allocation65_spill] sm:$0xff] }
 0x2a2   : > { %4467 = vmatpush3.bf16.msra.mxu1 %v8268_v10 }
 0x2a3   : > { %4468 = vmatprep.subr.bf16.mxu1 %v8268_v10  ;;  %3234 = vperm.xlu1 %4844, %v8334_v6  }
 0x2a4   : > { %2184 = vmatmul.mubr.bf16.gmra.mrb[64].mxu1 %v6534_v18  ;;  %v8338_v18 = vld [vmem:[#allocation26_spill] sm:$0xff] }
 0x2a5   : > { %3238 = vperm.xlu0 %4845, %v8335_v52   ;;  %2191 = vmatprep.mubr.bf16.mxu1 %v6611_v2  ;;  %v2539_v2 = vadd.f32 %v5502_v37, %v2495_v35  ;;  %v2499_v35 = vpop.permute.xlu0 %2498 }
 0x2a6   : > { %4469 = vmatpush3.bf16.msra.mxu1 %v8268_v10 }
 0x2a7   : > { %4470 = vmatprep.subr.bf16.mxu1 %v8268_v10  ;;  %3242 = vperm.xlu1 %4844, %v8336_v4   ;;  %v2603_v45 = vmul.f32 0.2, %v2539_v2  ;;  %vm2571_vm1 = vcmp.gt.f32.partialorder %v2539_v2, 0.0  ;;  %v2607_v4 = vmul.f32 0.2, %v2543_v31 }
 0x2a8   : > { %v1881_v62 = vpop.xlane.xlu1 %1880 }
 0x2a9   : > { %3246 = vperm.xlu0 %4845, %v8337_v23   ;;  %v1914_v6 = vsub.f32 %v8341_v12, %v1881_v62  ;;  %v8342_v23 = vld [vmem:[#allocation37_spill] sm:$0xff] }
 0x2aa   : > { %4471 = vmatpush3.bf16.msra.mxu1 %v8268_v10 }
 0x2ab   : > { %4472 = vmatprep.subr.bf16.mxu1 %v8268_v10  ;;  %3250 = vperm.xlu1 %4844, %v8338_v18   ;;  %v1915_v18 = vsub.f32 %v8342_v23, %v1881_v62  ;;  %v1972_v7 = vmul.f32 1.442695, %v1914_v6 }
 0x2ac   : > { %2192 = vmatmul.mubr.bf16.gmra.mrb[68].mxu1 %v6604_v44  ;;  %v6737_v50 = vpop.xlane.xlu1 %1883  ;;  %v8340_v44 = vmov 0  }
 0x2ad   : > { %3254 = vperm.xlu0 %4845, %v8339_v48   ;;  %2199 = vmatprep.mubr.bf16.mxu1 %v6638_v1  ;;  %v2544_v1 = vadd.f32 %v8197_v16, %v2503_v46  ;;  %v2635_v48 = vsel %vm2571_vm1, %v2539_v2, %v2603_v45  ;;  %v1974_v53 = vmul.f32 1.442695, %v1915_v18  ;;  %v6770_v45 = vsel %vm2575_vm3, %v2543_v31, %v2607_v4 }
 0x2ae   : > { %4473 = vmatpush3.bf16.msra.mxu1 %v8268_v10  ;;  %v6764_v57 = vadd.f32 %v2635_v48, %v8343_v39  ;;  %v1917_v40 = vsub.f32 %v8347_v61, %v6737_v50  ;;  %v2541_v48 = vadd.f32 %v5502_v37, %v2499_v35  ;;  %v2542_v18 = vadd.f32 %v8197_v16, %v2499_v35  ;;  %v8348_v61 = vld [vmem:[#allocation53_spill] sm:$0xff] }
 0x2af   : > { %4474 = vmatprep.subr.bf16.mxu1 %v8268_v10  ;;  %4846 = vset.pattern.permute.xlu1 %v8340_v44  ;;  %v2608_v46 = vmul.f32 0.2, %v2544_v1  ;;  %vm2576_vm4 = vcmp.gt.f32.partialorder %v2544_v1, 0.0  ;;  %4960 = vpow2.f32 %v1972_v7 }
 0x2b0   : > { %8344 = vst [vmem:[#allocation75_spill] sm:$0xff] %v6764_v57  ;;  %4962 = vpow2.f32 %v1974_v53  ;;  %v1978_v39 = vmul.f32 1.442695, %v1917_v40  ;;  %vm2573_vm7 = vcmp.gt.f32.partialorder %v2541_v48, 0.0  ;;  %vm2574_vm8 = vcmp.gt.f32.partialorder %v2542_v18, 0.0 }
 0x2b1   : > { %4847 = vset.pattern.permute.xlu0 %v8340_v44  ;;  %v2537_v44 = vadd.f32 %v5502_v37, %v2491_v5  ;;  %v6775_v6 = vsel %vm2576_vm4, %v2544_v1, %v2608_v46  ;;  %v8349_v1 = vld [vmem:[#allocation8_spill] sm:$0xff]  ;;  %v8350_v37 = vld [vmem:[#allocation10_spill] sm:$0xff]  ;;  %v2605_v35 = vmul.f32 0.2, %v2541_v48  ;;  %v2606_v53 = vmul.f32 0.2, %v2542_v18 }
 0x2b2   : > { %v6745_v47 = vpop.xlane.xlu1 %2674  ;;  %4475 = vmatpush3.bf16.msra.mxu1 %v8268_v10 }
 0x2b3   : > { %4588 = vmatprep.subr.bf16.mxu1 %v8268_v10  ;;  %vm2569_vm5 = vcmp.gt.f32.partialorder %v2537_v44, 0.0  ;;  %v2601_v23 = vmul.f32 0.2, %v2537_v44 }
 0x2b4   : > { %2200 = vmatmul.mubr.bf16.gmra.mrb[72].mxu1 %v6634_v0 }
 0x2b5   : > { %2207 = vmatprep.mubr.bf16.mxu1 %v6670_v49  ;;  %v8345_v49 = vld [vmem:[#allocation123_spill] sm:$0xff] }
 0x2b6   : > { %v6755_v52 = vpop.xlane.xlu1 %2680  ;;  %v6768_v2 = vadd.f32 %v2636_v19, %v8345_v49 }
 0x2b8   : > { %8346 = vst [vmem:[#allocation71_spill] sm:$0xff] %v6768_v2 }
 0x2b9   : > { %v1878_v0 = vpop.xlane.xlu0 %1877 }
 0x2ba   : > { %v6761_v12 = vpop.permute.xlu1 %3198  ;;  %v1912_v62 = vsub.f32 %v6339_v3, %v1878_v0  ;;  %v1913_v5 = vsub.f32 %v6342_v60, %v1878_v0  ;;  %v2602_v3 = vmul.f32 0.2, %v2538_v24  ;;  %v1916_v60 = vsub.f32 %v8348_v61, %v6737_v50 }
 0x2bc   : > { %v1968_v19 = vmul.f32 1.442695, %v1912_v62  ;;  %v1970_v49 = vmul.f32 1.442695, %v1913_v5  ;;  %2208 = vmatmul.mubr.bf16.gmra.mrb[76].mxu1 %v6668_v11  ;;  %v2633_v11 = vsel %vm2569_vm5, %v2537_v44, %v2601_v23  ;;  %v2634_v61 = vsel %vm2570_vm6, %v2538_v24, %v2602_v3 }
 0x2bd   : > { %v1887_v4 = vpop.xlane.xlu0 %1886  ;;  %v1976_v32 = vmul.f32 1.442695, %v1916_v60  ;;  %v2712_v24 = vmax.f32 %v6764_v57, %v6768_v2  ;;  %v6796_v3 = vadd.f32 %v2633_v11, %v5993_v22 }
 0x2be   : > { %v3203_v31 = vpop.permute.xlu1 %3202  ;;  %v1919_v0 = vsub.f32 %v6355_v54, %v1887_v4  ;;  %4964 = vpow2.f32 %v1968_v19  ;;  %v1918_v7 = vsub.f32 %v6350_v21, %v1887_v4  ;;  %v8351_v54 = vld [vmem:[#allocation27_spill] sm:$0xff] }
 0x2bf   : > { %v3269_v46 = vadd.f32 %v8349_v1, %v3203_v31  ;;  %v3270_v16 = vadd.f32 %v8350_v37, %v3203_v31  ;;  %4966 = vpow2.f32 %v1970_v49  ;;  %v2722_v40 = vsub.f32 %v8351_v54, %v6745_v47 }
 0x2c0   : > { %v1982_v62 = vmul.f32 1.442695, %v1919_v0  ;;  %4968 = vpow2.f32 %v1978_v39  ;;  %v1980_v49 = vmul.f32 1.442695, %v1918_v7  ;;  %v2637_v7 = vsel %vm2573_vm7, %v2541_v48, %v2605_v35 }
 0x2c1   : > { %v2678_v50 = vpop.xlane.xlu0 %2677  ;;  %vm3301_vm9 = vcmp.gt.f32.partialorder %v3269_v46, 0.0  ;;  %v3333_v21 = vmul.f32 0.2, %v3269_v46  ;;  %v3334_v31 = vmul.f32 0.2, %v3270_v16  ;;  %vm3302_vm10 = vcmp.gt.f32.partialorder %v3270_v16, 0.0 }
 0x2c2   : > { %v3211_v5 = vpop.permute.xlu1 %3210  ;;  %v2724_v19 = vsub.f32 %v6374_v14, %v2678_v50  ;;  %4970 = vpow2.f32 %v1982_v62  ;;  %v6799_v14 = vadd.f32 %v2634_v61, %v6003_v51  ;;  %v2755_v39 = vmul.f32 1.442695, %v2722_v40 }
 0x2c3   : > { %v3273_v44 = vadd.f32 %v8349_v1, %v3211_v5  ;;  %v3274_v23 = vadd.f32 %v8350_v37, %v3211_v5  ;;  %4972 = vpow2.f32 %v1976_v32  ;;  %v2638_v62 = vsel %vm2574_vm8, %v2542_v18, %v2606_v53  ;;  %v4961_v5 = vpop.eup %4960 }
 0x2c4   : > { %v2759_v4 = vmul.f32 1.442695, %v2724_v19  ;;  %4974 = vpow2.f32 %v1980_v49  ;;  %v2723_v54 = vsub.f32 %v6370_v42, %v2678_v50  ;;  %v3365_v19 = vsel %vm3301_vm9, %v3269_v46, %v3333_v21  ;;  %v4963_v2 = vpop.eup %4962  ;;  %v8352_v42 = vld [vmem:[#allocation9_spill] sm:$0xff]  ;;  %v8353_v21 = vld [vmem:[#allocation48_spill] sm:$0xff] }
 0x2c5   : > { %v6801_v60 = vpop.xlane.xlu0 %2683  ;;  %v3366_v11 = vsel %vm3302_vm10, %v3270_v16, %v3334_v31  ;;  %v3337_v57 = vmul.f32 0.2, %v3273_v44  ;;  %v3338_v61 = vmul.f32 0.2, %v3274_v23  ;;  %vm3305_vm11 = vcmp.gt.f32.partialorder %v3273_v44, 0.0  ;;  %v8355_v49 = vld [vmem:[#allocation49_spill] sm:$0xff] }
 0x2c6   : > { %v3219_v0 = vpop.permute.xlu1 %3218  ;;  %vm3306_vm12 = vcmp.gt.f32.partialorder %v3274_v23, 0.0  ;;  %4976 = vpow2.f32 %v2759_v4  ;;  %v2728_v48 = vsub.f32 %v6415_v36, %v6801_v60  ;;  %v2721_v46 = vsub.f32 %v8352_v42, %v6745_v47  ;;  %v8365_v42 = vld [vmem:[#allocation34_spill] sm:$0xff] }
 0x2c7   : > { %v3277_v32 = vadd.f32 %v8349_v1, %v3219_v0  ;;  %v3278_v40 = vadd.f32 %v8350_v37, %v3219_v0  ;;  %4978 = vpow2.f32 %v2755_v39  ;;  %v2726_v16 = vsub.f32 %v6318_v15, %v6755_v52 }
 0x2c8   : > { %v4965_v51 = vpop.eup %4964  ;;  %v2757_v53 = vmul.f32 1.442695, %v2723_v54  ;;  %v6817_v31 = vadd.f32 %v3365_v19, %v8353_v21  ;;  %v6820_v0 = vadd.f32 %v3366_v11, %v8355_v49  ;;  %v3369_v36 = vsel %vm3305_vm11, %v3273_v44, %v3337_v57  ;;  %v8358_v19 = vld [vmem:[#allocation113_spill] sm:$0xff] }
 0x2c9   : > { %v4967_v18 = vpop.eup %4966  ;;  %v1996_v35 = vpack.c.bf16 %v4961_v5, %v4965_v51  ;;  %v3341_v4 = vmul.f32 0.2, %v3277_v32  ;;  %v3342_v22 = vmul.f32 0.2, %v3278_v40  ;;  %v3370_v29 = vsel %vm3306_vm12, %v3274_v23, %v3338_v61  ;;  %v8357_v5 = vld [vmem:[#allocation112_spill] sm:$0xff] }
 0x2ca   : > { %v1997_v50 = vpack.c.bf16 %v4963_v2, %v4967_v18  ;;  %8354 = vst [vmem:[#allocation14_spill] sm:$0xff] %v6817_v31  ;;  %8356 = vst [vmem:[#allocation16_spill] sm:$0xff] %v6820_v0  ;;  %v4969_v56 = vpop.eup %4968  ;;  %vm3309_vm13 = vcmp.gt.f32.partialorder %v3277_v32, 0.0  ;;  %vm3310_vm14 = vcmp.gt.f32.partialorder %v3278_v40, 0.0  ;;  %v2767_v47 = vmul.f32 1.442695, %v2728_v48 }
 0x2cb   : > { %v2709_v51 = vmax.f32 %v6796_v3, %v6799_v14  ;;  %v2753_v2 = vmul.f32 1.442695, %v2721_v46  ;;  %v2763_v39 = vmul.f32 1.442695, %v2726_v16  ;;  %v6825_v54 = vadd.f32 %v2637_v7, %v8357_v5 }
 0x2cc   : > { %2713 = vmax.xlane.f32.xlu0 %v2712_v24  ;;  %2080 = vmatprep.mubr.bf16.mxu0 %v1997_v50  ;;  %v4971_v15 = vpop.eup %4970  ;;  %v6828_v57 = vadd.f32 %v2638_v62, %v8358_v19  ;;  %v3431_v44 = vmax.f32 %v6817_v31, %v6820_v0  ;;  %v6833_v24 = vadd.f32 %v3369_v36, %v8283_v55  ;;  %4980 = vpow2.f32 %v2757_v53  ;;  %v8402_v0 = vld [vmem:[#allocation28_spill] sm:$0xff] }
 0x2cd   : > { %2215 = vmatprep.mubr.bf16.mxu1 %v1997_v50  ;;  %2081 = vmatmul.mubr.bf16.gmra.mrb[52].mxu0 %v1996_v35  ;;  %v1999_v23 = vpack.c.bf16 %v4971_v15, %v4969_v56  ;;  %v6836_v11 = vadd.f32 %v3370_v29, %v8291_v34  ;;  %v4973_v61 = vpop.eup %4972  ;;  %v2727_v7 = vsub.f32 %v6412_v28, %v6801_v60  ;;  %4982 = vpow2.f32 %v2767_v47  ;;  %v8366_v47 = vld [vmem:[#allocation107_spill] sm:$0xff] }
 0x2ce   : > { %2216 = vmatmul.mubr.bf16.gmra.mrb[80].mxu1 %v1996_v35  ;;  %8359 = vst [vmem:[#allocation84_spill] sm:$0xff] %v6833_v24  ;;  %v3373_v48 = vsel %vm3309_vm13, %v3277_v32, %v3341_v4  ;;  %v3374_v62 = vsel %vm3310_vm14, %v3278_v40, %v3342_v22  ;;  %v4975_v18 = vpop.eup %4974  ;;  %v6844_v55 = vadd.f32 %v6770_v45, %v6200_v41  ;;  %4984 = vpow2.f32 %v2753_v2 }
 0x2cf   : > { %8360 = vst [vmem:[#allocation85_spill] sm:$0xff] %v6836_v11  ;;  %2710 = vmax.xlane.f32.xlu1 %v2709_v51  ;;  %v2725_v34 = vsub.f32 %v6315_v20, %v6755_v52  ;;  %2088 = vmatprep.mubr.bf16.mxu0 %v1999_v23  ;;  %v2715_v28 = vmax.f32 %v6825_v54, %v6828_v57  ;;  %4986 = vpow2.f32 %v2763_v39  ;;  %v2765_v52 = vmul.f32 1.442695, %v2727_v7  ;;  %v8370_v7 = vld [vmem:[#allocation77_spill] sm:$0xff] }
 0x2d0   : > { %3432 = vmax.xlane.f32.xlu0 %v3431_v44  ;;  %8361 = vst [vmem:[#allocation18_spill] sm:$0xff] %v6844_v55  ;;  %2223 = vmatprep.mubr.bf16.mxu1 %v1999_v23  ;;  %v6852_v22 = vadd.f32 %v6775_v6, %v6202_v63  ;;  %v4977_v56 = vpop.eup %4976  ;;  %v3437_v29 = vmax.f32 %v6833_v24, %v6836_v11  ;;  %v8368_v44 = vld [vmem:[#allocation104_spill] sm:$0xff] }
 0x2d1   : > { %v6857_v45 = vadd.f32 %v3373_v48, %v8297_v38  ;;  %v6860_v60 = vadd.f32 %v3374_v62, %v8299_v8  ;;  %v4979_v20 = vpop.eup %4978  ;;  %v1998_v32 = vpack.c.bf16 %v4975_v18, %v4973_v61  ;;  %v2761_v40 = vmul.f32 1.442695, %v2725_v34  ;;  %v8369_v61 = vld [vmem:[#allocation35_spill] sm:$0xff] }
 0x2d2   : > { %8362 = vst [vmem:[#allocation90_spill] sm:$0xff] %v6852_v22  ;;  %v6862_v6 = vpack.c.bf16 %v4977_v56, %v4979_v20  ;;  %v2718_v38 = vmax.f32 %v6844_v55, %v6852_v22  ;;  %4988 = vpow2.f32 %v2765_v52  ;;  %v2952_v35 = vmul.bf16 %v6553_v17, %v8229_v27  ;;  %v8371_v62 = vld [vmem:[#allocation39_spill] sm:$0xff]  ;;  %v8375_v52 = vld [vmem:[#allocation42_spill] sm:$0xff] }
 0x2d3   : > { %8363 = vst [vmem:[#allocation91_spill] sm:$0xff] %v6857_v45  ;;  %8364 = vst [vmem:[#allocation96_spill] sm:$0xff] %v6860_v60  ;;  %2716 = vmax.xlane.f32.xlu1 %v2715_v28  ;;  %v3443_v46 = vmax.f32 %v6857_v45, %v6860_v60  ;;  %4990 = vpow2.f32 %v2761_v40  ;;  %v2961_v49 = vmul.bf16 %v6553_v17, %v6051_v13  ;;  %v8372_v18 = vld [vmem:[#allocation119_spill] sm:$0xff]  ;;  %v8376_v40 = vld [vmem:[#allocation44_spill] sm:$0xff] }
 0x2d4   : > { %3438 = vmax.xlane.f32.xlu0 %v3437_v29  ;;  %v2953_v36 = vmul.bf16 %v6553_v17, %v8236_v58  ;;  %v2962_v51 = vmul.bf16 %v6553_v17, %v8366_v47  ;;  %v2955_v48 = vmul.bf16 %v6553_v17, %v8370_v7  ;;  %v2964_v34 = vmul.bf16 %v6553_v17, %v8372_v18  ;;  %v8373_v28 = vld [vmem:[#allocation99_spill] sm:$0xff]  ;;  %v8374_v29 = vld [vmem:[#allocation114_spill] sm:$0xff] }
 0x2d5   : > { %2089 = vmatmul.mubr.bf16.gmra.mrb[56].mxu0 %v1998_v32  ;;  %v2956_v56 = vmul.bf16 %v6553_v17, %v8373_v28  ;;  %v2965_v20 = vmul.bf16 %v6553_v17, %v8374_v29 }
 0x2d6   : > { %2224 = vmatmul.mubr.bf16.gmra.mrb[84].mxu1 %v1998_v32  ;;  %2264 = vmatprep.mubr.bf16.mxu0 %v8365_v42  ;;  %v4981_v8 = vpop.eup %4980  ;;  %v2690_v32 = vpop.xlane.xlu0 %2689  ;;  %v8377_v42 = vld [vmem:[#allocation81_spill] sm:$0xff] }
 0x2d7   : > { %2865 = vmatprep.mubr.bf16.mxu1 %v6862_v6  ;;  %2719 = vmax.xlane.f32.xlu1 %v2718_v38  ;;  %v4983_v16 = vpop.eup %4982  ;;  %v8378_v38 = vld [vmem:[#allocation98_spill] sm:$0xff] }
 0x2d8   : > { %3444 = vmax.xlane.f32.xlu0 %v3443_v46  ;;  %v4985_v53 = vpop.eup %4984  ;;  %v2957_v46 = vmul.bf16 %v6553_v17, %v8377_v42 }
 0x2d9   : > { %v4987_v50 = vpop.eup %4986  ;;  %v6872_v21 = vpack.c.bf16 %v4981_v8, %v4985_v53  ;;  %v2731_v8 = vsub.f32 %v8378_v38, %v2690_v32  ;;  %v8380_v53 = vld [vmem:[#allocation33_spill] sm:$0xff] }
 0x2da   : > { %v6877_v4 = vpack.c.bf16 %v4983_v16, %v4987_v50  ;;  %v8379_v16 = vld [vmem:[#allocation7_spill] sm:$0xff]  ;;  %v2732_v50 = vsub.f32 %v8380_v53, %v2690_v32  ;;  %v8387_v32 = vld [vmem:[#allocation41_spill] sm:$0xff]  ;;  %v8390_v53 = vld [vmem:[#allocation102_spill] sm:$0xff] }
 0x2dc   : > { %v4989_v15 = vpop.eup %4988 }
 0x2dd   : > { %2265 = vmatmul.mubr.bf16.vlgmr.msra.gmra.mrb[60].mxu0 %v6347_v33  ;;  %v8367_v33 = vld [vmem:[#allocation78_spill] sm:$0xff]  ;;  %v4991_v39 = vpop.eup %4990 }
 0x2de   : > { %2866 = vmatmul.mubr.bf16.vlgmr.msra.gmra.mrb[88].mxu1 %v6872_v21  ;;  %4525 = vmatpush3.bf16.msra.mxu0 %v2952_v35  ;;  %v2954_v2 = vmul.bf16 %v6553_v17, %v8367_v33  ;;  %v6892_v23 = vpack.c.bf16 %v4989_v15, %v4991_v39  ;;  %v2966_v35 = vmul.bf16 %v6553_v17, %v8379_v16  ;;  %v8382_v15 = vld [vmem:[#allocation5_spill] sm:$0xff]  ;;  %v2773_v39 = vmul.f32 1.442695, %v2731_v8  ;;  %v8389_v8 = vld [vmem:[#allocation92_spill] sm:$0xff] }
 0x2df   : > { %2272 = vmatprep.mubr.bf16.mxu0 %v6435_v26  ;;  %2873 = vmatprep.mubr.bf16.mxu1 %v6877_v4  ;;  %v2963_v26 = vmul.bf16 %v6553_v17, %v8368_v44 }
 0x2e0   : > { %4526 = vmatprep.subr.bf16.mxu0 %v2961_v49  ;;  %4589 = vmatpush3.bf16.msra.mxu1 %v8268_v10  ;;  %v8381_v49 = vld [vmem:[#allocation101_spill] sm:$0xff]  ;;  %4992 = vpow2.f32 %v2773_v39 }
 0x2e1   : > { %4590 = vmatprep.subr.bf16.mxu1 %v8268_v10 }
 0x2e2   : > { %4527 = vmatpush3.bf16.msra.mxu0 %v2953_v36  ;;  %v2958_v36 = vmul.bf16 %v6553_v17, %v8381_v49 }
 0x2e3   : > { %4528 = vmatprep.subr.bf16.mxu0 %v2962_v51  ;;  %v2696_v51 = vpop.xlane.xlu0 %2695 }
 0x2e4   : > { %4591 = vmatpush3.bf16.msra.mxu1 %v8268_v10 }
 0x2e5   : > { %2273 = vmatmul.mubr.bf16.gmra.mrb[64].mxu0 %v8369_v61  ;;  %4592 = vmatprep.subr.bf16.mxu1 %v8268_v10  ;;  %v8384_v61 = vld [vmem:[#allocation6_spill] sm:$0xff] }
 0x2e6   : > { %2874 = vmatmul.mubr.bf16.gmra.mrb[92].mxu1 %v6892_v23  ;;  %4529 = vmatpush3.bf16.msra.mxu0 %v2954_v2  ;;  %v6926_v2 = vpack.c.bf16 %v8382_v15, %v8382_v15  ;;  %v8392_v15 = vld [vmem:[#allocation57_spill] sm:$0xff] }
 0x2e7   : > { %2280 = vmatprep.mubr.bf16.mxu0 %v8371_v62  ;;  %4530 = vmatprep.subr.bf16.mxu0 %v2963_v26  ;;  %v8383_v26 = vld [vmem:[#allocation43_spill] sm:$0xff]  ;;  %v2775_v62 = vmul.f32 1.442695, %v2732_v50 }
 0x2e8   : > { %4593 = vmatpush3.bf16.msra.mxu1 %v8268_v10 }
 0x2e9   : > { %4594 = vmatprep.subr.bf16.mxu1 %v8268_v10  ;;  %4994 = vpow2.f32 %v2775_v62 }
 0x2ea   : > { %4531 = vmatpush3.bf16.msra.mxu0 %v2955_v48  ;;  %v2967_v48 = vmul.bf16 %v6553_v17, %v8384_v61 }
 0x2eb   : > { %4532 = vmatprep.subr.bf16.mxu0 %v2964_v34 }
 0x2ec   : > { %4595 = vmatpush3.bf16.msra.mxu1 %v8268_v10 }
 0x2ed   : > { %2281 = vmatmul.mubr.bf16.gmra.mrb[68].mxu0 %v8375_v52  ;;  %4596 = vmatprep.subr.bf16.mxu1 %v8268_v10 }
 0x2ee   : > { %4533 = vmatpush3.bf16.msra.mxu0 %v2956_v56  ;;  %2288 = vmatprep.mubr.bf16.mxu0 %v8376_v40  ;;  %v8385_v56 = vld [vmem:[#allocation50_spill] sm:$0xff]  ;;  %v2736_v40 = vsub.f32 %v8387_v32, %v2696_v51 }
 0x2ef   : > { %4534 = vmatprep.subr.bf16.mxu0 %v2965_v20  ;;  %v8386_v20 = vld [vmem:[#allocation100_spill] sm:$0xff]  ;;  %v8391_v32 = vld [vmem:[#allocation46_spill] sm:$0xff] }
 0x2f0   : > { %4597 = vmatpush3.bf16.msra.mxu1 %v8268_v10  ;;  %v2959_v52 = vmul.bf16 %v6553_v17, %v8386_v20 }
 0x2f1   : > { %4598 = vmatprep.subr.bf16.mxu1 %v8268_v10 }
 0x2f2   : > { %4535 = vmatpush3.bf16.msra.mxu0 %v2957_v46  ;;  %v8388_v46 = vld [vmem:[#allocation40_spill] sm:$0xff] }
 0x2f3   : > { %4536 = vmatprep.subr.bf16.mxu0 %v2966_v35 }
 0x2f4   : > { %4599 = vmatpush3.bf16.msra.mxu1 %v8268_v10 }
 0x2f5   : > { %2289 = vmatmul.mubr.bf16.gmra.mrb[72].mxu0 %v8383_v26  ;;  %4600 = vmatprep.subr.bf16.mxu1 %v8268_v10  ;;  %v3712_v26 = vmul.bf16 %v6926_v2, %v8390_v53 }
 0x2f6   : > { %4537 = vmatpush3.bf16.msra.mxu0 %v2958_v36  ;;  %2296 = vmatprep.mubr.bf16.mxu0 %v8385_v56  ;;  %v2783_v56 = vmul.f32 1.442695, %v2736_v40 }
 0x2f7   : > { %v2687_v34 = vpop.xlane.xlu1 %2686  ;;  %4538 = vmatprep.subr.bf16.mxu0 %v2967_v48  ;;  %v8393_v48 = vld [vmem:[#allocation36_spill] sm:$0xff] }
 0x2f8   : > { %v2729_v38 = vsub.f32 %v8388_v46, %v2687_v34  ;;  %v2730_v35 = vsub.f32 %v8389_v8, %v2687_v34  ;;  %4601 = vmatpush3.bf16.msra.mxu1 %v8268_v10  ;;  %v2735_v8 = vsub.f32 %v8393_v48, %v2696_v51 }
 0x2f9   : > { %4602 = vmatprep.subr.bf16.mxu1 %v8268_v10 }
 0x2fa   : > { %v2769_v50 = vmul.f32 1.442695, %v2729_v38  ;;  %v2771_v36 = vmul.f32 1.442695, %v2730_v35  ;;  %4539 = vmatpush3.bf16.msra.mxu0 %v2959_v52  ;;  %v8394_v38 = vld [vmem:[#allocation47_spill] sm:$0xff] }
 0x2fb   : > { %v2693_v17 = vpop.xlane.xlu1 %2692  ;;  %4652 = vmatprep.subr.bf16.mxu0 %v3712_v26 }
 0x2fc   : > { %4996 = vpow2.f32 %v2769_v50  ;;  %v2733_v46 = vsub.f32 %v8391_v32, %v2693_v17  ;;  %v2734_v34 = vsub.f32 %v8392_v15, %v2693_v17  ;;  %4603 = vmatpush3.bf16.msra.mxu1 %v8268_v10  ;;  %v2781_v15 = vmul.f32 1.442695, %v2735_v8 }
 0x2fd   : > { %4998 = vpow2.f32 %v2771_v36  ;;  %2297 = vmatmul.mubr.bf16.gmra.mrb[76].mxu0 %v8394_v38  ;;  %v4993_v36 = vpop.eup %4992 }
 0x2fe   : > { %v2779_v39 = vmul.f32 1.442695, %v2734_v34  ;;  %2304 = vmatprep.mubr.bf16.mxu0 %v6660_v43  ;;  %5000 = vpow2.f32 %v2783_v56  ;;  %v2777_v52 = vmul.f32 1.442695, %v2733_v46  ;;  %v4995_v17 = vpop.eup %4994 }
 0x2ff   : > { %v4220_v62 = vpop.f32.mrb[24].mxu1 }
 0x300   : > { %v4221_v40 = vpop.f32.mrb[25].mxu1  ;;  %5002 = vpow2.f32 %v2779_v39 }
 0x301   : > { %v6948_v35 = vadd.f32 %v4221_v40, %v4220_v62  ;;  %v4223_v53 = vpop.f32.mrb[26].mxu1  ;;  %5004 = vpow2.f32 %v2777_v52  ;;  %v3267_v52 = vadd.f32 %v8349_v1, %v6761_v12 }
 0x302   : > { %v4224_v26 = vpop.f32.mrb[27].mxu1  ;;  %5006 = vpow2.f32 %v2781_v15 }
 0x303   : > { %v6950_v50 = vadd.f32 %v4224_v26, %v4223_v53  ;;  %v4284_v10 = vpop.f32.mrb[28].mxu0  ;;  %vm3299_vm15 = vcmp.gt.f32.partialorder %v3267_v52, 0.0 }
 0x304   : > { %v4285_v51 = vpop.f32.mrb[29].mxu0  ;;  %v6955_v48 = vpop.xlane.xlu0 %2701 }
 0x305   : > { %v6952_v32 = vadd.f32 %v4285_v51, %v4284_v10  ;;  %v4287_v43 = vpop.f32.mrb[30].mxu0  ;;  %2305 = vmatmul.mubr.bf16.gmra.mrb[80].mxu0 %v6658_v30  ;;  %v3268_v30 = vadd.f32 %v8350_v37, %v6761_v12 }
 0x306   : > { %v4997_v34 = vpop.eup %4996  ;;  %v4288_v56 = vpop.f32.mrb[31].mxu0  ;;  %2312 = vmatprep.mubr.bf16.mxu0 %v6674_v25 }
 0x307   : > { %8395 = vst [vmem:[#allocation83_spill] sm:$0xff] %v6952_v32  ;;  %v4999_v46 = vpop.eup %4998  ;;  %v6957_v8 = vadd.f32 %v4288_v56, %v4287_v43  ;;  %v6960_v39 = vpack.c.bf16 %v4993_v36, %v4997_v34  ;;  %v3332_v56 = vmul.f32 0.2, %v3268_v30  ;;  %vm3300_vm0 = vcmp.gt.f32.partialorder %v3268_v30, 0.0 }
 0x308   : > { %v6962_v38 = vpack.c.bf16 %v4995_v17, %v4999_v46  ;;  %v5001_v62 = vpop.eup %5000  ;;  %v6972_v25 = vpop.xlane.xlu0 %2707  ;;  %v3331_v17 = vmul.f32 0.2, %v3267_v52 }
 0x309   : > { %8396 = vst [vmem:[#allocation86_spill] sm:$0xff] %v6957_v8 }
 0x30a   : > { %2881 = vmatprep.mubr.bf16.mxu1 %v6962_v38  ;;  %v5003_v40 = vpop.eup %5002  ;;  %v3363_v11 = vsel %vm3299_vm15, %v3267_v52, %v3331_v17  ;;  %v8400_v52 = vld [vmem:[#allocation56_spill] sm:$0xff] }
 0x30b   : > { %2882 = vmatmul.mubr.bf16.gmra.mrb[96].mxu1 %v6960_v39  ;;  %v4226_v53 = vpop.f32.mrb[28].mxu1  ;;  %v6970_v26 = vpack.c.bf16 %v5001_v62, %v5003_v40  ;;  %v5005_v51 = vpop.eup %5004  ;;  %v2743_v17 = vsub.f32 %v8400_v52, %v6972_v25  ;;  %v7019_v8 = vadd.f32 %v3363_v11, %v8402_v0  ;;  %v8408_v0 = vld [vmem:[#allocation30_spill] sm:$0xff] }
 0x30c   : > { %v4227_v15 = vpop.f32.mrb[29].mxu1  ;;  %v5007_v40 = vpop.eup %5006 }
 0x30d   : > { %v6974_v10 = vadd.f32 %v4227_v15, %v4226_v53  ;;  %v4229_v36 = vpop.f32.mrb[30].mxu1  ;;  %2889 = vmatprep.mubr.bf16.mxu1 %v6970_v26  ;;  %2313 = vmatmul.mubr.bf16.gmra.mrb[84].mxu0 %v6676_v59  ;;  %v6995_v45 = vpack.c.bf16 %v5007_v40, %v5005_v51  ;;  %v3364_v40 = vsel %vm3300_vm0, %v3268_v30, %v3332_v56 }
 0x30e   : > { %v4230_v43 = vpop.f32.mrb[31].mxu1  ;;  %2320 = vmatprep.mubr.bf16.mxu0 %v6694_v9  ;;  %8403 = vst [vmem:[#allocation54_spill] sm:$0xff] %v7019_v8 }
 0x30f   : > { %v6982_v46 = vadd.f32 %v4230_v43, %v4229_v36  ;;  %v4290_v53 = vpop.f32.mrb[32].mxu0  ;;  %v8397_v36 = vld [vmem:[#allocation51_spill] sm:$0xff] }
 0x310   : > { %v2739_v43 = vsub.f32 %v8397_v36, %v6955_v48  ;;  %v3195_v12 = vpop.permute.xlu0 %3194  ;;  %v4291_v9 = vpop.f32.mrb[33].mxu0  ;;  %v8399_v36 = vld [vmem:[#allocation55_spill] sm:$0xff] }
 0x311   : > { %v3265_v59 = vadd.f32 %v8349_v1, %v3195_v12  ;;  %v3266_v15 = vadd.f32 %v8350_v37, %v3195_v12  ;;  %v7003_v24 = vadd.f32 %v4291_v9, %v4290_v53  ;;  %v4293_v34 = vpop.f32.mrb[34].mxu0  ;;  %v2740_v31 = vsub.f32 %v8399_v36, %v6955_v48 }
 0x312   : > { %v4294_v51 = vpop.f32.mrb[35].mxu0  ;;  %v2789_v9 = vmul.f32 1.442695, %v2739_v43  ;;  %v8405_v43 = vld [vmem:[#allocation52_spill] sm:$0xff] }
 0x313   : > { %8398 = vst [vmem:[#allocation45_spill] sm:$0xff] %v7003_v24  ;;  %2890 = vmatmul.mubr.bf16.gmra.mrb[100].mxu1 %v6995_v45  ;;  %vm3297_vm1 = vcmp.gt.f32.partialorder %v3265_v59, 0.0  ;;  %vm3298_vm2 = vcmp.gt.f32.partialorder %v3266_v15, 0.0  ;;  %v3329_v12 = vmul.f32 0.2, %v3265_v59  ;;  %v7016_v48 = vadd.f32 %v4294_v51, %v4293_v34  ;;  %v8404_v24 = vld [vmem:[#allocation11_spill] sm:$0xff] }
 0x314   : > { %v3330_v53 = vmul.f32 0.2, %v3266_v15  ;;  %v3207_v36 = vpop.permute.xlu0 %3206  ;;  %v2791_v32 = vmul.f32 1.442695, %v2740_v31  ;;  %v2744_v22 = vsub.f32 %v8405_v43, %v6972_v25  ;;  %v8406_v51 = vld [vmem:[#allocation29_spill] sm:$0xff]  ;;  %5008 = vpow2.f32 %v2789_v9 }
 0x315   : > { %8401 = vst [vmem:[#allocation97_spill] sm:$0xff] %v7016_v48  ;;  %v3361_v30 = vsel %vm3297_vm1, %v3265_v59, %v3329_v12  ;;  %v3271_v60 = vadd.f32 %v8349_v1, %v3207_v36  ;;  %v3272_v62 = vadd.f32 %v8350_v37, %v3207_v36  ;;  %2321 = vmatmul.mubr.bf16.gmra.mrb[88].mxu0 %v8404_v24  ;;  %v2797_v12 = vmul.f32 1.442695, %v2743_v17  ;;  %v8410_v24 = vld [vmem:[#allocation61_spill] sm:$0xff]  ;;  %v8411_v36 = vld [vmem:[#allocation31_spill] sm:$0xff] }
 0x316   : > { %v3362_v56 = vsel %vm3298_vm2, %v3266_v15, %v3330_v53  ;;  %3000 = vmatprep.mubr.bf16.mxu0 %v6862_v6  ;;  %v7028_v52 = vadd.f32 %v3361_v30, %v8406_v51  ;;  %v7037_v6 = vadd.f32 %v3364_v40, %v8411_v36  ;;  %5010 = vpow2.f32 %v2791_v32  ;;  %v8414_v40 = vld [vmem:[#allocation32_spill] sm:$0xff] }
 0x317   : > { %v2699_v34 = vpop.xlane.xlu1 %2698  ;;  %v7031_v11 = vadd.f32 %v3362_v56, %v8408_v0  ;;  %vm3303_vm3 = vcmp.gt.f32.partialorder %v3271_v60, 0.0  ;;  %vm3304_vm4 = vcmp.gt.f32.partialorder %v3272_v62, 0.0  ;;  %v3335_v59 = vmul.f32 0.2, %v3271_v60  ;;  %v8413_v0 = vld [vmem:[#allocation62_spill] sm:$0xff] }
 0x318   : > { %8407 = vst [vmem:[#allocation88_spill] sm:$0xff] %v7028_v52  ;;  %v3336_v15 = vmul.f32 0.2, %v3272_v62  ;;  %v3215_v53 = vpop.permute.xlu0 %3214  ;;  %v2737_v31 = vsub.f32 %v8410_v24, %v2699_v34  ;;  %8412 = vst [vmem:[#allocation103_spill] sm:$0xff] %v7037_v6  ;;  %v2738_v48 = vsub.f32 %v8413_v0, %v2699_v34  ;;  %5012 = vpow2.f32 %v2797_v12  ;;  %v8419_v12 = vld [vmem:[#allocation74_spill] sm:$0xff] }
 0x319   : > { %8409 = vst [vmem:[#allocation89_spill] sm:$0xff] %v7031_v11  ;;  %v3425_v25 = vmax.f32 %v7028_v52, %v7031_v11  ;;  %v3367_v43 = vsel %vm3303_vm3, %v3271_v60, %v3335_v59  ;;  %v3275_v51 = vadd.f32 %v8349_v1, %v3215_v53  ;;  %v3276_v56 = vadd.f32 %v8350_v37, %v3215_v53  ;;  %v8416_v60 = vld [vmem:[#allocation38_spill] sm:$0xff]  ;;  %v8433_v52 = vld [vmem:[#allocation79_spill] sm:$0xff] }
 0x31a   : > { %v3368_v30 = vsel %vm3304_vm4, %v3272_v62, %v3336_v15  ;;  %v2799_v11 = vmul.f32 1.442695, %v2744_v22  ;;  %v7047_v36 = vadd.f32 %v3367_v43, %v8414_v40  ;;  %v3428_v53 = vmax.f32 %v7019_v8, %v7037_v6 }
 0x31b   : > { %3426 = vmax.xlane.f32.xlu1 %v3425_v25  ;;  %v7050_v62 = vadd.f32 %v3368_v30, %v8416_v60  ;;  %v3339_v59 = vmul.f32 0.2, %v3275_v51  ;;  %v3340_v9 = vmul.f32 0.2, %v3276_v56  ;;  %v2705_v34 = vpop.xlane.xlu1 %2704  ;;  %vm3307_vm5 = vcmp.gt.f32.partialorder %v3275_v51, 0.0  ;;  %v8418_v30 = vld [vmem:[#allocation70_spill] sm:$0xff] }
 0x31c   : > { %8415 = vst [vmem:[#allocation60_spill] sm:$0xff] %v7047_v36  ;;  %v3223_v15 = vpop.permute.xlu0 %3222  ;;  %vm3308_vm6 = vcmp.gt.f32.partialorder %v3276_v56, 0.0  ;;  %v2785_v25 = vmul.f32 1.442695, %v2737_v31  ;;  %v2787_v22 = vmul.f32 1.442695, %v2738_v48  ;;  %v2741_v0 = vsub.f32 %v8418_v30, %v2705_v34 }
 0x31d   : > { %8417 = vst [vmem:[#allocation108_spill] sm:$0xff] %v7050_v62  ;;  %v3279_v32 = vadd.f32 %v8349_v1, %v3223_v15  ;;  %3001 = vmatmul.mubr.bf16.vlgmr.msra.gmra.mrb[92].mxu0 %v6872_v21  ;;  %v3280_v43 = vadd.f32 %v8350_v37, %v3223_v15  ;;  %v2742_v40 = vsub.f32 %v8419_v12, %v2705_v34  ;;  %5014 = vpow2.f32 %v2799_v11 }
 0x31e   : > { %v8420_v60 = vmul.bf16 %v6926_v2, %v8229_v27  ;;  %3008 = vmatprep.mubr.bf16.mxu0 %v6877_v4  ;;  %v8421_v31 = vmul.bf16 %v6926_v2, %v6051_v13  ;;  %v3434_v21 = vmax.f32 %v7047_v36, %v7050_v62  ;;  %v3371_v27 = vsel %vm3307_vm5, %v3275_v51, %v3339_v59 }
 0x31f   : > { %3429 = vmax.xlane.f32.xlu1 %v3428_v53  ;;  %v3372_v34 = vsel %vm3308_vm6, %v3276_v56, %v3340_v9  ;;  %v3343_v11 = vmul.f32 0.2, %v3279_v32  ;;  %v2793_v53 = vmul.f32 1.442695, %v2741_v0  ;;  %v3227_v30 = vpop.permute.xlu1 %3226  ;;  %5016 = vpow2.f32 %v2785_v25 }
 0x320   : > { %4653 = vmatpush3.bf16.msra.mxu0 %v8420_v60  ;;  %v3231_v4 = vpop.permute.xlu0 %3230  ;;  %vm3311_vm7 = vcmp.gt.f32.partialorder %v3279_v32, 0.0  ;;  %5018 = vpow2.f32 %v2787_v22  ;;  %v3344_v60 = vmul.f32 0.2, %v3280_v43  ;;  %v8422_v15 = vmul.bf16 %v6926_v2, %v8236_v58  ;;  %v8424_v22 = vld [vmem:[#allocation58_spill] sm:$0xff] }
 0x321   : > { %4654 = vmatprep.subr.bf16.mxu0 %v8421_v31  ;;  %v3283_v13 = vadd.f32 %v8349_v1, %v3231_v4  ;;  %v3284_v12 = vadd.f32 %v8350_v37, %v3231_v4  ;;  %v2795_v31 = vmul.f32 1.442695, %v2742_v40  ;;  %vm3312_vm8 = vcmp.gt.f32.partialorder %v3280_v43, 0.0  ;;  %v8426_v40 = vld [vmem:[#allocation59_spill] sm:$0xff] }
 0x322   : > { %v4232_v51 = vpop.f32.mrb[32].mxu1  ;;  %v7082_v59 = vadd.f32 %v8349_v1, %v3227_v30  ;;  %v8423_v9 = vmul.bf16 %v6926_v2, %v8366_v47  ;;  %v7088_v0 = vadd.f32 %v3371_v27, %v8424_v22  ;;  %v7091_v58 = vadd.f32 %v3372_v34, %v8426_v40 }
 0x323   : > { %3435 = vmax.xlane.f32.xlu1 %v3434_v21  ;;  %v4233_v25 = vpop.f32.mrb[33].mxu1  ;;  %v7093_v21 = vpop.eup %5008  ;;  %5020 = vpow2.f32 %v2793_v53  ;;  %v3347_v4 = vmul.f32 0.2, %v3283_v13  ;;  %v7097_v56 = vadd.f32 %v8350_v37, %v3227_v30  ;;  %vm3315_vm9 = vcmp.gt.f32.partialorder %v3283_v13, 0.0 }
 0x324   : > { %4655 = vmatpush3.bf16.msra.mxu0 %v8422_v15  ;;  %8425 = vst [vmem:[#allocation109_spill] sm:$0xff] %v7088_v0  ;;  %8427 = vst [vmem:[#allocation105_spill] sm:$0xff] %v7091_v58  ;;  %v3375_v15 = vsel %vm3311_vm7, %v3279_v32, %v3343_v11  ;;  %v3239_v48 = vpop.permute.xlu0 %3238  ;;  %v3235_v24 = vpop.permute.xlu1 %3234  ;;  %v7101_v27 = vadd.f32 %v4233_v25, %v4232_v51  ;;  %v3376_v32 = vsel %vm3312_vm8, %v3280_v43, %v3344_v60 }
 0x325   : > { %4656 = vmatprep.subr.bf16.mxu0 %v8423_v9  ;;  %v7099_v47 = vpop.eup %5010  ;;  %v3348_v9 = vmul.f32 0.2, %v3284_v12  ;;  %v3287_v34 = vadd.f32 %v8349_v1, %v3239_v48  ;;  %v4235_v22 = vpop.f32.mrb[34].mxu1  ;;  %3009 = vmatmul.mubr.bf16.gmra.mrb[96].mxu0 %v6892_v23  ;;  %5022 = vpow2.f32 %v2795_v31  ;;  %vm3316_vm10 = vcmp.gt.f32.partialorder %v3284_v12, 0.0 }
 0x326   : > { %v7105_v40 = vpop.eup %5012  ;;  %v3288_v11 = vadd.f32 %v8350_v37, %v3239_v48  ;;  %v4236_v53 = vpop.f32.mrb[35].mxu1  ;;  %v8428_v30 = vmul.bf16 %v6926_v2, %v8367_v33  ;;  %vm3313_vm11 = vcmp.gt.f32.partialorder %v7082_v59, 0.0  ;;  %v7114_v51 = vadd.f32 %v8349_v1, %v3235_v24  ;;  %3016 = vmatprep.mubr.bf16.mxu0 %v6962_v38 }
 0x327   : > { %v7117_v23 = vadd.f32 %v8350_v37, %v3235_v24  ;;  %v7119_v25 = vadd.f32 %v4236_v53, %v4235_v22  ;;  %v8429_v43 = vmul.bf16 %v6926_v2, %v8368_v44  ;;  %v7126_v48 = vsel %vm3315_vm9, %v3283_v13, %v3347_v4  ;;  %v7130_v24 = vpop.eup %5014 }
 0x328   : > { %4657 = vmatpush3.bf16.msra.mxu0 %v8428_v30  ;;  %vm3314_vm12 = vcmp.gt.f32.partialorder %v7097_v56, 0.0  ;;  %v3345_v33 = vmul.f32 0.2, %v7082_v59  ;;  %v3351_v60 = vmul.f32 0.2, %v3287_v34  ;;  %v3247_v31 = vpop.permute.xlu0 %3246  ;;  %v4296_v30 = vpop.f32.mrb[36].mxu0  ;;  %v7133_v22 = vsel %vm3316_vm10, %v3284_v12, %v3348_v9 }
 0x329   : > { %4658 = vmatprep.subr.bf16.mxu0 %v8429_v43  ;;  %v3346_v38 = vmul.f32 0.2, %v7097_v56  ;;  %vm3319_vm13 = vcmp.gt.f32.partialorder %v3287_v34, 0.0  ;;  %v3352_v44 = vmul.f32 0.2, %v3288_v11  ;;  %v3243_v53 = vpop.permute.xlu1 %3242  ;;  %v4297_v43 = vpop.f32.mrb[37].mxu0  ;;  %v3440_v13 = vmax.f32 %v7088_v0, %v7091_v58 }
 0x32a   : > { %vm3320_vm14 = vcmp.gt.f32.partialorder %v3288_v11, 0.0  ;;  %v3291_v4 = vadd.f32 %v8349_v1, %v3247_v31  ;;  %v3292_v17 = vadd.f32 %v8350_v37, %v3247_v31  ;;  %v8430_v62 = vmul.bf16 %v6926_v2, %v8370_v7  ;;  %v4299_v12 = vpop.f32.mrb[38].mxu0  ;;  %v5017_v9 = vpop.eup %5016 }
 0x32b   : > { %vm3317_vm15 = vcmp.gt.f32.partialorder %v7114_v51, 0.0  ;;  %vm3318_vm0 = vcmp.gt.f32.partialorder %v7117_v23, 0.0  ;;  %v7146_v36 = vadd.f32 %v8349_v1, %v3243_v53  ;;  %v7148_v6 = vadd.f32 %v4297_v43, %v4296_v30  ;;  %v4300_v31 = vpop.f32.mrb[39].mxu0  ;;  %v5019_v0 = vpop.eup %5018  ;;  %3441 = vmax.xlane.f32.xlu1 %v3440_v13  ;;  %v8434_v43 = vld [vmem:[#allocation82_spill] sm:$0xff] }
 0x32c   : > { %4659 = vmatpush3.bf16.msra.mxu0 %v8430_v62  ;;  %v8432_v58 = vmul.bf16 %v6926_v2, %v8372_v18  ;;  %v7154_v7 = vsel %vm3319_vm13, %v3287_v34, %v3351_v60  ;;  %v3349_v62 = vmul.f32 0.2, %v7114_v51  ;;  %v3350_v8 = vmul.f32 0.2, %v7117_v23 }
 0x32d   : > { %8431 = vst [vmem:[#allocation106_spill] sm:$0xff] %v7148_v6  ;;  %v7159_v55 = vadd.f32 %v3375_v15, %v8433_v52  ;;  %v7162_v30 = vsel %vm3320_vm14, %v3288_v11, %v3352_v44  ;;  %vm3323_vm1 = vcmp.gt.f32.partialorder %v3291_v4, 0.0  ;;  %vm3324_vm2 = vcmp.gt.f32.partialorder %v3292_v17, 0.0  ;;  %3017 = vmatmul.mubr.bf16.gmra.mrb[100].mxu0 %v6960_v39  ;;  %v3255_v52 = vpop.permute.xlu0 %3254  ;;  %v3251_v15 = vpop.permute.xlu1 %3250 }
 0x32e   : > { %4660 = vmatprep.subr.bf16.mxu0 %v8432_v58  ;;  %v7165_v18 = vadd.f32 %v8350_v37, %v3243_v53  ;;  %v5021_v58 = vpop.eup %5020  ;;  %v3355_v34 = vmul.f32 0.2, %v3291_v4  ;;  %v3356_v60 = vmul.f32 0.2, %v3292_v17  ;;  %vm3321_vm3 = vcmp.gt.f32.partialorder %v7146_v36, 0.0  ;;  %3024 = vmatprep.mubr.bf16.mxu0 %v6970_v26 }
 0x32f   : > { %v7170_v13 = vadd.f32 %v3376_v32, %v8434_v43  ;;  %v8435_v11 = vmul.bf16 %v6926_v2, %v8373_v28  ;;  %v3377_v39 = vsel %vm3313_vm11, %v7082_v59, %v3345_v33  ;;  %v3378_v44 = vsel %vm3314_vm12, %v7097_v56, %v3346_v38  ;;  %v5023_v28 = vpop.eup %5022  ;;  %v8438_v59 = vld [vmem:[#allocation72_spill] sm:$0xff] }
 0x330   : > { %v2826_v53 = vpack.c.bf16 %v7099_v47, %v5019_v0  ;;  %v7183_v32 = vadd.f32 %v4300_v31, %v4299_v12  ;;  %v8436_v43 = vmul.bf16 %v6926_v2, %v8374_v29  ;;  %v7194_v33 = vadd.f32 %v3378_v44, %v8438_v59 }
 0x331   : > { %4661 = vmatpush3.bf16.msra.mxu0 %v8435_v11  ;;  %v3446_v26 = vmax.f32 %v7159_v55, %v7170_v13  ;;  %v8437_v11 = vld [vmem:[#allocation69_spill] sm:$0xff]  ;;  %v7197_v56 = vpack.c.bf16 %v7093_v21, %v5017_v9  ;;  %vm3322_vm4 = vcmp.gt.f32.partialorder %v7165_v18, 0.0  ;;  %v3295_v0 = vadd.f32 %v8349_v1, %v3255_v52 }
 0x332   : > { %4662 = vmatprep.subr.bf16.mxu0 %v8436_v43  ;;  %v7191_v6 = vadd.f32 %v3377_v39, %v8437_v11  ;;  %2897 = vmatprep.mubr.bf16.mxu1 %v2826_v53  ;;  %v3296_v29 = vadd.f32 %v8350_v37, %v3255_v52  ;;  %v3293_v47 = vadd.f32 %v8349_v1, %v3251_v15  ;;  %v3353_v38 = vmul.f32 0.2, %v7146_v36  ;;  %v8439_v52 = vld [vmem:[#allocation67_spill] sm:$0xff] }
 0x333   : > { %v3354_v12 = vmul.f32 0.2, %v7165_v18  ;;  %3447 = vmax.xlane.f32.xlu1 %v3446_v26  ;;  %2898 = vmatmul.mubr.bf16.gmra.mrb[104].mxu1 %v7197_v56  ;;  %v3294_v21 = vadd.f32 %v8350_v37, %v3251_v15  ;;  %v3387_v9 = vsel %vm3323_vm1, %v3291_v4, %v3355_v34  ;;  %v3388_v39 = vsel %vm3324_vm2, %v3292_v17, %v3356_v60  ;;  %v8442_v34 = vld [vmem:[#allocation68_spill] sm:$0xff] }
 0x334   : > { %v3449_v31 = vmax.f32 %v7191_v6, %v7194_v33  ;;  %vm3327_vm5 = vcmp.gt.f32.partialorder %v3295_v0, 0.0  ;;  %v7213_v1 = vadd.f32 %v7126_v48, %v8439_v52  ;;  %v8440_v44 = vmul.bf16 %v6926_v2, %v8377_v42  ;;  %v8444_v52 = vld [vmem:[#allocation93_spill] sm:$0xff] }
 0x335   : > { %vm3325_vm6 = vcmp.gt.f32.partialorder %v3293_v47, 0.0  ;;  %vm3326_vm7 = vcmp.gt.f32.partialorder %v3294_v21, 0.0  ;;  %v3357_v43 = vmul.f32 0.2, %v3293_v47  ;;  %v3358_v26 = vmul.f32 0.2, %v3294_v21  ;;  %3025 = vmatmul.mubr.bf16.gmra.mrb[104].mxu0 %v6995_v45 }
 0x336   : > { %4663 = vmatpush3.bf16.msra.mxu0 %v8440_v44  ;;  %3450 = vmax.xlane.f32.xlu0 %v3449_v31  ;;  %v8441_v37 = vmul.bf16 %v6926_v2, %v8379_v16  ;;  %v3359_v4 = vmul.f32 0.2, %v3295_v0  ;;  %v3360_v17 = vmul.f32 0.2, %v3296_v29  ;;  %v7223_v60 = vadd.f32 %v7133_v22, %v8442_v34  ;;  %v8443_v16 = vld [vmem:[#allocation80_spill] sm:$0xff]  ;;  %v4238_v31 = vpop.f32.mrb[36].mxu1 }
 0x337   : > { %v3381_v42 = vsel %vm3317_vm15, %v7114_v51, %v3349_v62  ;;  %v3389_v48 = vsel %vm3325_vm6, %v3293_v47, %v3357_v43  ;;  %v3390_v15 = vsel %vm3326_vm7, %v3294_v21, %v3358_v26  ;;  %v3382_v11 = vsel %vm3318_vm0, %v7117_v23, %v3350_v8  ;;  %3032 = vmatprep.mubr.bf16.mxu0 %v2826_v53  ;;  %v8445_v45 = vld [vmem:[#allocation73_spill] sm:$0xff]  ;;  %v4239_v23 = vpop.f32.mrb[37].mxu1  ;;  %v8447_v47 = vld [vmem:[#allocation76_spill] sm:$0xff]  ;;  %v8449_v43 = vld [vmem:[#allocation94_spill] sm:$0xff] }
 0x338   : > { %4664 = vmatprep.subr.bf16.mxu0 %v8441_v37  ;;  %v7233_v59 = vadd.f32 %v3381_v42, %v8443_v16  ;;  %v3452_v22 = vmax.f32 %v7213_v1, %v7223_v60  ;;  %v7238_v44 = vadd.f32 %v3382_v11, %v8444_v52  ;;  %v2828_v51 = vpack.c.bf16 %v7130_v24, %v5023_v28 }
 0x339   : > { %v7243_v62 = vadd.f32 %v7154_v7, %v8445_v45  ;;  %v8446_v8 = vmul.bf16 %v6926_v2, %v8381_v49  ;;  %v7250_v53 = vadd.f32 %v7162_v30, %v8447_v47  ;;  %v3385_v21 = vsel %vm3321_vm3, %v7146_v36, %v3353_v38  ;;  %v4241_v49 = vpop.f32.mrb[38].mxu1  ;;  %v8450_v36 = vld [vmem:[#allocation95_spill] sm:$0xff] }
 0x33a   : > { %v3386_v24 = vsel %vm3322_vm4, %v7165_v18, %v3354_v12  ;;  %v2827_v7 = vpack.c.bf16 %v7105_v40, %v5021_v58  ;;  %v8448_v28 = vmul.bf16 %v6926_v2, %v8384_v61  ;;  %vm3328_vm8 = vcmp.gt.f32.partialorder %v3296_v29, 0.0  ;;  %3453 = vmax.xlane.f32.xlu1 %v3452_v22  ;;  %2905 = vmatprep.mubr.bf16.mxu1 %v2828_v51  ;;  %v4242_v18 = vpop.f32.mrb[39].mxu1  ;;  %v8451_v61 = vld [vmem:[#allocation122_spill] sm:$0xff]  ;;  %v8452_v12 = vld [vmem:[#allocation123_spill] sm:$0xff] }
 0x33b   : > { %4665 = vmatpush3.bf16.msra.mxu0 %v8446_v8  ;;  %v3455_v30 = vmax.f32 %v7233_v59, %v7238_v44  ;;  %v7265_v26 = vadd.f32 %v3385_v21, %v8449_v43  ;;  %v7268_v38 = vadd.f32 %v3386_v24, %v8450_v36  ;;  %v3458_v40 = vmax.f32 %v7243_v62, %v7250_v53 }
 0x33c   : > { %4666 = vmatprep.subr.bf16.mxu0 %v8448_v28  ;;  %2906 = vmatmul.mubr.bf16.gmra.mrb[108].mxu1 %v2827_v7  ;;  %v7273_v58 = vadd.f32 %v3387_v9, %v8451_v61  ;;  %v7276_v37 = vadd.f32 %v3388_v39, %v8452_v12  ;;  %v7279_v34 = vadd.f32 %v3389_v48, %v8357_v5  ;;  %5024 = vrcp.f32 %v6948_v35 }
 0x33d   : > { %3456 = vmax.xlane.f32.xlu0 %v3455_v30  ;;  %v3461_v42 = vmax.f32 %v7265_v26, %v7268_v38  ;;  %v7284_v11 = vadd.f32 %v3390_v15, %v8358_v19  ;;  %v7286_v16 = vadd.f32 %v4239_v23, %v4238_v31  ;;  %v7288_v22 = vadd.f32 %v4242_v18, %v4241_v49  ;;  %v4302_v5 = vpop.f32.mrb[40].mxu0 }
 0x33e   : > { %v3391_v9 = vsel %vm3327_vm5, %v3295_v0, %v3359_v4  ;;  %v3392_v52 = vsel %vm3328_vm8, %v3296_v29, %v3360_v17  ;;  %v8453_v39 = vmul.bf16 %v6926_v2, %v8386_v20  ;;  %3459 = vmax.xlane.f32.xlu1 %v3458_v40  ;;  %3033 = vmatmul.mubr.bf16.gmra.mrb[108].mxu0 %v7197_v56  ;;  %v4303_v48 = vpop.f32.mrb[41].mxu0  ;;  %5026 = vrcp.f32 %v6950_v50 }
 0x33f   : > { %v3464_v19 = vmax.f32 %v7273_v58, %v7276_v37  ;;  %3040 = vmatprep.mubr.bf16.mxu0 %v2828_v51  ;;  %v3467_v15 = vmax.f32 %v7279_v34, %v7284_v11  ;;  %v7301_v0 = vadd.f32 %v3391_v9, %v6200_v41  ;;  %v7304_v29 = vadd.f32 %v3392_v52, %v6202_v63  ;;  %v4305_v20 = vpop.f32.mrb[42].mxu0 }
 0x340   : > { %4667 = vmatpush3.bf16.msra.mxu0 %v8453_v39  ;;  %v7306_v2 = vadd.f32 %v4303_v48, %v4302_v5  ;;  %v4306_v4 = vpop.f32.mrb[43].mxu0  ;;  %5028 = vrcp.f32 %v6974_v10 }
 0x341   : > { %3462 = vmax.xlane.f32.xlu0 %v3461_v42  ;;  %v4244_v56 = vpop.f32.mrb[40].mxu1  ;;  %v7308_v17 = vadd.f32 %v4306_v4, %v4305_v20  ;;  %v3470_v41 = vmax.f32 %v7301_v0, %v7304_v29 }
 0x342   : > { %3465 = vmax.xlane.f32.xlu1 %v3464_v19  ;;  %v4245_v31 = vpop.f32.mrb[41].mxu1 }
 0x343   : > { %v7310_v51 = vadd.f32 %v4245_v31, %v4244_v56  ;;  %v4247_v45 = vpop.f32.mrb[42].mxu1  ;;  %v8454_v56 = vld [vmem:[#allocation75_spill] sm:$0xff] }
 0x344   : > { %v4248_v8 = vpop.f32.mrb[43].mxu1 }
 0x345   : > { %3468 = vmax.xlane.f32.xlu0 %v3467_v15  ;;  %v7314_v23 = vadd.f32 %v4248_v8, %v4247_v45 }
 0x346   : > { %3471 = vmax.xlane.f32.xlu1 %v3470_v41  ;;  %3041 = vmatmul.mubr.bf16.gmra.mrb[112].mxu0 %v2827_v7  ;;  %v5025_v52 = vpop.eup %5024  ;;  %v8455_v41 = vld [vmem:[#allocation71_spill] sm:$0xff] }
 0x348   : > { %v4308_v63 = vpop.f32.mrb[44].mxu0  ;;  %v5027_v48 = vpop.eup %5026 }
 0x349   : > { %v4309_v47 = vpop.f32.mrb[45].mxu0 }
 0x34a   : > { %v7316_v21 = vadd.f32 %v4309_v47, %v4308_v63  ;;  %v4311_v24 = vpop.f32.mrb[46].mxu0  ;;  %v5029_v20 = vpop.eup %5028 }
 0x34b   : > { %v4312_v28 = vpop.f32.mrb[47].mxu0 }
 0x34c   : > { %v7319_v49 = vadd.f32 %v4312_v28, %v4311_v24  ;;  %v4250_v30 = vpop.f32.mrb[44].mxu1 }
 0x34d   : > { %v4251_v43 = vpop.f32.mrb[45].mxu1 }
 0x34e   : > { %v4252_v36 = vadd.f32 %v4251_v43, %v4250_v30  ;;  %v4253_v18 = vpop.f32.mrb[46].mxu1 }
 0x34f   : > { %v4254_v40 = vpop.f32.mrb[47].mxu1 }
 0x350   : > { %5030 = vrcp.f32 %v4252_v36  ;;  %v7323_v7 = vadd.f32 %v4254_v40, %v4253_v18  ;;  %v4314_v61 = vpop.f32.mrb[48].mxu0 }
 0x351   : > { %v4315_v12 = vpop.f32.mrb[49].mxu0  ;;  %5032 = vrcp.f32 %v6982_v46 }
 0x352   : > { %v7326_v42 = vadd.f32 %v4315_v12, %v4314_v61  ;;  %v4317_v35 = vpop.f32.mrb[50].mxu0  ;;  %5034 = vrcp.f32 %v7101_v27 }
 0x353   : > { %v4318_v9 = vpop.f32.mrb[51].mxu0 }
 0x354   : > { %v7328_v39 = vadd.f32 %v4318_v9, %v4317_v35 }
 0x355   : > { %v4256_v50 = vpop.f32.mrb[48].mxu1 }
 0x356   : > { %v4257_v10 = vpop.f32.mrb[49].mxu1 }
 0x357   : > { %1498 = vperm.xlu1 %4846, %v5025_v52   ;;  %v4258_v5 = vadd.f32 %v4257_v10, %v4256_v50  ;;  %v4259_v19 = vpop.f32.mrb[50].mxu1  ;;  %v8456_v10 = vld [vmem:[#allocation18_spill] sm:$0xff] }
 0x358   : > { %v4260_v15 = vpop.f32.mrb[51].mxu1 }
 0x359   : > { %5036 = vrcp.f32 %v4258_v5  ;;  %v7331_v46 = vadd.f32 %v4260_v15, %v4259_v19  ;;  %v2714_v4 = vpop.xlane.xlu0 %2713  ;;  %v8457_v19 = vld [vmem:[#allocation90_spill] sm:$0xff] }
 0x35a   : > { %v2747_v31 = vsub.f32 %v8454_v56, %v2714_v4  ;;  %v5031_v45 = vpop.eup %5030  ;;  %5038 = vrcp.f32 %v7119_v25  ;;  %v2748_v8 = vsub.f32 %v8455_v41, %v2714_v4 }
 0x35b   : > { %1503 = vperm.xlu0 %4847, %v5027_v48   ;;  %1508 = vperm.xlu1 %4846, %v5029_v20   ;;  %v5033_v63 = vpop.eup %5032  ;;  %5040 = vrcp.f32 %v7286_v16  ;;  %v8458_v20 = vld [vmem:[#allocation83_spill] sm:$0xff] }
 0x35c   : > { %v2711_v27 = vpop.xlane.xlu1 %2710  ;;  %v2805_v47 = vmul.f32 1.442695, %v2747_v31  ;;  %v2807_v28 = vmul.f32 1.442695, %v2748_v8  ;;  %v5035_v18 = vpop.eup %5034  ;;  %5042 = vrcp.f32 %v7288_v22  ;;  %v8459_v31 = vld [vmem:[#allocation45_spill] sm:$0xff] }
 0x35d   : > { %v2745_v24 = vsub.f32 %v6796_v3, %v2711_v27  ;;  %v2746_v30 = vsub.f32 %v6799_v14, %v2711_v27 }
 0x35e   : > { %5044 = vpow2.f32 %v2805_v47 }
 0x35f   : > { %1548 = vperm.xlu0 %4847, %v5031_v45   ;;  %1513 = vperm.xlu1 %4846, %v5033_v63   ;;  %v4262_v43 = vpop.f32.mrb[52].mxu1  ;;  %v2801_v36 = vmul.f32 1.442695, %v2745_v24  ;;  %v2803_v25 = vmul.f32 1.442695, %v2746_v30  ;;  %5046 = vpow2.f32 %v2807_v28 }
 0x360   : > { %v4263_v40 = vpop.f32.mrb[53].mxu1  ;;  %v2717_v35 = vpop.xlane.xlu1 %2716 }
 0x361   : > { %v4264_v61 = vadd.f32 %v4263_v40, %v4262_v43  ;;  %v4265_v12 = vpop.f32.mrb[54].mxu1  ;;  %5048 = vpow2.f32 %v2801_v36  ;;  %v2749_v16 = vsub.f32 %v6825_v54, %v2717_v35  ;;  %v2750_v22 = vsub.f32 %v6828_v57, %v2717_v35 }
 0x362   : > { %v4266_v3 = vpop.f32.mrb[55].mxu1  ;;  %5050 = vpow2.f32 %v2803_v25 }
 0x363   : > { %1518 = vperm.xlu1 %4846, %v5035_v18   ;;  %v5037_v9 = vpop.eup %5036  ;;  %v7341_v52 = vadd.f32 %v4266_v3, %v4265_v12  ;;  %5052 = vrcp.f32 %v4264_v61  ;;  %v2809_v54 = vmul.f32 1.442695, %v2749_v16  ;;  %v2811_v45 = vmul.f32 1.442695, %v2750_v22 }
 0x364   : > { %1558 = vperm.xlu0 %4847, %v5037_v9   ;;  %v5039_v14 = vpop.eup %5038  ;;  %v2720_v50 = vpop.xlane.xlu1 %2719  ;;  %5054 = vrcp.f32 %v7310_v51  ;;  %v8460_v9 = vld [vmem:[#allocation106_spill] sm:$0xff] }
 0x365   : > { %v2751_v5 = vsub.f32 %v8456_v10, %v2720_v50  ;;  %v2752_v48 = vsub.f32 %v8457_v19, %v2720_v50  ;;  %5056 = vrcp.f32 %v8458_v20  ;;  %v5041_v56 = vpop.eup %5040 }
 0x366   : > { %5058 = vrcp.f32 %v8459_v31  ;;  %v5043_v63 = vpop.eup %5042 }
 0x367   : > { %1523 = vperm.xlu1 %4846, %v5039_v14   ;;  %v4348_v15 = vpop.f32.mrb[56].mxu1  ;;  %5060 = vrcp.f32 %v7314_v23  ;;  %v2813_v51 = vmul.f32 1.442695, %v2751_v5  ;;  %v2815_v27 = vmul.f32 1.442695, %v2752_v48 }
 0x368   : > { %v4349_v4 = vpop.f32.mrb[57].mxu1  ;;  %5062 = vrcp.f32 %v7323_v7  ;;  %v5045_v24 = vpop.eup %5044 }
 0x369   : > { %v7349_v41 = vadd.f32 %v4349_v4, %v4348_v15  ;;  %v4351_v57 = vpop.f32.mrb[58].mxu1  ;;  %5064 = vpow2.f32 %v2809_v54  ;;  %v5047_v28 = vpop.eup %5046 }
 0x36a   : > { %v4352_v8 = vpop.f32.mrb[59].mxu1  ;;  %5066 = vpow2.f32 %v2811_v45 }
 0x36b   : > { %1528 = vperm.xlu1 %4846, %v5041_v56   ;;  %v7353_v47 = vadd.f32 %v4352_v8, %v4351_v57  ;;  %v5049_v30 = vpop.eup %5048  ;;  %5068 = vpow2.f32 %v2813_v51  ;;  %v8461_v56 = vld [vmem:[#allocation86_spill] sm:$0xff]  ;;  %v8462_v51 = vld [vmem:[#allocation97_spill] sm:$0xff] }
 0x36c   : > { %v5051_v43 = vpop.eup %5050  ;;  %5070 = vpow2.f32 %v2815_v27  ;;  %v2829_v23 = vpack.c.bf16 %v5045_v24, %v5049_v30 }
 0x36d   : > { %v5053_v18 = vpop.eup %5052  ;;  %v2830_v25 = vpack.c.bf16 %v5047_v28, %v5051_v43  ;;  %5072 = vrcp.f32 %v8460_v9 }
 0x36e   : > { %v5055_v61 = vpop.eup %5054  ;;  %1568 = vperm.xlu0 %4847, %v5053_v18   ;;  %5074 = vrcp.f32 %v7331_v46 }
 0x36f   : > { %1533 = vperm.xlu1 %4846, %v5043_v63   ;;  %v4354_v36 = vpop.f32.mrb[60].mxu1  ;;  %v5057_v35 = vpop.eup %5056  ;;  %2913 = vmatprep.mubr.bf16.mxu1 %v2830_v25  ;;  %5076 = vrcp.f32 %v7306_v2 }
 0x370   : > { %v4355_v40 = vpop.f32.mrb[61].mxu1  ;;  %v5059_v16 = vpop.eup %5058  ;;  %3048 = vmatprep.mubr.bf16.mxu0 %v2830_v25  ;;  %2914 = vmatmul.mubr.bf16.gmra.mrb[112].mxu1 %v2829_v23  ;;  %5078 = vrcp.f32 %v7341_v52 }
 0x371   : > { %v7355_v7 = vadd.f32 %v4355_v40, %v4354_v36  ;;  %v4357_v12 = vpop.f32.mrb[62].mxu1  ;;  %v5061_v22 = vpop.eup %5060  ;;  %3049 = vmatmul.mubr.bf16.gmra.mrb[116].mxu0 %v2829_v23  ;;  %5080 = vrcp.f32 %v8461_v56 }
 0x372   : > { %v4358_v3 = vpop.f32.mrb[63].mxu1  ;;  %v5063_v50 = vpop.eup %5062  ;;  %2331 = vperm.xlu0 %4847, %v5057_v35   ;;  %5082 = vrcp.f32 %v7316_v21 }
 0x373   : > { %1538 = vperm.xlu1 %4846, %v5055_v61   ;;  %v7359_v14 = vadd.f32 %v4358_v3, %v4357_v12  ;;  %v5065_v10 = vpop.eup %5064  ;;  %5084 = vrcp.f32 %v8462_v51 }
 0x374   : > { %v5067_v5 = vpop.eup %5066  ;;  %5086 = vrcp.f32 %v7326_v42 }
 0x375   : > { %v5069_v48 = vpop.eup %5068  ;;  %5088 = vrcp.f32 %v7183_v32 }
 0x376   : > { %v5071_v20 = vpop.eup %5070  ;;  %2341 = vperm.xlu0 %4847, %v5059_v16   ;;  %v2831_v54 = vpack.c.bf16 %v5069_v48, %v5065_v10  ;;  %5090 = vrcp.f32 %v7308_v17 }
 0x377   : > { %1543 = vperm.xlu1 %4846, %v5061_v22   ;;  %v4360_v19 = vpop.f32.mrb[64].mxu1  ;;  %v2832_v31 = vpack.c.bf16 %v5071_v20, %v5067_v5  ;;  %v5073_v57 = vpop.eup %5072  ;;  %5092 = vrcp.f32 %v7319_v49 }
 0x378   : > { %v4361_v15 = vpop.f32.mrb[65].mxu1  ;;  %v5075_v52 = vpop.eup %5074  ;;  %5094 = vrcp.f32 %v7328_v39 }
 0x379   : > { %v7363_v46 = vadd.f32 %v4361_v15, %v4360_v19  ;;  %v4363_v4 = vpop.f32.mrb[66].mxu1  ;;  %2921 = vmatprep.mubr.bf16.mxu1 %v2832_v31  ;;  %3056 = vmatprep.mubr.bf16.mxu0 %v2832_v31  ;;  %v5077_v63 = vpop.eup %5076 }
 0x37a   : > { %v4364_v45 = vpop.f32.mrb[67].mxu1  ;;  %2922 = vmatmul.mubr.bf16.gmra.mrb[116].mxu1 %v2831_v54  ;;  %3057 = vmatmul.mubr.bf16.gmra.mrb[120].mxu0 %v2831_v54  ;;  %v5079_v24 = vpop.eup %5078 }
 0x37b   : > { %1553 = vperm.xlu1 %4846, %v5063_v50   ;;  %v7367_v2 = vadd.f32 %v4364_v45, %v4363_v4  ;;  %2351 = vperm.xlu0 %4847, %v5073_v57   ;;  %v5081_v36 = vpop.eup %5080 }
 0x37c   : > { %v5083_v23 = vpop.eup %5082 }
 0x37d   : > { %v5085_v18 = vpop.eup %5084 }
 0x37e   : > { %v5087_v40 = vpop.eup %5086 }
 0x37f   : > { %1563 = vperm.xlu1 %4846, %v5075_v52   ;;  %v4366_v8 = vpop.f32.mrb[68].mxu1  ;;  %2361 = vperm.xlu0 %4847, %v5077_v63   ;;  %v5089_v9 = vpop.eup %5088 }
 0x380   : > { %v4367_v27 = vpop.f32.mrb[69].mxu1  ;;  %v5091_v16 = vpop.eup %5090 }
 0x381   : > { %v7371_v28 = vadd.f32 %v4367_v27, %v4366_v8  ;;  %v4369_v21 = vpop.f32.mrb[70].mxu1  ;;  %v5093_v19 = vpop.eup %5092  ;;  %v8463_v27 = vld [vmem:[#allocation88_spill] sm:$0xff] }
 0x382   : > { %v4370_v30 = vpop.f32.mrb[71].mxu1  ;;  %v5095_v48 = vpop.eup %5094 }
 0x383   : > { %1573 = vperm.xlu1 %4846, %v5079_v24   ;;  %v7374_v43 = vadd.f32 %v4370_v30, %v4369_v21  ;;  %2371 = vperm.xlu0 %4847, %v5083_v23   ;;  %v3433_v63 = vpop.xlane.xlu0 %3432  ;;  %v8464_v21 = vld [vmem:[#allocation89_spill] sm:$0xff] }
 0x387   : > { %2336 = vperm.xlu1 %4846, %v5081_v36   ;;  %v4372_v42 = vpop.f32.mrb[72].mxu1  ;;  %2381 = vperm.xlu0 %4847, %v5087_v40  }
 0x388   : > { %v4373_v25 = vpop.f32.mrb[73].mxu1 }
 0x389   : > { %v7377_v61 = vadd.f32 %v4373_v25, %v4372_v42  ;;  %v4375_v12 = vpop.f32.mrb[74].mxu1 }
 0x38a   : > { %v4376_v35 = vpop.f32.mrb[75].mxu1 }
 0x38b   : > { %2346 = vperm.xlu1 %4846, %v5085_v18   ;;  %v7380_v32 = vadd.f32 %v4376_v35, %v4375_v12 }
 0x38f   : > { %2356 = vperm.xlu1 %4846, %v5089_v9   ;;  %v4378_v3 = vpop.f32.mrb[76].mxu1 }
 0x390   : > { %v4379_v17 = vpop.f32.mrb[77].mxu1 }
 0x391   : > { %v7383_v22 = vadd.f32 %v4379_v17, %v4378_v3  ;;  %v4381_v50 = vpop.f32.mrb[78].mxu1 }
 0x392   : > { %v4382_v10 = vpop.f32.mrb[79].mxu1 }
 0x393   : > { %2366 = vperm.xlu1 %4846, %v5091_v16   ;;  %v7385_v5 = vadd.f32 %v4382_v10, %v4381_v50  ;;  %v8465_v16 = vld [vmem:[#allocation16_spill] sm:$0xff]  ;;  %v8466_v10 = vld [vmem:[#allocation54_spill] sm:$0xff] }
 0x394   : > { %v3478_v50 = vsub.f32 %v8465_v16, %v3433_v63  ;;  %v8471_v16 = vld [vmem:[#allocation85_spill] sm:$0xff] }
 0x397   : > { %2376 = vperm.xlu1 %4846, %v5093_v19  }
 0x39b   : > { %2386 = vperm.xlu1 %4846, %v5095_v48   ;;  %v8467_v48 = vld [vmem:[#allocation103_spill] sm:$0xff] }
 0x3a0   : > { %v4320_v49 = vpop.f32.mrb[52].mxu0 }
 0x3a1   : > { %v4384_v15 = vpop.f32.mrb[80].mxu1  ;;  %v4321_v20 = vpop.f32.mrb[53].mxu0 }
 0x3a2   : > { %v4322_v54 = vadd.f32 %v4321_v20, %v4320_v49  ;;  %v4385_v4 = vpop.f32.mrb[81].mxu1  ;;  %v4323_v39 = vpop.f32.mrb[54].mxu0 }
 0x3a3   : > { %v7387_v56 = vadd.f32 %v4385_v4, %v4384_v15  ;;  %v4387_v31 = vpop.f32.mrb[82].mxu1  ;;  %v4324_v45 = vpop.f32.mrb[55].mxu0 }
 0x3a4   : > { %5096 = vrcp.f32 %v4322_v54  ;;  %v4325_v57 = vadd.f32 %v4324_v45, %v4323_v39  ;;  %v4388_v52 = vpop.f32.mrb[83].mxu1 }
 0x3a5   : > { %v7389_v51 = vadd.f32 %v4388_v52, %v4387_v31 }
 0x3a6   : > { %5098 = vrcp.f32 %v4325_v57 }
 0x3a8   : > { %v3427_v8 = vpop.xlane.xlu1 %3426  ;;  %v4326_v36 = vpop.f32.mrb[56].mxu0 }
 0x3a9   : > { %v3473_v24 = vsub.f32 %v8463_v27, %v3427_v8  ;;  %v3474_v30 = vsub.f32 %v8464_v21, %v3427_v8  ;;  %v4390_v23 = vpop.f32.mrb[84].mxu1  ;;  %v4327_v42 = vpop.f32.mrb[57].mxu0  ;;  %v3515_v8 = vmul.f32 1.442695, %v3478_v50 }
 0x3aa   : > { %v4328_v40 = vadd.f32 %v4327_v42, %v4326_v36  ;;  %v4391_v12 = vpop.f32.mrb[85].mxu1  ;;  %v4329_v35 = vpop.f32.mrb[58].mxu0 }
 0x3ab   : > { %v3505_v18 = vmul.f32 1.442695, %v3473_v24  ;;  %v3507_v25 = vmul.f32 1.442695, %v3474_v30  ;;  %v7393_v9 = vadd.f32 %v4391_v12, %v4390_v23  ;;  %v4393_v3 = vpop.f32.mrb[86].mxu1  ;;  %v4330_v15 = vpop.f32.mrb[59].mxu0 }
 0x3ac   : > { %v3430_v17 = vpop.xlane.xlu1 %3429  ;;  %v4394_v20 = vpop.f32.mrb[87].mxu1  ;;  %v4331_v54 = vadd.f32 %v4330_v15, %v4329_v35  ;;  %v8468_v24 = vld [vmem:[#allocation60_spill] sm:$0xff] }
 0x3ad   : > { %5100 = vpow2.f32 %v3505_v18  ;;  %v3475_v19 = vsub.f32 %v8466_v10, %v3430_v17  ;;  %v3476_v49 = vsub.f32 %v8467_v48, %v3430_v17  ;;  %v7398_v4 = vadd.f32 %v4394_v20, %v4393_v3  ;;  %v7400_v27 = vpop.xlane.xlu0 %3438  ;;  %v8469_v30 = vld [vmem:[#allocation108_spill] sm:$0xff] }
 0x3ae   : > { %5102 = vpow2.f32 %v3507_v25  ;;  %v5097_v39 = vpop.eup %5096  ;;  %v8470_v25 = vld [vmem:[#allocation14_spill] sm:$0xff]  ;;  %v3482_v50 = vsub.f32 %v8471_v16, %v7400_v27  ;;  %v8475_v16 = vld [vmem:[#allocation96_spill] sm:$0xff] }
 0x3af   : > { %5104 = vrcp.f32 %v4328_v40  ;;  %v3509_v31 = vmul.f32 1.442695, %v3475_v19  ;;  %v3511_v45 = vmul.f32 1.442695, %v3476_v49  ;;  %2391 = vperm.xlu0 %4847, %v5097_v39   ;;  %v3477_v40 = vsub.f32 %v8470_v25, %v3433_v63  ;;  %v8473_v25 = vld [vmem:[#allocation109_spill] sm:$0xff] }
 0x3b0   : > { %5106 = vrcp.f32 %v4331_v54  ;;  %v3436_v57 = vpop.xlane.xlu1 %3435  ;;  %v5099_v52 = vpop.eup %5098 }
 0x3b1   : > { %5108 = vpow2.f32 %v3509_v31  ;;  %v3479_v21 = vsub.f32 %v8468_v24, %v3436_v57  ;;  %v3480_v36 = vsub.f32 %v8469_v30, %v3436_v57  ;;  %v4412_v23 = vpop.f32.mrb[60].mxu0  ;;  %v4476_v42 = vpop.f32.mrb[88].mxu1  ;;  %2396 = vperm.xlu1 %4846, %v5099_v52   ;;  %v3513_v31 = vmul.f32 1.442695, %v3477_v40  ;;  %v8474_v40 = vld [vmem:[#allocation105_spill] sm:$0xff] }
 0x3b2   : > { %5110 = vpow2.f32 %v3511_v45  ;;  %v4413_v18 = vpop.f32.mrb[61].mxu0  ;;  %v4477_v3 = vpop.f32.mrb[89].mxu1  ;;  %v3523_v24 = vmul.f32 1.442695, %v3482_v50 }
 0x3b3   : > { %v3519_v12 = vmul.f32 1.442695, %v3480_v36  ;;  %v4414_v35 = vadd.f32 %v4413_v18, %v4412_v23  ;;  %v4415_v17 = vpop.f32.mrb[62].mxu0  ;;  %v4478_v10 = vadd.f32 %v4477_v3, %v4476_v42  ;;  %v4479_v19 = vpop.f32.mrb[90].mxu1  ;;  %5112 = vpow2.f32 %v3515_v8  ;;  %v8472_v42 = vld [vmem:[#allocation84_spill] sm:$0xff] }
 0x3b4   : > { %v4416_v48 = vpop.f32.mrb[63].mxu0  ;;  %v3517_v49 = vmul.f32 1.442695, %v3479_v21  ;;  %v4480_v54 = vpop.f32.mrb[91].mxu1  ;;  %v3481_v18 = vsub.f32 %v8472_v42, %v7400_v27 }
 0x3b5   : > { %v7408_v15 = vadd.f32 %v4414_v35, %v7349_v41  ;;  %v4417_v20 = vadd.f32 %v4416_v48, %v4415_v17  ;;  %5114 = vpow2.f32 %v3519_v12  ;;  %v4481_v39 = vadd.f32 %v4480_v54, %v4479_v19  ;;  %v7413_v30 = vpop.xlane.xlu0 %3444 }
 0x3b6   : > { %5116 = vrcp.f32 %v4478_v10  ;;  %v3486_v50 = vsub.f32 %v8475_v16, %v7413_v30  ;;  %v8476_v16 = vld [vmem:[#allocation91_spill] sm:$0xff] }
 0x3b7   : > { %v5101_v63 = vpop.eup %5100  ;;  %v7411_v45 = vadd.f32 %v4417_v20, %v7353_v47  ;;  %5118 = vrcp.f32 %v4481_v39 }
 0x3b8   : > { %v5103_v57 = vpop.eup %5102  ;;  %5120 = vpow2.f32 %v3517_v49  ;;  %v4418_v8 = vpop.f32.mrb[64].mxu0 }
 0x3b9   : > { %v5105_v52 = vpop.eup %5104  ;;  %v3442_v21 = vpop.xlane.xlu1 %3441  ;;  %5122 = vpow2.f32 %v3513_v31 }
 0x3ba   : > { %v5107_v41 = vpop.eup %5106  ;;  %2401 = vperm.xlu0 %4847, %v5105_v52   ;;  %v4482_v36 = vpop.f32.mrb[92].mxu1  ;;  %v3483_v47 = vsub.f32 %v8473_v25, %v3442_v21  ;;  %v3484_v12 = vsub.f32 %v8474_v40, %v3442_v21  ;;  %5124 = vpow2.f32 %v3523_v24  ;;  %v3521_v40 = vmul.f32 1.442695, %v3481_v18 }
 0x3bb   : > { %v5109_v23 = vpop.eup %5108  ;;  %v4419_v35 = vpop.f32.mrb[65].mxu0  ;;  %2406 = vperm.xlu1 %4846, %v5107_v41  }
 0x3bc   : > { %v4483_v3 = vpop.f32.mrb[93].mxu1  ;;  %v5111_v17 = vpop.eup %5110  ;;  %v4420_v10 = vadd.f32 %v4419_v35, %v4418_v8  ;;  %v3569_v20 = vpack.c.bf16 %v5109_v23, %v5101_v63  ;;  %v3525_v54 = vmul.f32 1.442695, %v3483_v47  ;;  %v3527_v39 = vmul.f32 1.442695, %v3484_v12 }
 0x3bd   : > { %v4484_v19 = vadd.f32 %v4483_v3, %v4482_v36  ;;  %v4421_v48 = vpop.f32.mrb[66].mxu0  ;;  %v4485_v49 = vpop.f32.mrb[94].mxu1  ;;  %v3570_v52 = vpack.c.bf16 %v5111_v17, %v5103_v57  ;;  %v3531_v36 = vmul.f32 1.442695, %v3486_v50 }
 0x3be   : > { %v4422_v27 = vpop.f32.mrb[67].mxu0  ;;  %v4486_v31 = vpop.f32.mrb[95].mxu1  ;;  %v7422_v21 = vadd.f32 %v4420_v10, %v7355_v7 }
 0x3bf   : > { %5126 = vrcp.f32 %v4484_v19  ;;  %v4423_v41 = vadd.f32 %v4422_v27, %v4421_v48  ;;  %v4487_v42 = vadd.f32 %v4486_v31, %v4485_v49  ;;  %v5113_v25 = vpop.eup %5112  ;;  %3617 = vmatprep.mubr.bf16.mxu1 %v3570_v52  ;;  %3752 = vmatprep.mubr.bf16.mxu0 %v3570_v52 }
 0x3c0   : > { %5128 = vpow2.f32 %v3525_v54  ;;  %v5115_v8 = vpop.eup %5114  ;;  %v3448_v63 = vpop.xlane.xlu1 %3447  ;;  %3618 = vmatmul.mubr.bf16.vlgmr.msra.gmra.mrb[120].mxu1 %v3569_v20  ;;  %3753 = vmatmul.mubr.bf16.vlgmr.msra.gmra.mrb[124].mxu0 %v3569_v20 }
 0x3c1   : > { %5130 = vpow2.f32 %v3527_v39  ;;  %v7425_v24 = vadd.f32 %v4423_v41, %v7359_v14  ;;  %v5117_v57 = vpop.eup %5116  ;;  %v3487_v7 = vsub.f32 %v7159_v55, %v3448_v63  ;;  %v3488_v23 = vsub.f32 %v7170_v13, %v3448_v63  ;;  %v4424_v47 = vpop.f32.mrb[68].mxu0 }
 0x3c2   : > { %5132 = vrcp.f32 %v4487_v42  ;;  %v3572_v18 = vpack.c.bf16 %v5115_v8, %v5113_v25  ;;  %v5119_v12 = vpop.eup %5118  ;;  %3083 = vperm.xlu0 %4847, %v5117_v57   ;;  %v4425_v3 = vpop.f32.mrb[69].mxu0  ;;  %v3485_v14 = vsub.f32 %v8476_v16, %v7413_v30 }
 0x3c3   : > { %v3451_v35 = vpop.xlane.xlu0 %3450  ;;  %v5121_v17 = vpop.eup %5120  ;;  %5134 = vpow2.f32 %v3521_v40  ;;  %v3535_v50 = vmul.f32 1.442695, %v3488_v23  ;;  %v4426_v19 = vadd.f32 %v4425_v3, %v4424_v47  ;;  %3088 = vperm.xlu1 %4846, %v5119_v12   ;;  %v3533_v49 = vmul.f32 1.442695, %v3487_v7 }
 0x3c4   : > { %3625 = vmatprep.mubr.bf16.mxu1 %v3572_v18  ;;  %3760 = vmatprep.mubr.bf16.mxu0 %v3572_v18  ;;  %v4427_v10 = vpop.f32.mrb[70].mxu0  ;;  %v3490_v55 = vsub.f32 %v7194_v33, %v3451_v35  ;;  %v5123_v48 = vpop.eup %5122  ;;  %5136 = vpow2.f32 %v3531_v36  ;;  %v3529_v30 = vmul.f32 1.442695, %v3485_v14 }
 0x3c5   : > { %v4428_v13 = vpop.f32.mrb[71].mxu0  ;;  %5138 = vpow2.f32 %v3535_v50  ;;  %v7433_v54 = vadd.f32 %v4426_v19, %v7363_v46  ;;  %v3571_v39 = vpack.c.bf16 %v5121_v17, %v5123_v48  ;;  %v5125_v27 = vpop.eup %5124 }
 0x3c6   : > { %v4429_v20 = vadd.f32 %v4428_v13, %v4427_v10  ;;  %v3539_v33 = vmul.f32 1.442695, %v3490_v55  ;;  %5140 = vpow2.f32 %v3533_v49 }
 0x3c7   : > { %v3454_v31 = vpop.xlane.xlu1 %3453  ;;  %5142 = vpow2.f32 %v3529_v30 }
 0x3c8   : > { %v7436_v52 = vadd.f32 %v4429_v20, %v7367_v2  ;;  %v3491_v42 = vsub.f32 %v7213_v1, %v3454_v31  ;;  %v3492_v25 = vsub.f32 %v7223_v60, %v3454_v31  ;;  %3626 = vmatmul.mubr.bf16.gmra.mrb[124].mxu1 %v3571_v39  ;;  %3761 = vmatmul.mubr.bf16.gmra.mrb[128].mxu0 %v3571_v39  ;;  %v4430_v46 = vpop.f32.mrb[72].mxu0  ;;  %5144 = vpow2.f32 %v3539_v33 }
 0x3c9   : > { %v5127_v41 = vpop.eup %5126  ;;  %v4431_v57 = vpop.f32.mrb[73].mxu0  ;;  %v3489_v2 = vsub.f32 %v7191_v6, %v3451_v35 }
 0x3ca   : > { %v5129_v40 = vpop.eup %5128  ;;  %v3457_v8 = vpop.xlane.xlu0 %3456  ;;  %3093 = vperm.xlu0 %4847, %v5127_v41   ;;  %v3543_v63 = vmul.f32 1.442695, %v3492_v25  ;;  %v4432_v18 = vadd.f32 %v4431_v57, %v4430_v46  ;;  %v3541_v60 = vmul.f32 1.442695, %v3491_v42 }
 0x3cb   : > { %v5131_v36 = vpop.eup %5130  ;;  %v3460_v23 = vpop.xlane.xlu1 %3459  ;;  %v3494_v12 = vsub.f32 %v7238_v44, %v3457_v8  ;;  %v3537_v10 = vmul.f32 1.442695, %v3489_v2  ;;  %v3493_v31 = vsub.f32 %v7233_v59, %v3457_v8 }
 0x3cc   : > { %v5133_v7 = vpop.eup %5132  ;;  %v3574_v47 = vpack.c.bf16 %v5131_v36, %v5125_v27  ;;  %v4433_v1 = vpop.f32.mrb[74].mxu0  ;;  %5146 = vpow2.f32 %v3543_v63  ;;  %v3496_v16 = vsub.f32 %v7250_v53, %v3460_v23  ;;  %v7444_v14 = vadd.f32 %v4432_v18, %v7371_v28 }
 0x3cd   : > { %3098 = vperm.xlu1 %4846, %v5133_v7   ;;  %v4434_v3 = vpop.f32.mrb[75].mxu0  ;;  %v5135_v17 = vpop.eup %5134  ;;  %v3547_v48 = vmul.f32 1.442695, %v3494_v12  ;;  %5148 = vpow2.f32 %v3541_v60  ;;  %v3495_v53 = vsub.f32 %v7243_v62, %v3460_v23  ;;  %v3545_v8 = vmul.f32 1.442695, %v3493_v31 }
 0x3ce   : > { %3633 = vmatprep.mubr.bf16.mxu1 %v3574_v47  ;;  %3768 = vmatprep.mubr.bf16.mxu0 %v3574_v47  ;;  %v4435_v6 = vadd.f32 %v4434_v3, %v4433_v1  ;;  %v3573_v35 = vpack.c.bf16 %v5129_v40, %v5135_v17  ;;  %v5137_v50 = vpop.eup %5136  ;;  %v3551_v55 = vmul.f32 1.442695, %v3496_v16  ;;  %v3463_v49 = vpop.xlane.xlu0 %3462 }
 0x3cf   : > { %v3466_v19 = vpop.xlane.xlu1 %3465  ;;  %v5139_v44 = vpop.eup %5138  ;;  %v3498_v62 = vsub.f32 %v7268_v38, %v3463_v49  ;;  %v3549_v40 = vmul.f32 1.442695, %v3495_v53  ;;  %v3497_v7 = vsub.f32 %v7265_v26, %v3463_v49 }
 0x3d0   : > { %v7447_v13 = vadd.f32 %v4435_v6, %v7374_v43  ;;  %3634 = vmatmul.mubr.bf16.gmra.mrb[128].mxu1 %v3573_v35  ;;  %3769 = vmatmul.mubr.bf16.gmra.mrb[132].mxu0 %v3573_v35  ;;  %v3576_v20 = vpack.c.bf16 %v5139_v44, %v5137_v50  ;;  %v4436_v28 = vpop.f32.mrb[76].mxu0  ;;  %5150 = vpow2.f32 %v3551_v55  ;;  %v3500_v39 = vsub.f32 %v7276_v37, %v3466_v19  ;;  %v5141_v30 = vpop.eup %5140 }
 0x3d1   : > { %v4437_v27 = vpop.f32.mrb[77].mxu0  ;;  %5152 = vpow2.f32 %v3537_v10  ;;  %v5143_v25 = vpop.eup %5142  ;;  %v3555_v38 = vmul.f32 1.442695, %v3498_v62  ;;  %v3499_v47 = vsub.f32 %v7273_v58, %v3466_v19 }
 0x3d2   : > { %3641 = vmatprep.mubr.bf16.mxu1 %v3576_v20  ;;  %3776 = vmatprep.mubr.bf16.mxu0 %v3576_v20  ;;  %v4438_v41 = vadd.f32 %v4437_v27, %v4436_v28  ;;  %v4439_v33 = vpop.f32.mrb[78].mxu0  ;;  %5154 = vpow2.f32 %v3547_v48  ;;  %v5145_v36 = vpop.eup %5144  ;;  %v3559_v63 = vmul.f32 1.442695, %v3500_v39  ;;  %v3575_v57 = vpack.c.bf16 %v5141_v30, %v5143_v25 }
 0x3d3   : > { %v7452_v43 = vpop.xlane.xlu1 %3471  ;;  %v4440_v42 = vpop.f32.mrb[79].mxu0  ;;  %5156 = vpow2.f32 %v3549_v40  ;;  %v3557_v35 = vmul.f32 1.442695, %v3499_v47 }
 0x3d4   : > { %v7456_v46 = vadd.f32 %v4438_v41, %v7377_v61  ;;  %v4441_v37 = vadd.f32 %v4440_v42, %v4439_v33  ;;  %v7465_v18 = vpop.xlane.xlu0 %3468  ;;  %v3504_v1 = vsub.f32 %v7304_v29, %v7452_v43  ;;  %5158 = vpow2.f32 %v3559_v63 }
 0x3d5   : > { %5160 = vpow2.f32 %v3545_v8  ;;  %v3502_v58 = vsub.f32 %v7284_v11, %v7465_v18  ;;  %v3501_v42 = vsub.f32 %v7279_v34, %v7465_v18 }
 0x3d6   : > { %v5147_v59 = vpop.eup %5146  ;;  %v7462_v23 = vadd.f32 %v4441_v37, %v7380_v32  ;;  %v3553_v32 = vmul.f32 1.442695, %v3497_v7  ;;  %5162 = vpow2.f32 %v3555_v38  ;;  %v3567_v10 = vmul.f32 1.442695, %v3504_v1 }
 0x3d7   : > { %v7459_v2 = vpop.permute.xlu1 %1498  ;;  %v3578_v61 = vpack.c.bf16 %v5147_v59, %v5145_v36  ;;  %v5149_v12 = vpop.eup %5148  ;;  %v3563_v49 = vmul.f32 1.442695, %v3502_v58  ;;  %v3561_v34 = vmul.f32 1.442695, %v3501_v42 }
 0x3d8   : > { %3642 = vmatmul.mubr.bf16.gmra.mrb[132].mxu1 %v3575_v57  ;;  %3777 = vmatmul.mubr.bf16.gmra.mrb[136].mxu0 %v3575_v57  ;;  %v4442_v60 = vpop.f32.mrb[80].mxu0  ;;  %5164 = vpow2.f32 %v3553_v32 }
 0x3d9   : > { %3649 = vmatprep.mubr.bf16.mxu1 %v3578_v61  ;;  %3784 = vmatprep.mubr.bf16.mxu0 %v3578_v61  ;;  %v4443_v26 = vpop.f32.mrb[81].mxu0  ;;  %5166 = vpow2.f32 %v3557_v35 }
 0x3da   : > { %v4444_v17 = vadd.f32 %v4443_v26, %v4442_v60  ;;  %v4445_v16 = vpop.f32.mrb[82].mxu0  ;;  %v5151_v6 = vpop.eup %5150  ;;  %5168 = vpow2.f32 %v3567_v10 }
 0x3db   : > { %v7471_v3 = vpop.permute.xlu1 %1508  ;;  %v4446_v50 = vpop.f32.mrb[83].mxu0 }
 0x3dc   : > { %v5153_v29 = vpop.eup %5152  ;;  %v7474_v55 = vadd.f32 %v4444_v17, %v7383_v22  ;;  %v4447_v19 = vadd.f32 %v4446_v50, %v4445_v16  ;;  %v3503_v22 = vsub.f32 %v7301_v0, %v7452_v43  ;;  %v7487_v63 = vpop.permute.xlu0 %1503 }
 0x3dd   : > { %v5155_v44 = vpop.eup %5154  ;;  %v3577_v53 = vpack.c.bf16 %v5149_v12, %v5153_v29 }
 0x3de   : > { %v4488_v48 = vpop.f32.mrb[96].mxu1  ;;  %v7479_v20 = vadd.f32 %v4447_v19, %v7385_v5  ;;  %v3580_v39 = vpack.c.bf16 %v5151_v6, %v5155_v44  ;;  %v5157_v5 = vpop.eup %5156  ;;  %v3565_v57 = vmul.f32 1.442695, %v3503_v22 }
 0x3df   : > { %v7476_v11 = vpop.permute.xlu1 %1513  ;;  %v4489_v28 = vpop.f32.mrb[97].mxu1 }
 0x3e0   : > { %v4490_v27 = vadd.f32 %v4489_v28, %v4488_v48  ;;  %3650 = vmatmul.mubr.bf16.gmra.mrb[136].mxu1 %v3577_v53  ;;  %3785 = vmatmul.mubr.bf16.gmra.mrb[140].mxu0 %v3577_v53  ;;  %v4491_v30 = vpop.f32.mrb[98].mxu1  ;;  %v4448_v41 = vpop.f32.mrb[84].mxu0 }
 0x3e1   : > { %3657 = vmatprep.mubr.bf16.mxu1 %v3580_v39  ;;  %3792 = vmatprep.mubr.bf16.mxu0 %v3580_v39  ;;  %v4492_v31 = vpop.f32.mrb[99].mxu1  ;;  %v4449_v62 = vpop.f32.mrb[85].mxu0 }
 0x3e2   : > { %5170 = vrcp.f32 %v4490_v27  ;;  %v4493_v33 = vadd.f32 %v4492_v31, %v4491_v30  ;;  %v4450_v40 = vadd.f32 %v4449_v62, %v4448_v41  ;;  %v4451_v37 = vpop.f32.mrb[86].mxu0  ;;  %v5159_v36 = vpop.eup %5158 }
 0x3e3   : > { %5172 = vpow2.f32 %v3563_v49  ;;  %v7485_v25 = vpop.permute.xlu1 %1518  ;;  %v4452_v0 = vpop.f32.mrb[87].mxu0 }
 0x3e4   : > { %5174 = vrcp.f32 %v4493_v33  ;;  %v5161_v43 = vpop.eup %5160  ;;  %v7490_v59 = vadd.f32 %v4450_v40, %v7387_v56  ;;  %v4453_v8 = vadd.f32 %v4452_v0, %v4451_v37  ;;  %v7497_v26 = vpop.permute.xlu0 %1548 }
 0x3e5   : > { %v5163_v7 = vpop.eup %5162  ;;  %v3579_v47 = vpack.c.bf16 %v5157_v5, %v5161_v43  ;;  %5176 = vpow2.f32 %v3565_v57 }
 0x3e6   : > { %v4494_v38 = vpop.f32.mrb[100].mxu1  ;;  %v7495_v61 = vadd.f32 %v4453_v8, %v7389_v51  ;;  %v3582_v60 = vpack.c.bf16 %v5159_v36, %v5163_v7  ;;  %v5165_v56 = vpop.eup %5164 }
 0x3e7   : > { %v7492_v18 = vpop.permute.xlu1 %1523  ;;  %v4495_v1 = vpop.f32.mrb[101].mxu1 }
 0x3e8   : > { %v4496_v12 = vadd.f32 %v4495_v1, %v4494_v38  ;;  %3658 = vmatmul.mubr.bf16.gmra.mrb[140].mxu1 %v3579_v47  ;;  %3793 = vmatmul.mubr.bf16.gmra.mrb[144].mxu0 %v3579_v47  ;;  %v4497_v32 = vpop.f32.mrb[102].mxu1  ;;  %v4454_v17 = vpop.f32.mrb[88].mxu0 }
 0x3e9   : > { %3665 = vmatprep.mubr.bf16.mxu1 %v3582_v60  ;;  %3800 = vmatprep.mubr.bf16.mxu0 %v3582_v60  ;;  %v4498_v58 = vpop.f32.mrb[103].mxu1  ;;  %v5167_v16 = vpop.eup %5166  ;;  %v8477_v60 = vld [vmem:[#allocation2_spill] sm:$0xff] }
 0x3ea   : > { %5178 = vrcp.f32 %v4496_v12  ;;  %v4499_v6 = vadd.f32 %v4498_v58, %v4497_v32  ;;  %v4455_v35 = vpop.f32.mrb[89].mxu0  ;;  %v5169_v51 = vpop.eup %5168  ;;  %v3581_v27 = vpack.c.bf16 %v5167_v16, %v5165_v56  ;;  %v8478_v12 = vld [vmem:[#allocation3_spill] sm:$0xff] }
 0x3eb   : > { %5180 = vpow2.f32 %v3561_v34  ;;  %v7499_v50 = vpop.permute.xlu1 %1528  ;;  %v4456_v29 = vadd.f32 %v4455_v35, %v4454_v17  ;;  %v4457_v10 = vpop.f32.mrb[90].mxu0 }
 0x3ec   : > { %v5171_v19 = vpop.eup %5170  ;;  %5182 = vrcp.f32 %v4499_v6  ;;  %v4458_v44 = vpop.f32.mrb[91].mxu0 }
 0x3ed   : > { %v5173_v48 = vpop.eup %5172  ;;  %v7501_v53 = vpop.permute.xlu0 %1558  ;;  %v7504_v49 = vadd.f32 %v4456_v29, %v7393_v9  ;;  %v4459_v28 = vadd.f32 %v4458_v44, %v4457_v10  ;;  %3103 = vperm.xlu0 %4847, %v5171_v19   ;;  %v1580_v10 = vmul.f32 %v8477_v60, %v7485_v25 }
 0x3ee   : > { %v5175_v39 = vpop.eup %5174  ;;  %v3584_v31 = vpack.c.bf16 %v5169_v51, %v5173_v48 }
 0x3ef   : > { %v7506_v30 = vpop.permute.xlu1 %1533  ;;  %v7509_v22 = vadd.f32 %v4459_v28, %v7398_v4  ;;  %3108 = vperm.xlu1 %4846, %v5175_v39   ;;  %v5177_v62 = vpop.eup %5176 }
 0x3f0   : > { %3666 = vmatmul.mubr.bf16.gmra.mrb[144].mxu1 %v3581_v27  ;;  %3801 = vmatmul.mubr.bf16.gmra.mrb[148].mxu0 %v3581_v27  ;;  %v4540_v33 = vpop.f32.mrb[92].mxu0 }
 0x3f1   : > { %v7511_v41 = vpop.permute.xlu0 %1568  ;;  %3673 = vmatprep.mubr.bf16.mxu1 %v3584_v31  ;;  %3808 = vmatprep.mubr.bf16.mxu0 %v3584_v31  ;;  %v4541_v9 = vpop.f32.mrb[93].mxu0 }
 0x3f2   : > { %v4542_v42 = vadd.f32 %v4541_v9, %v4540_v33  ;;  %v4543_v40 = vpop.f32.mrb[94].mxu0 }
 0x3f3   : > { %v1539_v5 = vpop.permute.xlu1 %1538  ;;  %v4544_v36 = vpop.f32.mrb[95].mxu0 }
 0x3f4   : > { %v5179_v37 = vpop.eup %5178  ;;  %v7514_v4 = vadd.f32 %v4542_v42, %v7408_v15  ;;  %v4545_v57 = vadd.f32 %v4544_v36, %v4543_v40  ;;  %v1578_v15 = vmul.f32 %v8477_v60, %v7471_v3 }
 0x3f5   : > { %v5181_v0 = vpop.eup %5180  ;;  %v7516_v43 = vpop.permute.xlu0 %2331  ;;  %3113 = vperm.xlu0 %4847, %v5179_v37  }
 0x3f6   : > { %v5183_v8 = vpop.eup %5182  ;;  %v3583_v7 = vpack.c.bf16 %v5177_v62, %v5181_v0  ;;  %v7521_v47 = vadd.f32 %v4545_v57, %v7411_v45  ;;  %v1584_v0 = vmul.f32 %v8477_v60, %v1539_v5  ;;  %v1586_v5 = vmul.f32 %v8477_v60, %v7497_v26 }
 0x3f7   : > { %v7518_v38 = vpop.permute.xlu1 %1543  ;;  %3118 = vperm.xlu1 %4846, %v5183_v8  }
 0x3f8   : > { %3674 = vmatmul.mubr.bf16.gmra.mrb[148].mxu1 %v3583_v7  ;;  %3809 = vmatmul.mubr.bf16.gmra.mrb[152].mxu0 %v3583_v7  ;;  %v4546_v1 = vpop.f32.mrb[96].mxu0 }
 0x3f9   : > { %v2342_v34 = vpop.permute.xlu0 %2341  ;;  %v4547_v56 = vpop.f32.mrb[97].mxu0 }
 0x3fa   : > { %v2411_v32 = vmul.f32 %v8478_v12, %v2342_v34  ;;  %v4548_v17 = vadd.f32 %v4547_v56, %v4546_v1  ;;  %v4549_v16 = vpop.f32.mrb[98].mxu0 }
 0x3fb   : > { %v7526_v58 = vpop.permute.xlu1 %1553  ;;  %v4550_v35 = vpop.f32.mrb[99].mxu0 }
 0x3fc   : > { %v7528_v6 = vadd.f32 %v2411_v32, %v1578_v15  ;;  %v7531_v45 = vadd.f32 %v4548_v17, %v7422_v21  ;;  %v4551_v51 = vadd.f32 %v4550_v35, %v4549_v16  ;;  %v1582_v21 = vmul.f32 %v8477_v60, %v7499_v50 }
 0x3fd   : > { %v2352_v29 = vpop.permute.xlu0 %2351 }
 0x3fe   : > { %v2413_v3 = vmul.f32 %v8478_v12, %v2352_v29  ;;  %v7539_v44 = vadd.f32 %v4551_v51, %v7425_v24 }
 0x3ff   : > { %v7535_v19 = vpop.permute.xlu1 %1563 }
 0x400   : > { %v7541_v48 = vadd.f32 %v2413_v3, %v1580_v10  ;;  %v4552_v28 = vpop.f32.mrb[100].mxu0 }
 0x401   : > { %v2362_v39 = vpop.permute.xlu0 %2361  ;;  %v4553_v27 = vpop.f32.mrb[101].mxu0 }
 0x402   : > { %v2415_v33 = vmul.f32 %v8478_v12, %v2362_v39  ;;  %v4554_v25 = vadd.f32 %v4553_v27, %v4552_v28  ;;  %v4555_v9 = vpop.f32.mrb[102].mxu0 }
 0x403   : > { %v7545_v31 = vpop.permute.xlu1 %1573  ;;  %v4556_v62 = vpop.f32.mrb[103].mxu0 }
 0x404   : > { %v7548_v42 = vadd.f32 %v2415_v33, %v1582_v21  ;;  %v7551_v24 = vadd.f32 %v4554_v25, %v7433_v54  ;;  %v4557_v40 = vadd.f32 %v4556_v62, %v4555_v9 }
 0x405   : > { %v2372_v36 = vpop.permute.xlu0 %2371 }
 0x406   : > { %v4500_v37 = vpop.f32.mrb[104].mxu1  ;;  %v2417_v8 = vmul.f32 %v8478_v12, %v2372_v36  ;;  %v7558_v7 = vadd.f32 %v4557_v40, %v7436_v52  ;;  %v1579_v52 = vmul.f32 %v8477_v60, %v7476_v11  ;;  %v1581_v11 = vmul.f32 %v8477_v60, %v7492_v18 }
 0x407   : > { %v7554_v57 = vpop.permute.xlu1 %2336  ;;  %v4501_v50 = vpop.f32.mrb[105].mxu1 }
 0x408   : > { %v4502_v34 = vadd.f32 %v4501_v50, %v4500_v37  ;;  %v4503_v1 = vpop.f32.mrb[106].mxu1  ;;  %v7560_v32 = vadd.f32 %v2417_v8, %v1584_v0  ;;  %v4558_v54 = vpop.f32.mrb[104].mxu0 }
 0x409   : > { %v4504_v15 = vpop.f32.mrb[107].mxu1  ;;  %v2382_v17 = vpop.permute.xlu0 %2381 }
 0x40a   : > { %5184 = vrcp.f32 %v4502_v34  ;;  %v4505_v56 = vadd.f32 %v4504_v15, %v4503_v1  ;;  %v4559_v16 = vpop.f32.mrb[105].mxu0  ;;  %v2419_v51 = vmul.f32 %v8478_v12, %v2382_v17 }
 0x40b   : > { %v2347_v35 = vpop.permute.xlu1 %2346  ;;  %v4560_v29 = vadd.f32 %v4559_v16, %v4558_v54  ;;  %v4561_v10 = vpop.f32.mrb[106].mxu0 }
 0x40c   : > { %v2412_v3 = vmul.f32 %v8478_v12, %v2347_v35  ;;  %5186 = vrcp.f32 %v4505_v56  ;;  %v4562_v28 = vpop.f32.mrb[107].mxu0  ;;  %v7568_v39 = vadd.f32 %v2419_v51, %v1586_v5 }
 0x40d   : > { %v7571_v27 = vadd.f32 %v4560_v29, %v7444_v14  ;;  %v4563_v21 = vadd.f32 %v4562_v28, %v4561_v10 }
 0x40e   : > { %v7573_v33 = vadd.f32 %v2412_v3, %v1579_v52 }
 0x40f   : > { %v4506_v26 = vpop.f32.mrb[108].mxu1  ;;  %v2357_v25 = vpop.permute.xlu1 %2356  ;;  %v7576_v62 = vadd.f32 %v4563_v21, %v7447_v13  ;;  %v1583_v13 = vmul.f32 %v8477_v60, %v7506_v30  ;;  %v1585_v30 = vmul.f32 %v8477_v60, %v7518_v38 }
 0x410   : > { %v4507_v9 = vpop.f32.mrb[109].mxu1  ;;  %v2414_v40 = vmul.f32 %v8478_v12, %v2357_v25 }
 0x411   : > { %v4508_v37 = vadd.f32 %v4507_v9, %v4506_v26  ;;  %v4509_v36 = vpop.f32.mrb[110].mxu1  ;;  %v4564_v50 = vpop.f32.mrb[108].mxu0 }
 0x412   : > { %v4510_v0 = vpop.f32.mrb[111].mxu1  ;;  %v7581_v14 = vadd.f32 %v2414_v40, %v1581_v11  ;;  %v4565_v34 = vpop.f32.mrb[109].mxu0  ;;  %v1587_v11 = vmul.f32 %v8477_v60, %v7526_v58 }
 0x413   : > { %5188 = vrcp.f32 %v4508_v37  ;;  %v4511_v8 = vadd.f32 %v4510_v0, %v4509_v36  ;;  %v2367_v1 = vpop.permute.xlu1 %2366  ;;  %v4566_v15 = vadd.f32 %v4565_v34, %v4564_v50  ;;  %v4567_v54 = vpop.f32.mrb[110].mxu0  ;;  %v1588_v34 = vmul.f32 %v8477_v60, %v7501_v53 }
 0x414   : > { %v5185_v56 = vpop.eup %5184  ;;  %v2416_v18 = vmul.f32 %v8478_v12, %v2367_v1  ;;  %v4568_v17 = vpop.f32.mrb[111].mxu0  ;;  %v1591_v53 = vmul.f32 %v8477_v60, %v7545_v31 }
 0x415   : > { %5190 = vrcp.f32 %v4511_v8  ;;  %3123 = vperm.xlu0 %4847, %v5185_v56   ;;  %v7587_v16 = vadd.f32 %v4566_v15, %v7456_v46  ;;  %v4569_v5 = vadd.f32 %v4568_v17, %v4567_v54  ;;  %v1589_v15 = vmul.f32 %v8477_v60, %v7535_v19 }
 0x416   : > { %v5187_v35 = vpop.eup %5186  ;;  %v7589_v51 = vadd.f32 %v2416_v18, %v1583_v13 }
 0x417   : > { %v2377_v29 = vpop.permute.xlu1 %2376  ;;  %3128 = vperm.xlu1 %4846, %v5187_v35   ;;  %v7592_v10 = vadd.f32 %v4569_v5, %v7462_v23 }
 0x418   : > { %v2418_v52 = vmul.f32 %v8478_v12, %v2377_v29 }
 0x419   : > { %v4570_v3 = vpop.f32.mrb[112].mxu0 }
 0x41a   : > { %v7597_v28 = vadd.f32 %v2418_v52, %v1585_v30  ;;  %v4571_v21 = vpop.f32.mrb[113].mxu0 }
 0x41b   : > { %v2387_v46 = vpop.permute.xlu1 %2386  ;;  %v4572_v26 = vadd.f32 %v4571_v21, %v4570_v3  ;;  %v4573_v25 = vpop.f32.mrb[114].mxu0 }
 0x41c   : > { %v2420_v40 = vmul.f32 %v8478_v12, %v2387_v46  ;;  %v4574_v23 = vpop.f32.mrb[115].mxu0 }
 0x41d   : > { %v5189_v9 = vpop.eup %5188  ;;  %v7603_v37 = vadd.f32 %v4572_v26, %v7474_v55  ;;  %v4575_v38 = vadd.f32 %v4574_v23, %v4573_v25 }
 0x41e   : > { %3133 = vperm.xlu0 %4847, %v5189_v9   ;;  %v7605_v0 = vadd.f32 %v2420_v40, %v1587_v11 }
 0x41f   : > { %v5191_v36 = vpop.eup %5190  ;;  %v7608_v50 = vadd.f32 %v4575_v38, %v7479_v20  ;;  %v1590_v20 = vmul.f32 %v8477_v60, %v7511_v41 }
 0x420   : > { %3138 = vperm.xlu1 %4846, %v5191_v36  }
 0x42e   : > { %v2392_v8 = vpop.permute.xlu0 %2391 }
 0x42f   : > { %v2421_v58 = vmul.f32 %v8478_v12, %v2392_v8 }
 0x430   : > { %v2397_v1 = vpop.permute.xlu1 %2396 }
 0x431   : > { %v7615_v55 = vadd.f32 %v2421_v58, %v1588_v34  ;;  %v2422_v54 = vmul.f32 %v8478_v12, %v2397_v1 }
 0x433   : > { %v7618_v56 = vadd.f32 %v2422_v54, %v1589_v15 }
 0x439   : > { %v2402_v13 = vpop.permute.xlu0 %2401 }
 0x43a   : > { %v2423_v18 = vmul.f32 %v8478_v12, %v2402_v13  ;;  %v2407_v17 = vpop.permute.xlu1 %2406 }
 0x43b   : > { %v2424_v5 = vmul.f32 %v8478_v12, %v2407_v17 }
 0x43c   : > { %v7626_v35 = vadd.f32 %v2423_v18, %v1590_v20 }
 0x43d   : > { %v7628_v19 = vadd.f32 %v2424_v5, %v1591_v53 }
 0x443   : > { %v4512_v29 = vpop.f32.mrb[112].mxu1 }
 0x444   : > { %v4576_v30 = vpop.f32.mrb[116].mxu0  ;;  %v4513_v52 = vpop.f32.mrb[113].mxu1 }
 0x445   : > { %v4514_v3 = vadd.f32 %v4513_v52, %v4512_v29  ;;  %v4577_v21 = vpop.f32.mrb[117].mxu0  ;;  %v4515_v46 = vpop.f32.mrb[114].mxu1 }
 0x446   : > { %v4578_v26 = vadd.f32 %v4577_v21, %v4576_v30  ;;  %v4579_v41 = vpop.f32.mrb[118].mxu0  ;;  %v4516_v25 = vpop.f32.mrb[115].mxu1 }
 0x447   : > { %5192 = vrcp.f32 %v4514_v3  ;;  %v4517_v9 = vadd.f32 %v4516_v25, %v4515_v46  ;;  %v4580_v11 = vpop.f32.mrb[119].mxu0 }
 0x448   : > { %v7631_v31 = vadd.f32 %v4578_v26, %v7490_v59  ;;  %v4581_v40 = vadd.f32 %v4580_v11, %v4579_v41 }
 0x449   : > { %5194 = vrcp.f32 %v4517_v9 }
 0x44a   : > { %v7634_v23 = vadd.f32 %v4581_v40, %v7495_v61 }
 0x44d   : > { %v4518_v38 = vpop.f32.mrb[116].mxu1  ;;  %v4582_v36 = vpop.f32.mrb[120].mxu0 }
 0x44e   : > { %v4519_v8 = vpop.f32.mrb[117].mxu1  ;;  %v4583_v34 = vpop.f32.mrb[121].mxu0 }
 0x44f   : > { %v4520_v58 = vadd.f32 %v4519_v8, %v4518_v38  ;;  %v4584_v1 = vadd.f32 %v4583_v34, %v4582_v36  ;;  %v4521_v15 = vpop.f32.mrb[118].mxu1  ;;  %v4585_v54 = vpop.f32.mrb[122].mxu0 }
 0x450   : > { %v4522_v13 = vpop.f32.mrb[119].mxu1  ;;  %v4586_v20 = vpop.f32.mrb[123].mxu0 }
 0x451   : > { %v5193_v18 = vpop.eup %5192  ;;  %5196 = vrcp.f32 %v4520_v58  ;;  %v7637_v59 = vadd.f32 %v4584_v1, %v7504_v49  ;;  %v4523_v17 = vadd.f32 %v4522_v13, %v4521_v15  ;;  %v4587_v53 = vadd.f32 %v4586_v20, %v4585_v54 }
 0x452   : > { %3143 = vperm.xlu0 %4847, %v5193_v18  }
 0x453   : > { %v5195_v61 = vpop.eup %5194  ;;  %5198 = vrcp.f32 %v4523_v17  ;;  %v7640_v5 = vadd.f32 %v4587_v53, %v7509_v22 }
 0x454   : > { %3148 = vperm.xlu1 %4846, %v5195_v61  }
 0x45b   : > { %v5197_v29 = vpop.eup %5196 }
 0x45c   : > { %3153 = vperm.xlu0 %4847, %v5197_v29  }
 0x45d   : > { %v5199_v30 = vpop.eup %5198 }
 0x45e   : > { %3158 = vperm.xlu1 %4846, %v5199_v30  }
 0x493   : > { %v4604_v52 = vpop.f32.mrb[120].mxu1  ;;  %v4668_v3 = vpop.f32.mrb[124].mxu0 }
 0x494   : > { %v4605_v21 = vpop.f32.mrb[121].mxu1  ;;  %v4669_v26 = vpop.f32.mrb[125].mxu0 }
 0x495   : > { %v4606_v46 = vadd.f32 %v4605_v21, %v4604_v52  ;;  %v4607_v49 = vpop.f32.mrb[122].mxu1  ;;  %v4670_v41 = vadd.f32 %v4669_v26, %v4668_v3  ;;  %v4671_v25 = vpop.f32.mrb[126].mxu0 }
 0x496   : > { %v4608_v9 = vpop.f32.mrb[123].mxu1  ;;  %v4672_v11 = vpop.f32.mrb[127].mxu0 }
 0x497   : > { %5200 = vrcp.f32 %v4606_v46  ;;  %v7643_v40 = vadd.f32 %v4670_v41, %v7514_v4  ;;  %v4609_v22 = vadd.f32 %v4608_v9, %v4607_v49  ;;  %v4673_v38 = vadd.f32 %v4672_v11, %v4671_v25 }
 0x499   : > { %5202 = vrcp.f32 %v4609_v22  ;;  %v7646_v36 = vadd.f32 %v4673_v38, %v7521_v47 }
 0x49b   : > { %v4610_v8 = vpop.f32.mrb[124].mxu1  ;;  %v4674_v34 = vpop.f32.mrb[128].mxu0 }
 0x49c   : > { %v4611_v58 = vpop.f32.mrb[125].mxu1  ;;  %v4675_v15 = vpop.f32.mrb[129].mxu0 }
 0x49d   : > { %v4612_v1 = vadd.f32 %v4611_v58, %v4610_v8  ;;  %v4613_v54 = vpop.f32.mrb[126].mxu1  ;;  %v4676_v13 = vadd.f32 %v4675_v15, %v4674_v34  ;;  %v4677_v20 = vpop.f32.mrb[130].mxu0 }
 0x49e   : > { %v4614_v18 = vpop.f32.mrb[127].mxu1  ;;  %v4678_v17 = vpop.f32.mrb[131].mxu0 }
 0x49f   : > { %5204 = vrcp.f32 %v4612_v1  ;;  %v7649_v4 = vadd.f32 %v4676_v13, %v7531_v45  ;;  %v4615_v53 = vadd.f32 %v4614_v18, %v4613_v54  ;;  %v4679_v61 = vadd.f32 %v4678_v17, %v4677_v20 }
 0x4a1   : > { %v5201_v29 = vpop.eup %5200  ;;  %5206 = vrcp.f32 %v4615_v53  ;;  %v7652_v47 = vadd.f32 %v4679_v61, %v7539_v44 }
 0x4a2   : > { %3835 = vperm.xlu0 %4847, %v5201_v29  }
 0x4a3   : > { %v4616_v30 = vpop.f32.mrb[128].mxu1  ;;  %v4680_v52 = vpop.f32.mrb[132].mxu0 }
 0x4a4   : > { %v5203_v3 = vpop.eup %5202  ;;  %v4617_v21 = vpop.f32.mrb[129].mxu1 }
 0x4a5   : > { %v4681_v46 = vpop.f32.mrb[133].mxu0  ;;  %3840 = vperm.xlu1 %4846, %v5203_v3   ;;  %v4618_v26 = vadd.f32 %v4617_v21, %v4616_v30  ;;  %v4619_v41 = vpop.f32.mrb[130].mxu1 }
 0x4a6   : > { %v4682_v49 = vadd.f32 %v4681_v46, %v4680_v52  ;;  %v4683_v25 = vpop.f32.mrb[134].mxu0  ;;  %v4620_v45 = vpop.f32.mrb[131].mxu1 }
 0x4a7   : > { %v4684_v9 = vpop.f32.mrb[135].mxu0  ;;  %5208 = vrcp.f32 %v4618_v26  ;;  %v4621_v22 = vadd.f32 %v4620_v45, %v4619_v41 }
 0x4a8   : > { %v7655_v11 = vadd.f32 %v4682_v49, %v7551_v24  ;;  %v4685_v44 = vadd.f32 %v4684_v9, %v4683_v25 }
 0x4a9   : > { %v5205_v38 = vpop.eup %5204  ;;  %5210 = vrcp.f32 %v4621_v22 }
 0x4aa   : > { %v7658_v8 = vadd.f32 %v4685_v44, %v7558_v7  ;;  %3845 = vperm.xlu0 %4847, %v5205_v38  }
 0x4ab   : > { %v4622_v34 = vpop.f32.mrb[132].mxu1  ;;  %v4686_v58 = vpop.f32.mrb[136].mxu0 }
 0x4ac   : > { %v5207_v1 = vpop.eup %5206  ;;  %v4623_v15 = vpop.f32.mrb[133].mxu1 }
 0x4ad   : > { %v4687_v54 = vpop.f32.mrb[137].mxu0  ;;  %3850 = vperm.xlu1 %4846, %v5207_v1   ;;  %v4624_v13 = vadd.f32 %v4623_v15, %v4622_v34  ;;  %v4625_v18 = vpop.f32.mrb[134].mxu1 }
 0x4ae   : > { %v4688_v20 = vadd.f32 %v4687_v54, %v4686_v58  ;;  %v4689_v17 = vpop.f32.mrb[138].mxu0  ;;  %v4626_v24 = vpop.f32.mrb[135].mxu1 }
 0x4af   : > { %v4690_v53 = vpop.f32.mrb[139].mxu0  ;;  %5212 = vrcp.f32 %v4624_v13  ;;  %v4627_v29 = vadd.f32 %v4626_v24, %v4625_v18 }
 0x4b0   : > { %v7661_v61 = vadd.f32 %v4688_v20, %v7571_v27  ;;  %v4691_v7 = vadd.f32 %v4690_v53, %v4689_v17 }
 0x4b1   : > { %v5209_v30 = vpop.eup %5208  ;;  %5214 = vrcp.f32 %v4627_v29 }
 0x4b2   : > { %v7664_v52 = vadd.f32 %v4691_v7, %v7576_v62  ;;  %3855 = vperm.xlu0 %4847, %v5209_v30  }
 0x4b3   : > { %v5211_v3 = vpop.eup %5210  ;;  %v4628_v21 = vpop.f32.mrb[136].mxu1 }
 0x4b4   : > { %v4692_v46 = vpop.f32.mrb[140].mxu0  ;;  %3860 = vperm.xlu1 %4846, %v5211_v3   ;;  %v4629_v26 = vpop.f32.mrb[137].mxu1 }
 0x4b5   : > { %v4693_v49 = vpop.f32.mrb[141].mxu0  ;;  %v4630_v41 = vadd.f32 %v4629_v26, %v4628_v21  ;;  %v4631_v45 = vpop.f32.mrb[138].mxu1 }
 0x4b6   : > { %v4694_v25 = vadd.f32 %v4693_v49, %v4692_v46  ;;  %v4695_v9 = vpop.f32.mrb[142].mxu0  ;;  %v4632_v27 = vpop.f32.mrb[139].mxu1 }
 0x4b7   : > { %v4696_v22 = vpop.f32.mrb[143].mxu0  ;;  %5216 = vrcp.f32 %v4630_v41  ;;  %v4633_v38 = vadd.f32 %v4632_v27, %v4631_v45 }
 0x4b8   : > { %v7667_v44 = vadd.f32 %v4694_v25, %v7587_v16  ;;  %v4697_v62 = vadd.f32 %v4696_v22, %v4695_v9 }
 0x4b9   : > { %v5213_v34 = vpop.eup %5212  ;;  %5218 = vrcp.f32 %v4633_v38 }
 0x4ba   : > { %v7670_v58 = vadd.f32 %v4697_v62, %v7592_v10  ;;  %3865 = vperm.xlu0 %4847, %v5213_v34  }
 0x4bb   : > { %v5215_v1 = vpop.eup %5214  ;;  %v4634_v15 = vpop.f32.mrb[140].mxu1 }
 0x4bc   : > { %v4698_v54 = vpop.f32.mrb[144].mxu0  ;;  %3870 = vperm.xlu1 %4846, %v5215_v1   ;;  %v4635_v13 = vpop.f32.mrb[141].mxu1 }
 0x4bd   : > { %v4699_v20 = vpop.f32.mrb[145].mxu0  ;;  %v4636_v18 = vadd.f32 %v4635_v13, %v4634_v15  ;;  %v4637_v24 = vpop.f32.mrb[142].mxu1 }
 0x4be   : > { %v4700_v17 = vadd.f32 %v4699_v20, %v4698_v54  ;;  %v4701_v53 = vpop.f32.mrb[146].mxu0  ;;  %v4638_v16 = vpop.f32.mrb[143].mxu1 }
 0x4bf   : > { %v4702_v29 = vpop.f32.mrb[147].mxu0  ;;  %5220 = vrcp.f32 %v4636_v18  ;;  %v4639_v30 = vadd.f32 %v4638_v16, %v4637_v24 }
 0x4c0   : > { %v7673_v7 = vadd.f32 %v4700_v17, %v7603_v37  ;;  %v4703_v10 = vadd.f32 %v4702_v29, %v4701_v53 }
 0x4c1   : > { %v5217_v3 = vpop.eup %5216  ;;  %5222 = vrcp.f32 %v4639_v30 }
 0x4c2   : > { %v7676_v21 = vadd.f32 %v4703_v10, %v7608_v50  ;;  %3875 = vperm.xlu0 %4847, %v5217_v3  }
 0x4c3   : > { %v5219_v46 = vpop.eup %5218  ;;  %v4640_v26 = vpop.f32.mrb[144].mxu1 }
 0x4c4   : > { %v4704_v49 = vpop.f32.mrb[148].mxu0  ;;  %3880 = vperm.xlu1 %4846, %v5219_v46   ;;  %v4641_v41 = vpop.f32.mrb[145].mxu1 }
 0x4c5   : > { %v4705_v25 = vpop.f32.mrb[149].mxu0  ;;  %v4642_v45 = vadd.f32 %v4641_v41, %v4640_v26  ;;  %v4643_v27 = vpop.f32.mrb[146].mxu1 }
 0x4c6   : > { %v4706_v9 = vadd.f32 %v4705_v25, %v4704_v49  ;;  %v4707_v22 = vpop.f32.mrb[150].mxu0  ;;  %v4644_v37 = vpop.f32.mrb[147].mxu1 }
 0x4c7   : > { %v4708_v38 = vpop.f32.mrb[151].mxu0  ;;  %5224 = vrcp.f32 %v4642_v45  ;;  %v4645_v34 = vadd.f32 %v4644_v37, %v4643_v27  ;;  %v3084_v45 = vpop.permute.xlu0 %3083 }
 0x4c8   : > { %v7679_v62 = vadd.f32 %v4706_v9, %v7631_v31  ;;  %v4709_v50 = vadd.f32 %v4708_v38, %v4707_v22  ;;  %v3089_v9 = vpop.permute.xlu1 %3088 }
 0x4c9   : > { %v5221_v1 = vpop.eup %5220  ;;  %5226 = vrcp.f32 %v4645_v34 }
 0x4ca   : > { %v7682_v15 = vadd.f32 %v4709_v50, %v7634_v23  ;;  %3885 = vperm.xlu0 %4847, %v5221_v1  }
 0x4cb   : > { %v5223_v54 = vpop.eup %5222  ;;  %v4646_v13 = vpop.f32.mrb[148].mxu1 }
 0x4cc   : > { %v4710_v20 = vpop.f32.mrb[152].mxu0  ;;  %3890 = vperm.xlu1 %4846, %v5223_v54   ;;  %v4647_v18 = vpop.f32.mrb[149].mxu1 }
 0x4cd   : > { %v4711_v17 = vpop.f32.mrb[153].mxu0  ;;  %v4648_v24 = vadd.f32 %v4647_v18, %v4646_v13  ;;  %v4649_v16 = vpop.f32.mrb[150].mxu1 }
 0x4ce   : > { %v4712_v53 = vadd.f32 %v4711_v17, %v4710_v20  ;;  %v4713_v29 = vpop.f32.mrb[154].mxu0  ;;  %v4650_v31 = vpop.f32.mrb[151].mxu1  ;;  %v2409_v20 = vmul.f32 %v8478_v12, %v7516_v43 }
 0x4cf   : > { %v4714_v30 = vpop.f32.mrb[155].mxu0  ;;  %5228 = vrcp.f32 %v4648_v24  ;;  %v4651_v3 = vadd.f32 %v4650_v31, %v4649_v16  ;;  %v3094_v27 = vpop.permute.xlu0 %3093  ;;  %v1576_v24 = vmul.f32 %v8477_v60, %v7459_v2 }
 0x4d0   : > { %v7685_v10 = vadd.f32 %v4712_v53, %v7637_v59  ;;  %v4715_v23 = vadd.f32 %v4714_v30, %v4713_v29  ;;  %v3099_v22 = vpop.permute.xlu1 %3098  ;;  %v8480_v53 = vld [vmem:[#allocation4_spill] sm:$0xff]  ;;  %v2410_v29 = vmul.f32 %v8478_v12, %v7554_v57  ;;  %v7724_v12 = vld [vmem:[%s7843_s7] ss:$0 sm:$0xff] }
 0x4d1   : > { %v5225_v46 = vpop.eup %5224  ;;  %5230 = vrcp.f32 %v4651_v3  ;;  %v3161_v16 = vmul.f32 %v8480_v53, %v3084_v45  ;;  %v2425_v31 = vadd.f32 %v2409_v20, %v1576_v24  ;;  %v1577_v3 = vmul.f32 %v8477_v60, %v7487_v63 }
 0x4d2   : > { %v7688_v26 = vadd.f32 %v4715_v23, %v7640_v5  ;;  %3895 = vperm.xlu0 %4847, %v5225_v46   ;;  %v3162_v43 = vmul.f32 %v8480_v53, %v3089_v9  ;;  %v3163_v63 = vmul.f32 %v8480_v53, %v3094_v27  ;;  %v3164_v24 = vmul.f32 %v8480_v53, %v3099_v22 }
 0x4d3   : > { %v5227_v49 = vpop.eup %5226  ;;  %v3104_v59 = vpop.permute.xlu0 %3103  ;;  %v3177_v46 = vadd.f32 %v3161_v16, %v2425_v31 }
 0x4d4   : > { %8479 = vst [vmem:[#allocation63_spill] sm:$0xff] %v7688_v26  ;;  %3900 = vperm.xlu1 %4846, %v5227_v49   ;;  %v3109_v37 = vpop.permute.xlu1 %3108  ;;  %v8481_v49 = vld [vmem:[#allocation5_spill] sm:$0xff] }
 0x4d7   : > { %v7690_v38 = vpop.permute.xlu0 %3113 }
 0x4d8   : > { %v7692_v34 = vpop.permute.xlu1 %3118 }
 0x4d9   : > { %v5229_v41 = vpop.eup %5228 }
 0x4da   : > { %3905 = vperm.xlu0 %4847, %v5229_v41  }
 0x4db   : > { %v5231_v25 = vpop.eup %5230  ;;  %v7694_v50 = vpop.permute.xlu0 %3123 }
 0x4dc   : > { %3910 = vperm.xlu1 %4846, %v5231_v25   ;;  %v7696_v5 = vpop.permute.xlu1 %3128  ;;  %v2426_v25 = vadd.f32 %v2410_v29, %v1577_v3 }
 0x4de   : > { %v3178_v45 = vadd.f32 %v3162_v43, %v2426_v25 }
 0x4df   : > { %v7698_v1 = vpop.permute.xlu0 %3133 }
 0x4e0   : > { %v7700_v54 = vpop.permute.xlu1 %3138 }
 0x4e3   : > { %v7702_v13 = vpop.permute.xlu0 %3143 }
 0x4e4   : > { %v7706_v18 = vpop.permute.xlu1 %3148 }
 0x4e7   : > { %v7708_v17 = vpop.permute.xlu0 %3153 }
 0x4e8   : > { %v7715_v30 = vpop.permute.xlu1 %3158 }
 0x521   : > { %v3836_v23 = vpop.permute.xlu0 %3835 }
 0x522   : > { %v3913_v41 = vmul.f32 %v8481_v49, %v3836_v23 }
 0x524   : > { %v3929_v2 = vadd.f32 %v3913_v41, %v3177_v46  ;;  %v3841_v26 = vpop.permute.xlu1 %3840  ;;  %v3165_v41 = vmul.f32 %v8480_v53, %v3104_v59 }
 0x525   : > { %v3914_v57 = vmul.f32 %v8481_v49, %v3841_v26  ;;  %v3179_v26 = vadd.f32 %v3163_v63, %v7528_v6 }
 0x526   : > { %v3945_v60 = vmul.f32 %v3929_v2, %v7643_v40 }
 0x527   : > { %v3930_v9 = vadd.f32 %v3914_v57, %v3178_v45  ;;  %v3166_v45 = vmul.f32 %v8480_v53, %v3109_v37 }
 0x528   : > { %v3968_v20 = vadd.f32 %v7724_v12, %v3945_v60  ;;  %v3181_v60 = vadd.f32 %v3165_v41, %v7541_v48 }
 0x529   : > { %v3946_v16 = vmul.f32 %v3930_v9, %v7646_v36  ;;  %v3846_v29 = vpop.permute.xlu0 %3845  ;;  %v3180_v36 = vadd.f32 %v3164_v24, %v7573_v33  ;;  %v3182_v24 = vadd.f32 %v3166_v45, %v7581_v14 }
 0x52a   : > { %vm3984_vm9 = vcmp.gt.f32.partialorder %v3968_v20, 0.0  ;;  %v4000_v27 = vmul.f32 0.01, %v3968_v20  ;;  %v3915_v40 = vmul.f32 %v8481_v49, %v3846_v29 }
 0x52b   : > { %v3969_v31 = vadd.f32 %v7724_v12, %v3946_v16 }
 0x52c   : > { %v4016_v3 = vsel %vm3984_vm9, %v3968_v20, %v4000_v27  ;;  %v3931_v22 = vadd.f32 %v3915_v40, %v3179_v26  ;;  %v3851_v43 = vpop.permute.xlu1 %3850 }
 0x52d   : > { %4032 = vst [vmem:[%s7736_s20] sm:$0xff] %v4016_v3  ;;  %vm3985_vm10 = vcmp.gt.f32.partialorder %v3969_v31, 0.0  ;;  %v4001_v23 = vmul.f32 0.01, %v3969_v31  ;;  %v3916_v46 = vmul.f32 %v8481_v49, %v3851_v43 }
 0x52e   : > { %v3947_v6 = vmul.f32 %v3931_v22, %v7649_v4  ;;  %v3168_v22 = vmul.f32 %v8480_v53, %v7692_v34  ;;  %v3169_v34 = vmul.f32 %v8480_v53, %v7694_v50 }
 0x52f   : > { %v4017_v25 = vsel %vm3985_vm10, %v3969_v31, %v4001_v23  ;;  %v3932_v2 = vadd.f32 %v3916_v46, %v3180_v36 }
 0x530   : > { %4033 = vst [vmem:[%s7736_s20 + $0x8] sm:$0xff] %v4017_v25  ;;  %v3970_v57 = vadd.f32 %v7724_v12, %v3947_v6 }
 0x531   : > { %v3948_v63 = vmul.f32 %v3932_v2, %v7652_v47  ;;  %v3856_v33 = vpop.permute.xlu0 %3855  ;;  %v3167_v47 = vmul.f32 %v8480_v53, %v7690_v38 }
 0x532   : > { %vm3986_vm11 = vcmp.gt.f32.partialorder %v3970_v57, 0.0  ;;  %v4002_v9 = vmul.f32 0.01, %v3970_v57  ;;  %v3917_v59 = vmul.f32 %v8481_v49, %v3856_v33 }
 0x533   : > { %v3971_v4 = vadd.f32 %v7724_v12, %v3948_v63  ;;  %v3861_v20 = vpop.permute.xlu1 %3860  ;;  %v3183_v3 = vadd.f32 %v3167_v47, %v7548_v42 }
 0x534   : > { %v4018_v37 = vsel %vm3986_vm11, %v3970_v57, %v4002_v9  ;;  %v3933_v16 = vadd.f32 %v3917_v59, %v3181_v60  ;;  %v3918_v29 = vmul.f32 %v8481_v49, %v3861_v20  ;;  %v3170_v57 = vmul.f32 %v8480_v53, %v7696_v5 }
 0x535   : > { %4034 = vst [vmem:[%s7736_s20 + $0x10] sm:$0xff] %v4018_v37  ;;  %vm3987_vm12 = vcmp.gt.f32.partialorder %v3971_v4, 0.0  ;;  %v4003_v48 = vmul.f32 0.01, %v3971_v4  ;;  %v3185_v60 = vadd.f32 %v3169_v34, %v7560_v32 }
 0x536   : > { %v3949_v26 = vmul.f32 %v3933_v16, %v7655_v11  ;;  %v3934_v27 = vadd.f32 %v3918_v29, %v3182_v24 }
 0x537   : > { %v4019_v40 = vsel %vm3987_vm12, %v3971_v4, %v4003_v48  ;;  %v3186_v4 = vadd.f32 %v3170_v57, %v7597_v28 }
 0x538   : > { %4035 = vst [vmem:[%s7736_s20 + $0x18] sm:$0xff] %v4019_v40  ;;  %v3972_v31 = vadd.f32 %v7724_v12, %v3949_v26  ;;  %v3950_v14 = vmul.f32 %v3934_v27, %v7658_v8  ;;  %v3184_v8 = vadd.f32 %v3168_v22, %v7589_v51  ;;  %v3172_v26 = vmul.f32 %v8480_v53, %v7700_v54 }
 0x539   : > { %v3866_v43 = vpop.permute.xlu0 %3865  ;;  %v3173_v54 = vmul.f32 %v8480_v53, %v7702_v13 }
 0x53a   : > { %vm3988_vm13 = vcmp.gt.f32.partialorder %v3972_v31, 0.0  ;;  %v4004_v38 = vmul.f32 0.01, %v3972_v31  ;;  %v3973_v36 = vadd.f32 %v7724_v12, %v3950_v14  ;;  %v3919_v11 = vmul.f32 %v8481_v49, %v3866_v43 }
 0x53b   : > { %v3871_v23 = vpop.permute.xlu1 %3870 }
 0x53c   : > { %v4020_v46 = vsel %vm3988_vm13, %v3972_v31, %v4004_v38  ;;  %vm3989_vm14 = vcmp.gt.f32.partialorder %v3973_v36, 0.0  ;;  %v4005_v41 = vmul.f32 0.01, %v3973_v36  ;;  %v3935_v6 = vadd.f32 %v3919_v11, %v3183_v3 }
 0x53d   : > { %4036 = vst [vmem:[%s7736_s20 + $0x20] sm:$0xff] %v4020_v46  ;;  %v3920_v42 = vmul.f32 %v8481_v49, %v3871_v23  ;;  %v3174_v11 = vmul.f32 %v8480_v53, %v7706_v18 }
 0x53e   : > { %v4021_v25 = vsel %vm3989_vm14, %v3973_v36, %v4005_v41  ;;  %v3951_v2 = vmul.f32 %v3935_v6, %v7661_v61  ;;  %v3189_v41 = vadd.f32 %v3173_v54, %v7615_v55 }
 0x53f   : > { %4037 = vst [vmem:[%s7736_s20 + $0x28] sm:$0xff] %v4021_v25  ;;  %v3936_v45 = vadd.f32 %v3920_v42, %v3184_v8  ;;  %v3190_v42 = vadd.f32 %v3174_v11, %v7618_v56 }
 0x540   : > { %v3974_v63 = vadd.f32 %v7724_v12, %v3951_v2 }
 0x541   : > { %v3952_v33 = vmul.f32 %v3936_v45, %v7664_v52  ;;  %v3876_v51 = vpop.permute.xlu0 %3875  ;;  %v3171_v52 = vmul.f32 %v8480_v53, %v7698_v1 }
 0x542   : > { %vm3990_vm15 = vcmp.gt.f32.partialorder %v3974_v63, 0.0  ;;  %v4006_v9 = vmul.f32 0.01, %v3974_v63  ;;  %v3921_v50 = vmul.f32 %v8481_v49, %v3876_v51  ;;  %v3176_v51 = vmul.f32 %v8480_v53, %v7715_v30 }
 0x543   : > { %v3975_v61 = vadd.f32 %v7724_v12, %v3952_v33  ;;  %v3881_v59 = vpop.permute.xlu1 %3880  ;;  %v3187_v48 = vadd.f32 %v3171_v52, %v7568_v39 }
 0x544   : > { %v4022_v20 = vsel %vm3990_vm15, %v3974_v63, %v4006_v9  ;;  %v3937_v24 = vadd.f32 %v3921_v50, %v3185_v60  ;;  %v3922_v5 = vmul.f32 %v8481_v49, %v3881_v59 }
 0x545   : > { %4038 = vst [vmem:[%s7736_s20 + $0x30] sm:$0xff] %v4022_v20  ;;  %vm3991_vm0 = vcmp.gt.f32.partialorder %v3975_v61, 0.0  ;;  %v4007_v32 = vmul.f32 0.01, %v3975_v61 }
 0x546   : > { %v3953_v37 = vmul.f32 %v3937_v24, %v7667_v44  ;;  %v3938_v16 = vadd.f32 %v3922_v5, %v3186_v4  ;;  %v8482_v5 = vld [vmem:[#allocation63_spill] sm:$0xff] }
 0x547   : > { %v4023_v29 = vsel %vm3991_vm0, %v3975_v61, %v4007_v32 }
 0x548   : > { %4039 = vst [vmem:[%s7736_s20 + $0x38] sm:$0xff] %v4023_v29  ;;  %v3976_v47 = vadd.f32 %v7724_v12, %v3953_v37  ;;  %v3954_v28 = vmul.f32 %v3938_v16, %v7670_v58  ;;  %v3188_v58 = vadd.f32 %v3172_v26, %v7605_v0 }
 0x549   : > { %v3886_v27 = vpop.permute.xlu0 %3885 }
 0x54a   : > { %vm3992_vm1 = vcmp.gt.f32.partialorder %v3976_v47, 0.0  ;;  %v4008_v1 = vmul.f32 0.01, %v3976_v47  ;;  %v3977_v40 = vadd.f32 %v7724_v12, %v3954_v28  ;;  %v3923_v44 = vmul.f32 %v8481_v49, %v3886_v27 }
 0x54b   : > { %v3891_v31 = vpop.permute.xlu1 %3890 }
 0x54c   : > { %v4024_v14 = vsel %vm3992_vm1, %v3976_v47, %v4008_v1  ;;  %vm3993_vm2 = vcmp.gt.f32.partialorder %v3977_v40, 0.0  ;;  %v4009_v3 = vmul.f32 0.01, %v3977_v40  ;;  %v3939_v22 = vadd.f32 %v3923_v44, %v3187_v48 }
 0x54d   : > { %4040 = vst [vmem:[%s7736_s20 + $0x40] sm:$0xff] %v4024_v14  ;;  %v3924_v39 = vmul.f32 %v8481_v49, %v3891_v31 }
 0x54e   : > { %v4025_v43 = vsel %vm3993_vm2, %v3977_v40, %v4009_v3  ;;  %v3955_v38 = vmul.f32 %v3939_v22, %v7673_v7 }
 0x54f   : > { %4041 = vst [vmem:[%s7736_s20 + $0x48] sm:$0xff] %v4025_v43  ;;  %v3940_v36 = vadd.f32 %v3924_v39, %v3188_v58 }
 0x550   : > { %v3978_v23 = vadd.f32 %v7724_v12, %v3955_v38 }
 0x551   : > { %v3956_v46 = vmul.f32 %v3940_v36, %v7676_v21  ;;  %v3896_v0 = vpop.permute.xlu0 %3895  ;;  %v3175_v21 = vmul.f32 %v8480_v53, %v7708_v17 }
 0x552   : > { %vm3994_vm3 = vcmp.gt.f32.partialorder %v3978_v23, 0.0  ;;  %v4010_v6 = vmul.f32 0.01, %v3978_v23  ;;  %v3925_v13 = vmul.f32 %v8481_v49, %v3896_v0 }
 0x553   : > { %v3979_v7 = vadd.f32 %v7724_v12, %v3956_v46  ;;  %v3901_v8 = vpop.permute.xlu1 %3900  ;;  %v3191_v33 = vadd.f32 %v3175_v21, %v7626_v35 }
 0x554   : > { %v4026_v34 = vsel %vm3994_vm3, %v3978_v23, %v4010_v6  ;;  %v3941_v25 = vadd.f32 %v3925_v13, %v3189_v41  ;;  %v3926_v18 = vmul.f32 %v8481_v49, %v3901_v8 }
 0x555   : > { %4042 = vst [vmem:[%s7736_s20 + $0x50] sm:$0xff] %v4026_v34  ;;  %vm3995_vm4 = vcmp.gt.f32.partialorder %v3979_v7, 0.0  ;;  %v4011_v55 = vmul.f32 0.01, %v3979_v7 }
 0x556   : > { %v3957_v2 = vmul.f32 %v3941_v25, %v7679_v62  ;;  %v3942_v45 = vadd.f32 %v3926_v18, %v3190_v42 }
 0x557   : > { %v4027_v57 = vsel %vm3995_vm4, %v3979_v7, %v4011_v55 }
 0x558   : > { %4043 = vst [vmem:[%s7736_s20 + $0x58] sm:$0xff] %v4027_v57  ;;  %v3980_v63 = vadd.f32 %v7724_v12, %v3957_v2  ;;  %v3958_v56 = vmul.f32 %v3942_v45, %v7682_v15  ;;  %v3192_v15 = vadd.f32 %v3176_v51, %v7628_v19 }
 0x559   : > { %v3906_v17 = vpop.permute.xlu0 %3905 }
 0x55a   : > { %vm3996_vm5 = vcmp.gt.f32.partialorder %v3980_v63, 0.0  ;;  %v4012_v60 = vmul.f32 0.01, %v3980_v63  ;;  %v3981_v9 = vadd.f32 %v7724_v12, %v3958_v56  ;;  %v3927_v62 = vmul.f32 %v8481_v49, %v3906_v17 }
 0x55b   : > { %v3911_v50 = vpop.permute.xlu1 %3910 }
 0x55c   : > { %v4028_v61 = vsel %vm3996_vm5, %v3980_v63, %v4012_v60  ;;  %vm3997_vm6 = vcmp.gt.f32.partialorder %v3981_v9, 0.0  ;;  %v4013_v59 = vmul.f32 0.01, %v3981_v9  ;;  %v3943_v4 = vadd.f32 %v3927_v62, %v3191_v33 }
 0x55d   : > { %4044 = vst [vmem:[%s7736_s20 + $0x60] sm:$0xff] %v4028_v61  ;;  %v3928_v35 = vmul.f32 %v8481_v49, %v3911_v50 }
 0x55e   : > { %v4029_v53 = vsel %vm3997_vm6, %v3981_v9, %v4013_v59  ;;  %v3959_v30 = vmul.f32 %v3943_v4, %v7685_v10 }
 0x55f   : > { %4045 = vst [vmem:[%s7736_s20 + $0x68] sm:$0xff] %v4029_v53  ;;  %v3944_v20 = vadd.f32 %v3928_v35, %v3192_v15 }
 0x560   : > { %v3982_v24 = vadd.f32 %v7724_v12, %v3959_v30 }
 0x561   : > { %v3960_v52 = vmul.f32 %v3944_v20, %v8482_v5 }
 0x562   : > { %vm3998_vm7 = vcmp.gt.f32.partialorder %v3982_v24, 0.0  ;;  %v4014_v32 = vmul.f32 0.01, %v3982_v24 }
 0x563   : > { %v3983_v37 = vadd.f32 %v7724_v12, %v3960_v52 }
 0x564   : > { %v4030_v16 = vsel %vm3998_vm7, %v3982_v24, %v4014_v32 }
 0x565   : > { %4046 = vst [vmem:[%s7736_s20 + $0x70] sm:$0xff] %v4030_v16  ;;  %vm3999_vm8 = vcmp.gt.f32.partialorder %v3983_v37, 0.0  ;;  %v4015_v19 = vmul.f32 0.01, %v3983_v37 }
 0x567   : > { %v4031_v29 = vsel %vm3999_vm8, %v3983_v37, %v4015_v19 }
 0x568   : > { %4047 = vst [vmem:[%s7736_s20 + $0x78] sm:$0xff] %v4031_v29 }
 0x569 PF: > { %s18_s27 = sadd.s32 1, %s5238_s27  }
 0x56a   : > { %p15_p4 = scmp.ge.s32.totalorder %s18_s27, 4  }
 0x56c   :  { %17 = sbr.rel (!%p15_p4) target bundleno = 1 (0x1), region = 85 }

</bundles_post_ra>
